<compile_context>
chip_gen: v7x
topology: tpu7x:2x2x1
jax: 0.10.0
libtpu: 0.0.40
codegen_flags: <defaults>
</compile_context>

<pallas_src>
import functools

import jax
import jax.numpy as jnp
from jax.experimental import pallas as pl
from jax.experimental.pallas import tpu as pltpu

IN_FEATURES = 5750
HIDDEN = 512
NUM_CLASSES = 10          # stand-in for undefined len(classifications)
N_PAD = 128               # lane-dense logits width; sliced back to 10 in wrapper
MAX_TB = 256              # batch tile that fills the 256x256 MXU
TK_CHUNK = 1152           # 9*128; ceil(5750/1152) = 5 pipelined K chunks


def _round_up(n, m):
    return -(-n // m) * m


def _cdiv(a, b):
    return -(-a // b)


def _mlp_kernel(x_ref, w1_ref, b1_ref, w2_ref, b2_ref, w3_ref, b3_ref,
                o_ref, acc_ref, *, tk, masked):
    """One (batch-tile i, K-chunk k) grid step of the fused 3-layer MLP."""
    k = pl.program_id(1)

    @pl.when(k == 0)
    def _():
        acc_ref[...] = jnp.zeros_like(acc_ref)

    x = x_ref[...]
    w1 = w1_ref[...]
    if masked:
        # K is chunked and 5750 % tk != 0: the final chunk's VMEM buffers hold
        # out-of-bounds garbage in the trailing columns/rows. Zero both sides
        # so garbage (possibly NaN) can never pollute the accumulation.
        rem = IN_FEATURES - k * tk                       # valid width of chunk
        cols = jax.lax.broadcasted_iota(jnp.int32, x.shape, 1)
        x = jnp.where(cols < rem, x, 0.0)
        rows = jax.lax.broadcasted_iota(jnp.int32, w1.shape, 0)
        w1 = jnp.where(rows < rem, w1, 0.0)

    # fc01 partial product: f32 activations cast to bf16 on the VPU, f32 MXU
    # accumulation into the resident VMEM scratch.
    acc_ref[...] += jnp.dot(x.astype(jnp.bfloat16), w1,
                            preferred_element_type=jnp.float32)

    @pl.when(k == pl.num_programs(1) - 1)
    def _():
        h1 = acc_ref[...] + b1_ref[...]
        # drop (p=0.5): identity in eval/inference mode.
        # TODO(synk): training-mode dropout would need pltpu.prng_seed /
        # pltpu.prng_random_bits masks here and after fc02.
        h2 = jnp.dot(h1.astype(jnp.bfloat16), w2_ref[...],
                     preferred_element_type=jnp.float32) + b2_ref[...]
        out = jnp.dot(h2.astype(jnp.bfloat16), w3_ref[...],
                      preferred_element_type=jnp.float32) + b3_ref[...]
        o_ref[...] = out.astype(o_ref.dtype)


@jax.jit
def dense_mutation_net(x, prepared):
    """x: [B, 5750] float32/bf16 -> [B, NUM_CLASSES] float32."""
    w1, b1, w2, b2, w3, b3 = prepared
    B, F = x.shape
    assert F == IN_FEATURES, F

    # Keep the batch (sublane) dim a multiple of 8; only copies x for odd B.
    if B % 8:
        x = jnp.pad(x, ((0, 8 - B % 8), (0, 0)))
    Bp = x.shape[0]

    # Balanced batch tiling; even tile count when splitting (v7x megacore).
    num_bt = _cdiv(Bp, MAX_TB)
    if num_bt > 1 and num_bt % 2:
        num_bt += 1
    tb = _round_up(_cdiv(Bp, num_bt), 8)
    num_bt = _cdiv(Bp, tb)

    # K-chunking policy:
    #  * single batch tile with non-trivial compute (64 <= B <= 256): stream
    #    w1 in 5 chunks so its 5.6 MiB DMA overlaps the fc01 matmul.
    #  * tiny B (pure weight-DMA bound) or multiple batch tiles: one full-K
    #    block -> w1 index_map is constant, fetched exactly once, resident.
    chunked = (num_bt == 1) and (Bp >= 64)
    tk = TK_CHUNK if chunked else IN_FEATURES
    num_k = _cdiv(IN_FEATURES, tk)

    kernel = functools.partial(_mlp_kernel, tk=tk, masked=chunked)

    flops = 2 * Bp * (IN_FEATURES * HIDDEN + HIDDEN * HIDDEN + HIDDEN * N_PAD)
    bytes_accessed = (x.size * x.dtype.itemsize
                      + (w1.size + w2.size + w3.size) * 2
                      + (b1.size + b2.size + b3.size) * 4
                      + Bp * N_PAD * 4)

    out = pl.pallas_call(
        kernel,
        out_shape=jax.ShapeDtypeStruct((Bp, N_PAD), jnp.float32),
        grid_spec=pltpu.PrefetchScalarGridSpec(
            num_scalar_prefetch=0,
            grid=(num_bt, num_k),
            in_specs=[
                pl.BlockSpec((tb, tk), lambda i, k: (i, k)),          # x (f32)
                pl.BlockSpec((tk, HIDDEN), lambda i, k: (k, 0)),      # w1 bf16
                pl.BlockSpec((1, HIDDEN), lambda i, k: (0, 0)),       # b1 f32
                pl.BlockSpec((HIDDEN, HIDDEN), lambda i, k: (0, 0)),  # w2 bf16
                pl.BlockSpec((1, HIDDEN), lambda i, k: (0, 0)),       # b2 f32
                pl.BlockSpec((HIDDEN, N_PAD), lambda i, k: (0, 0)),   # w3 bf16
                pl.BlockSpec((1, N_PAD), lambda i, k: (0, 0)),        # b3 f32
            ],
            out_specs=pl.BlockSpec((tb, N_PAD), lambda i, k: (i, 0)),
            scratch_shapes=[pltpu.VMEM((tb, HIDDEN), jnp.float32)],
        ),
        compiler_params=pltpu.CompilerParams(
            dimension_semantics=("parallel", "arbitrary"),
            vmem_limit_bytes=48 * 1024 * 1024,   # fits v7x's 64 MiB per-TC VMEM
        ),
        cost_estimate=pl.CostEstimate(
            flops=flops, transcendentals=0, bytes_accessed=bytes_accessed),
    )(x, w1, b1, w2, b2, w3, b3)

    return out[:B, :NUM_CLASSES]


def init_params(key):
    """nn.Linear-style init: U(-1/sqrt(fan_in), 1/sqrt(fan_in)).

    Weights stored as [in_features, out_features] (transpose of PyTorch);
    biases as [1, out_features].
    """
    ks = jax.random.split(key, 6)

    def linear(kw, kb, fan_in, fan_out):
        bound = 1.0 / jnp.sqrt(jnp.float32(fan_in))
        w = jax.random.uniform(kw, (fan_in, fan_out), jnp.float32, -bound, bound)
        b = jax.random.uniform(kb, (1, fan_out), jnp.float32, -bound, bound)
        return w, b

    w1, b1 = linear(ks[0], ks[1], IN_FEATURES, HIDDEN)
    w2, b2 = linear(ks[2], ks[3], HIDDEN, HIDDEN)
    w3, b3 = linear(ks[4], ks[5], HIDDEN, NUM_CLASSES)
    return (w1, b1, w2, b2, w3, b3)


def prepare_params(params):
    """One-time prep: cast weights to bf16, pad fc03 to a lane-dense 128-wide
    output. w1 keeps its natural 5750 rows (full-dim blocks satisfy the
    (8,128) rule; ragged K chunks are masked in-kernel)."""
    w1, b1, w2, b2, w3, b3 = params
    w3p = jnp.pad(w3, ((0, 0), (0, N_PAD - NUM_CLASSES)))
    b3p = jnp.pad(b3, ((0, 0), (0, N_PAD - NUM_CLASSES)))
    return (w1.astype(jnp.bfloat16), b1.astype(jnp.float32),
            w2.astype(jnp.bfloat16), b2.astype(jnp.float32),
            w3p.astype(jnp.bfloat16), b3p.astype(jnp.float32))


def _reference_bf16(x, prepared):
    """Pure-JAX reference mirroring the kernel's mixed precision."""
    w1, b1, w2, b2, w3, b3 = prepared
    h1 = jnp.dot(x.astype(jnp.bfloat16), w1,
                 preferred_element_type=jnp.float32) + b1
    h2 = jnp.dot(h1.astype(jnp.bfloat16), w2,
                 preferred_element_type=jnp.float32) + b2
    o = jnp.dot(h2.astype(jnp.bfloat16), w3,
                preferred_element_type=jnp.float32) + b3
    return o[:, :NUM_CLASSES]


def _reference_f32(x, params):
    w1, b1, w2, b2, w3, b3 = params
    h1 = x @ w1 + b1
    h2 = h1 @ w2 + b2
    return h2 @ w3 + b3


if __name__ == "__main__":
    key = jax.random.PRNGKey(0)
    k_p, k_a, k_b = jax.random.split(key, 3)

    params = init_params(k_p)
    prepared = prepare_params(params)

    # B=8  -> single grid step, w1 VMEM-resident (tiny-batch weight-DMA path)
    # B=96 -> K-pipelined fc01, grid=(1, 5) (chunked-w1 path)
    for B, kx in ((8, k_a), (96, k_b)):
        x = jax.random.normal(kx, (B, IN_FEATURES), jnp.float32)
        out = jax.block_until_ready(dense_mutation_net(x, prepared))
        assert out.shape == (B, NUM_CLASSES), out.shape

        ref = _reference_bf16(x, prepared)
        err = float(jnp.max(jnp.abs(out - ref)))
        assert err < 3e-3, f"B={B}: mismatch vs bf16 reference, max abs err={err}"

        err32 = float(jnp.max(jnp.abs(out - _reference_f32(x, params))))
        assert err32 < 1e-1, f"B={B}: far from f32 reference, err={err32}"

    print("KERNEL_OK")
</pallas_src>

<mosaic_0001>
module attributes {stable_mosaic.version = 11 : i64} {
  func.func @_mlp_kernel(%arg0: i32, %arg1: i32, %arg2: memref<8x5750xf32, #tpu.memory_space<vmem>>, %arg3: memref<5750x512xbf16, #tpu.memory_space<vmem>>, %arg4: memref<1x512xf32, #tpu.memory_space<vmem>>, %arg5: memref<512x512xbf16, #tpu.memory_space<vmem>>, %arg6: memref<1x512xf32, #tpu.memory_space<vmem>>, %arg7: memref<512x128xbf16, #tpu.memory_space<vmem>>, %arg8: memref<1x128xf32, #tpu.memory_space<vmem>>, %arg9: memref<8x128xf32, #tpu.memory_space<vmem>>, %arg10: memref<8x512xf32, #tpu.memory_space<vmem>>) attributes {dimension_semantics = [#tpu.dimension_semantics<parallel>, #tpu.dimension_semantics<arbitrary>], iteration_bounds = array<i64: 1, 1>, scalar_prefetch = 0 : i64, scratch_operands = 1 : i64, tpu.core_type = #tpu.core_type<tc>, window_params = [{transform_indices = @transform_0, window_bounds = array<i64: 8, 5750>}, {transform_indices = @transform_1, window_bounds = array<i64: 5750, 512>}, {pipeline_mode = #tpu.pipeline_mode<synchronous>, transform_indices = @transform_2, window_bounds = array<i64: 1, 512>}, {pipeline_mode = #tpu.pipeline_mode<synchronous>, transform_indices = @transform_3, window_bounds = array<i64: 512, 512>}, {pipeline_mode = #tpu.pipeline_mode<synchronous>, transform_indices = @transform_4, window_bounds = array<i64: 1, 512>}, {pipeline_mode = #tpu.pipeline_mode<synchronous>, transform_indices = @transform_5, window_bounds = array<i64: 512, 128>}, {pipeline_mode = #tpu.pipeline_mode<synchronous>, transform_indices = @transform_6, window_bounds = array<i64: 1, 128>}, {transform_indices = @transform_7, window_bounds = array<i64: 8, 128>}]} {
    %c0_i32 = arith.constant 0 : i32
    %0 = arith.cmpi eq, %arg1, %c0_i32 : i32
    %1 = arith.extui %0 : i1 to i32
    %c0_i32_0 = arith.constant 0 : i32
    %2 = arith.cmpi ne, %1, %c0_i32_0 : i32
    scf.if %2 {
      %cst_10 = arith.constant 0.000000e+00 : f32
      %13 = vector.broadcast %cst_10 : f32 to vector<8x512xf32>
      %c0_11 = arith.constant 0 : index
      %c0_12 = arith.constant 0 : index
      %14 = vector.load %arg10[%c0_11, %c0_12] : memref<8x512xf32, #tpu.memory_space<vmem>>, vector<8x512xf32>
      tpu.vector_store %arg10[%c0_11, %c0_12], %13 {strides = array<i32>} : memref<8x512xf32, #tpu.memory_space<vmem>>, vector<8x512xf32>,
    } else {
    }
    %c0 = arith.constant 0 : index
    %c0_1 = arith.constant 0 : index
    %3 = vector.load %arg2[%c0, %c0_1] : memref<8x5750xf32, #tpu.memory_space<vmem>>, vector<8x5750xf32>
    %c0_2 = arith.constant 0 : index
    %c0_3 = arith.constant 0 : index
    %4 = vector.load %arg3[%c0_2, %c0_3] : memref<5750x512xbf16, #tpu.memory_space<vmem>>, vector<5750x512xbf16>
    %c0_4 = arith.constant 0 : index
    %c0_5 = arith.constant 0 : index
    %5 = vector.load %arg10[%c0_4, %c0_5] : memref<8x512xf32, #tpu.memory_space<vmem>>, vector<8x512xf32>
    %6 = arith.truncf %3 : vector<8x5750xf32> to vector<8x5750xbf16>
    %cst = arith.constant dense<0.000000e+00> : vector<8x512xf32>
    %7 = tpu.matmul %6, %4, %cst {dimension_numbers = #tpu.dot_dimension_numbers<[1], [0], [0], [1], [0, 0, 1, 1], [], []>} : vector<8x5750xbf16>, vector<5750x512xbf16>, vector<8x512xf32> -> vector<8x512xf32>
    %8 = arith.addf %5, %7 : vector<8x512xf32>
    %c0_6 = arith.constant 0 : index
    %c0_7 = arith.constant 0 : index
    %9 = vector.load %arg10[%c0_6, %c0_7] : memref<8x512xf32, #tpu.memory_space<vmem>>, vector<8x512xf32>
    tpu.vector_store %arg10[%c0_6, %c0_7], %8 {strides = array<i32>} : memref<8x512xf32, #tpu.memory_space<vmem>>, vector<8x512xf32>,
    %c0_i32_8 = arith.constant 0 : i32
    %10 = arith.cmpi eq, %arg1, %c0_i32_8 : i32
    %11 = arith.extui %10 : i1 to i32
    %c0_i32_9 = arith.constant 0 : i32
    %12 = arith.cmpi ne, %11, %c0_i32_9 : i32
    scf.if %12 {
      %c0_10 = arith.constant 0 : index
      %c0_11 = arith.constant 0 : index
      %13 = vector.load %arg10[%c0_10, %c0_11] : memref<8x512xf32, #tpu.memory_space<vmem>>, vector<8x512xf32>
      %c0_12 = arith.constant 0 : index
      %c0_13 = arith.constant 0 : index
      %14 = vector.load %arg4[%c0_12, %c0_13] : memref<1x512xf32, #tpu.memory_space<vmem>>, vector<1x512xf32>
      %15 = vector.broadcast %14 : vector<1x512xf32> to vector<8x512xf32>
      %16 = arith.addf %13, %15 : vector<8x512xf32>
      %17 = arith.truncf %16 : vector<8x512xf32> to vector<8x512xbf16>
      %c0_14 = arith.constant 0 : index
      %c0_15 = arith.constant 0 : index
      %18 = vector.load %arg5[%c0_14, %c0_15] : memref<512x512xbf16, #tpu.memory_space<vmem>>, vector<512x512xbf16>
      %cst_16 = arith.constant dense<0.000000e+00> : vector<8x512xf32>
      %19 = tpu.matmul %17, %18, %cst_16 {dimension_numbers = #tpu.dot_dimension_numbers<[1], [0], [0], [1], [0, 0, 1, 1], [], []>} : vector<8x512xbf16>, vector<512x512xbf16>, vector<8x512xf32> -> vector<8x512xf32>
      %c0_17 = arith.constant 0 : index
      %c0_18 = arith.constant 0 : index
      %20 = vector.load %arg6[%c0_17, %c0_18] : memref<1x512xf32, #tpu.memory_space<vmem>>, vector<1x512xf32>
      %21 = vector.broadcast %20 : vector<1x512xf32> to vector<8x512xf32>
      %22 = arith.addf %19, %21 : vector<8x512xf32>
      %23 = arith.truncf %22 : vector<8x512xf32> to vector<8x512xbf16>
      %c0_19 = arith.constant 0 : index
      %c0_20 = arith.constant 0 : index
      %24 = vector.load %arg7[%c0_19, %c0_20] : memref<512x128xbf16, #tpu.memory_space<vmem>>, vector<512x128xbf16>
      %cst_21 = arith.constant dense<0.000000e+00> : vector<8x128xf32>
      %25 = tpu.matmul %23, %24, %cst_21 {dimension_numbers = #tpu.dot_dimension_numbers<[1], [0], [0], [1], [0, 0, 1, 1], [], []>} : vector<8x512xbf16>, vector<512x128xbf16>, vector<8x128xf32> -> vector<8x128xf32>
      %c0_22 = arith.constant 0 : index
      %c0_23 = arith.constant 0 : index
      %26 = vector.load %arg8[%c0_22, %c0_23] : memref<1x128xf32, #tpu.memory_space<vmem>>, vector<1x128xf32>
      %27 = vector.broadcast %26 : vector<1x128xf32> to vector<8x128xf32>
      %28 = arith.addf %25, %27 : vector<8x128xf32>
      %c0_24 = arith.constant 0 : index
      %c0_25 = arith.constant 0 : index
      %29 = vector.load %arg9[%c0_24, %c0_25] : memref<8x128xf32, #tpu.memory_space<vmem>>, vector<8x128xf32>
      tpu.vector_store %arg9[%c0_24, %c0_25], %28 {strides = array<i32>} : memref<8x128xf32, #tpu.memory_space<vmem>>, vector<8x128xf32>,
    } else {
    }
    return
  }
  func.func @transform_0(%arg0: i32, %arg1: i32) -> (i32, i32) {
    %c0_i32 = arith.constant 0 : i32
    return %arg0, %arg1 : i32, i32
  }
  func.func @transform_1(%arg0: i32, %arg1: i32) -> (i32, i32) {
    %c0_i32 = arith.constant 0 : i32
    %c0_i32_0 = arith.constant 0 : i32
    return %arg1, %c0_i32 : i32, i32
  }
  func.func @transform_2(%arg0: i32, %arg1: i32) -> (i32, i32) {
    %c0_i32 = arith.constant 0 : i32
    %c0_i32_0 = arith.constant 0 : i32
    %c0_i32_1 = arith.constant 0 : i32
    return %c0_i32, %c0_i32_0 : i32, i32
  }
  func.func @transform_3(%arg0: i32, %arg1: i32) -> (i32, i32) {
    %c0_i32 = arith.constant 0 : i32
    %c0_i32_0 = arith.constant 0 : i32
    %c0_i32_1 = arith.constant 0 : i32
    return %c0_i32, %c0_i32_0 : i32, i32
  }
  func.func @transform_4(%arg0: i32, %arg1: i32) -> (i32, i32) {
    %c0_i32 = arith.constant 0 : i32
    %c0_i32_0 = arith.constant 0 : i32
    %c0_i32_1 = arith.constant 0 : i32
    return %c0_i32, %c0_i32_0 : i32, i32
  }
  func.func @transform_5(%arg0: i32, %arg1: i32) -> (i32, i32) {
    %c0_i32 = arith.constant 0 : i32
    %c0_i32_0 = arith.constant 0 : i32
    %c0_i32_1 = arith.constant 0 : i32
    return %c0_i32, %c0_i32_0 : i32, i32
  }
  func.func @transform_6(%arg0: i32, %arg1: i32) -> (i32, i32) {
    %c0_i32 = arith.constant 0 : i32
    %c0_i32_0 = arith.constant 0 : i32
    %c0_i32_1 = arith.constant 0 : i32
    return %c0_i32, %c0_i32_0 : i32, i32
  }
  func.func @transform_7(%arg0: i32, %arg1: i32) -> (i32, i32) {
    %c0_i32 = arith.constant 0 : i32
    %c0_i32_0 = arith.constant 0 : i32
    return %arg0, %c0_i32 : i32, i32
  }
}

</mosaic_0001>

<bundles_post_ra>
// kernel: dense_mutation_net.1
= control target key start
LH: loop header
LB: loop body
LE: loop exit
PB: predicated region body
PF: predicated region fallthrough
CT: control target
= control target key end

     0   :  { %12 = vsyncpa [#allocation4], 0  ;;  %s16897_s0 = inlined_call_operand.hbm [shape: f32[8,5750], index: 0, kind: input, shape index: {}]   ;;  %s16898_s1 = inlined_call_operand.hbm [shape: bf16[5750,512], index: 1, kind: input, shape index: {}]   ;;  %s16899_s2 = inlined_call_operand.hbm [shape: f32[1,512], index: 2, kind: input, shape index: {}]   ;;  %s16900_s3 = inlined_call_operand.hbm [shape: bf16[512,512], index: 3, kind: input, shape index: {}]   ;;  %s16901_s4 = inlined_call_operand.hbm [shape: f32[1,512], index: 4, kind: input, shape index: {}]   ;;  %s16902_s5 = inlined_call_operand.hbm [shape: bf16[512,128], index: 5, kind: input, shape index: {}]   ;;  %s16903_s6 = inlined_call_operand.hbm [shape: f32[1,128], index: 6, kind: input, shape index: {}]   ;;  %s16904_s7 = inlined_call_operand.hbm [shape: f32[8,128], index: 7, kind: output, shape index: {}]  }
   0x1   :  { %13 = vsyncpa [#allocation7], 0 }
   0x2   :  { %14 = vsyncpa [#allocation10], 0 }
   0x3   :  { %15 = vsyncpa [#allocation13], 0 }
   0x4   :  { %16 = vsyncpa [#allocation5], 0  ;;  %s16355_s24 = smov [#allocation6]   ;;  %s16169_s28 = scalar_lea.hbm %s16898_s1, 184064 }
   0x5   :  { %s32_s25 = sshll.u32 %s16355_s24, 4  ;;  %p16170_p0 = scmp.ne.s32.totalorder %s16898_s1, %s16169_s28  ;;  %s33_s25 = int_to_ptr.vmem [resolvable:$true] %s32_s25 }
   0x6   :  { %p16173_p1 = scmp.lt.u32.totalorder %s16169_s28, %s16898_s1 }
   0x8   :  { %p16175_p2 = pnand %p16173_p1, %p16170_p0 }
   0xa   :  { %16178 = shalt.err (!%p16175_p2)
}
   0xb   :  { %s16179_s10 = scalar_lea.vmem %s33_s25, 184064  ;;  %p16184_p4 = scmp.lt.s32.totalorder %s33_s25, %s33_s25 }
   0xc   :  { %p16180_p3 = scmp.ne.s32.totalorder %s33_s25, %s16179_s10  ;;  %p16185_p5 = scmp.lt.s32.totalorder %s16179_s10, %s16179_s10 }
   0xe   :  { %p16186_p6 = por %p16185_p5, %p16184_p4 }
  0x10   :  { %p16187_p7 = pnand %p16186_p6, %p16180_p3 }
  0x12   :  { %16190 = shalt.err (!%p16187_p7)
}
  0x13   :  { %s16356_s11 = smov 256   ;;  %s16357_s12 = smov 16  }
  0x14   :  { %38 = dma.hbm_to_vmem [thread:$0]  %s16898_s1, 184064, %s33_s25, [#allocation7], %s16356_s11, %s16356_s11, %s16357_s12  }
  0x15   :  { %s16358_s15 = smov [#allocation9]   ;;  %s16359_s17 = smov [#allocation12]  }
  0x16   :  { %s54_s16 = sshll.u32 %s16358_s15, 4  ;;  %s76_s18 = sshll.u32 %s16359_s17, 4  ;;  %s55_s16 = int_to_ptr.vmem [resolvable:$true] %s54_s16  ;;  %s77_s18 = int_to_ptr.vmem [resolvable:$true] %s76_s18 }
  0x17   :  { %s16191_s21 = scalar_lea.hbm %s16900_s3, 16384 }
  0x18   :  { %p16192_p8 = scmp.ne.s32.totalorder %s16900_s3, %s16191_s21  ;;  %p16195_p9 = scmp.lt.u32.totalorder %s16191_s21, %s16900_s3 }
  0x1a   :  { %p16197_p10 = pnand %p16195_p9, %p16192_p8 }
  0x1c   :  { %16200 = shalt.err (!%p16197_p10)
}
  0x1d   :  { %s16201_s1 = scalar_lea.vmem %s55_s16, 16384  ;;  %p16206_p12 = scmp.lt.s32.totalorder %s55_s16, %s55_s16 }
  0x1e   :  { %p16202_p11 = scmp.ne.s32.totalorder %s55_s16, %s16201_s1  ;;  %p16207_p13 = scmp.lt.s32.totalorder %s16201_s1, %s16201_s1 }
  0x20   :  { %p16208_p0 = por %p16207_p13, %p16206_p12 }
  0x22   :  { %p16209_p1 = pnand %p16208_p0, %p16202_p11 }
  0x24   :  { %16212 = shalt.err (!%p16209_p1)
}
  0x25   :  { %60 = dma.hbm_to_vmem [thread:$0]  %s16900_s3, 16384, %s55_s16, [#allocation10], %s16356_s11, %s16356_s11, %s16357_s12  }
  0x26   :  { %s16213_s30 = scalar_lea.hbm %s16902_s5, 4096 }
  0x27   :  { %p16214_p2 = scmp.ne.s32.totalorder %s16902_s5, %s16213_s30  ;;  %p16217_p3 = scmp.lt.u32.totalorder %s16213_s30, %s16902_s5 }
  0x29   :  { %p16219_p4 = pnand %p16217_p3, %p16214_p2 }
  0x2b   :  { %16222 = shalt.err (!%p16219_p4)
}
  0x2c   :  { %s16223_s14 = scalar_lea.vmem %s77_s18, 4096  ;;  %p16228_p6 = scmp.lt.s32.totalorder %s77_s18, %s77_s18 }
  0x2d   :  { %p16224_p5 = scmp.ne.s32.totalorder %s77_s18, %s16223_s14  ;;  %p16229_p7 = scmp.lt.s32.totalorder %s16223_s14, %s16223_s14 }
  0x2f   :  { %p16230_p8 = por %p16229_p7, %p16228_p6 }
  0x31   :  { %p16231_p9 = pnand %p16230_p8, %p16224_p5 }
  0x33   :  { %16234 = shalt.err (!%p16231_p9)
}
  0x34   :  { %s16360_s3 = smov 64   ;;  %s16361_s11 = smov 4  }
  0x35   :  { %82 = dma.hbm_to_vmem [thread:$0]  %s16902_s5, 4096, %s77_s18, [#allocation13], %s16360_s3, %s16360_s3, %s16361_s11  }
  0x36   :  { %s16362_s16 = smov [#allocation3]   ;;  %s16363_s19 = smov [#allocation8]  }
  0x37   :  { %s23_s17 = sshll.u32 %s16362_s16, 4  ;;  %s45_s20 = sshll.u32 %s16363_s19, 4  ;;  %s24_s17 = int_to_ptr.vmem [resolvable:$true] %s23_s17  ;;  %s46_s20 = int_to_ptr.vmem [resolvable:$true] %s45_s20 }
  0x38   :  { %s16235_s23 = scalar_lea.hbm %s16897_s0, 5760 }
  0x39   :  { %p16236_p10 = scmp.ne.s32.totalorder %s16897_s0, %s16235_s23  ;;  %p16239_p11 = scmp.lt.u32.totalorder %s16235_s23, %s16897_s0 }
  0x3b   :  { %p16241_p12 = pnand %p16239_p11, %p16236_p10 }
  0x3d   :  { %16244 = shalt.err (!%p16241_p12)
}
  0x3e   :  { %s16245_s5 = scalar_lea.vmem %s24_s17, 5760  ;;  %p16250_p0 = scmp.lt.s32.totalorder %s24_s17, %s24_s17 }
  0x3f   :  { %p16246_p13 = scmp.ne.s32.totalorder %s24_s17, %s16245_s5  ;;  %p16251_p1 = scmp.lt.s32.totalorder %s16245_s5, %s16245_s5 }
  0x41   :  { %p16252_p2 = por %p16251_p1, %p16250_p0 }
  0x43   :  { %p16253_p3 = pnand %p16252_p2, %p16246_p13 }
  0x45   :  { %16256 = shalt.err (!%p16253_p3)
}
  0x46   :  { %26 = dma.hbm_to_vmem [thread:$0]  %s16897_s0, 5760, %s24_s17, [#allocation4]  }
  0x47   :  { %s16257_s30 = scalar_lea.hbm %s16899_s2, 64 }
  0x48   :  { %p16258_p4 = scmp.ne.s32.totalorder %s16899_s2, %s16257_s30  ;;  %p16261_p5 = scmp.lt.u32.totalorder %s16257_s30, %s16899_s2 }
  0x4a   :  { %p16263_p6 = pnand %p16261_p5, %p16258_p4 }
  0x4c   :  { %16266 = shalt.err (!%p16263_p6)
}
  0x4d   :  { %s16267_s14 = scalar_lea.vmem %s46_s20, 64  ;;  %p16272_p8 = scmp.lt.s32.totalorder %s46_s20, %s46_s20 }
  0x4e   :  { %p16268_p7 = scmp.ne.s32.totalorder %s46_s20, %s16267_s14  ;;  %p16273_p9 = scmp.lt.s32.totalorder %s16267_s14, %s16267_s14 }
  0x50   :  { %p16274_p10 = por %p16273_p9, %p16272_p8 }
  0x52   :  { %p16275_p11 = pnand %p16274_p10, %p16268_p7 }
  0x54   :  { %16278 = shalt.err (!%p16275_p11)
}
  0x55   :  { %48 = dma.hbm_to_vmem [thread:$0]  %s16899_s2, 64, %s46_s20, [#allocation7]  }
  0x56   :  { %s16364_s11 = smov [#allocation11]   ;;  %s16365_s15 = smov [#allocation14]  }
  0x57   :  { %s67_s12 = sshll.u32 %s16364_s11, 4  ;;  %s89_s16 = sshll.u32 %s16365_s15, 4  ;;  %s68_s12 = int_to_ptr.vmem [resolvable:$true] %s67_s12  ;;  %s90_s16 = int_to_ptr.vmem [resolvable:$true] %s89_s16 }
  0x58   :  { %s16279_s21 = scalar_lea.hbm %s16901_s4, 64 }
  0x59   :  { %p16280_p12 = scmp.ne.s32.totalorder %s16901_s4, %s16279_s21  ;;  %p16283_p13 = scmp.lt.u32.totalorder %s16279_s21, %s16901_s4 }
  0x5b   :  { %p16285_p0 = pnand %p16283_p13, %p16280_p12 }
  0x5d   :  { %16288 = shalt.err (!%p16285_p0)
}
  0x5e   :  { %s16289_s2 = scalar_lea.vmem %s68_s12, 64  ;;  %p16294_p2 = scmp.lt.s32.totalorder %s68_s12, %s68_s12 }
  0x5f   :  { %p16290_p1 = scmp.ne.s32.totalorder %s68_s12, %s16289_s2  ;;  %p16295_p3 = scmp.lt.s32.totalorder %s16289_s2, %s16289_s2 }
  0x61   :  { %p16296_p4 = por %p16295_p3, %p16294_p2 }
  0x63   :  { %p16297_p5 = pnand %p16296_p4, %p16290_p1 }
  0x65   :  { %16300 = shalt.err (!%p16297_p5)
}
  0x66   :  { %70 = dma.hbm_to_vmem [thread:$0]  %s16901_s4, 64, %s68_s12, [#allocation10]  }
  0x67   :  { %s16301_s18 = scalar_lea.hbm %s16903_s6, 16 }
  0x68   :  { %p16302_p6 = scmp.ne.s32.totalorder %s16903_s6, %s16301_s18  ;;  %p16305_p7 = scmp.lt.u32.totalorder %s16301_s18, %s16903_s6 }
  0x6a   :  { %p16307_p8 = pnand %p16305_p7, %p16302_p6 }
  0x6c   :  { %16310 = shalt.err (!%p16307_p8)
}
  0x6d   :  { %s16311_s8 = scalar_lea.vmem %s90_s16, 16  ;;  %s16315_s9 = scalar_lea.vmem %s90_s16, 32 }
  0x6e   :  { %p16312_p9 = scmp.ne.s32.totalorder %s90_s16, %s16311_s8  ;;  %p16316_p10 = scmp.lt.s32.totalorder %s90_s16, %s90_s16 }
  0x6f   :  { %p16317_p11 = scmp.lt.s32.totalorder %s16315_s9, %s16311_s8 }
  0x71   :  { %p16318_p12 = por %p16317_p11, %p16316_p10 }
  0x73   :  { %p16319_p13 = pnand %p16318_p12, %p16312_p9 }
  0x75   :  { %16322 = shalt.err (!%p16319_p13)
}
  0x76   :  { %92 = dma.hbm_to_vmem [thread:$0]  %s16903_s6, 16, %s90_s16, [#allocation13]  }
  0x77   :  { %16345 = dma.done.wait [#allocation4], 5760  }
  0x78   :  { %16346 = vsyncadd [#allocation4], 4294961536 }
  0x79   :  { %16347 = dma.done.wait [#allocation7], 184128  }
  0x7a   :  { %16348 = vsyncadd [#allocation7], 4294783168 }
  0x7b   :  { %16349 = dma.done.wait [#allocation10], 16448  }
  0x7c   :  { %16350 = vsyncadd [#allocation10], 4294950848 }
  0x7d   :  { %16351 = dma.done.wait [#allocation13], 4112  }
  0x7e   :  { %16352 = vsyncadd [#allocation13], 4294963184  ;;  %v13787_v0 = vld [vmem:[#allocation6 + $0x4] ss:$16 sps:$4 sm:$0xff]   ;;  %v13791_v2 = vld [vmem:[#allocation6] ss:$16 sps:$4 sm:$0xff]  }
  0x7f   :  { %v13789_v1 = vld [vmem:[#allocation6 + $0x204] ss:$16 sps:$4 sm:$0xff]   ;;  %8862 = vmatprep.subr.bf16.mxu0 %v13787_v0  ;;  %v13792_v3 = vld [vmem:[#allocation6 + $0x200] ss:$16 sps:$4 sm:$0xff]   ;;  %vm8849_vm0 = vcmask 1042432   ;;  %vm8845_vm1 = vcmask 965632  }
  0x80   :  { %8903 = vmatprep.subr.bf16.mxu1 %v13789_v1  ;;  %v13793_v4 = vld [vmem:[#allocation6 + $0x24] ss:$16 sps:$4 sm:$0xff]   ;;  %8863 = vmatpush1.bf16.msra.mxu0 %v13791_v2  ;;  %v13797_v6 = vld [vmem:[#allocation6 + $0x20] ss:$16 sps:$4 sm:$0xff]   ;;  %s16367_s6 = smov [#allocation15]  }
  0x81   :  { %8904 = vmatpush1.bf16.msra.mxu1 %v13792_v3  ;;  %v13795_v5 = vld [vmem:[#allocation6 + $0x224] ss:$16 sps:$4 sm:$0xff]   ;;  %8864 = vmatprep.subr.bf16.mxu0 %v13793_v4  ;;  %v13798_v7 = vld [vmem:[#allocation6 + $0x220] ss:$16 sps:$4 sm:$0xff]   ;;  %v123_v4 = vld [vmem:[#allocation3] sm:$0xff]  ;;  %s12101_s13 = sshll.u32 %s16367_s6, 4  ;;  %s12102_s13 = int_to_ptr.vmem [resolvable:$true] %s12101_s13 }
  0x82   :  { %8905 = vmatprep.subr.bf16.mxu1 %v13795_v5  ;;  %v13799_v8 = vld [vmem:[#allocation6 + $0x44] ss:$16 sps:$4 sm:$0xff]   ;;  %v13803_v10 = vld [vmem:[#allocation6 + $0x40] ss:$16 sps:$4 sm:$0xff]   ;;  %v125_v5 = vld [vmem:[#allocation3 + $0x10] sm:$0xff]  ;;  %s16323_s14 = scalar_lea.vmem %s12102_s13, 128  ;;  %p16328_p1 = scmp.lt.s32.totalorder %s12102_s13, %s12102_s13 }
  0x83   :  { %v13801_v9 = vld [vmem:[#allocation6 + $0x244] ss:$16 sps:$4 sm:$0xff]   ;;  %v13804_v11 = vld [vmem:[#allocation6 + $0x240] ss:$16 sps:$4 sm:$0xff]   ;;  %p16324_p0 = scmp.ne.s32.totalorder %s12102_s13, %s16323_s14  ;;  %p16329_p2 = scmp.lt.s32.totalorder %s16323_s14, %s16323_s14 }
  0x84   :  { %8865 = vmatpush1.bf16.msra.mxu0 %v13797_v6  ;;  %v13805_v12 = vld [vmem:[#allocation6 + $0x64] ss:$16 sps:$4 sm:$0xff]   ;;  %v13809_v14 = vld [vmem:[#allocation6 + $0x60] ss:$16 sps:$4 sm:$0xff]  }
  0x85   :  { %8906 = vmatpush1.bf16.msra.mxu1 %v13798_v7  ;;  %8866 = vmatprep.subr.bf16.mxu0 %v13799_v8  ;;  %v13807_v13 = vld [vmem:[#allocation6 + $0x264] ss:$16 sps:$4 sm:$0xff]   ;;  %v13810_v15 = vld [vmem:[#allocation6 + $0x260] ss:$16 sps:$4 sm:$0xff]   ;;  %v16498_v8 = vpack.c.bf16 %v123_v4, %v123_v4  ;;  %p16330_p3 = por %p16329_p2, %p16328_p1 }
  0x86   :  { %8907 = vmatprep.subr.bf16.mxu1 %v13801_v9  ;;  %v13811_v16 = vld [vmem:[#allocation6 + $0x84] ss:$16 sps:$4 sm:$0xff]   ;;  %v13815_v18 = vld [vmem:[#allocation6 + $0x80] ss:$16 sps:$4 sm:$0xff]   ;;  %v16500_v9 = vpack.c.bf16 %v125_v5, %v125_v5 }
  0x87   :  { %v13813_v17 = vld [vmem:[#allocation6 + $0x284] ss:$16 sps:$4 sm:$0xff]   ;;  %v13816_v19 = vld [vmem:[#allocation6 + $0x280] ss:$16 sps:$4 sm:$0xff]   ;;  %p16331_p4 = pnand %p16330_p3, %p16324_p0 }
  0x88   :  { %8867 = vmatpush1.bf16.msra.mxu0 %v13803_v10  ;;  %v13817_v20 = vld [vmem:[#allocation6 + $0xa4] ss:$16 sps:$4 sm:$0xff]   ;;  %v13821_v22 = vld [vmem:[#allocation6 + $0xa0] ss:$16 sps:$4 sm:$0xff]  }
  0x89   :  { %8908 = vmatpush1.bf16.msra.mxu1 %v13804_v11  ;;  %8868 = vmatprep.subr.bf16.mxu0 %v13805_v12  ;;  %v13819_v21 = vld [vmem:[#allocation6 + $0x2a4] ss:$16 sps:$4 sm:$0xff]   ;;  %v13822_v23 = vld [vmem:[#allocation6 + $0x2a0] ss:$16 sps:$4 sm:$0xff]  }
  0x8a   :  { %8909 = vmatprep.subr.bf16.mxu1 %v13807_v13  ;;  %v13823_v24 = vld [vmem:[#allocation6 + $0xc4] ss:$16 sps:$4 sm:$0xff]   ;;  %v13827_v26 = vld [vmem:[#allocation6 + $0xc0] ss:$16 sps:$4 sm:$0xff]  }
  0x8b   :  { %v13825_v25 = vld [vmem:[#allocation6 + $0x2c4] ss:$16 sps:$4 sm:$0xff]   ;;  %v13828_v27 = vld [vmem:[#allocation6 + $0x2c0] ss:$16 sps:$4 sm:$0xff]  }
  0x8c   :  { %8869 = vmatpush1.bf16.msra.mxu0 %v13809_v14  ;;  %v13829_v28 = vld [vmem:[#allocation6 + $0xe4] ss:$16 sps:$4 sm:$0xff]   ;;  %v13833_v30 = vld [vmem:[#allocation6 + $0xe0] ss:$16 sps:$4 sm:$0xff]  }
  0x8d   :  { %8910 = vmatpush1.bf16.msra.mxu1 %v13810_v15  ;;  %8870 = vmatprep.subr.bf16.mxu0 %v13811_v16  ;;  %v13831_v29 = vld [vmem:[#allocation6 + $0x2e4] ss:$16 sps:$4 sm:$0xff]   ;;  %v13834_v31 = vld [vmem:[#allocation6 + $0x2e0] ss:$16 sps:$4 sm:$0xff]  }
  0x8e   :  { %8911 = vmatprep.subr.bf16.mxu1 %v13813_v17  ;;  %v13835_v32 = vld [vmem:[#allocation6 + $0x104] ss:$16 sps:$4 sm:$0xff]   ;;  %v13839_v34 = vld [vmem:[#allocation6 + $0x100] ss:$16 sps:$4 sm:$0xff]  }
  0x8f   :  { %v13837_v33 = vld [vmem:[#allocation6 + $0x304] ss:$16 sps:$4 sm:$0xff]   ;;  %v13840_v35 = vld [vmem:[#allocation6 + $0x300] ss:$16 sps:$4 sm:$0xff]  }
  0x90   :  { %8871 = vmatpush1.bf16.msra.mxu0 %v13815_v18  ;;  %v13841_v36 = vld [vmem:[#allocation6 + $0x124] ss:$16 sps:$4 sm:$0xff]   ;;  %v13845_v38 = vld [vmem:[#allocation6 + $0x120] ss:$16 sps:$4 sm:$0xff]  }
  0x91   :  { %8912 = vmatpush1.bf16.msra.mxu1 %v13816_v19  ;;  %8872 = vmatprep.subr.bf16.mxu0 %v13817_v20  ;;  %v13843_v37 = vld [vmem:[#allocation6 + $0x324] ss:$16 sps:$4 sm:$0xff]   ;;  %v13846_v39 = vld [vmem:[#allocation6 + $0x320] ss:$16 sps:$4 sm:$0xff]  }
  0x92   :  { %8913 = vmatprep.subr.bf16.mxu1 %v13819_v21  ;;  %v13847_v40 = vld [vmem:[#allocation6 + $0x144] ss:$16 sps:$4 sm:$0xff]   ;;  %v13851_v42 = vld [vmem:[#allocation6 + $0x140] ss:$16 sps:$4 sm:$0xff]  }
  0x93   :  { %v13849_v41 = vld [vmem:[#allocation6 + $0x344] ss:$16 sps:$4 sm:$0xff]   ;;  %v13852_v43 = vld [vmem:[#allocation6 + $0x340] ss:$16 sps:$4 sm:$0xff]  }
  0x94   :  { %8873 = vmatpush1.bf16.msra.mxu0 %v13821_v22  ;;  %v13853_v44 = vld [vmem:[#allocation6 + $0x164] ss:$16 sps:$4 sm:$0xff]   ;;  %v13857_v47 = vld [vmem:[#allocation6 + $0x160] ss:$16 sps:$4 sm:$0xff]  }
  0x95   :  { %8914 = vmatpush1.bf16.msra.mxu1 %v13822_v23  ;;  %8874 = vmatprep.subr.bf16.mxu0 %v13823_v24  ;;  %v13855_v45 = vld [vmem:[#allocation6 + $0x364] ss:$16 sps:$4 sm:$0xff]   ;;  %v13858_v48 = vld [vmem:[#allocation6 + $0x360] ss:$16 sps:$4 sm:$0xff]  }
  0x96   :  { %8915 = vmatprep.subr.bf16.mxu1 %v13825_v25  ;;  %v124_v46 = vld [vmem:[#allocation3 + $0x8] sm:$0xff]  ;;  %v126_v50 = vld [vmem:[#allocation3 + $0x18] sm:$0xff] }
  0x97   :  { %v16492_v49 = vpack.c.bf16 %v124_v46, %v124_v46  ;;  %v13859_v51 = vld [vmem:[#allocation6 + $0x184] ss:$16 sps:$4 sm:$0xff]   ;;  %v16494_v52 = vpack.c.bf16 %v126_v50, %v126_v50  ;;  %v13863_v54 = vld [vmem:[#allocation6 + $0x180] ss:$16 sps:$4 sm:$0xff]  }
  0x98   :  { %8875 = vmatpush1.bf16.msra.mxu0 %v13827_v26  ;;  %v13861_v53 = vld [vmem:[#allocation6 + $0x384] ss:$16 sps:$4 sm:$0xff]   ;;  %v13864_v55 = vld [vmem:[#allocation6 + $0x380] ss:$16 sps:$4 sm:$0xff]  }
  0x99   :  { %8916 = vmatpush1.bf16.msra.mxu1 %v13828_v27  ;;  %8876 = vmatprep.subr.bf16.mxu0 %v13829_v28  ;;  %v13865_v56 = vld [vmem:[#allocation6 + $0x1a4] ss:$16 sps:$4 sm:$0xff]   ;;  %v13869_v58 = vld [vmem:[#allocation6 + $0x1a0] ss:$16 sps:$4 sm:$0xff]  }
  0x9a   :  { %8917 = vmatprep.subr.bf16.mxu1 %v13831_v29  ;;  %8894 = vmatprep.mubr.bf16.mxu0 %v16492_v49  ;;  %v13867_v57 = vld [vmem:[#allocation6 + $0x3a4] ss:$16 sps:$4 sm:$0xff]   ;;  %v13870_v59 = vld [vmem:[#allocation6 + $0x3a0] ss:$16 sps:$4 sm:$0xff]  }
  0x9b   :  { %8935 = vmatprep.mubr.bf16.mxu1 %v16494_v52  ;;  %v13871_v60 = vld [vmem:[#allocation6 + $0x1c4] ss:$16 sps:$4 sm:$0xff]   ;;  %v13875_v62 = vld [vmem:[#allocation6 + $0x1c0] ss:$16 sps:$4 sm:$0xff]  }
  0x9c   :  { %8877 = vmatpush1.bf16.msra.mxu0 %v13833_v30  ;;  %v13873_v61 = vld [vmem:[#allocation6 + $0x3c4] ss:$16 sps:$4 sm:$0xff]   ;;  %v13876_v63 = vld [vmem:[#allocation6 + $0x3c0] ss:$16 sps:$4 sm:$0xff]  }
  0x9d   :  { %8918 = vmatpush1.bf16.msra.mxu1 %v13834_v31  ;;  %8878 = vmatprep.subr.bf16.mxu0 %v13835_v32  ;;  %v13877_v0 = vld [vmem:[#allocation6 + $0x1e4] ss:$16 sps:$4 sm:$0xff]   ;;  %v13881_v2 = vld [vmem:[#allocation6 + $0x1e0] ss:$16 sps:$4 sm:$0xff]  }
  0x9e   :  { %8919 = vmatprep.subr.bf16.mxu1 %v13837_v33  ;;  %v13879_v1 = vld [vmem:[#allocation6 + $0x3e4] ss:$16 sps:$4 sm:$0xff]   ;;  %v13882_v3 = vld [vmem:[#allocation6 + $0x3e0] ss:$16 sps:$4 sm:$0xff]  }
  0x9f   :  { %v13885_v6 = vld [vmem:[#allocation6 + $0x404] ss:$16 sps:$4 sm:$0xff]   ;;  %v13883_v10 = vld [vmem:[#allocation6 + $0x400] ss:$16 sps:$4 sm:$0xff]  }
  0xa0   :  { %8879 = vmatpush1.bf16.msra.mxu0 %v13839_v34  ;;  %v13888_v7 = vld [vmem:[#allocation6 + $0x604] ss:$16 sps:$4 sm:$0xff]   ;;  %v13886_v11 = vld [vmem:[#allocation6 + $0x600] ss:$16 sps:$4 sm:$0xff]  }
  0xa1   :  { %8920 = vmatpush1.bf16.msra.mxu1 %v13840_v35  ;;  %8880 = vmatprep.subr.bf16.mxu0 %v13841_v36  ;;  %v13891_v12 = vld [vmem:[#allocation6 + $0x424] ss:$16 sps:$4 sm:$0xff]   ;;  %v13889_v14 = vld [vmem:[#allocation6 + $0x420] ss:$16 sps:$4 sm:$0xff]  }
  0xa2   :  { %8921 = vmatprep.subr.bf16.mxu1 %v13843_v37  ;;  %v13894_v13 = vld [vmem:[#allocation6 + $0x624] ss:$16 sps:$4 sm:$0xff]   ;;  %v13892_v15 = vld [vmem:[#allocation6 + $0x620] ss:$16 sps:$4 sm:$0xff]  }
  0xa3   :  { %v13897_v16 = vld [vmem:[#allocation6 + $0x444] ss:$16 sps:$4 sm:$0xff]   ;;  %v13895_v18 = vld [vmem:[#allocation6 + $0x440] ss:$16 sps:$4 sm:$0xff]  }
  0xa4   :  { %8881 = vmatpush1.bf16.msra.mxu0 %v13845_v38  ;;  %v13900_v17 = vld [vmem:[#allocation6 + $0x644] ss:$16 sps:$4 sm:$0xff]   ;;  %v13898_v19 = vld [vmem:[#allocation6 + $0x640] ss:$16 sps:$4 sm:$0xff]  }
  0xa5   :  { %8922 = vmatpush1.bf16.msra.mxu1 %v13846_v39  ;;  %8882 = vmatprep.subr.bf16.mxu0 %v13847_v40  ;;  %v13903_v20 = vld [vmem:[#allocation6 + $0x464] ss:$16 sps:$4 sm:$0xff]   ;;  %v13901_v22 = vld [vmem:[#allocation6 + $0x460] ss:$16 sps:$4 sm:$0xff]  }
  0xa6   :  { %8923 = vmatprep.subr.bf16.mxu1 %v13849_v41  ;;  %v13906_v21 = vld [vmem:[#allocation6 + $0x664] ss:$16 sps:$4 sm:$0xff]   ;;  %v13904_v23 = vld [vmem:[#allocation6 + $0x660] ss:$16 sps:$4 sm:$0xff]  }
  0xa7   :  { %v13909_v24 = vld [vmem:[#allocation6 + $0x484] ss:$16 sps:$4 sm:$0xff]   ;;  %v13907_v26 = vld [vmem:[#allocation6 + $0x480] ss:$16 sps:$4 sm:$0xff]  }
  0xa8   :  { %8883 = vmatpush1.bf16.msra.mxu0 %v13851_v42  ;;  %v13912_v25 = vld [vmem:[#allocation6 + $0x684] ss:$16 sps:$4 sm:$0xff]   ;;  %v13910_v27 = vld [vmem:[#allocation6 + $0x680] ss:$16 sps:$4 sm:$0xff]  }
  0xa9   :  { %8924 = vmatpush1.bf16.msra.mxu1 %v13852_v43  ;;  %8884 = vmatprep.subr.bf16.mxu0 %v13853_v44  ;;  %v13915_v28 = vld [vmem:[#allocation6 + $0x4a4] ss:$16 sps:$4 sm:$0xff]   ;;  %v13913_v30 = vld [vmem:[#allocation6 + $0x4a0] ss:$16 sps:$4 sm:$0xff]  }
  0xaa   :  { %8925 = vmatprep.subr.bf16.mxu1 %v13855_v45  ;;  %v13918_v29 = vld [vmem:[#allocation6 + $0x6a4] ss:$16 sps:$4 sm:$0xff]   ;;  %v13916_v31 = vld [vmem:[#allocation6 + $0x6a0] ss:$16 sps:$4 sm:$0xff]  }
  0xab   :  { %v13921_v32 = vld [vmem:[#allocation6 + $0x4c4] ss:$16 sps:$4 sm:$0xff]   ;;  %v13919_v35 = vld [vmem:[#allocation6 + $0x4c0] ss:$16 sps:$4 sm:$0xff]  }
  0xac   :  { %8885 = vmatpush1.bf16.msra.mxu0 %v13857_v47  ;;  %v13924_v33 = vld [vmem:[#allocation6 + $0x6c4] ss:$16 sps:$4 sm:$0xff]   ;;  %v13922_v36 = vld [vmem:[#allocation6 + $0x6c0] ss:$16 sps:$4 sm:$0xff]  }
  0xad   :  { %8926 = vmatpush1.bf16.msra.mxu1 %v13858_v48  ;;  %8886 = vmatprep.subr.bf16.mxu0 %v13859_v51  ;;  %v128_v34 = vld [vmem:[#allocation3 + $0x28] sm:$0xff]  ;;  %v130_v38 = vld [vmem:[#allocation3 + $0x38] sm:$0xff] }
  0xae   :  { %8927 = vmatprep.subr.bf16.mxu1 %v13861_v53  ;;  %v16504_v37 = vpack.c.bf16 %v128_v34, %v128_v34  ;;  %v13927_v39 = vld [vmem:[#allocation6 + $0x4e4] ss:$16 sps:$4 sm:$0xff]   ;;  %v16506_v40 = vpack.c.bf16 %v130_v38, %v130_v38  ;;  %v13925_v42 = vld [vmem:[#allocation6 + $0x4e0] ss:$16 sps:$4 sm:$0xff]  }
  0xaf   :  { %v13930_v41 = vld [vmem:[#allocation6 + $0x6e4] ss:$16 sps:$4 sm:$0xff]   ;;  %v13928_v43 = vld [vmem:[#allocation6 + $0x6e0] ss:$16 sps:$4 sm:$0xff]  }
  0xb0   :  { %8887 = vmatpush1.bf16.msra.mxu0 %v13863_v54  ;;  %v13933_v44 = vld [vmem:[#allocation6 + $0x504] ss:$16 sps:$4 sm:$0xff]   ;;  %v13931_v46 = vld [vmem:[#allocation6 + $0x500] ss:$16 sps:$4 sm:$0xff]  }
  0xb1   :  { %8928 = vmatpush1.bf16.msra.mxu1 %v13864_v55  ;;  %8888 = vmatprep.subr.bf16.mxu0 %v13865_v56  ;;  %v13936_v45 = vld [vmem:[#allocation6 + $0x704] ss:$16 sps:$4 sm:$0xff]   ;;  %v13934_v47 = vld [vmem:[#allocation6 + $0x700] ss:$16 sps:$4 sm:$0xff]  }
  0xb2   :  { %8929 = vmatprep.subr.bf16.mxu1 %v13867_v57  ;;  %v13939_v48 = vld [vmem:[#allocation6 + $0x524] ss:$16 sps:$4 sm:$0xff]   ;;  %v13937_v51 = vld [vmem:[#allocation6 + $0x520] ss:$16 sps:$4 sm:$0xff]  }
  0xb3   :  { %v13942_v50 = vld [vmem:[#allocation6 + $0x724] ss:$16 sps:$4 sm:$0xff]   ;;  %v13940_v53 = vld [vmem:[#allocation6 + $0x720] ss:$16 sps:$4 sm:$0xff]  }
  0xb4   :  { %8889 = vmatpush1.bf16.msra.mxu0 %v13869_v58  ;;  %v13945_v54 = vld [vmem:[#allocation6 + $0x544] ss:$16 sps:$4 sm:$0xff]   ;;  %v13943_v56 = vld [vmem:[#allocation6 + $0x540] ss:$16 sps:$4 sm:$0xff]  }
  0xb5   :  { %8930 = vmatpush1.bf16.msra.mxu1 %v13870_v59  ;;  %8890 = vmatprep.subr.bf16.mxu0 %v13871_v60  ;;  %v13948_v55 = vld [vmem:[#allocation6 + $0x744] ss:$16 sps:$4 sm:$0xff]   ;;  %v13946_v57 = vld [vmem:[#allocation6 + $0x740] ss:$16 sps:$4 sm:$0xff]  }
  0xb6   :  { %8931 = vmatprep.subr.bf16.mxu1 %v13873_v61  ;;  %v13951_v58 = vld [vmem:[#allocation6 + $0x564] ss:$16 sps:$4 sm:$0xff]   ;;  %v13949_v60 = vld [vmem:[#allocation6 + $0x560] ss:$16 sps:$4 sm:$0xff]  }
  0xb7   :  { %v13954_v59 = vld [vmem:[#allocation6 + $0x764] ss:$16 sps:$4 sm:$0xff]   ;;  %v13952_v61 = vld [vmem:[#allocation6 + $0x760] ss:$16 sps:$4 sm:$0xff]  }
  0xb8   :  { %8891 = vmatpush1.bf16.msra.mxu0 %v13875_v62  ;;  %v13957_v62 = vld [vmem:[#allocation6 + $0x584] ss:$16 sps:$4 sm:$0xff]   ;;  %v13961_v4 = vld [vmem:[#allocation6 + $0x5a0] ss:$16 sps:$4 sm:$0xff]  }
  0xb9   :  { %8932 = vmatpush1.bf16.msra.mxu1 %v13876_v63  ;;  %8892 = vmatprep.subr.bf16.mxu0 %v13877_v0  ;;  %v13960_v63 = vld [vmem:[#allocation6 + $0x784] ss:$16 sps:$4 sm:$0xff]   ;;  %v13955_v0 = vld [vmem:[#allocation6 + $0x580] ss:$16 sps:$4 sm:$0xff]  }
  0xba   :  { %8933 = vmatprep.subr.bf16.mxu1 %v13879_v1  ;;  %v13958_v1 = vld [vmem:[#allocation6 + $0x780] ss:$16 sps:$4 sm:$0xff]   ;;  %v14002_v38 = vld [vmem:[#allocation6 + $0xa64] ss:$16 sps:$4 sm:$0xff]  }
  0xbb   :  { %v13964_v5 = vld [vmem:[#allocation6 + $0x7a0] ss:$16 sps:$4 sm:$0xff]  }
  0xbc   :  { %8893 = vmatpush1.bf16.msra.mxu0 %v13881_v2  ;;  %v13963_v2 = vld [vmem:[#allocation6 + $0x5a4] ss:$16 sps:$4 sm:$0xff]   ;;  %v13991_v34 = vld [vmem:[#allocation6 + $0x840] ss:$16 sps:$4 sm:$0xff]  }
  0xbd   :  { %8934 = vmatpush1.bf16.msra.mxu1 %v13882_v3  ;;  %8944 = vmatprep.subr.bf16.mxu0 %v13885_v6  ;;  %v13966_v3 = vld [vmem:[#allocation6 + $0x7a4] ss:$16 sps:$4 sm:$0xff]  }
  0xbe   :  { %8985 = vmatprep.subr.bf16.mxu1 %v13888_v7  ;;  %v13969_v6 = vld [vmem:[#allocation6 + $0x5c4] ss:$16 sps:$4 sm:$0xff]  }
  0xbf   :  { %8895 = vmatmul.mubr.bf16.vlgmr.msra.gmra.mrb[0].mxu0 %v16498_v8  ;;  %v13972_v7 = vld [vmem:[#allocation6 + $0x7c4] ss:$16 sps:$4 sm:$0xff]  }
  0xc0   :  { %8936 = vmatmul.mubr.bf16.vlgmr.msra.gmra.mrb[0].mxu1 %v16500_v9  ;;  %8945 = vmatpush1.bf16.msra.mxu0 %v13883_v10  ;;  %v13967_v10 = vld [vmem:[#allocation6 + $0x5c0] ss:$16 sps:$4 sm:$0xff]  }
  0xc1   :  { %8986 = vmatpush1.bf16.msra.mxu1 %v13886_v11  ;;  %8946 = vmatprep.subr.bf16.mxu0 %v13891_v12  ;;  %v13970_v11 = vld [vmem:[#allocation6 + $0x7c0] ss:$16 sps:$4 sm:$0xff]   ;;  %v13975_v12 = vld [vmem:[#allocation6 + $0x5e4] ss:$16 sps:$4 sm:$0xff]  }
  0xc2   :  { %8987 = vmatprep.subr.bf16.mxu1 %v13894_v13  ;;  %8976 = vmatprep.mubr.bf16.mxu0 %v16504_v37  ;;  %v13978_v13 = vld [vmem:[#allocation6 + $0x7e4] ss:$16 sps:$4 sm:$0xff]  }
  0xc3   :  { %9017 = vmatprep.mubr.bf16.mxu1 %v16506_v40 }
  0xc4   :  { %8947 = vmatpush1.bf16.msra.mxu0 %v13889_v14  ;;  %v13973_v14 = vld [vmem:[#allocation6 + $0x5e0] ss:$16 sps:$4 sm:$0xff]  }
  0xc5   :  { %8988 = vmatpush1.bf16.msra.mxu1 %v13892_v15  ;;  %8948 = vmatprep.subr.bf16.mxu0 %v13897_v16  ;;  %v13976_v15 = vld [vmem:[#allocation6 + $0x7e0] ss:$16 sps:$4 sm:$0xff]   ;;  %v127_v16 = vld [vmem:[#allocation3 + $0x20] sm:$0xff] }
  0xc6   :  { %8989 = vmatprep.subr.bf16.mxu1 %v13900_v17  ;;  %v129_v17 = vld [vmem:[#allocation3 + $0x30] sm:$0xff] }
  0xc8   :  { %8949 = vmatpush1.bf16.msra.mxu0 %v13895_v18  ;;  %v13981_v18 = vld [vmem:[#allocation6 + $0x804] ss:$16 sps:$4 sm:$0xff]  }
  0xc9   :  { %8990 = vmatpush1.bf16.msra.mxu1 %v13898_v19  ;;  %8950 = vmatprep.subr.bf16.mxu0 %v13903_v20  ;;  %v13984_v19 = vld [vmem:[#allocation6 + $0xa04] ss:$16 sps:$4 sm:$0xff]   ;;  %v16510_v20 = vpack.c.bf16 %v127_v16, %v127_v16  ;;  %v14051_v16 = vld [vmem:[#allocation6 + $0x980] ss:$16 sps:$4 sm:$0xff]  }
  0xca   :  { %8991 = vmatprep.subr.bf16.mxu1 %v13906_v21  ;;  %v16512_v21 = vpack.c.bf16 %v129_v17, %v129_v17  ;;  %v14054_v17 = vld [vmem:[#allocation6 + $0xb80] ss:$16 sps:$4 sm:$0xff]  }
  0xcc   :  { %8951 = vmatpush1.bf16.msra.mxu0 %v13901_v22  ;;  %v13979_v22 = vld [vmem:[#allocation6 + $0x800] ss:$16 sps:$4 sm:$0xff]  }
  0xcd   :  { %8992 = vmatpush1.bf16.msra.mxu1 %v13904_v23  ;;  %8952 = vmatprep.subr.bf16.mxu0 %v13909_v24  ;;  %v13982_v23 = vld [vmem:[#allocation6 + $0xa00] ss:$16 sps:$4 sm:$0xff]   ;;  %v13987_v24 = vld [vmem:[#allocation6 + $0x824] ss:$16 sps:$4 sm:$0xff]  }
  0xce   :  { %8993 = vmatprep.subr.bf16.mxu1 %v13912_v25  ;;  %v13990_v25 = vld [vmem:[#allocation6 + $0xa24] ss:$16 sps:$4 sm:$0xff]  }
  0xd0   :  { %8953 = vmatpush1.bf16.msra.mxu0 %v13907_v26  ;;  %v132_v26 = vld [vmem:[#allocation3 + $0x48] sm:$0xff] }
  0xd1   :  { %8994 = vmatpush1.bf16.msra.mxu1 %v13910_v27  ;;  %8954 = vmatprep.subr.bf16.mxu0 %v13915_v28  ;;  %v13985_v27 = vld [vmem:[#allocation6 + $0x820] ss:$16 sps:$4 sm:$0xff]  }
  0xd2   :  { %8995 = vmatprep.subr.bf16.mxu1 %v13918_v29  ;;  %v13988_v28 = vld [vmem:[#allocation6 + $0xa20] ss:$16 sps:$4 sm:$0xff]   ;;  %v16516_v29 = vpack.c.bf16 %v132_v26, %v132_v26 }
  0xd3   :  { %v14063_v26 = vld [vmem:[#allocation6 + $0x9c0] ss:$16 sps:$4 sm:$0xff]  }
  0xd4   :  { %8955 = vmatpush1.bf16.msra.mxu0 %v13913_v30  ;;  %v134_v30 = vld [vmem:[#allocation3 + $0x58] sm:$0xff] }
  0xd5   :  { %8996 = vmatpush1.bf16.msra.mxu1 %v13916_v31  ;;  %8956 = vmatprep.subr.bf16.mxu0 %v13921_v32  ;;  %v13993_v31 = vld [vmem:[#allocation6 + $0x844] ss:$16 sps:$4 sm:$0xff]   ;;  %v16518_v32 = vpack.c.bf16 %v134_v30, %v134_v30 }
  0xd6   :  { %8997 = vmatprep.subr.bf16.mxu1 %v13924_v33  ;;  %v13996_v33 = vld [vmem:[#allocation6 + $0xa44] ss:$16 sps:$4 sm:$0xff]  }
  0xd7   :  { %v14074_v30 = vld [vmem:[#allocation6 + $0xbe4] ss:$16 sps:$4 sm:$0xff]  }
  0xd8   :  { %8957 = vmatpush1.bf16.msra.mxu0 %v13919_v35  ;;  %v13994_v35 = vld [vmem:[#allocation6 + $0xa40] ss:$16 sps:$4 sm:$0xff]  }
  0xd9   :  { %8998 = vmatpush1.bf16.msra.mxu1 %v13922_v36  ;;  %8958 = vmatprep.subr.bf16.mxu0 %v13927_v39  ;;  %v13999_v36 = vld [vmem:[#allocation6 + $0x864] ss:$16 sps:$4 sm:$0xff]   ;;  %v13997_v39 = vld [vmem:[#allocation6 + $0x860] ss:$16 sps:$4 sm:$0xff]  }
  0xda   :  { %8999 = vmatprep.subr.bf16.mxu1 %v13930_v41  ;;  %v14000_v41 = vld [vmem:[#allocation6 + $0xa60] ss:$16 sps:$4 sm:$0xff]  }
  0xdc   :  { %8959 = vmatpush1.bf16.msra.mxu0 %v13925_v42  ;;  %v14005_v42 = vld [vmem:[#allocation6 + $0x884] ss:$16 sps:$4 sm:$0xff]  }
  0xdd   :  { %9000 = vmatpush1.bf16.msra.mxu1 %v13928_v43  ;;  %8960 = vmatprep.subr.bf16.mxu0 %v13933_v44  ;;  %v14008_v43 = vld [vmem:[#allocation6 + $0xa84] ss:$16 sps:$4 sm:$0xff]   ;;  %v14003_v44 = vld [vmem:[#allocation6 + $0x880] ss:$16 sps:$4 sm:$0xff]  }
  0xde   :  { %9001 = vmatprep.subr.bf16.mxu1 %v13936_v45  ;;  %v14006_v45 = vld [vmem:[#allocation6 + $0xa80] ss:$16 sps:$4 sm:$0xff]  }
  0xe0   :  { %8961 = vmatpush1.bf16.msra.mxu0 %v13931_v46  ;;  %v14011_v46 = vld [vmem:[#allocation6 + $0x8a4] ss:$16 sps:$4 sm:$0xff]  }
  0xe1   :  { %9002 = vmatpush1.bf16.msra.mxu1 %v13934_v47  ;;  %8962 = vmatprep.subr.bf16.mxu0 %v13939_v48  ;;  %v14014_v47 = vld [vmem:[#allocation6 + $0xaa4] ss:$16 sps:$4 sm:$0xff]   ;;  %v14009_v48 = vld [vmem:[#allocation6 + $0x8a0] ss:$16 sps:$4 sm:$0xff]  }
  0xe2   :  { %9003 = vmatprep.subr.bf16.mxu1 %v13942_v50  ;;  %v14012_v50 = vld [vmem:[#allocation6 + $0xaa0] ss:$16 sps:$4 sm:$0xff]  }
  0xe4   :  { %8963 = vmatpush1.bf16.msra.mxu0 %v13937_v51  ;;  %v14017_v51 = vld [vmem:[#allocation6 + $0x8c4] ss:$16 sps:$4 sm:$0xff]  }
  0xe5   :  { %9004 = vmatpush1.bf16.msra.mxu1 %v13940_v53  ;;  %8964 = vmatprep.subr.bf16.mxu0 %v13945_v54  ;;  %v14020_v53 = vld [vmem:[#allocation6 + $0xac4] ss:$16 sps:$4 sm:$0xff]   ;;  %v14015_v54 = vld [vmem:[#allocation6 + $0x8c0] ss:$16 sps:$4 sm:$0xff]  }
  0xe6   :  { %9005 = vmatprep.subr.bf16.mxu1 %v13948_v55  ;;  %v14018_v55 = vld [vmem:[#allocation6 + $0xac0] ss:$16 sps:$4 sm:$0xff]  }
  0xe8   :  { %8965 = vmatpush1.bf16.msra.mxu0 %v13943_v56  ;;  %v14023_v56 = vld [vmem:[#allocation6 + $0x8e4] ss:$16 sps:$4 sm:$0xff]  }
  0xe9   :  { %9006 = vmatpush1.bf16.msra.mxu1 %v13946_v57  ;;  %8966 = vmatprep.subr.bf16.mxu0 %v13951_v58  ;;  %v14026_v57 = vld [vmem:[#allocation6 + $0xae4] ss:$16 sps:$4 sm:$0xff]   ;;  %v14021_v58 = vld [vmem:[#allocation6 + $0x8e0] ss:$16 sps:$4 sm:$0xff]  }
  0xea   :  { %9007 = vmatprep.subr.bf16.mxu1 %v13954_v59  ;;  %v14024_v59 = vld [vmem:[#allocation6 + $0xae0] ss:$16 sps:$4 sm:$0xff]  }
  0xec   :  { %8967 = vmatpush1.bf16.msra.mxu0 %v13949_v60  ;;  %v14029_v60 = vld [vmem:[#allocation6 + $0x904] ss:$16 sps:$4 sm:$0xff]  }
  0xed   :  { %9008 = vmatpush1.bf16.msra.mxu1 %v13952_v61  ;;  %8968 = vmatprep.subr.bf16.mxu0 %v13957_v62  ;;  %v14032_v61 = vld [vmem:[#allocation6 + $0xb04] ss:$16 sps:$4 sm:$0xff]   ;;  %v14027_v62 = vld [vmem:[#allocation6 + $0x900] ss:$16 sps:$4 sm:$0xff]  }
  0xee   :  { %9009 = vmatprep.subr.bf16.mxu1 %v13960_v63  ;;  %v14030_v63 = vld [vmem:[#allocation6 + $0xb00] ss:$16 sps:$4 sm:$0xff]  }
  0xf0   :  { %8969 = vmatpush1.bf16.msra.mxu0 %v13955_v0  ;;  %v14035_v0 = vld [vmem:[#allocation6 + $0x924] ss:$16 sps:$4 sm:$0xff]  }
  0xf1   :  { %9010 = vmatpush1.bf16.msra.mxu1 %v13958_v1  ;;  %8970 = vmatprep.subr.bf16.mxu0 %v13963_v2  ;;  %v14038_v1 = vld [vmem:[#allocation6 + $0xb24] ss:$16 sps:$4 sm:$0xff]   ;;  %v14033_v2 = vld [vmem:[#allocation6 + $0x920] ss:$16 sps:$4 sm:$0xff]  }
  0xf2   :  { %9011 = vmatprep.subr.bf16.mxu1 %v13966_v3  ;;  %v14036_v3 = vld [vmem:[#allocation6 + $0xb20] ss:$16 sps:$4 sm:$0xff]  }
  0xf4   :  { %8971 = vmatpush1.bf16.msra.mxu0 %v13961_v4  ;;  %v14041_v4 = vld [vmem:[#allocation6 + $0x944] ss:$16 sps:$4 sm:$0xff]  }
  0xf5   :  { %9012 = vmatpush1.bf16.msra.mxu1 %v13964_v5  ;;  %8972 = vmatprep.subr.bf16.mxu0 %v13969_v6  ;;  %v14044_v5 = vld [vmem:[#allocation6 + $0xb44] ss:$16 sps:$4 sm:$0xff]   ;;  %v14039_v6 = vld [vmem:[#allocation6 + $0x940] ss:$16 sps:$4 sm:$0xff]  }
  0xf6   :  { %9013 = vmatprep.subr.bf16.mxu1 %v13972_v7  ;;  %v14042_v7 = vld [vmem:[#allocation6 + $0xb40] ss:$16 sps:$4 sm:$0xff]  }
  0xf8   :  { %8973 = vmatpush1.bf16.msra.mxu0 %v13967_v10  ;;  %v14047_v10 = vld [vmem:[#allocation6 + $0x964] ss:$16 sps:$4 sm:$0xff]  }
  0xf9   :  { %9014 = vmatpush1.bf16.msra.mxu1 %v13970_v11  ;;  %8974 = vmatprep.subr.bf16.mxu0 %v13975_v12  ;;  %v14050_v11 = vld [vmem:[#allocation6 + $0xb64] ss:$16 sps:$4 sm:$0xff]   ;;  %v14045_v12 = vld [vmem:[#allocation6 + $0x960] ss:$16 sps:$4 sm:$0xff]  }
  0xfa   :  { %9015 = vmatprep.subr.bf16.mxu1 %v13978_v13  ;;  %v14048_v13 = vld [vmem:[#allocation6 + $0xb60] ss:$16 sps:$4 sm:$0xff]  }
  0xfc   :  { %8975 = vmatpush1.bf16.msra.mxu0 %v13973_v14  ;;  %v14053_v14 = vld [vmem:[#allocation6 + $0x984] ss:$16 sps:$4 sm:$0xff]  }
  0xfd   :  { %9016 = vmatpush1.bf16.msra.mxu1 %v13976_v15  ;;  %9026 = vmatprep.subr.bf16.mxu0 %v13981_v18  ;;  %v14056_v15 = vld [vmem:[#allocation6 + $0xb84] ss:$16 sps:$4 sm:$0xff]  }
  0xfe   :  { %9067 = vmatprep.subr.bf16.mxu1 %v13984_v19  ;;  %v14059_v18 = vld [vmem:[#allocation6 + $0x9a4] ss:$16 sps:$4 sm:$0xff]  }
  0xff   :  { %8977 = vmatmul.mubr.bf16.vlgmr.msra.gmra.mrb[4].mxu0 %v16510_v20  ;;  %v14062_v19 = vld [vmem:[#allocation6 + $0xba4] ss:$16 sps:$4 sm:$0xff]  }
 0x100   :  { %9018 = vmatmul.mubr.bf16.vlgmr.msra.gmra.mrb[4].mxu1 %v16512_v21  ;;  %9027 = vmatpush1.bf16.msra.mxu0 %v13979_v22  ;;  %v14057_v22 = vld [vmem:[#allocation6 + $0x9a0] ss:$16 sps:$4 sm:$0xff]  }
 0x101   :  { %9068 = vmatpush1.bf16.msra.mxu1 %v13982_v23  ;;  %9028 = vmatprep.subr.bf16.mxu0 %v13987_v24  ;;  %v14060_v23 = vld [vmem:[#allocation6 + $0xba0] ss:$16 sps:$4 sm:$0xff]   ;;  %v14065_v24 = vld [vmem:[#allocation6 + $0x9c4] ss:$16 sps:$4 sm:$0xff]  }
 0x102   :  { %9069 = vmatprep.subr.bf16.mxu1 %v13990_v25  ;;  %9058 = vmatprep.mubr.bf16.mxu0 %v16516_v29  ;;  %v14068_v25 = vld [vmem:[#allocation6 + $0xbc4] ss:$16 sps:$4 sm:$0xff]  }
 0x103   :  { %9099 = vmatprep.mubr.bf16.mxu1 %v16518_v32 }
 0x104   :  { %9029 = vmatpush1.bf16.msra.mxu0 %v13985_v27  ;;  %v14066_v27 = vld [vmem:[#allocation6 + $0xbc0] ss:$16 sps:$4 sm:$0xff]  }
 0x105   :  { %9070 = vmatpush1.bf16.msra.mxu1 %v13988_v28  ;;  %9030 = vmatprep.subr.bf16.mxu0 %v13993_v31  ;;  %v14071_v28 = vld [vmem:[#allocation6 + $0x9e4] ss:$16 sps:$4 sm:$0xff]   ;;  %v14069_v31 = vld [vmem:[#allocation6 + $0x9e0] ss:$16 sps:$4 sm:$0xff]  }
 0x106   :  { %9071 = vmatprep.subr.bf16.mxu1 %v13996_v33  ;;  %v14072_v33 = vld [vmem:[#allocation6 + $0xbe0] ss:$16 sps:$4 sm:$0xff]  }
 0x108   :  { %9031 = vmatpush1.bf16.msra.mxu0 %v13991_v34  ;;  %v131_v34 = vld [vmem:[#allocation3 + $0x40] sm:$0xff] }
 0x109   :  { %9072 = vmatpush1.bf16.msra.mxu1 %v13994_v35  ;;  %9032 = vmatprep.subr.bf16.mxu0 %v13999_v36  ;;  %v133_v35 = vld [vmem:[#allocation3 + $0x50] sm:$0xff]  ;;  %v14077_v36 = vld [vmem:[#allocation6 + $0xc04] ss:$16 sps:$4 sm:$0xff]  }
 0x10a   :  { %9073 = vmatprep.subr.bf16.mxu1 %v14002_v38  ;;  %v14080_v38 = vld [vmem:[#allocation6 + $0xe04] ss:$16 sps:$4 sm:$0xff]  }
 0x10c   :  { %9033 = vmatpush1.bf16.msra.mxu0 %v13997_v39  ;;  %v14075_v39 = vld [vmem:[#allocation6 + $0xc00] ss:$16 sps:$4 sm:$0xff]  }
 0x10d   :  { %9074 = vmatpush1.bf16.msra.mxu1 %v14000_v41  ;;  %9034 = vmatprep.subr.bf16.mxu0 %v14005_v42  ;;  %v14078_v41 = vld [vmem:[#allocation6 + $0xe00] ss:$16 sps:$4 sm:$0xff]   ;;  %v16522_v42 = vpack.c.bf16 %v131_v34, %v131_v34 }
 0x10e   :  { %9075 = vmatprep.subr.bf16.mxu1 %v14008_v43  ;;  %v16524_v43 = vpack.c.bf16 %v133_v35, %v133_v35  ;;  %v14141_v34 = vld [vmem:[#allocation6 + $0xd60] ss:$16 sps:$4 sm:$0xff]  }
 0x10f   :  { %v14144_v35 = vld [vmem:[#allocation6 + $0xf60] ss:$16 sps:$4 sm:$0xff]  }
 0x110   :  { %9035 = vmatpush1.bf16.msra.mxu0 %v14003_v44  ;;  %v136_v44 = vld [vmem:[#allocation3 + $0x68] sm:$0xff] }
 0x111   :  { %9076 = vmatpush1.bf16.msra.mxu1 %v14006_v45  ;;  %9036 = vmatprep.subr.bf16.mxu0 %v14011_v46  ;;  %v138_v45 = vld [vmem:[#allocation3 + $0x78] sm:$0xff] }
 0x112   :  { %9077 = vmatprep.subr.bf16.mxu1 %v14014_v47  ;;  %v14083_v46 = vld [vmem:[#allocation6 + $0xc24] ss:$16 sps:$4 sm:$0xff]  }
 0x113   :  { %v14086_v47 = vld [vmem:[#allocation6 + $0xe24] ss:$16 sps:$4 sm:$0xff]  }
 0x114   :  { %9037 = vmatpush1.bf16.msra.mxu0 %v14009_v48  ;;  %v16526_v48 = vpack.c.bf16 %v136_v44, %v136_v44  ;;  %v14155_v44 = vld [vmem:[#allocation6 + $0xda4] ss:$16 sps:$4 sm:$0xff]  }
 0x115   :  { %9078 = vmatpush1.bf16.msra.mxu1 %v14012_v50  ;;  %9038 = vmatprep.subr.bf16.mxu0 %v14017_v51  ;;  %v16528_v50 = vpack.c.bf16 %v138_v45, %v138_v45  ;;  %v14081_v51 = vld [vmem:[#allocation6 + $0xc20] ss:$16 sps:$4 sm:$0xff]   ;;  %v14158_v45 = vld [vmem:[#allocation6 + $0xfa4] ss:$16 sps:$4 sm:$0xff]  }
 0x116   :  { %9079 = vmatprep.subr.bf16.mxu1 %v14020_v53  ;;  %v14084_v53 = vld [vmem:[#allocation6 + $0xe20] ss:$16 sps:$4 sm:$0xff]  }
 0x118   :  { %9039 = vmatpush1.bf16.msra.mxu0 %v14015_v54  ;;  %v14089_v54 = vld [vmem:[#allocation6 + $0xc44] ss:$16 sps:$4 sm:$0xff]  }
 0x119   :  { %9080 = vmatpush1.bf16.msra.mxu1 %v14018_v55  ;;  %9040 = vmatprep.subr.bf16.mxu0 %v14023_v56  ;;  %v14092_v55 = vld [vmem:[#allocation6 + $0xe44] ss:$16 sps:$4 sm:$0xff]   ;;  %v14087_v56 = vld [vmem:[#allocation6 + $0xc40] ss:$16 sps:$4 sm:$0xff]  }
 0x11a   :  { %9081 = vmatprep.subr.bf16.mxu1 %v14026_v57  ;;  %v14090_v57 = vld [vmem:[#allocation6 + $0xe40] ss:$16 sps:$4 sm:$0xff]  }
 0x11c   :  { %9041 = vmatpush1.bf16.msra.mxu0 %v14021_v58  ;;  %v14095_v58 = vld [vmem:[#allocation6 + $0xc64] ss:$16 sps:$4 sm:$0xff]  }
 0x11d   :  { %9082 = vmatpush1.bf16.msra.mxu1 %v14024_v59  ;;  %9042 = vmatprep.subr.bf16.mxu0 %v14029_v60  ;;  %v14098_v59 = vld [vmem:[#allocation6 + $0xe64] ss:$16 sps:$4 sm:$0xff]   ;;  %v14093_v60 = vld [vmem:[#allocation6 + $0xc60] ss:$16 sps:$4 sm:$0xff]  }
 0x11e   :  { %9083 = vmatprep.subr.bf16.mxu1 %v14032_v61  ;;  %v14096_v61 = vld [vmem:[#allocation6 + $0xe60] ss:$16 sps:$4 sm:$0xff]  }
 0x120   :  { %9043 = vmatpush1.bf16.msra.mxu0 %v14027_v62  ;;  %v14101_v62 = vld [vmem:[#allocation6 + $0xc84] ss:$16 sps:$4 sm:$0xff]  }
 0x121   :  { %9084 = vmatpush1.bf16.msra.mxu1 %v14030_v63  ;;  %9044 = vmatprep.subr.bf16.mxu0 %v14035_v0  ;;  %v14104_v63 = vld [vmem:[#allocation6 + $0xe84] ss:$16 sps:$4 sm:$0xff]   ;;  %v14099_v0 = vld [vmem:[#allocation6 + $0xc80] ss:$16 sps:$4 sm:$0xff]  }
 0x122   :  { %9085 = vmatprep.subr.bf16.mxu1 %v14038_v1  ;;  %v14102_v1 = vld [vmem:[#allocation6 + $0xe80] ss:$16 sps:$4 sm:$0xff]  }
 0x124   :  { %9045 = vmatpush1.bf16.msra.mxu0 %v14033_v2  ;;  %v14107_v2 = vld [vmem:[#allocation6 + $0xca4] ss:$16 sps:$4 sm:$0xff]  }
 0x125   :  { %9086 = vmatpush1.bf16.msra.mxu1 %v14036_v3  ;;  %9046 = vmatprep.subr.bf16.mxu0 %v14041_v4  ;;  %v14110_v3 = vld [vmem:[#allocation6 + $0xea4] ss:$16 sps:$4 sm:$0xff]   ;;  %v14105_v4 = vld [vmem:[#allocation6 + $0xca0] ss:$16 sps:$4 sm:$0xff]  }
 0x126   :  { %9087 = vmatprep.subr.bf16.mxu1 %v14044_v5  ;;  %v14108_v5 = vld [vmem:[#allocation6 + $0xea0] ss:$16 sps:$4 sm:$0xff]  }
 0x128   :  { %9047 = vmatpush1.bf16.msra.mxu0 %v14039_v6  ;;  %v14113_v6 = vld [vmem:[#allocation6 + $0xcc4] ss:$16 sps:$4 sm:$0xff]  }
 0x129   :  { %9088 = vmatpush1.bf16.msra.mxu1 %v14042_v7  ;;  %9048 = vmatprep.subr.bf16.mxu0 %v14047_v10  ;;  %v14116_v7 = vld [vmem:[#allocation6 + $0xec4] ss:$16 sps:$4 sm:$0xff]   ;;  %v14111_v10 = vld [vmem:[#allocation6 + $0xcc0] ss:$16 sps:$4 sm:$0xff]  }
 0x12a   :  { %9089 = vmatprep.subr.bf16.mxu1 %v14050_v11  ;;  %v14114_v11 = vld [vmem:[#allocation6 + $0xec0] ss:$16 sps:$4 sm:$0xff]  }
 0x12c   :  { %9049 = vmatpush1.bf16.msra.mxu0 %v14045_v12  ;;  %v14119_v12 = vld [vmem:[#allocation6 + $0xce4] ss:$16 sps:$4 sm:$0xff]  }
 0x12d   :  { %9090 = vmatpush1.bf16.msra.mxu1 %v14048_v13  ;;  %9050 = vmatprep.subr.bf16.mxu0 %v14053_v14  ;;  %v14122_v13 = vld [vmem:[#allocation6 + $0xee4] ss:$16 sps:$4 sm:$0xff]   ;;  %v14117_v14 = vld [vmem:[#allocation6 + $0xce0] ss:$16 sps:$4 sm:$0xff]  }
 0x12e   :  { %9091 = vmatprep.subr.bf16.mxu1 %v14056_v15  ;;  %v14120_v15 = vld [vmem:[#allocation6 + $0xee0] ss:$16 sps:$4 sm:$0xff]  }
 0x130   :  { %9051 = vmatpush1.bf16.msra.mxu0 %v14051_v16  ;;  %v14125_v16 = vld [vmem:[#allocation6 + $0xd04] ss:$16 sps:$4 sm:$0xff]  }
 0x131   :  { %9092 = vmatpush1.bf16.msra.mxu1 %v14054_v17  ;;  %9052 = vmatprep.subr.bf16.mxu0 %v14059_v18  ;;  %v14128_v17 = vld [vmem:[#allocation6 + $0xf04] ss:$16 sps:$4 sm:$0xff]   ;;  %v14123_v18 = vld [vmem:[#allocation6 + $0xd00] ss:$16 sps:$4 sm:$0xff]  }
 0x132   :  { %9093 = vmatprep.subr.bf16.mxu1 %v14062_v19  ;;  %v14126_v19 = vld [vmem:[#allocation6 + $0xf00] ss:$16 sps:$4 sm:$0xff]  }
 0x134   :  { %9053 = vmatpush1.bf16.msra.mxu0 %v14057_v22  ;;  %v14131_v22 = vld [vmem:[#allocation6 + $0xd24] ss:$16 sps:$4 sm:$0xff]  }
 0x135   :  { %9094 = vmatpush1.bf16.msra.mxu1 %v14060_v23  ;;  %9054 = vmatprep.subr.bf16.mxu0 %v14065_v24  ;;  %v14134_v23 = vld [vmem:[#allocation6 + $0xf24] ss:$16 sps:$4 sm:$0xff]   ;;  %v14129_v24 = vld [vmem:[#allocation6 + $0xd20] ss:$16 sps:$4 sm:$0xff]  }
 0x136   :  { %9095 = vmatprep.subr.bf16.mxu1 %v14068_v25  ;;  %v14132_v25 = vld [vmem:[#allocation6 + $0xf20] ss:$16 sps:$4 sm:$0xff]  }
 0x138   :  { %9055 = vmatpush1.bf16.msra.mxu0 %v14063_v26  ;;  %v14137_v26 = vld [vmem:[#allocation6 + $0xd44] ss:$16 sps:$4 sm:$0xff]  }
 0x139   :  { %9096 = vmatpush1.bf16.msra.mxu1 %v14066_v27  ;;  %9056 = vmatprep.subr.bf16.mxu0 %v14071_v28  ;;  %v14140_v27 = vld [vmem:[#allocation6 + $0xf44] ss:$16 sps:$4 sm:$0xff]   ;;  %v14135_v28 = vld [vmem:[#allocation6 + $0xd40] ss:$16 sps:$4 sm:$0xff]  }
 0x13a   :  { %9097 = vmatprep.subr.bf16.mxu1 %v14074_v30  ;;  %v14138_v30 = vld [vmem:[#allocation6 + $0xf40] ss:$16 sps:$4 sm:$0xff]  }
 0x13c   :  { %9057 = vmatpush1.bf16.msra.mxu0 %v14069_v31  ;;  %v14143_v31 = vld [vmem:[#allocation6 + $0xd64] ss:$16 sps:$4 sm:$0xff]  }
 0x13d   :  { %9098 = vmatpush1.bf16.msra.mxu1 %v14072_v33  ;;  %9108 = vmatprep.subr.bf16.mxu0 %v14077_v36  ;;  %v14146_v33 = vld [vmem:[#allocation6 + $0xf64] ss:$16 sps:$4 sm:$0xff]  }
 0x13e   :  { %9149 = vmatprep.subr.bf16.mxu1 %v14080_v38  ;;  %v14149_v36 = vld [vmem:[#allocation6 + $0xd84] ss:$16 sps:$4 sm:$0xff]  }
 0x13f   :  { %9059 = vmatmul.mubr.bf16.vlgmr.msra.gmra.mrb[8].mxu0 %v16522_v42  ;;  %v14152_v38 = vld [vmem:[#allocation6 + $0xf84] ss:$16 sps:$4 sm:$0xff]  }
 0x140   :  { %9100 = vmatmul.mubr.bf16.vlgmr.msra.gmra.mrb[8].mxu1 %v16524_v43  ;;  %9109 = vmatpush1.bf16.msra.mxu0 %v14075_v39  ;;  %v14147_v39 = vld [vmem:[#allocation6 + $0xd80] ss:$16 sps:$4 sm:$0xff]  }
 0x141   :  { %9150 = vmatpush1.bf16.msra.mxu1 %v14078_v41  ;;  %9110 = vmatprep.subr.bf16.mxu0 %v14083_v46  ;;  %v14150_v41 = vld [vmem:[#allocation6 + $0xf80] ss:$16 sps:$4 sm:$0xff]  }
 0x142   :  { %9151 = vmatprep.subr.bf16.mxu1 %v14086_v47  ;;  %9140 = vmatprep.mubr.bf16.mxu0 %v16526_v48  ;;  %v14153_v46 = vld [vmem:[#allocation6 + $0xda0] ss:$16 sps:$4 sm:$0xff]  }
 0x143   :  { %9181 = vmatprep.mubr.bf16.mxu1 %v16528_v50  ;;  %v14156_v47 = vld [vmem:[#allocation6 + $0xfa0] ss:$16 sps:$4 sm:$0xff]  }
 0x144   :  { %9111 = vmatpush1.bf16.msra.mxu0 %v14081_v51  ;;  %v14161_v51 = vld [vmem:[#allocation6 + $0xdc4] ss:$16 sps:$4 sm:$0xff]  }
 0x145   :  { %9152 = vmatpush1.bf16.msra.mxu1 %v14084_v53  ;;  %9112 = vmatprep.subr.bf16.mxu0 %v14089_v54  ;;  %v14164_v53 = vld [vmem:[#allocation6 + $0xfc4] ss:$16 sps:$4 sm:$0xff]   ;;  %v14159_v54 = vld [vmem:[#allocation6 + $0xdc0] ss:$16 sps:$4 sm:$0xff]  }
 0x146   :  { %9153 = vmatprep.subr.bf16.mxu1 %v14092_v55  ;;  %v14162_v55 = vld [vmem:[#allocation6 + $0xfc0] ss:$16 sps:$4 sm:$0xff]  }
 0x148   :  { %9113 = vmatpush1.bf16.msra.mxu0 %v14087_v56  ;;  %v14167_v56 = vld [vmem:[#allocation6 + $0xde4] ss:$16 sps:$4 sm:$0xff]  }
 0x149   :  { %9154 = vmatpush1.bf16.msra.mxu1 %v14090_v57  ;;  %9114 = vmatprep.subr.bf16.mxu0 %v14095_v58  ;;  %v14170_v57 = vld [vmem:[#allocation6 + $0xfe4] ss:$16 sps:$4 sm:$0xff]   ;;  %v14165_v58 = vld [vmem:[#allocation6 + $0xde0] ss:$16 sps:$4 sm:$0xff]  }
 0x14a   :  { %9155 = vmatprep.subr.bf16.mxu1 %v14098_v59  ;;  %v14168_v59 = vld [vmem:[#allocation6 + $0xfe0] ss:$16 sps:$4 sm:$0xff]  }
 0x14c   :  { %9115 = vmatpush1.bf16.msra.mxu0 %v14093_v60  ;;  %v135_v60 = vld [vmem:[#allocation3 + $0x60] sm:$0xff] }
 0x14d   :  { %9156 = vmatpush1.bf16.msra.mxu1 %v14096_v61  ;;  %9116 = vmatprep.subr.bf16.mxu0 %v14101_v62  ;;  %v137_v61 = vld [vmem:[#allocation3 + $0x70] sm:$0xff]  ;;  %v14173_v62 = vld [vmem:[#allocation6 + $0x1004] ss:$16 sps:$4 sm:$0xff]  }
 0x14e   :  { %9157 = vmatprep.subr.bf16.mxu1 %v14104_v63  ;;  %v14176_v63 = vld [vmem:[#allocation6 + $0x1204] ss:$16 sps:$4 sm:$0xff]  }
 0x150   :  { %9117 = vmatpush1.bf16.msra.mxu0 %v14099_v0  ;;  %v14171_v0 = vld [vmem:[#allocation6 + $0x1000] ss:$16 sps:$4 sm:$0xff]  }
 0x151   :  { %9158 = vmatpush1.bf16.msra.mxu1 %v14102_v1  ;;  %9118 = vmatprep.subr.bf16.mxu0 %v14107_v2  ;;  %v14174_v1 = vld [vmem:[#allocation6 + $0x1200] ss:$16 sps:$4 sm:$0xff]   ;;  %v16534_v2 = vpack.c.bf16 %v135_v60, %v135_v60  ;;  %v14221_v60 = vld [vmem:[#allocation6 + $0x1104] ss:$16 sps:$4 sm:$0xff]  }
 0x152   :  { %9159 = vmatprep.subr.bf16.mxu1 %v14110_v3  ;;  %v16536_v3 = vpack.c.bf16 %v137_v61, %v137_v61  ;;  %v14224_v61 = vld [vmem:[#allocation6 + $0x1304] ss:$16 sps:$4 sm:$0xff]  }
 0x154   :  { %9119 = vmatpush1.bf16.msra.mxu0 %v14105_v4  ;;  %v140_v4 = vld [vmem:[#allocation3 + $0x88] sm:$0xff] }
 0x155   :  { %9160 = vmatpush1.bf16.msra.mxu1 %v14108_v5  ;;  %9120 = vmatprep.subr.bf16.mxu0 %v14113_v6  ;;  %v142_v5 = vld [vmem:[#allocation3 + $0x98] sm:$0xff] }
 0x156   :  { %9161 = vmatprep.subr.bf16.mxu1 %v14116_v7  ;;  %v14179_v6 = vld [vmem:[#allocation6 + $0x1024] ss:$16 sps:$4 sm:$0xff]  }
 0x157   :  { %v14182_v7 = vld [vmem:[#allocation6 + $0x1224] ss:$16 sps:$4 sm:$0xff]  }
 0x158   :  { %9121 = vmatpush1.bf16.msra.mxu0 %v14111_v10  ;;  %v16538_v10 = vpack.c.bf16 %v140_v4, %v140_v4  ;;  %v14225_v4 = vld [vmem:[#allocation6 + $0x1120] ss:$16 sps:$4 sm:$0xff]  }
 0x159   :  { %9162 = vmatpush1.bf16.msra.mxu1 %v14114_v11  ;;  %9122 = vmatprep.subr.bf16.mxu0 %v14119_v12  ;;  %v16540_v11 = vpack.c.bf16 %v142_v5, %v142_v5  ;;  %v14177_v12 = vld [vmem:[#allocation6 + $0x1020] ss:$16 sps:$4 sm:$0xff]  }
 0x15a   :  { %9163 = vmatprep.subr.bf16.mxu1 %v14122_v13  ;;  %v14180_v13 = vld [vmem:[#allocation6 + $0x1220] ss:$16 sps:$4 sm:$0xff]  }
 0x15b   :  { %v14228_v5 = vld [vmem:[#allocation6 + $0x1320] ss:$16 sps:$4 sm:$0xff]  }
 0x15c   :  { %9123 = vmatpush1.bf16.msra.mxu0 %v14117_v14  ;;  %v14185_v14 = vld [vmem:[#allocation6 + $0x1044] ss:$16 sps:$4 sm:$0xff]  }
 0x15d   :  { %9164 = vmatpush1.bf16.msra.mxu1 %v14120_v15  ;;  %9124 = vmatprep.subr.bf16.mxu0 %v14125_v16  ;;  %v14188_v15 = vld [vmem:[#allocation6 + $0x1244] ss:$16 sps:$4 sm:$0xff]   ;;  %v14183_v16 = vld [vmem:[#allocation6 + $0x1040] ss:$16 sps:$4 sm:$0xff]  }
 0x15e   :  { %9165 = vmatprep.subr.bf16.mxu1 %v14128_v17  ;;  %v14186_v17 = vld [vmem:[#allocation6 + $0x1240] ss:$16 sps:$4 sm:$0xff]  }
 0x160   :  { %9125 = vmatpush1.bf16.msra.mxu0 %v14123_v18  ;;  %v14191_v18 = vld [vmem:[#allocation6 + $0x1064] ss:$16 sps:$4 sm:$0xff]  }
 0x161   :  { %9166 = vmatpush1.bf16.msra.mxu1 %v14126_v19  ;;  %9126 = vmatprep.subr.bf16.mxu0 %v14131_v22  ;;  %v14194_v19 = vld [vmem:[#allocation6 + $0x1264] ss:$16 sps:$4 sm:$0xff]   ;;  %v14189_v22 = vld [vmem:[#allocation6 + $0x1060] ss:$16 sps:$4 sm:$0xff]  }
 0x162   :  { %9167 = vmatprep.subr.bf16.mxu1 %v14134_v23  ;;  %v14192_v23 = vld [vmem:[#allocation6 + $0x1260] ss:$16 sps:$4 sm:$0xff]  }
 0x164   :  { %9127 = vmatpush1.bf16.msra.mxu0 %v14129_v24  ;;  %v14197_v24 = vld [vmem:[#allocation6 + $0x1084] ss:$16 sps:$4 sm:$0xff]  }
 0x165   :  { %9168 = vmatpush1.bf16.msra.mxu1 %v14132_v25  ;;  %9128 = vmatprep.subr.bf16.mxu0 %v14137_v26  ;;  %v14200_v25 = vld [vmem:[#allocation6 + $0x1284] ss:$16 sps:$4 sm:$0xff]   ;;  %v14195_v26 = vld [vmem:[#allocation6 + $0x1080] ss:$16 sps:$4 sm:$0xff]  }
 0x166   :  { %9169 = vmatprep.subr.bf16.mxu1 %v14140_v27  ;;  %v14198_v27 = vld [vmem:[#allocation6 + $0x1280] ss:$16 sps:$4 sm:$0xff]  }
 0x168   :  { %9129 = vmatpush1.bf16.msra.mxu0 %v14135_v28  ;;  %v14203_v28 = vld [vmem:[#allocation6 + $0x10a4] ss:$16 sps:$4 sm:$0xff]  }
 0x169   :  { %9170 = vmatpush1.bf16.msra.mxu1 %v14138_v30  ;;  %9130 = vmatprep.subr.bf16.mxu0 %v14143_v31  ;;  %v14206_v30 = vld [vmem:[#allocation6 + $0x12a4] ss:$16 sps:$4 sm:$0xff]   ;;  %v14201_v31 = vld [vmem:[#allocation6 + $0x10a0] ss:$16 sps:$4 sm:$0xff]  }
 0x16a   :  { %9171 = vmatprep.subr.bf16.mxu1 %v14146_v33  ;;  %v14204_v33 = vld [vmem:[#allocation6 + $0x12a0] ss:$16 sps:$4 sm:$0xff]  }
 0x16c   :  { %9131 = vmatpush1.bf16.msra.mxu0 %v14141_v34  ;;  %v14209_v34 = vld [vmem:[#allocation6 + $0x10c4] ss:$16 sps:$4 sm:$0xff]  }
 0x16d   :  { %9172 = vmatpush1.bf16.msra.mxu1 %v14144_v35  ;;  %9132 = vmatprep.subr.bf16.mxu0 %v14149_v36  ;;  %v14212_v35 = vld [vmem:[#allocation6 + $0x12c4] ss:$16 sps:$4 sm:$0xff]  }
 0x16e   :  { %9173 = vmatprep.subr.bf16.mxu1 %v14152_v38 }
 0x170   :  { %9133 = vmatpush1.bf16.msra.mxu0 %v14147_v39  ;;  %v14207_v39 = vld [vmem:[#allocation6 + $0x10c0] ss:$16 sps:$4 sm:$0xff]  }
 0x171   :  { %9174 = vmatpush1.bf16.msra.mxu1 %v14150_v41  ;;  %9134 = vmatprep.subr.bf16.mxu0 %v14155_v44 }
 0x172   :  { %9175 = vmatprep.subr.bf16.mxu1 %v14158_v45 }
 0x174   :  { %9135 = vmatpush1.bf16.msra.mxu0 %v14153_v46  ;;  %v14210_v46 = vld [vmem:[#allocation6 + $0x12c0] ss:$16 sps:$4 sm:$0xff]  }
 0x175   :  { %9176 = vmatpush1.bf16.msra.mxu1 %v14156_v47  ;;  %9136 = vmatprep.subr.bf16.mxu0 %v14161_v51 }
 0x176   :  { %9177 = vmatprep.subr.bf16.mxu1 %v14164_v53 }
 0x178   :  { %9137 = vmatpush1.bf16.msra.mxu0 %v14159_v54  ;;  %v14215_v54 = vld [vmem:[#allocation6 + $0x10e4] ss:$16 sps:$4 sm:$0xff]  }
 0x179   :  { %9178 = vmatpush1.bf16.msra.mxu1 %v14162_v55  ;;  %9138 = vmatprep.subr.bf16.mxu0 %v14167_v56 }
 0x17a   :  { %9179 = vmatprep.subr.bf16.mxu1 %v14170_v57  ;;  %v14218_v57 = vld [vmem:[#allocation6 + $0x12e4] ss:$16 sps:$4 sm:$0xff]  }
 0x17c   :  { %9139 = vmatpush1.bf16.msra.mxu0 %v14165_v58  ;;  %v14213_v58 = vld [vmem:[#allocation6 + $0x10e0] ss:$16 sps:$4 sm:$0xff]  }
 0x17d   :  { %9180 = vmatpush1.bf16.msra.mxu1 %v14168_v59  ;;  %9190 = vmatprep.subr.bf16.mxu0 %v14173_v62  ;;  %v14216_v59 = vld [vmem:[#allocation6 + $0x12e0] ss:$16 sps:$4 sm:$0xff]  }
 0x17e   :  { %9231 = vmatprep.subr.bf16.mxu1 %v14176_v63  ;;  %v14219_v62 = vld [vmem:[#allocation6 + $0x1100] ss:$16 sps:$4 sm:$0xff]  }
 0x17f   :  { %9141 = vmatmul.mubr.bf16.vlgmr.msra.gmra.mrb[12].mxu0 %v16534_v2  ;;  %v14222_v63 = vld [vmem:[#allocation6 + $0x1300] ss:$16 sps:$4 sm:$0xff]  }
 0x180   :  { %9182 = vmatmul.mubr.bf16.vlgmr.msra.gmra.mrb[12].mxu1 %v16536_v3  ;;  %9191 = vmatpush1.bf16.msra.mxu0 %v14171_v0  ;;  %v14227_v0 = vld [vmem:[#allocation6 + $0x1124] ss:$16 sps:$4 sm:$0xff]  }
 0x181   :  { %9232 = vmatpush1.bf16.msra.mxu1 %v14174_v1  ;;  %9192 = vmatprep.subr.bf16.mxu0 %v14179_v6  ;;  %v14230_v1 = vld [vmem:[#allocation6 + $0x1324] ss:$16 sps:$4 sm:$0xff]  }
 0x182   :  { %9233 = vmatprep.subr.bf16.mxu1 %v14182_v7  ;;  %9222 = vmatprep.mubr.bf16.mxu0 %v16538_v10  ;;  %v14233_v6 = vld [vmem:[#allocation6 + $0x1144] ss:$16 sps:$4 sm:$0xff]  }
 0x183   :  { %9263 = vmatprep.mubr.bf16.mxu1 %v16540_v11  ;;  %v14236_v7 = vld [vmem:[#allocation6 + $0x1344] ss:$16 sps:$4 sm:$0xff]  }
 0x184   :  { %9193 = vmatpush1.bf16.msra.mxu0 %v14177_v12  ;;  %v14231_v12 = vld [vmem:[#allocation6 + $0x1140] ss:$16 sps:$4 sm:$0xff]  }
 0x185   :  { %9234 = vmatpush1.bf16.msra.mxu1 %v14180_v13  ;;  %9194 = vmatprep.subr.bf16.mxu0 %v14185_v14  ;;  %v14234_v13 = vld [vmem:[#allocation6 + $0x1340] ss:$16 sps:$4 sm:$0xff]   ;;  %v14239_v14 = vld [vmem:[#allocation6 + $0x1164] ss:$16 sps:$4 sm:$0xff]  }
 0x186   :  { %9235 = vmatprep.subr.bf16.mxu1 %v14188_v15  ;;  %v14242_v15 = vld [vmem:[#allocation6 + $0x1364] ss:$16 sps:$4 sm:$0xff]  }
 0x188   :  { %9195 = vmatpush1.bf16.msra.mxu0 %v14183_v16  ;;  %v14237_v16 = vld [vmem:[#allocation6 + $0x1160] ss:$16 sps:$4 sm:$0xff]  }
 0x189   :  { %9236 = vmatpush1.bf16.msra.mxu1 %v14186_v17  ;;  %9196 = vmatprep.subr.bf16.mxu0 %v14191_v18  ;;  %v14240_v17 = vld [vmem:[#allocation6 + $0x1360] ss:$16 sps:$4 sm:$0xff]   ;;  %v14245_v18 = vld [vmem:[#allocation6 + $0x1184] ss:$16 sps:$4 sm:$0xff]  }
 0x18a   :  { %9237 = vmatprep.subr.bf16.mxu1 %v14194_v19  ;;  %v14248_v19 = vld [vmem:[#allocation6 + $0x1384] ss:$16 sps:$4 sm:$0xff]  }
 0x18c   :  { %9197 = vmatpush1.bf16.msra.mxu0 %v14189_v22  ;;  %v14243_v22 = vld [vmem:[#allocation6 + $0x1180] ss:$16 sps:$4 sm:$0xff]  }
 0x18d   :  { %9238 = vmatpush1.bf16.msra.mxu1 %v14192_v23  ;;  %9198 = vmatprep.subr.bf16.mxu0 %v14197_v24  ;;  %v14246_v23 = vld [vmem:[#allocation6 + $0x1380] ss:$16 sps:$4 sm:$0xff]   ;;  %v14251_v24 = vld [vmem:[#allocation6 + $0x11a4] ss:$16 sps:$4 sm:$0xff]  }
 0x18e   :  { %9239 = vmatprep.subr.bf16.mxu1 %v14200_v25  ;;  %v14254_v25 = vld [vmem:[#allocation6 + $0x13a4] ss:$16 sps:$4 sm:$0xff]  }
 0x190   :  { %9199 = vmatpush1.bf16.msra.mxu0 %v14195_v26  ;;  %v14249_v26 = vld [vmem:[#allocation6 + $0x11a0] ss:$16 sps:$4 sm:$0xff]  }
 0x191   :  { %9240 = vmatpush1.bf16.msra.mxu1 %v14198_v27  ;;  %9200 = vmatprep.subr.bf16.mxu0 %v14203_v28  ;;  %v14252_v27 = vld [vmem:[#allocation6 + $0x13a0] ss:$16 sps:$4 sm:$0xff]   ;;  %v14257_v28 = vld [vmem:[#allocation6 + $0x11c4] ss:$16 sps:$4 sm:$0xff]  }
 0x192   :  { %9241 = vmatprep.subr.bf16.mxu1 %v14206_v30  ;;  %v8896_v36 = vpop.f32.mrb[0].mxu0  ;;  %v14260_v30 = vld [vmem:[#allocation6 + $0x13c4] ss:$16 sps:$4 sm:$0xff]  }
 0x193   :  { %v8937_v38 = vpop.f32.mrb[0].mxu1  ;;  %v8898_v44 = vpop.f32.mrb[1].mxu0 }
 0x194   :  { %v16546_v41 = vadd.f32 %v8937_v38, %v8896_v36  ;;  %v8939_v45 = vpop.f32.mrb[1].mxu1  ;;  %v8900_v51 = vpop.f32.mrb[2].mxu0  ;;  %9201 = vmatpush1.bf16.msra.mxu0 %v14201_v31  ;;  %v14255_v31 = vld [vmem:[#allocation6 + $0x11c0] ss:$16 sps:$4 sm:$0xff]  }
 0x195   :  { %v16548_v47 = vadd.f32 %v8939_v45, %v8898_v44  ;;  %v8941_v53 = vpop.f32.mrb[2].mxu1  ;;  %9242 = vmatpush1.bf16.msra.mxu1 %v14204_v33  ;;  %v8901_v55 = vpop.f32.mrb[3].mxu0  ;;  %9202 = vmatprep.subr.bf16.mxu0 %v14209_v34  ;;  %v14258_v33 = vld [vmem:[#allocation6 + $0x13c0] ss:$16 sps:$4 sm:$0xff]   ;;  %v14263_v34 = vld [vmem:[#allocation6 + $0x11e4] ss:$16 sps:$4 sm:$0xff]  }
 0x196   :  { %v8942_v56 = vpop.f32.mrb[3].mxu1  ;;  %9243 = vmatprep.subr.bf16.mxu1 %v14212_v35  ;;  %v14266_v35 = vld [vmem:[#allocation6 + $0x13e4] ss:$16 sps:$4 sm:$0xff]   ;;  %v14261_v36 = vld [vmem:[#allocation6 + $0x11e0] ss:$16 sps:$4 sm:$0xff]   ;;  %v141_v44 = vld [vmem:[#allocation3 + $0x90] sm:$0xff] }
 0x197   :  { %v14264_v38 = vld [vmem:[#allocation6 + $0x13e0] ss:$16 sps:$4 sm:$0xff]   ;;  %v14269_v45 = vld [vmem:[#allocation6 + $0x1404] ss:$16 sps:$4 sm:$0xff]   ;;  %v16552_v53 = vpack.c.bf16 %v141_v44, %v141_v44 }
 0x198   :  { %9203 = vmatpush1.bf16.msra.mxu0 %v14207_v39  ;;  %v139_v39 = vld [vmem:[#allocation3 + $0x80] sm:$0xff]  ;;  %v146_v55 = vld [vmem:[#allocation3 + $0xb8] sm:$0xff] }
 0x199   :  { %9244 = vmatpush1.bf16.msra.mxu1 %v14210_v46  ;;  %9204 = vmatprep.subr.bf16.mxu0 %v14215_v54  ;;  %v14272_v46 = vld [vmem:[#allocation6 + $0x1604] ss:$16 sps:$4 sm:$0xff]   ;;  %v16550_v51 = vpack.c.bf16 %v139_v39, %v139_v39  ;;  %v14267_v56 = vld [vmem:[#allocation6 + $0x1400] ss:$16 sps:$4 sm:$0xff]  }
 0x19a   :  { %9245 = vmatprep.subr.bf16.mxu1 %v14218_v57  ;;  %v144_v54 = vld [vmem:[#allocation3 + $0xa8] sm:$0xff] }
 0x19b   :  { %v14270_v57 = vld [vmem:[#allocation6 + $0x1600] ss:$16 sps:$4 sm:$0xff]  }
 0x19c   :  { %9205 = vmatpush1.bf16.msra.mxu0 %v14213_v58  ;;  %v14275_v58 = vld [vmem:[#allocation6 + $0x1424] ss:$16 sps:$4 sm:$0xff]  }
 0x19d   :  { %9246 = vmatpush1.bf16.msra.mxu1 %v14216_v59  ;;  %9206 = vmatprep.subr.bf16.mxu0 %v14221_v60  ;;  %v14278_v59 = vld [vmem:[#allocation6 + $0x1624] ss:$16 sps:$4 sm:$0xff]   ;;  %v16554_v60 = vpack.c.bf16 %v144_v54, %v144_v54 }
 0x19e   :  { %9247 = vmatprep.subr.bf16.mxu1 %v14224_v61  ;;  %v16556_v61 = vpack.c.bf16 %v146_v55, %v146_v55  ;;  %v14314_v54 = vld [vmem:[#allocation6 + $0x16e4] ss:$16 sps:$4 sm:$0xff]  }
 0x1a0   :  { %9207 = vmatpush1.bf16.msra.mxu0 %v14219_v62  ;;  %v14273_v62 = vld [vmem:[#allocation6 + $0x1420] ss:$16 sps:$4 sm:$0xff]  }
 0x1a1   :  { %9248 = vmatpush1.bf16.msra.mxu1 %v14222_v63  ;;  %9208 = vmatprep.subr.bf16.mxu0 %v14227_v0  ;;  %v14276_v63 = vld [vmem:[#allocation6 + $0x1620] ss:$16 sps:$4 sm:$0xff]   ;;  %v14281_v0 = vld [vmem:[#allocation6 + $0x1444] ss:$16 sps:$4 sm:$0xff]  }
 0x1a2   :  { %9249 = vmatprep.subr.bf16.mxu1 %v14230_v1  ;;  %v14284_v1 = vld [vmem:[#allocation6 + $0x1644] ss:$16 sps:$4 sm:$0xff]  }
 0x1a4   :  { %9209 = vmatpush1.bf16.msra.mxu0 %v14225_v4  ;;  %v14279_v4 = vld [vmem:[#allocation6 + $0x1440] ss:$16 sps:$4 sm:$0xff]  }
 0x1a5   :  { %9250 = vmatpush1.bf16.msra.mxu1 %v14228_v5  ;;  %9210 = vmatprep.subr.bf16.mxu0 %v14233_v6  ;;  %v14282_v5 = vld [vmem:[#allocation6 + $0x1640] ss:$16 sps:$4 sm:$0xff]   ;;  %v14287_v6 = vld [vmem:[#allocation6 + $0x1464] ss:$16 sps:$4 sm:$0xff]  }
 0x1a6   :  { %9251 = vmatprep.subr.bf16.mxu1 %v14236_v7  ;;  %v14290_v7 = vld [vmem:[#allocation6 + $0x1664] ss:$16 sps:$4 sm:$0xff]  }
 0x1a8   :  { %9211 = vmatpush1.bf16.msra.mxu0 %v14231_v12  ;;  %v14285_v12 = vld [vmem:[#allocation6 + $0x1460] ss:$16 sps:$4 sm:$0xff]  }
 0x1a9   :  { %9252 = vmatpush1.bf16.msra.mxu1 %v14234_v13  ;;  %9212 = vmatprep.subr.bf16.mxu0 %v14239_v14  ;;  %v14288_v13 = vld [vmem:[#allocation6 + $0x1660] ss:$16 sps:$4 sm:$0xff]   ;;  %v14293_v14 = vld [vmem:[#allocation6 + $0x1484] ss:$16 sps:$4 sm:$0xff]  }
 0x1aa   :  { %9253 = vmatprep.subr.bf16.mxu1 %v14242_v15  ;;  %v14296_v15 = vld [vmem:[#allocation6 + $0x1684] ss:$16 sps:$4 sm:$0xff]  }
 0x1ac   :  { %9213 = vmatpush1.bf16.msra.mxu0 %v14237_v16  ;;  %v14291_v16 = vld [vmem:[#allocation6 + $0x1480] ss:$16 sps:$4 sm:$0xff]  }
 0x1ad   :  { %9254 = vmatpush1.bf16.msra.mxu1 %v14240_v17  ;;  %9214 = vmatprep.subr.bf16.mxu0 %v14245_v18  ;;  %v14294_v17 = vld [vmem:[#allocation6 + $0x1680] ss:$16 sps:$4 sm:$0xff]   ;;  %v14299_v18 = vld [vmem:[#allocation6 + $0x14a4] ss:$16 sps:$4 sm:$0xff]  }
 0x1ae   :  { %9255 = vmatprep.subr.bf16.mxu1 %v14248_v19  ;;  %v14302_v19 = vld [vmem:[#allocation6 + $0x16a4] ss:$16 sps:$4 sm:$0xff]  }
 0x1b0   :  { %9215 = vmatpush1.bf16.msra.mxu0 %v14243_v22  ;;  %v14297_v22 = vld [vmem:[#allocation6 + $0x14a0] ss:$16 sps:$4 sm:$0xff]  }
 0x1b1   :  { %9256 = vmatpush1.bf16.msra.mxu1 %v14246_v23  ;;  %9216 = vmatprep.subr.bf16.mxu0 %v14251_v24  ;;  %v14300_v23 = vld [vmem:[#allocation6 + $0x16a0] ss:$16 sps:$4 sm:$0xff]   ;;  %v14305_v24 = vld [vmem:[#allocation6 + $0x14c4] ss:$16 sps:$4 sm:$0xff]  }
 0x1b2   :  { %9257 = vmatprep.subr.bf16.mxu1 %v14254_v25  ;;  %v14308_v25 = vld [vmem:[#allocation6 + $0x16c4] ss:$16 sps:$4 sm:$0xff]  }
 0x1b4   :  { %9217 = vmatpush1.bf16.msra.mxu0 %v14249_v26 }
 0x1b5   :  { %9258 = vmatpush1.bf16.msra.mxu1 %v14252_v27  ;;  %9218 = vmatprep.subr.bf16.mxu0 %v14257_v28  ;;  %v14303_v28 = vld [vmem:[#allocation6 + $0x14c0] ss:$16 sps:$4 sm:$0xff]  }
 0x1b6   :  { %9259 = vmatprep.subr.bf16.mxu1 %v14260_v30  ;;  %v14306_v30 = vld [vmem:[#allocation6 + $0x16c0] ss:$16 sps:$4 sm:$0xff]  }
 0x1b8   :  { %9219 = vmatpush1.bf16.msra.mxu0 %v14255_v31 }
 0x1b9   :  { %9260 = vmatpush1.bf16.msra.mxu1 %v14258_v33  ;;  %9220 = vmatprep.subr.bf16.mxu0 %v14263_v34 }
 0x1ba   :  { %9261 = vmatprep.subr.bf16.mxu1 %v14266_v35 }
 0x1bc   :  { %9221 = vmatpush1.bf16.msra.mxu0 %v14261_v36 }
 0x1bd   :  { %9262 = vmatpush1.bf16.msra.mxu1 %v14264_v38  ;;  %9272 = vmatprep.subr.bf16.mxu0 %v14269_v45 }
 0x1be   :  { %9313 = vmatprep.subr.bf16.mxu1 %v14272_v46  ;;  %v14311_v46 = vld [vmem:[#allocation6 + $0x14e4] ss:$16 sps:$4 sm:$0xff]  }
 0x1bf   :  { %9223 = vmatmul.mubr.bf16.vlgmr.msra.gmra.mrb[16].mxu0 %v16550_v51 }
 0x1c0   :  { %9264 = vmatmul.mubr.bf16.vlgmr.msra.gmra.mrb[16].mxu1 %v16552_v53  ;;  %9273 = vmatpush1.bf16.msra.mxu0 %v14267_v56  ;;  %v14312_v56 = vld [vmem:[#allocation6 + $0x16e0] ss:$16 sps:$4 sm:$0xff]  }
 0x1c1   :  { %9314 = vmatpush1.bf16.msra.mxu1 %v14270_v57  ;;  %9274 = vmatprep.subr.bf16.mxu0 %v14275_v58  ;;  %v14320_v57 = vld [vmem:[#allocation6 + $0x1704] ss:$16 sps:$4 sm:$0xff]   ;;  %v14315_v58 = vld [vmem:[#allocation6 + $0x1500] ss:$16 sps:$4 sm:$0xff]  }
 0x1c2   :  { %9315 = vmatprep.subr.bf16.mxu1 %v14278_v59  ;;  %9304 = vmatprep.mubr.bf16.mxu0 %v16554_v60  ;;  %v14318_v59 = vld [vmem:[#allocation6 + $0x1700] ss:$16 sps:$4 sm:$0xff]  }
 0x1c3   :  { %9345 = vmatprep.mubr.bf16.mxu1 %v16556_v61 }
 0x1c4   :  { %9275 = vmatpush1.bf16.msra.mxu0 %v14273_v62  ;;  %v14323_v62 = vld [vmem:[#allocation6 + $0x1524] ss:$16 sps:$4 sm:$0xff]  }
 0x1c5   :  { %9316 = vmatpush1.bf16.msra.mxu1 %v14276_v63  ;;  %9276 = vmatprep.subr.bf16.mxu0 %v14281_v0  ;;  %v14326_v63 = vld [vmem:[#allocation6 + $0x1724] ss:$16 sps:$4 sm:$0xff]   ;;  %v14321_v0 = vld [vmem:[#allocation6 + $0x1520] ss:$16 sps:$4 sm:$0xff]  }
 0x1c6   :  { %9317 = vmatprep.subr.bf16.mxu1 %v14284_v1  ;;  %v14324_v1 = vld [vmem:[#allocation6 + $0x1720] ss:$16 sps:$4 sm:$0xff]  }
 0x1c8   :  { %9277 = vmatpush1.bf16.msra.mxu0 %v14279_v4  ;;  %v14329_v4 = vld [vmem:[#allocation6 + $0x1544] ss:$16 sps:$4 sm:$0xff]  }
 0x1c9   :  { %9318 = vmatpush1.bf16.msra.mxu1 %v14282_v5  ;;  %9278 = vmatprep.subr.bf16.mxu0 %v14287_v6  ;;  %v14332_v5 = vld [vmem:[#allocation6 + $0x1744] ss:$16 sps:$4 sm:$0xff]   ;;  %v14327_v6 = vld [vmem:[#allocation6 + $0x1540] ss:$16 sps:$4 sm:$0xff]  }
 0x1ca   :  { %9319 = vmatprep.subr.bf16.mxu1 %v14290_v7  ;;  %v14330_v7 = vld [vmem:[#allocation6 + $0x1740] ss:$16 sps:$4 sm:$0xff]  }
 0x1cc   :  { %9279 = vmatpush1.bf16.msra.mxu0 %v14285_v12  ;;  %v14335_v12 = vld [vmem:[#allocation6 + $0x1564] ss:$16 sps:$4 sm:$0xff]  }
 0x1cd   :  { %9320 = vmatpush1.bf16.msra.mxu1 %v14288_v13  ;;  %9280 = vmatprep.subr.bf16.mxu0 %v14293_v14  ;;  %v14338_v13 = vld [vmem:[#allocation6 + $0x1764] ss:$16 sps:$4 sm:$0xff]   ;;  %v14333_v14 = vld [vmem:[#allocation6 + $0x1560] ss:$16 sps:$4 sm:$0xff]  }
 0x1ce   :  { %9321 = vmatprep.subr.bf16.mxu1 %v14296_v15  ;;  %v14336_v15 = vld [vmem:[#allocation6 + $0x1760] ss:$16 sps:$4 sm:$0xff]  }
 0x1d0   :  { %9281 = vmatpush1.bf16.msra.mxu0 %v14291_v16  ;;  %v14341_v16 = vld [vmem:[#allocation6 + $0x1584] ss:$16 sps:$4 sm:$0xff]  }
 0x1d1   :  { %9322 = vmatpush1.bf16.msra.mxu1 %v14294_v17  ;;  %9282 = vmatprep.subr.bf16.mxu0 %v14299_v18  ;;  %v14344_v17 = vld [vmem:[#allocation6 + $0x1784] ss:$16 sps:$4 sm:$0xff]   ;;  %v14339_v18 = vld [vmem:[#allocation6 + $0x1580] ss:$16 sps:$4 sm:$0xff]  }
 0x1d2   :  { %9323 = vmatprep.subr.bf16.mxu1 %v14302_v19  ;;  %v8978_v26 = vpop.f32.mrb[4].mxu0  ;;  %v14342_v19 = vld [vmem:[#allocation6 + $0x1780] ss:$16 sps:$4 sm:$0xff]  }
 0x1d3   :  { %v9019_v27 = vpop.f32.mrb[4].mxu1  ;;  %v8979_v31 = vadd.f32 %v8978_v26, %v16546_v41  ;;  %v8980_v33 = vpop.f32.mrb[5].mxu0  ;;  %v14309_v41 = vld [vmem:[#allocation6 + $0x14e0] ss:$16 sps:$4 sm:$0xff]   ;;  %v14353_v26 = vld [vmem:[#allocation6 + $0x15c4] ss:$16 sps:$4 sm:$0xff]  }
 0x1d4   :  { %v9021_v34 = vpop.f32.mrb[5].mxu1  ;;  %v8981_v35 = vadd.f32 %v8980_v33, %v16548_v47  ;;  %v8982_v36 = vpop.f32.mrb[6].mxu0  ;;  %9283 = vmatpush1.bf16.msra.mxu0 %v14297_v22  ;;  %v14317_v47 = vld [vmem:[#allocation6 + $0x1504] ss:$16 sps:$4 sm:$0xff]  }
 0x1d5   :  { %v9023_v38 = vpop.f32.mrb[6].mxu1  ;;  %9324 = vmatpush1.bf16.msra.mxu1 %v14300_v23  ;;  %v16564_v39 = vadd.f32 %v9019_v27, %v8979_v31  ;;  %v8983_v44 = vpop.f32.mrb[7].mxu0  ;;  %9284 = vmatprep.subr.bf16.mxu0 %v14305_v24  ;;  %v14347_v22 = vld [vmem:[#allocation6 + $0x15a4] ss:$16 sps:$4 sm:$0xff]   ;;  %v14345_v24 = vld [vmem:[#allocation6 + $0x15a0] ss:$16 sps:$4 sm:$0xff]  }
 0x1d6   :  { %v9024_v45 = vpop.f32.mrb[7].mxu1  ;;  %9325 = vmatprep.subr.bf16.mxu1 %v14308_v25  ;;  %v16566_v55 = vadd.f32 %v9021_v34, %v8981_v35  ;;  %v14350_v23 = vld [vmem:[#allocation6 + $0x17a4] ss:$16 sps:$4 sm:$0xff]   ;;  %v14348_v25 = vld [vmem:[#allocation6 + $0x17a0] ss:$16 sps:$4 sm:$0xff]   ;;  %v143_v36 = vld [vmem:[#allocation3 + $0xa0] sm:$0xff] }
 0x1d7   :  { %v14356_v27 = vld [vmem:[#allocation6 + $0x17c4] ss:$16 sps:$4 sm:$0xff]   ;;  %v14357_v34 = vld [vmem:[#allocation6 + $0x15e0] ss:$16 sps:$4 sm:$0xff]   ;;  %v145_v38 = vld [vmem:[#allocation3 + $0xb0] sm:$0xff] }
 0x1d8   :  { %9285 = vmatpush1.bf16.msra.mxu0 %v14303_v28  ;;  %v14351_v28 = vld [vmem:[#allocation6 + $0x15c0] ss:$16 sps:$4 sm:$0xff]   ;;  %v14359_v31 = vld [vmem:[#allocation6 + $0x15e4] ss:$16 sps:$4 sm:$0xff]  }
 0x1d9   :  { %9326 = vmatpush1.bf16.msra.mxu1 %v14306_v30  ;;  %9286 = vmatprep.subr.bf16.mxu0 %v14311_v46  ;;  %v14354_v30 = vld [vmem:[#allocation6 + $0x17c0] ss:$16 sps:$4 sm:$0xff]   ;;  %v14362_v33 = vld [vmem:[#allocation6 + $0x17e4] ss:$16 sps:$4 sm:$0xff]   ;;  %v16568_v46 = vpack.c.bf16 %v143_v36, %v143_v36 }
 0x1da   :  { %9327 = vmatprep.subr.bf16.mxu1 %v14314_v54  ;;  %v14360_v35 = vld [vmem:[#allocation6 + $0x17e0] ss:$16 sps:$4 sm:$0xff]   ;;  %v14365_v44 = vld [vmem:[#allocation6 + $0x1804] ss:$16 sps:$4 sm:$0xff]   ;;  %v16570_v54 = vpack.c.bf16 %v145_v38, %v145_v38 }
 0x1db   :  { %v14368_v45 = vld [vmem:[#allocation6 + $0x1a04] ss:$16 sps:$4 sm:$0xff]  }
 0x1dc   :  { %9287 = vmatpush1.bf16.msra.mxu0 %v14309_v41  ;;  %v148_v41 = vld [vmem:[#allocation3 + $0xc8] sm:$0xff] }
 0x1dd   :  { %9328 = vmatpush1.bf16.msra.mxu1 %v14312_v56  ;;  %9288 = vmatprep.subr.bf16.mxu0 %v14317_v47  ;;  %v150_v56 = vld [vmem:[#allocation3 + $0xd8] sm:$0xff] }
 0x1de   :  { %9329 = vmatprep.subr.bf16.mxu1 %v14320_v57  ;;  %v14363_v47 = vld [vmem:[#allocation6 + $0x1800] ss:$16 sps:$4 sm:$0xff]  }
 0x1df   :  { %v14366_v57 = vld [vmem:[#allocation6 + $0x1a00] ss:$16 sps:$4 sm:$0xff]  }
 0x1e0   :  { %9289 = vmatpush1.bf16.msra.mxu0 %v14315_v58  ;;  %v14371_v58 = vld [vmem:[#allocation6 + $0x1824] ss:$16 sps:$4 sm:$0xff]  }
 0x1e1   :  { %9330 = vmatpush1.bf16.msra.mxu1 %v14318_v59  ;;  %9290 = vmatprep.subr.bf16.mxu0 %v14323_v62  ;;  %v14374_v59 = vld [vmem:[#allocation6 + $0x1a24] ss:$16 sps:$4 sm:$0xff]   ;;  %v16572_v62 = vpack.c.bf16 %v148_v41, %v148_v41 }
 0x1e2   :  { %9331 = vmatprep.subr.bf16.mxu1 %v14326_v63  ;;  %v16574_v63 = vpack.c.bf16 %v150_v56, %v150_v56 }
 0x1e4   :  { %9291 = vmatpush1.bf16.msra.mxu0 %v14321_v0  ;;  %v14369_v0 = vld [vmem:[#allocation6 + $0x1820] ss:$16 sps:$4 sm:$0xff]  }
 0x1e5   :  { %9332 = vmatpush1.bf16.msra.mxu1 %v14324_v1  ;;  %9292 = vmatprep.subr.bf16.mxu0 %v14329_v4  ;;  %v14372_v1 = vld [vmem:[#allocation6 + $0x1a20] ss:$16 sps:$4 sm:$0xff]   ;;  %v14377_v4 = vld [vmem:[#allocation6 + $0x1844] ss:$16 sps:$4 sm:$0xff]  }
 0x1e6   :  { %9333 = vmatprep.subr.bf16.mxu1 %v14332_v5  ;;  %v14380_v5 = vld [vmem:[#allocation6 + $0x1a44] ss:$16 sps:$4 sm:$0xff]  }
 0x1e8   :  { %9293 = vmatpush1.bf16.msra.mxu0 %v14327_v6  ;;  %v14375_v6 = vld [vmem:[#allocation6 + $0x1840] ss:$16 sps:$4 sm:$0xff]  }
 0x1e9   :  { %9334 = vmatpush1.bf16.msra.mxu1 %v14330_v7  ;;  %9294 = vmatprep.subr.bf16.mxu0 %v14335_v12  ;;  %v14378_v7 = vld [vmem:[#allocation6 + $0x1a40] ss:$16 sps:$4 sm:$0xff]   ;;  %v14383_v12 = vld [vmem:[#allocation6 + $0x1864] ss:$16 sps:$4 sm:$0xff]  }
 0x1ea   :  { %9335 = vmatprep.subr.bf16.mxu1 %v14338_v13  ;;  %v14386_v13 = vld [vmem:[#allocation6 + $0x1a64] ss:$16 sps:$4 sm:$0xff]  }
 0x1ec   :  { %9295 = vmatpush1.bf16.msra.mxu0 %v14333_v14  ;;  %v14381_v14 = vld [vmem:[#allocation6 + $0x1860] ss:$16 sps:$4 sm:$0xff]  }
 0x1ed   :  { %9336 = vmatpush1.bf16.msra.mxu1 %v14336_v15  ;;  %9296 = vmatprep.subr.bf16.mxu0 %v14341_v16  ;;  %v14384_v15 = vld [vmem:[#allocation6 + $0x1a60] ss:$16 sps:$4 sm:$0xff]   ;;  %v14389_v16 = vld [vmem:[#allocation6 + $0x1884] ss:$16 sps:$4 sm:$0xff]  }
 0x1ee   :  { %9337 = vmatprep.subr.bf16.mxu1 %v14344_v17  ;;  %v14392_v17 = vld [vmem:[#allocation6 + $0x1a84] ss:$16 sps:$4 sm:$0xff]  }
 0x1f0   :  { %9297 = vmatpush1.bf16.msra.mxu0 %v14339_v18  ;;  %v14387_v18 = vld [vmem:[#allocation6 + $0x1880] ss:$16 sps:$4 sm:$0xff]  }
 0x1f1   :  { %9338 = vmatpush1.bf16.msra.mxu1 %v14342_v19  ;;  %9298 = vmatprep.subr.bf16.mxu0 %v14347_v22  ;;  %v14390_v19 = vld [vmem:[#allocation6 + $0x1a80] ss:$16 sps:$4 sm:$0xff]   ;;  %v14395_v22 = vld [vmem:[#allocation6 + $0x18a4] ss:$16 sps:$4 sm:$0xff]  }
 0x1f2   :  { %9339 = vmatprep.subr.bf16.mxu1 %v14350_v23  ;;  %v14398_v23 = vld [vmem:[#allocation6 + $0x1aa4] ss:$16 sps:$4 sm:$0xff]  }
 0x1f4   :  { %9299 = vmatpush1.bf16.msra.mxu0 %v14345_v24  ;;  %v14393_v24 = vld [vmem:[#allocation6 + $0x18a0] ss:$16 sps:$4 sm:$0xff]  }
 0x1f5   :  { %9340 = vmatpush1.bf16.msra.mxu1 %v14348_v25  ;;  %9300 = vmatprep.subr.bf16.mxu0 %v14353_v26  ;;  %v14396_v25 = vld [vmem:[#allocation6 + $0x1aa0] ss:$16 sps:$4 sm:$0xff]   ;;  %v14401_v26 = vld [vmem:[#allocation6 + $0x18c4] ss:$16 sps:$4 sm:$0xff]  }
 0x1f6   :  { %9341 = vmatprep.subr.bf16.mxu1 %v14356_v27  ;;  %v14404_v27 = vld [vmem:[#allocation6 + $0x1ac4] ss:$16 sps:$4 sm:$0xff]  }
 0x1f8   :  { %9301 = vmatpush1.bf16.msra.mxu0 %v14351_v28 }
 0x1f9   :  { %9342 = vmatpush1.bf16.msra.mxu1 %v14354_v30  ;;  %9302 = vmatprep.subr.bf16.mxu0 %v14359_v31  ;;  %v14399_v31 = vld [vmem:[#allocation6 + $0x18c0] ss:$16 sps:$4 sm:$0xff]  }
 0x1fa   :  { %9343 = vmatprep.subr.bf16.mxu1 %v14362_v33  ;;  %v14402_v33 = vld [vmem:[#allocation6 + $0x1ac0] ss:$16 sps:$4 sm:$0xff]  }
 0x1fc   :  { %9303 = vmatpush1.bf16.msra.mxu0 %v14357_v34 }
 0x1fd   :  { %9344 = vmatpush1.bf16.msra.mxu1 %v14360_v35  ;;  %9354 = vmatprep.subr.bf16.mxu0 %v14365_v44 }
 0x1fe   :  { %9395 = vmatprep.subr.bf16.mxu1 %v14368_v45 }
 0x1ff   :  { %9305 = vmatmul.mubr.bf16.vlgmr.msra.gmra.mrb[20].mxu0 %v16568_v46 }
 0x200   :  { %9346 = vmatmul.mubr.bf16.vlgmr.msra.gmra.mrb[20].mxu1 %v16570_v54  ;;  %9355 = vmatpush1.bf16.msra.mxu0 %v14363_v47 }
 0x201   :  { %9396 = vmatpush1.bf16.msra.mxu1 %v14366_v57  ;;  %9356 = vmatprep.subr.bf16.mxu0 %v14371_v58  ;;  %v14407_v57 = vld [vmem:[#allocation6 + $0x18e4] ss:$16 sps:$4 sm:$0xff]  }
 0x202   :  { %9397 = vmatprep.subr.bf16.mxu1 %v14374_v59  ;;  %9386 = vmatprep.mubr.bf16.mxu0 %v16572_v62  ;;  %v14410_v58 = vld [vmem:[#allocation6 + $0x1ae4] ss:$16 sps:$4 sm:$0xff]  }
 0x203   :  { %9427 = vmatprep.mubr.bf16.mxu1 %v16574_v63 }
 0x204   :  { %9357 = vmatpush1.bf16.msra.mxu0 %v14369_v0  ;;  %v14408_v0 = vld [vmem:[#allocation6 + $0x1ae0] ss:$16 sps:$4 sm:$0xff]  }
 0x205   :  { %9398 = vmatpush1.bf16.msra.mxu1 %v14372_v1  ;;  %9358 = vmatprep.subr.bf16.mxu0 %v14377_v4  ;;  %v14416_v1 = vld [vmem:[#allocation6 + $0x1b04] ss:$16 sps:$4 sm:$0xff]   ;;  %v14411_v4 = vld [vmem:[#allocation6 + $0x1900] ss:$16 sps:$4 sm:$0xff]  }
 0x206   :  { %9399 = vmatprep.subr.bf16.mxu1 %v14380_v5  ;;  %v14414_v5 = vld [vmem:[#allocation6 + $0x1b00] ss:$16 sps:$4 sm:$0xff]  }
 0x208   :  { %9359 = vmatpush1.bf16.msra.mxu0 %v14375_v6  ;;  %v14419_v6 = vld [vmem:[#allocation6 + $0x1924] ss:$16 sps:$4 sm:$0xff]  }
 0x209   :  { %9400 = vmatpush1.bf16.msra.mxu1 %v14378_v7  ;;  %9360 = vmatprep.subr.bf16.mxu0 %v14383_v12  ;;  %v14422_v7 = vld [vmem:[#allocation6 + $0x1b24] ss:$16 sps:$4 sm:$0xff]   ;;  %v14417_v12 = vld [vmem:[#allocation6 + $0x1920] ss:$16 sps:$4 sm:$0xff]  }
 0x20a   :  { %9401 = vmatprep.subr.bf16.mxu1 %v14386_v13  ;;  %v14420_v13 = vld [vmem:[#allocation6 + $0x1b20] ss:$16 sps:$4 sm:$0xff]  }
 0x20c   :  { %9361 = vmatpush1.bf16.msra.mxu0 %v14381_v14  ;;  %v14425_v14 = vld [vmem:[#allocation6 + $0x1944] ss:$16 sps:$4 sm:$0xff]  }
 0x20d   :  { %9402 = vmatpush1.bf16.msra.mxu1 %v14384_v15  ;;  %9362 = vmatprep.subr.bf16.mxu0 %v14389_v16  ;;  %v14428_v15 = vld [vmem:[#allocation6 + $0x1b44] ss:$16 sps:$4 sm:$0xff]   ;;  %v14423_v16 = vld [vmem:[#allocation6 + $0x1940] ss:$16 sps:$4 sm:$0xff]  }
 0x20e   :  { %9403 = vmatprep.subr.bf16.mxu1 %v14392_v17  ;;  %v14426_v17 = vld [vmem:[#allocation6 + $0x1b40] ss:$16 sps:$4 sm:$0xff]  }
 0x210   :  { %9363 = vmatpush1.bf16.msra.mxu0 %v14387_v18  ;;  %v14431_v18 = vld [vmem:[#allocation6 + $0x1964] ss:$16 sps:$4 sm:$0xff]  }
 0x211   :  { %9404 = vmatpush1.bf16.msra.mxu1 %v14390_v19  ;;  %9364 = vmatprep.subr.bf16.mxu0 %v14395_v22  ;;  %v14434_v19 = vld [vmem:[#allocation6 + $0x1b64] ss:$16 sps:$4 sm:$0xff]   ;;  %v14429_v22 = vld [vmem:[#allocation6 + $0x1960] ss:$16 sps:$4 sm:$0xff]  }
 0x212   :  { %9405 = vmatprep.subr.bf16.mxu1 %v14398_v23  ;;  %v9060_v28 = vpop.f32.mrb[8].mxu0  ;;  %v14432_v23 = vld [vmem:[#allocation6 + $0x1b60] ss:$16 sps:$4 sm:$0xff]  }
 0x213   :  { %v9101_v30 = vpop.f32.mrb[8].mxu1  ;;  %v9061_v34 = vadd.f32 %v9060_v28, %v16564_v39  ;;  %v9062_v35 = vpop.f32.mrb[9].mxu0  ;;  %v14405_v39 = vld [vmem:[#allocation6 + $0x18e0] ss:$16 sps:$4 sm:$0xff]   ;;  %v14443_v28 = vld [vmem:[#allocation6 + $0x19a4] ss:$16 sps:$4 sm:$0xff]  }
 0x214   :  { %v9103_v36 = vpop.f32.mrb[9].mxu1  ;;  %v9063_v38 = vadd.f32 %v9062_v35, %v16566_v55  ;;  %v9064_v44 = vpop.f32.mrb[10].mxu0  ;;  %9365 = vmatpush1.bf16.msra.mxu0 %v14393_v24  ;;  %v14413_v55 = vld [vmem:[#allocation6 + $0x1904] ss:$16 sps:$4 sm:$0xff]  }
 0x215   :  { %v9105_v45 = vpop.f32.mrb[10].mxu1  ;;  %9406 = vmatpush1.bf16.msra.mxu1 %v14396_v25  ;;  %v16582_v41 = vadd.f32 %v9101_v30, %v9061_v34  ;;  %v9065_v56 = vpop.f32.mrb[11].mxu0  ;;  %9366 = vmatprep.subr.bf16.mxu0 %v14401_v26  ;;  %v14437_v24 = vld [vmem:[#allocation6 + $0x1984] ss:$16 sps:$4 sm:$0xff]   ;;  %v14435_v26 = vld [vmem:[#allocation6 + $0x1980] ss:$16 sps:$4 sm:$0xff]  }
 0x216   :  { %v9106_v47 = vpop.f32.mrb[11].mxu1  ;;  %9407 = vmatprep.subr.bf16.mxu1 %v14404_v27  ;;  %v16584_v59 = vadd.f32 %v9103_v36, %v9063_v38  ;;  %v14440_v25 = vld [vmem:[#allocation6 + $0x1b84] ss:$16 sps:$4 sm:$0xff]   ;;  %v14438_v27 = vld [vmem:[#allocation6 + $0x1b80] ss:$16 sps:$4 sm:$0xff]  }
 0x217   :  { %v14446_v30 = vld [vmem:[#allocation6 + $0x1ba4] ss:$16 sps:$4 sm:$0xff]   ;;  %v14447_v36 = vld [vmem:[#allocation6 + $0x19c0] ss:$16 sps:$4 sm:$0xff]  }
 0x218   :  { %9367 = vmatpush1.bf16.msra.mxu0 %v14399_v31  ;;  %v14441_v31 = vld [vmem:[#allocation6 + $0x19a0] ss:$16 sps:$4 sm:$0xff]   ;;  %v14449_v34 = vld [vmem:[#allocation6 + $0x19c4] ss:$16 sps:$4 sm:$0xff]  }
 0x219   :  { %9408 = vmatpush1.bf16.msra.mxu1 %v14402_v33  ;;  %9368 = vmatprep.subr.bf16.mxu0 %v14407_v57  ;;  %v14444_v33 = vld [vmem:[#allocation6 + $0x1ba0] ss:$16 sps:$4 sm:$0xff]   ;;  %v14452_v35 = vld [vmem:[#allocation6 + $0x1bc4] ss:$16 sps:$4 sm:$0xff]   ;;  %v147_v57 = vld [vmem:[#allocation3 + $0xc0] sm:$0xff] }
 0x21a   :  { %9409 = vmatprep.subr.bf16.mxu1 %v14410_v58  ;;  %v14450_v38 = vld [vmem:[#allocation6 + $0x1bc0] ss:$16 sps:$4 sm:$0xff]   ;;  %v14455_v44 = vld [vmem:[#allocation6 + $0x19e4] ss:$16 sps:$4 sm:$0xff]   ;;  %v149_v58 = vld [vmem:[#allocation3 + $0xd0] sm:$0xff] }
 0x21b   :  { %v14458_v45 = vld [vmem:[#allocation6 + $0x1be4] ss:$16 sps:$4 sm:$0xff]   ;;  %v14453_v56 = vld [vmem:[#allocation6 + $0x19e0] ss:$16 sps:$4 sm:$0xff]  }
 0x21c   :  { %9369 = vmatpush1.bf16.msra.mxu0 %v14405_v39  ;;  %v14456_v47 = vld [vmem:[#allocation6 + $0x1be0] ss:$16 sps:$4 sm:$0xff]   ;;  %v14461_v39 = vld [vmem:[#allocation6 + $0x1c04] ss:$16 sps:$4 sm:$0xff]  }
 0x21d   :  { %9410 = vmatpush1.bf16.msra.mxu1 %v14408_v0  ;;  %9370 = vmatprep.subr.bf16.mxu0 %v14413_v55  ;;  %v14464_v0 = vld [vmem:[#allocation6 + $0x1e04] ss:$16 sps:$4 sm:$0xff]   ;;  %v16586_v55 = vpack.c.bf16 %v147_v57, %v147_v57  ;;  %v14495_v57 = vld [vmem:[#allocation6 + $0x1cc0] ss:$16 sps:$4 sm:$0xff]  }
 0x21e   :  { %9411 = vmatprep.subr.bf16.mxu1 %v14416_v1  ;;  %v16588_v1 = vpack.c.bf16 %v149_v58, %v149_v58  ;;  %v14498_v58 = vld [vmem:[#allocation6 + $0x1ec0] ss:$16 sps:$4 sm:$0xff]  }
 0x220   :  { %9371 = vmatpush1.bf16.msra.mxu0 %v14411_v4  ;;  %v152_v4 = vld [vmem:[#allocation3 + $0xe8] sm:$0xff] }
 0x221   :  { %9412 = vmatpush1.bf16.msra.mxu1 %v14414_v5  ;;  %9372 = vmatprep.subr.bf16.mxu0 %v14419_v6  ;;  %v154_v5 = vld [vmem:[#allocation3 + $0xf8] sm:$0xff] }
 0x222   :  { %9413 = vmatprep.subr.bf16.mxu1 %v14422_v7  ;;  %v14459_v6 = vld [vmem:[#allocation6 + $0x1c00] ss:$16 sps:$4 sm:$0xff]  }
 0x223   :  { %v14462_v7 = vld [vmem:[#allocation6 + $0x1e00] ss:$16 sps:$4 sm:$0xff]  }
 0x224   :  { %9373 = vmatpush1.bf16.msra.mxu0 %v14417_v12  ;;  %v14467_v12 = vld [vmem:[#allocation6 + $0x1c24] ss:$16 sps:$4 sm:$0xff]  }
 0x225   :  { %9414 = vmatpush1.bf16.msra.mxu1 %v14420_v13  ;;  %9374 = vmatprep.subr.bf16.mxu0 %v14425_v14  ;;  %v14470_v13 = vld [vmem:[#allocation6 + $0x1e24] ss:$16 sps:$4 sm:$0xff]   ;;  %v16590_v14 = vpack.c.bf16 %v152_v4, %v152_v4 }
 0x226   :  { %9415 = vmatprep.subr.bf16.mxu1 %v14428_v15  ;;  %v16592_v15 = vpack.c.bf16 %v154_v5, %v154_v5 }
 0x228   :  { %9375 = vmatpush1.bf16.msra.mxu0 %v14423_v16  ;;  %v14465_v16 = vld [vmem:[#allocation6 + $0x1c20] ss:$16 sps:$4 sm:$0xff]  }
 0x229   :  { %9416 = vmatpush1.bf16.msra.mxu1 %v14426_v17  ;;  %9376 = vmatprep.subr.bf16.mxu0 %v14431_v18  ;;  %v14468_v17 = vld [vmem:[#allocation6 + $0x1e20] ss:$16 sps:$4 sm:$0xff]   ;;  %v14473_v18 = vld [vmem:[#allocation6 + $0x1c44] ss:$16 sps:$4 sm:$0xff]  }
 0x22a   :  { %9417 = vmatprep.subr.bf16.mxu1 %v14434_v19  ;;  %v14476_v19 = vld [vmem:[#allocation6 + $0x1e44] ss:$16 sps:$4 sm:$0xff]  }
 0x22c   :  { %9377 = vmatpush1.bf16.msra.mxu0 %v14429_v22  ;;  %v14471_v22 = vld [vmem:[#allocation6 + $0x1c40] ss:$16 sps:$4 sm:$0xff]  }
 0x22d   :  { %9418 = vmatpush1.bf16.msra.mxu1 %v14432_v23  ;;  %9378 = vmatprep.subr.bf16.mxu0 %v14437_v24  ;;  %v14474_v23 = vld [vmem:[#allocation6 + $0x1e40] ss:$16 sps:$4 sm:$0xff]   ;;  %v14479_v24 = vld [vmem:[#allocation6 + $0x1c64] ss:$16 sps:$4 sm:$0xff]  }
 0x22e   :  { %9419 = vmatprep.subr.bf16.mxu1 %v14440_v25  ;;  %v14482_v25 = vld [vmem:[#allocation6 + $0x1e64] ss:$16 sps:$4 sm:$0xff]  }
 0x230   :  { %9379 = vmatpush1.bf16.msra.mxu0 %v14435_v26  ;;  %v14477_v26 = vld [vmem:[#allocation6 + $0x1c60] ss:$16 sps:$4 sm:$0xff]  }
 0x231   :  { %9420 = vmatpush1.bf16.msra.mxu1 %v14438_v27  ;;  %9380 = vmatprep.subr.bf16.mxu0 %v14443_v28  ;;  %v14480_v27 = vld [vmem:[#allocation6 + $0x1e60] ss:$16 sps:$4 sm:$0xff]   ;;  %v14485_v28 = vld [vmem:[#allocation6 + $0x1c84] ss:$16 sps:$4 sm:$0xff]  }
 0x232   :  { %9421 = vmatprep.subr.bf16.mxu1 %v14446_v30  ;;  %v14488_v30 = vld [vmem:[#allocation6 + $0x1e84] ss:$16 sps:$4 sm:$0xff]  }
 0x234   :  { %9381 = vmatpush1.bf16.msra.mxu0 %v14441_v31  ;;  %v14483_v31 = vld [vmem:[#allocation6 + $0x1c80] ss:$16 sps:$4 sm:$0xff]  }
 0x235   :  { %9422 = vmatpush1.bf16.msra.mxu1 %v14444_v33  ;;  %9382 = vmatprep.subr.bf16.mxu0 %v14449_v34  ;;  %v14486_v33 = vld [vmem:[#allocation6 + $0x1e80] ss:$16 sps:$4 sm:$0xff]   ;;  %v14491_v34 = vld [vmem:[#allocation6 + $0x1ca4] ss:$16 sps:$4 sm:$0xff]  }
 0x236   :  { %9423 = vmatprep.subr.bf16.mxu1 %v14452_v35  ;;  %v14494_v35 = vld [vmem:[#allocation6 + $0x1ea4] ss:$16 sps:$4 sm:$0xff]  }
 0x238   :  { %9383 = vmatpush1.bf16.msra.mxu0 %v14447_v36  ;;  %v14489_v36 = vld [vmem:[#allocation6 + $0x1ca0] ss:$16 sps:$4 sm:$0xff]  }
 0x239   :  { %9424 = vmatpush1.bf16.msra.mxu1 %v14450_v38  ;;  %9384 = vmatprep.subr.bf16.mxu0 %v14455_v44  ;;  %v14492_v38 = vld [vmem:[#allocation6 + $0x1ea0] ss:$16 sps:$4 sm:$0xff]   ;;  %v14497_v44 = vld [vmem:[#allocation6 + $0x1cc4] ss:$16 sps:$4 sm:$0xff]  }
 0x23a   :  { %9425 = vmatprep.subr.bf16.mxu1 %v14458_v45  ;;  %v14500_v45 = vld [vmem:[#allocation6 + $0x1ec4] ss:$16 sps:$4 sm:$0xff]  }
 0x23c   :  { %9385 = vmatpush1.bf16.msra.mxu0 %v14453_v56 }
 0x23d   :  { %9426 = vmatpush1.bf16.msra.mxu1 %v14456_v47  ;;  %9436 = vmatprep.subr.bf16.mxu0 %v14461_v39 }
 0x23e   :  { %9477 = vmatprep.subr.bf16.mxu1 %v14464_v0 }
 0x23f   :  { %9387 = vmatmul.mubr.bf16.vlgmr.msra.gmra.mrb[24].mxu0 %v16586_v55 }
 0x240   :  { %9428 = vmatmul.mubr.bf16.vlgmr.msra.gmra.mrb[24].mxu1 %v16588_v1  ;;  %9437 = vmatpush1.bf16.msra.mxu0 %v14459_v6 }
 0x241   :  { %9478 = vmatpush1.bf16.msra.mxu1 %v14462_v7  ;;  %9438 = vmatprep.subr.bf16.mxu0 %v14467_v12 }
 0x242   :  { %9479 = vmatprep.subr.bf16.mxu1 %v14470_v13  ;;  %9468 = vmatprep.mubr.bf16.mxu0 %v16590_v14 }
 0x243   :  { %9509 = vmatprep.mubr.bf16.mxu1 %v16592_v15 }
 0x244   :  { %9439 = vmatpush1.bf16.msra.mxu0 %v14465_v16 }
 0x245   :  { %9480 = vmatpush1.bf16.msra.mxu1 %v14468_v17  ;;  %9440 = vmatprep.subr.bf16.mxu0 %v14473_v18  ;;  %v14503_v17 = vld [vmem:[#allocation6 + $0x1ce4] ss:$16 sps:$4 sm:$0xff]  }
 0x246   :  { %9481 = vmatprep.subr.bf16.mxu1 %v14476_v19  ;;  %v14506_v18 = vld [vmem:[#allocation6 + $0x1ee4] ss:$16 sps:$4 sm:$0xff]  }
 0x248   :  { %9441 = vmatpush1.bf16.msra.mxu0 %v14471_v22  ;;  %v14504_v22 = vld [vmem:[#allocation6 + $0x1ee0] ss:$16 sps:$4 sm:$0xff]  }
 0x249   :  { %9482 = vmatpush1.bf16.msra.mxu1 %v14474_v23  ;;  %9442 = vmatprep.subr.bf16.mxu0 %v14479_v24  ;;  %v14512_v23 = vld [vmem:[#allocation6 + $0x1f04] ss:$16 sps:$4 sm:$0xff]   ;;  %v14507_v24 = vld [vmem:[#allocation6 + $0x1d00] ss:$16 sps:$4 sm:$0xff]  }
 0x24a   :  { %9483 = vmatprep.subr.bf16.mxu1 %v14482_v25  ;;  %v14510_v25 = vld [vmem:[#allocation6 + $0x1f00] ss:$16 sps:$4 sm:$0xff]  }
 0x24c   :  { %9443 = vmatpush1.bf16.msra.mxu0 %v14477_v26  ;;  %v14515_v26 = vld [vmem:[#allocation6 + $0x1d24] ss:$16 sps:$4 sm:$0xff]  }
 0x24d   :  { %9484 = vmatpush1.bf16.msra.mxu1 %v14480_v27  ;;  %9444 = vmatprep.subr.bf16.mxu0 %v14485_v28  ;;  %v14518_v27 = vld [vmem:[#allocation6 + $0x1f24] ss:$16 sps:$4 sm:$0xff]   ;;  %v14513_v28 = vld [vmem:[#allocation6 + $0x1d20] ss:$16 sps:$4 sm:$0xff]  }
 0x24e   :  { %9485 = vmatprep.subr.bf16.mxu1 %v14488_v30  ;;  %v14516_v30 = vld [vmem:[#allocation6 + $0x1f20] ss:$16 sps:$4 sm:$0xff]  }
 0x250   :  { %9445 = vmatpush1.bf16.msra.mxu0 %v14483_v31  ;;  %v14521_v31 = vld [vmem:[#allocation6 + $0x1d44] ss:$16 sps:$4 sm:$0xff]  }
 0x251   :  { %9486 = vmatpush1.bf16.msra.mxu1 %v14486_v33  ;;  %9446 = vmatprep.subr.bf16.mxu0 %v14491_v34  ;;  %v14524_v33 = vld [vmem:[#allocation6 + $0x1f44] ss:$16 sps:$4 sm:$0xff]   ;;  %v14519_v34 = vld [vmem:[#allocation6 + $0x1d40] ss:$16 sps:$4 sm:$0xff]  }
 0x252   :  { %9487 = vmatprep.subr.bf16.mxu1 %v14494_v35  ;;  %v9142_v56 = vpop.f32.mrb[12].mxu0  ;;  %v14522_v35 = vld [vmem:[#allocation6 + $0x1f40] ss:$16 sps:$4 sm:$0xff]  }
 0x253   :  { %v9183_v47 = vpop.f32.mrb[12].mxu1  ;;  %v9143_v39 = vadd.f32 %v9142_v56, %v16582_v41  ;;  %v9144_v0 = vpop.f32.mrb[13].mxu0  ;;  %v14501_v41 = vld [vmem:[#allocation6 + $0x1ce0] ss:$16 sps:$4 sm:$0xff]   ;;  %v14533_v56 = vld [vmem:[#allocation6 + $0x1d84] ss:$16 sps:$4 sm:$0xff]  }
 0x254   :  { %v9185_v4 = vpop.f32.mrb[13].mxu1  ;;  %v9145_v5 = vadd.f32 %v9144_v0, %v16584_v59  ;;  %v9146_v6 = vpop.f32.mrb[14].mxu0  ;;  %9447 = vmatpush1.bf16.msra.mxu0 %v14489_v36  ;;  %v14509_v59 = vld [vmem:[#allocation6 + $0x1d04] ss:$16 sps:$4 sm:$0xff]  }
 0x255   :  { %v9187_v7 = vpop.f32.mrb[14].mxu1  ;;  %9488 = vmatpush1.bf16.msra.mxu1 %v14492_v38  ;;  %v16600_v12 = vadd.f32 %v9183_v47, %v9143_v39  ;;  %v9147_v13 = vpop.f32.mrb[15].mxu0  ;;  %9448 = vmatprep.subr.bf16.mxu0 %v14497_v44  ;;  %v14527_v36 = vld [vmem:[#allocation6 + $0x1d64] ss:$16 sps:$4 sm:$0xff]   ;;  %v14525_v44 = vld [vmem:[#allocation6 + $0x1d60] ss:$16 sps:$4 sm:$0xff]  }
 0x256   :  { %v9188_v16 = vpop.f32.mrb[15].mxu1  ;;  %9489 = vmatprep.subr.bf16.mxu1 %v14500_v45  ;;  %v16602_v19 = vadd.f32 %v9185_v4, %v9145_v5  ;;  %v14530_v38 = vld [vmem:[#allocation6 + $0x1f64] ss:$16 sps:$4 sm:$0xff]   ;;  %v14528_v45 = vld [vmem:[#allocation6 + $0x1f60] ss:$16 sps:$4 sm:$0xff]  }
 0x257   :  { %v14536_v47 = vld [vmem:[#allocation6 + $0x1f84] ss:$16 sps:$4 sm:$0xff]   ;;  %v14537_v4 = vld [vmem:[#allocation6 + $0x1da0] ss:$16 sps:$4 sm:$0xff]  }
 0x258   :  { %9449 = vmatpush1.bf16.msra.mxu0 %v14495_v57  ;;  %v14531_v57 = vld [vmem:[#allocation6 + $0x1d80] ss:$16 sps:$4 sm:$0xff]   ;;  %v14539_v39 = vld [vmem:[#allocation6 + $0x1da4] ss:$16 sps:$4 sm:$0xff]  }
 0x259   :  { %9490 = vmatpush1.bf16.msra.mxu1 %v14498_v58  ;;  %9450 = vmatprep.subr.bf16.mxu0 %v14503_v17  ;;  %v14534_v58 = vld [vmem:[#allocation6 + $0x1f80] ss:$16 sps:$4 sm:$0xff]   ;;  %v14542_v0 = vld [vmem:[#allocation6 + $0x1fa4] ss:$16 sps:$4 sm:$0xff]  }
 0x25a   :  { %9491 = vmatprep.subr.bf16.mxu1 %v14506_v18  ;;  %v14540_v5 = vld [vmem:[#allocation6 + $0x1fa0] ss:$16 sps:$4 sm:$0xff]   ;;  %v14545_v6 = vld [vmem:[#allocation6 + $0x1dc4] ss:$16 sps:$4 sm:$0xff]  }
 0x25b   :  { %v14548_v7 = vld [vmem:[#allocation6 + $0x1fc4] ss:$16 sps:$4 sm:$0xff]   ;;  %v14543_v13 = vld [vmem:[#allocation6 + $0x1dc0] ss:$16 sps:$4 sm:$0xff]  }
 0x25c   :  { %9451 = vmatpush1.bf16.msra.mxu0 %v14501_v41  ;;  %v14546_v16 = vld [vmem:[#allocation6 + $0x1fc0] ss:$16 sps:$4 sm:$0xff]   ;;  %v14551_v17 = vld [vmem:[#allocation6 + $0x1de4] ss:$16 sps:$4 sm:$0xff]  }
 0x25d   :  { %9492 = vmatpush1.bf16.msra.mxu1 %v14504_v22  ;;  %9452 = vmatprep.subr.bf16.mxu0 %v14509_v59  ;;  %v14554_v18 = vld [vmem:[#allocation6 + $0x1fe4] ss:$16 sps:$4 sm:$0xff]   ;;  %v14549_v41 = vld [vmem:[#allocation6 + $0x1de0] ss:$16 sps:$4 sm:$0xff]   ;;  %v151_v59 = vld [vmem:[#allocation3 + $0xe0] sm:$0xff] }
 0x25e   :  { %9493 = vmatprep.subr.bf16.mxu1 %v14512_v23  ;;  %v14552_v22 = vld [vmem:[#allocation6 + $0x1fe0] ss:$16 sps:$4 sm:$0xff]   ;;  %v153_v23 = vld [vmem:[#allocation3 + $0xf0] sm:$0xff] }
 0x260   :  { %9453 = vmatpush1.bf16.msra.mxu0 %v14507_v24  ;;  %v14557_v24 = vld [vmem:[#allocation6 + $0x2004] ss:$16 sps:$4 sm:$0xff]  }
 0x261   :  { %9494 = vmatpush1.bf16.msra.mxu1 %v14510_v25  ;;  %9454 = vmatprep.subr.bf16.mxu0 %v14515_v26  ;;  %v14560_v25 = vld [vmem:[#allocation6 + $0x2204] ss:$16 sps:$4 sm:$0xff]   ;;  %v16604_v26 = vpack.c.bf16 %v151_v59, %v151_v59 }
 0x262   :  { %9495 = vmatprep.subr.bf16.mxu1 %v14518_v27  ;;  %v16606_v27 = vpack.c.bf16 %v153_v23, %v153_v23  ;;  %v14593_v59 = vld [vmem:[#allocation6 + $0x20c4] ss:$16 sps:$4 sm:$0xff]  }
 0x263   :  { %v14596_v23 = vld [vmem:[#allocation6 + $0x22c4] ss:$16 sps:$4 sm:$0xff]  }
 0x264   :  { %9455 = vmatpush1.bf16.msra.mxu0 %v14513_v28  ;;  %v156_v28 = vld [vmem:[#allocation3 + $0x108] sm:$0xff] }
 0x265   :  { %9496 = vmatpush1.bf16.msra.mxu1 %v14516_v30  ;;  %9456 = vmatprep.subr.bf16.mxu0 %v14521_v31  ;;  %v158_v30 = vld [vmem:[#allocation3 + $0x118] sm:$0xff] }
 0x266   :  { %9497 = vmatprep.subr.bf16.mxu1 %v14524_v33  ;;  %v14555_v31 = vld [vmem:[#allocation6 + $0x2000] ss:$16 sps:$4 sm:$0xff]  }
 0x267   :  { %v14558_v33 = vld [vmem:[#allocation6 + $0x2200] ss:$16 sps:$4 sm:$0xff]  }
 0x268   :  { %9457 = vmatpush1.bf16.msra.mxu0 %v14519_v34  ;;  %v14563_v34 = vld [vmem:[#allocation6 + $0x2024] ss:$16 sps:$4 sm:$0xff]  }
 0x269   :  { %9498 = vmatpush1.bf16.msra.mxu1 %v14522_v35  ;;  %9458 = vmatprep.subr.bf16.mxu0 %v14527_v36  ;;  %v14566_v35 = vld [vmem:[#allocation6 + $0x2224] ss:$16 sps:$4 sm:$0xff]   ;;  %v16608_v36 = vpack.c.bf16 %v156_v28, %v156_v28  ;;  %v14591_v28 = vld [vmem:[#allocation6 + $0x20c0] ss:$16 sps:$4 sm:$0xff]  }
 0x26a   :  { %9499 = vmatprep.subr.bf16.mxu1 %v14530_v38  ;;  %v16610_v38 = vpack.c.bf16 %v158_v30, %v158_v30  ;;  %v14594_v30 = vld [vmem:[#allocation6 + $0x22c0] ss:$16 sps:$4 sm:$0xff]  }
 0x26c   :  { %9459 = vmatpush1.bf16.msra.mxu0 %v14525_v44  ;;  %v14561_v44 = vld [vmem:[#allocation6 + $0x2020] ss:$16 sps:$4 sm:$0xff]  }
 0x26d   :  { %9500 = vmatpush1.bf16.msra.mxu1 %v14528_v45  ;;  %9460 = vmatprep.subr.bf16.mxu0 %v14533_v56  ;;  %v14564_v45 = vld [vmem:[#allocation6 + $0x2220] ss:$16 sps:$4 sm:$0xff]   ;;  %v14569_v56 = vld [vmem:[#allocation6 + $0x2044] ss:$16 sps:$4 sm:$0xff]  }
 0x26e   :  { %9501 = vmatprep.subr.bf16.mxu1 %v14536_v47  ;;  %v14572_v47 = vld [vmem:[#allocation6 + $0x2244] ss:$16 sps:$4 sm:$0xff]  }
 0x270   :  { %9461 = vmatpush1.bf16.msra.mxu0 %v14531_v57  ;;  %v14567_v57 = vld [vmem:[#allocation6 + $0x2040] ss:$16 sps:$4 sm:$0xff]  }
 0x271   :  { %9502 = vmatpush1.bf16.msra.mxu1 %v14534_v58  ;;  %9462 = vmatprep.subr.bf16.mxu0 %v14539_v39  ;;  %v14570_v58 = vld [vmem:[#allocation6 + $0x2240] ss:$16 sps:$4 sm:$0xff]   ;;  %v14575_v39 = vld [vmem:[#allocation6 + $0x2064] ss:$16 sps:$4 sm:$0xff]  }
 0x272   :  { %9503 = vmatprep.subr.bf16.mxu1 %v14542_v0  ;;  %v14578_v0 = vld [vmem:[#allocation6 + $0x2264] ss:$16 sps:$4 sm:$0xff]  }
 0x274   :  { %9463 = vmatpush1.bf16.msra.mxu0 %v14537_v4  ;;  %v14573_v4 = vld [vmem:[#allocation6 + $0x2060] ss:$16 sps:$4 sm:$0xff]  }
 0x275   :  { %9504 = vmatpush1.bf16.msra.mxu1 %v14540_v5  ;;  %9464 = vmatprep.subr.bf16.mxu0 %v14545_v6  ;;  %v14576_v5 = vld [vmem:[#allocation6 + $0x2260] ss:$16 sps:$4 sm:$0xff]   ;;  %v14581_v6 = vld [vmem:[#allocation6 + $0x2084] ss:$16 sps:$4 sm:$0xff]  }
 0x276   :  { %9505 = vmatprep.subr.bf16.mxu1 %v14548_v7  ;;  %v14584_v7 = vld [vmem:[#allocation6 + $0x2284] ss:$16 sps:$4 sm:$0xff]  }
 0x278   :  { %9465 = vmatpush1.bf16.msra.mxu0 %v14543_v13  ;;  %v14579_v13 = vld [vmem:[#allocation6 + $0x2080] ss:$16 sps:$4 sm:$0xff]  }
 0x279   :  { %9506 = vmatpush1.bf16.msra.mxu1 %v14546_v16  ;;  %9466 = vmatprep.subr.bf16.mxu0 %v14551_v17  ;;  %v14582_v16 = vld [vmem:[#allocation6 + $0x2280] ss:$16 sps:$4 sm:$0xff]   ;;  %v14587_v17 = vld [vmem:[#allocation6 + $0x20a4] ss:$16 sps:$4 sm:$0xff]  }
 0x27a   :  { %9507 = vmatprep.subr.bf16.mxu1 %v14554_v18  ;;  %v14590_v18 = vld [vmem:[#allocation6 + $0x22a4] ss:$16 sps:$4 sm:$0xff]  }
 0x27c   :  { %9467 = vmatpush1.bf16.msra.mxu0 %v14549_v41  ;;  %v14585_v41 = vld [vmem:[#allocation6 + $0x20a0] ss:$16 sps:$4 sm:$0xff]  }
 0x27d   :  { %9508 = vmatpush1.bf16.msra.mxu1 %v14552_v22  ;;  %9518 = vmatprep.subr.bf16.mxu0 %v14557_v24  ;;  %v14588_v22 = vld [vmem:[#allocation6 + $0x22a0] ss:$16 sps:$4 sm:$0xff]  }
 0x27e   :  { %9559 = vmatprep.subr.bf16.mxu1 %v14560_v25 }
 0x27f   :  { %9469 = vmatmul.mubr.bf16.vlgmr.msra.gmra.mrb[28].mxu0 %v16604_v26 }
 0x280   :  { %9510 = vmatmul.mubr.bf16.vlgmr.msra.gmra.mrb[28].mxu1 %v16606_v27  ;;  %9519 = vmatpush1.bf16.msra.mxu0 %v14555_v31 }
 0x281   :  { %9560 = vmatpush1.bf16.msra.mxu1 %v14558_v33  ;;  %9520 = vmatprep.subr.bf16.mxu0 %v14563_v34 }
 0x282   :  { %9561 = vmatprep.subr.bf16.mxu1 %v14566_v35  ;;  %9550 = vmatprep.mubr.bf16.mxu0 %v16608_v36 }
 0x283   :  { %9591 = vmatprep.mubr.bf16.mxu1 %v16610_v38 }
 0x284   :  { %9521 = vmatpush1.bf16.msra.mxu0 %v14561_v44 }
 0x285   :  { %9562 = vmatpush1.bf16.msra.mxu1 %v14564_v45  ;;  %9522 = vmatprep.subr.bf16.mxu0 %v14569_v56 }
 0x286   :  { %9563 = vmatprep.subr.bf16.mxu1 %v14572_v47 }
 0x288   :  { %9523 = vmatpush1.bf16.msra.mxu0 %v14567_v57 }
 0x289   :  { %9564 = vmatpush1.bf16.msra.mxu1 %v14570_v58  ;;  %9524 = vmatprep.subr.bf16.mxu0 %v14575_v39  ;;  %v14599_v58 = vld [vmem:[#allocation6 + $0x20e4] ss:$16 sps:$4 sm:$0xff]  }
 0x28a   :  { %9565 = vmatprep.subr.bf16.mxu1 %v14578_v0  ;;  %v14602_v39 = vld [vmem:[#allocation6 + $0x22e4] ss:$16 sps:$4 sm:$0xff]  }
 0x28c   :  { %9525 = vmatpush1.bf16.msra.mxu0 %v14573_v4  ;;  %v14600_v4 = vld [vmem:[#allocation6 + $0x22e0] ss:$16 sps:$4 sm:$0xff]  }
 0x28d   :  { %9566 = vmatpush1.bf16.msra.mxu1 %v14576_v5  ;;  %9526 = vmatprep.subr.bf16.mxu0 %v14581_v6  ;;  %v14608_v5 = vld [vmem:[#allocation6 + $0x2304] ss:$16 sps:$4 sm:$0xff]   ;;  %v14603_v6 = vld [vmem:[#allocation6 + $0x2100] ss:$16 sps:$4 sm:$0xff]  }
 0x28e   :  { %9567 = vmatprep.subr.bf16.mxu1 %v14584_v7  ;;  %v14606_v7 = vld [vmem:[#allocation6 + $0x2300] ss:$16 sps:$4 sm:$0xff]  }
 0x290   :  { %9527 = vmatpush1.bf16.msra.mxu0 %v14579_v13  ;;  %v14611_v13 = vld [vmem:[#allocation6 + $0x2124] ss:$16 sps:$4 sm:$0xff]  }
 0x291   :  { %9568 = vmatpush1.bf16.msra.mxu1 %v14582_v16  ;;  %9528 = vmatprep.subr.bf16.mxu0 %v14587_v17  ;;  %v14614_v16 = vld [vmem:[#allocation6 + $0x2324] ss:$16 sps:$4 sm:$0xff]   ;;  %v14609_v17 = vld [vmem:[#allocation6 + $0x2120] ss:$16 sps:$4 sm:$0xff]  }
 0x292   :  { %9569 = vmatprep.subr.bf16.mxu1 %v14590_v18  ;;  %v9224_v24 = vpop.f32.mrb[16].mxu0  ;;  %v14612_v18 = vld [vmem:[#allocation6 + $0x2320] ss:$16 sps:$4 sm:$0xff]  }
 0x293   :  { %v9265_v25 = vpop.f32.mrb[16].mxu1  ;;  %v9225_v31 = vadd.f32 %v9224_v24, %v16600_v12  ;;  %v9226_v33 = vpop.f32.mrb[17].mxu0  ;;  %v14597_v12 = vld [vmem:[#allocation6 + $0x20e0] ss:$16 sps:$4 sm:$0xff]   ;;  %v14623_v24 = vld [vmem:[#allocation6 + $0x2164] ss:$16 sps:$4 sm:$0xff]  }
 0x294   :  { %v9267_v34 = vpop.f32.mrb[17].mxu1  ;;  %v9227_v35 = vadd.f32 %v9226_v33, %v16602_v19  ;;  %v9228_v44 = vpop.f32.mrb[18].mxu0  ;;  %9529 = vmatpush1.bf16.msra.mxu0 %v14585_v41  ;;  %v14605_v19 = vld [vmem:[#allocation6 + $0x2104] ss:$16 sps:$4 sm:$0xff]  }
 0x295   :  { %v9269_v45 = vpop.f32.mrb[18].mxu1  ;;  %9570 = vmatpush1.bf16.msra.mxu1 %v14588_v22  ;;  %v16618_v56 = vadd.f32 %v9265_v25, %v9225_v31  ;;  %v9229_v47 = vpop.f32.mrb[19].mxu0  ;;  %9530 = vmatprep.subr.bf16.mxu0 %v14593_v59  ;;  %v14617_v41 = vld [vmem:[#allocation6 + $0x2144] ss:$16 sps:$4 sm:$0xff]   ;;  %v14615_v59 = vld [vmem:[#allocation6 + $0x2140] ss:$16 sps:$4 sm:$0xff]  }
 0x296   :  { %v9270_v57 = vpop.f32.mrb[19].mxu1  ;;  %9571 = vmatprep.subr.bf16.mxu1 %v14596_v23  ;;  %v16620_v0 = vadd.f32 %v9267_v34, %v9227_v35  ;;  %v14620_v22 = vld [vmem:[#allocation6 + $0x2344] ss:$16 sps:$4 sm:$0xff]   ;;  %v14618_v23 = vld [vmem:[#allocation6 + $0x2340] ss:$16 sps:$4 sm:$0xff]  }
 0x297   :  { %v14626_v25 = vld [vmem:[#allocation6 + $0x2364] ss:$16 sps:$4 sm:$0xff]   ;;  %v14627_v34 = vld [vmem:[#allocation6 + $0x2180] ss:$16 sps:$4 sm:$0xff]  }
 0x298   :  { %9531 = vmatpush1.bf16.msra.mxu0 %v14591_v28  ;;  %v14621_v28 = vld [vmem:[#allocation6 + $0x2160] ss:$16 sps:$4 sm:$0xff]   ;;  %v14629_v31 = vld [vmem:[#allocation6 + $0x2184] ss:$16 sps:$4 sm:$0xff]  }
 0x299   :  { %9572 = vmatpush1.bf16.msra.mxu1 %v14594_v30  ;;  %9532 = vmatprep.subr.bf16.mxu0 %v14599_v58  ;;  %v14624_v30 = vld [vmem:[#allocation6 + $0x2360] ss:$16 sps:$4 sm:$0xff]   ;;  %v14632_v33 = vld [vmem:[#allocation6 + $0x2384] ss:$16 sps:$4 sm:$0xff]  }
 0x29a   :  { %9573 = vmatprep.subr.bf16.mxu1 %v14602_v39  ;;  %v14630_v35 = vld [vmem:[#allocation6 + $0x2380] ss:$16 sps:$4 sm:$0xff]   ;;  %v14635_v44 = vld [vmem:[#allocation6 + $0x21a4] ss:$16 sps:$4 sm:$0xff]  }
 0x29b   :  { %v14638_v45 = vld [vmem:[#allocation6 + $0x23a4] ss:$16 sps:$4 sm:$0xff]   ;;  %v14633_v47 = vld [vmem:[#allocation6 + $0x21a0] ss:$16 sps:$4 sm:$0xff]  }
 0x29c   :  { %9533 = vmatpush1.bf16.msra.mxu0 %v14597_v12  ;;  %v14636_v57 = vld [vmem:[#allocation6 + $0x23a0] ss:$16 sps:$4 sm:$0xff]   ;;  %v14641_v58 = vld [vmem:[#allocation6 + $0x21c4] ss:$16 sps:$4 sm:$0xff]  }
 0x29d   :  { %9574 = vmatpush1.bf16.msra.mxu1 %v14600_v4  ;;  %9534 = vmatprep.subr.bf16.mxu0 %v14605_v19  ;;  %v14644_v39 = vld [vmem:[#allocation6 + $0x23c4] ss:$16 sps:$4 sm:$0xff]   ;;  %v14639_v12 = vld [vmem:[#allocation6 + $0x21c0] ss:$16 sps:$4 sm:$0xff]  }
 0x29e   :  { %9575 = vmatprep.subr.bf16.mxu1 %v14608_v5  ;;  %v14642_v4 = vld [vmem:[#allocation6 + $0x23c0] ss:$16 sps:$4 sm:$0xff]   ;;  %v14647_v19 = vld [vmem:[#allocation6 + $0x21e4] ss:$16 sps:$4 sm:$0xff]  }
 0x29f   :  { %v14650_v5 = vld [vmem:[#allocation6 + $0x23e4] ss:$16 sps:$4 sm:$0xff]  }
 0x2a0   :  { %9535 = vmatpush1.bf16.msra.mxu0 %v14603_v6  ;;  %v14645_v6 = vld [vmem:[#allocation6 + $0x21e0] ss:$16 sps:$4 sm:$0xff]  }
 0x2a1   :  { %9576 = vmatpush1.bf16.msra.mxu1 %v14606_v7  ;;  %9536 = vmatprep.subr.bf16.mxu0 %v14611_v13  ;;  %v14648_v7 = vld [vmem:[#allocation6 + $0x23e0] ss:$16 sps:$4 sm:$0xff]   ;;  %v155_v13 = vld [vmem:[#allocation3 + $0x100] sm:$0xff] }
 0x2a2   :  { %9577 = vmatprep.subr.bf16.mxu1 %v14614_v16  ;;  %v157_v16 = vld [vmem:[#allocation3 + $0x110] sm:$0xff] }
 0x2a4   :  { %9537 = vmatpush1.bf16.msra.mxu0 %v14609_v17  ;;  %v14653_v17 = vld [vmem:[#allocation6 + $0x2404] ss:$16 sps:$4 sm:$0xff]  }
 0x2a5   :  { %9578 = vmatpush1.bf16.msra.mxu1 %v14612_v18  ;;  %9538 = vmatprep.subr.bf16.mxu0 %v14617_v41  ;;  %v14656_v18 = vld [vmem:[#allocation6 + $0x2604] ss:$16 sps:$4 sm:$0xff]   ;;  %v16622_v41 = vpack.c.bf16 %v155_v13, %v155_v13 }
 0x2a6   :  { %9579 = vmatprep.subr.bf16.mxu1 %v14620_v22  ;;  %v16624_v22 = vpack.c.bf16 %v157_v16, %v157_v16  ;;  %v14683_v13 = vld [vmem:[#allocation6 + $0x24a4] ss:$16 sps:$4 sm:$0xff]  }
 0x2a7   :  { %v14686_v16 = vld [vmem:[#allocation6 + $0x26a4] ss:$16 sps:$4 sm:$0xff]  }
 0x2a8   :  { %9539 = vmatpush1.bf16.msra.mxu0 %v14615_v59  ;;  %v160_v59 = vld [vmem:[#allocation3 + $0x128] sm:$0xff] }
 0x2a9   :  { %9580 = vmatpush1.bf16.msra.mxu1 %v14618_v23  ;;  %9540 = vmatprep.subr.bf16.mxu0 %v14623_v24  ;;  %v162_v23 = vld [vmem:[#allocation3 + $0x138] sm:$0xff] }
 0x2aa   :  { %9581 = vmatprep.subr.bf16.mxu1 %v14626_v25  ;;  %v14651_v24 = vld [vmem:[#allocation6 + $0x2400] ss:$16 sps:$4 sm:$0xff]  }
 0x2ab   :  { %v14654_v25 = vld [vmem:[#allocation6 + $0x2600] ss:$16 sps:$4 sm:$0xff]  }
 0x2ac   :  { %9541 = vmatpush1.bf16.msra.mxu0 %v14621_v28  ;;  %v14659_v28 = vld [vmem:[#allocation6 + $0x2424] ss:$16 sps:$4 sm:$0xff]  }
 0x2ad   :  { %9582 = vmatpush1.bf16.msra.mxu1 %v14624_v30  ;;  %9542 = vmatprep.subr.bf16.mxu0 %v14629_v31  ;;  %v14662_v30 = vld [vmem:[#allocation6 + $0x2624] ss:$16 sps:$4 sm:$0xff]   ;;  %v16626_v31 = vpack.c.bf16 %v160_v59, %v160_v59 }
 0x2ae   :  { %9583 = vmatprep.subr.bf16.mxu1 %v14632_v33  ;;  %v16628_v33 = vpack.c.bf16 %v162_v23, %v162_v23  ;;  %v14689_v59 = vld [vmem:[#allocation6 + $0x24c4] ss:$16 sps:$4 sm:$0xff]  }
 0x2af   :  { %v14692_v23 = vld [vmem:[#allocation6 + $0x26c4] ss:$16 sps:$4 sm:$0xff]  }
 0x2b0   :  { %9543 = vmatpush1.bf16.msra.mxu0 %v14627_v34  ;;  %v14657_v34 = vld [vmem:[#allocation6 + $0x2420] ss:$16 sps:$4 sm:$0xff]  }
 0x2b1   :  { %9584 = vmatpush1.bf16.msra.mxu1 %v14630_v35  ;;  %9544 = vmatprep.subr.bf16.mxu0 %v14635_v44  ;;  %v14660_v35 = vld [vmem:[#allocation6 + $0x2620] ss:$16 sps:$4 sm:$0xff]   ;;  %v14665_v44 = vld [vmem:[#allocation6 + $0x2444] ss:$16 sps:$4 sm:$0xff]  }
 0x2b2   :  { %9585 = vmatprep.subr.bf16.mxu1 %v14638_v45  ;;  %v14668_v45 = vld [vmem:[#allocation6 + $0x2644] ss:$16 sps:$4 sm:$0xff]  }
 0x2b4   :  { %9545 = vmatpush1.bf16.msra.mxu0 %v14633_v47  ;;  %v14663_v47 = vld [vmem:[#allocation6 + $0x2440] ss:$16 sps:$4 sm:$0xff]  }
 0x2b5   :  { %9586 = vmatpush1.bf16.msra.mxu1 %v14636_v57  ;;  %9546 = vmatprep.subr.bf16.mxu0 %v14641_v58  ;;  %v14666_v57 = vld [vmem:[#allocation6 + $0x2640] ss:$16 sps:$4 sm:$0xff]   ;;  %v14671_v58 = vld [vmem:[#allocation6 + $0x2464] ss:$16 sps:$4 sm:$0xff]  }
 0x2b6   :  { %9587 = vmatprep.subr.bf16.mxu1 %v14644_v39  ;;  %v14674_v39 = vld [vmem:[#allocation6 + $0x2664] ss:$16 sps:$4 sm:$0xff]  }
 0x2b8   :  { %9547 = vmatpush1.bf16.msra.mxu0 %v14639_v12  ;;  %v14669_v12 = vld [vmem:[#allocation6 + $0x2460] ss:$16 sps:$4 sm:$0xff]  }
 0x2b9   :  { %9588 = vmatpush1.bf16.msra.mxu1 %v14642_v4  ;;  %9548 = vmatprep.subr.bf16.mxu0 %v14647_v19  ;;  %v14672_v4 = vld [vmem:[#allocation6 + $0x2660] ss:$16 sps:$4 sm:$0xff]   ;;  %v14677_v19 = vld [vmem:[#allocation6 + $0x2484] ss:$16 sps:$4 sm:$0xff]  }
 0x2ba   :  { %9589 = vmatprep.subr.bf16.mxu1 %v14650_v5  ;;  %v14680_v5 = vld [vmem:[#allocation6 + $0x2684] ss:$16 sps:$4 sm:$0xff]  }
 0x2bc   :  { %9549 = vmatpush1.bf16.msra.mxu0 %v14645_v6  ;;  %v14675_v6 = vld [vmem:[#allocation6 + $0x2480] ss:$16 sps:$4 sm:$0xff]  }
 0x2bd   :  { %9590 = vmatpush1.bf16.msra.mxu1 %v14648_v7  ;;  %9600 = vmatprep.subr.bf16.mxu0 %v14653_v17  ;;  %v14678_v7 = vld [vmem:[#allocation6 + $0x2680] ss:$16 sps:$4 sm:$0xff]  }
 0x2be   :  { %9641 = vmatprep.subr.bf16.mxu1 %v14656_v18  ;;  %v14681_v17 = vld [vmem:[#allocation6 + $0x24a0] ss:$16 sps:$4 sm:$0xff]  }
 0x2bf   :  { %9551 = vmatmul.mubr.bf16.vlgmr.msra.gmra.mrb[32].mxu0 %v16622_v41  ;;  %v14684_v18 = vld [vmem:[#allocation6 + $0x26a0] ss:$16 sps:$4 sm:$0xff]  }
 0x2c0   :  { %9592 = vmatmul.mubr.bf16.vlgmr.msra.gmra.mrb[32].mxu1 %v16624_v22  ;;  %9601 = vmatpush1.bf16.msra.mxu0 %v14651_v24 }
 0x2c1   :  { %9642 = vmatpush1.bf16.msra.mxu1 %v14654_v25  ;;  %9602 = vmatprep.subr.bf16.mxu0 %v14659_v28  ;;  %v14687_v28 = vld [vmem:[#allocation6 + $0x24c0] ss:$16 sps:$4 sm:$0xff]  }
 0x2c2   :  { %9643 = vmatprep.subr.bf16.mxu1 %v14662_v30  ;;  %9632 = vmatprep.mubr.bf16.mxu0 %v16626_v31  ;;  %v14690_v30 = vld [vmem:[#allocation6 + $0x26c0] ss:$16 sps:$4 sm:$0xff]  }
 0x2c3   :  { %9673 = vmatprep.mubr.bf16.mxu1 %v16628_v33 }
 0x2c4   :  { %9603 = vmatpush1.bf16.msra.mxu0 %v14657_v34 }
 0x2c5   :  { %9644 = vmatpush1.bf16.msra.mxu1 %v14660_v35  ;;  %9604 = vmatprep.subr.bf16.mxu0 %v14665_v44 }
 0x2c6   :  { %9645 = vmatprep.subr.bf16.mxu1 %v14668_v45 }
 0x2c8   :  { %9605 = vmatpush1.bf16.msra.mxu0 %v14663_v47 }
 0x2c9   :  { %9646 = vmatpush1.bf16.msra.mxu1 %v14666_v57  ;;  %9606 = vmatprep.subr.bf16.mxu0 %v14671_v58 }
 0x2ca   :  { %9647 = vmatprep.subr.bf16.mxu1 %v14674_v39 }
 0x2cc   :  { %9607 = vmatpush1.bf16.msra.mxu0 %v14669_v12 }
 0x2cd   :  { %9648 = vmatpush1.bf16.msra.mxu1 %v14672_v4  ;;  %9608 = vmatprep.subr.bf16.mxu0 %v14677_v19  ;;  %v14695_v4 = vld [vmem:[#allocation6 + $0x24e4] ss:$16 sps:$4 sm:$0xff]  }
 0x2ce   :  { %9649 = vmatprep.subr.bf16.mxu1 %v14680_v5  ;;  %v14698_v19 = vld [vmem:[#allocation6 + $0x26e4] ss:$16 sps:$4 sm:$0xff]  }
 0x2d0   :  { %9609 = vmatpush1.bf16.msra.mxu0 %v14675_v6  ;;  %v14693_v6 = vld [vmem:[#allocation6 + $0x24e0] ss:$16 sps:$4 sm:$0xff]  }
 0x2d1   :  { %9650 = vmatpush1.bf16.msra.mxu1 %v14678_v7  ;;  %9610 = vmatprep.subr.bf16.mxu0 %v14683_v13  ;;  %v14704_v7 = vld [vmem:[#allocation6 + $0x2704] ss:$16 sps:$4 sm:$0xff]   ;;  %v14699_v13 = vld [vmem:[#allocation6 + $0x2500] ss:$16 sps:$4 sm:$0xff]  }
 0x2d2   :  { %9651 = vmatprep.subr.bf16.mxu1 %v14686_v16  ;;  %v9306_v24 = vpop.f32.mrb[20].mxu0  ;;  %v14702_v16 = vld [vmem:[#allocation6 + $0x2700] ss:$16 sps:$4 sm:$0xff]  }
 0x2d3   :  { %v9347_v25 = vpop.f32.mrb[20].mxu1  ;;  %v9307_v34 = vadd.f32 %v9306_v24, %v16618_v56  ;;  %v9308_v35 = vpop.f32.mrb[21].mxu0  ;;  %v14696_v56 = vld [vmem:[#allocation6 + $0x26e0] ss:$16 sps:$4 sm:$0xff]   ;;  %v14713_v24 = vld [vmem:[#allocation6 + $0x2544] ss:$16 sps:$4 sm:$0xff]  }
 0x2d4   :  { %v9349_v44 = vpop.f32.mrb[21].mxu1  ;;  %v9309_v45 = vadd.f32 %v9308_v35, %v16620_v0  ;;  %v9310_v47 = vpop.f32.mrb[22].mxu0  ;;  %9611 = vmatpush1.bf16.msra.mxu0 %v14681_v17  ;;  %v14701_v0 = vld [vmem:[#allocation6 + $0x2504] ss:$16 sps:$4 sm:$0xff]  }
 0x2d5   :  { %v9351_v57 = vpop.f32.mrb[22].mxu1  ;;  %9652 = vmatpush1.bf16.msra.mxu1 %v14684_v18  ;;  %v16636_v58 = vadd.f32 %v9347_v25, %v9307_v34  ;;  %v9311_v39 = vpop.f32.mrb[23].mxu0  ;;  %9612 = vmatprep.subr.bf16.mxu0 %v14689_v59  ;;  %v14707_v17 = vld [vmem:[#allocation6 + $0x2524] ss:$16 sps:$4 sm:$0xff]   ;;  %v14705_v59 = vld [vmem:[#allocation6 + $0x2520] ss:$16 sps:$4 sm:$0xff]  }
 0x2d6   :  { %v9352_v12 = vpop.f32.mrb[23].mxu1  ;;  %9653 = vmatprep.subr.bf16.mxu1 %v14692_v23  ;;  %v16638_v5 = vadd.f32 %v9349_v44, %v9309_v45  ;;  %v14710_v18 = vld [vmem:[#allocation6 + $0x2724] ss:$16 sps:$4 sm:$0xff]   ;;  %v14708_v23 = vld [vmem:[#allocation6 + $0x2720] ss:$16 sps:$4 sm:$0xff]  }
 0x2d7   :  { %v14716_v25 = vld [vmem:[#allocation6 + $0x2744] ss:$16 sps:$4 sm:$0xff]   ;;  %v14717_v44 = vld [vmem:[#allocation6 + $0x2560] ss:$16 sps:$4 sm:$0xff]  }
 0x2d8   :  { %9613 = vmatpush1.bf16.msra.mxu0 %v14687_v28  ;;  %v14711_v28 = vld [vmem:[#allocation6 + $0x2540] ss:$16 sps:$4 sm:$0xff]   ;;  %v14719_v34 = vld [vmem:[#allocation6 + $0x2564] ss:$16 sps:$4 sm:$0xff]  }
 0x2d9   :  { %9654 = vmatpush1.bf16.msra.mxu1 %v14690_v30  ;;  %9614 = vmatprep.subr.bf16.mxu0 %v14695_v4  ;;  %v14714_v30 = vld [vmem:[#allocation6 + $0x2740] ss:$16 sps:$4 sm:$0xff]   ;;  %v14722_v35 = vld [vmem:[#allocation6 + $0x2764] ss:$16 sps:$4 sm:$0xff]  }
 0x2da   :  { %9655 = vmatprep.subr.bf16.mxu1 %v14698_v19  ;;  %v14720_v45 = vld [vmem:[#allocation6 + $0x2760] ss:$16 sps:$4 sm:$0xff]   ;;  %v14725_v47 = vld [vmem:[#allocation6 + $0x2584] ss:$16 sps:$4 sm:$0xff]  }
 0x2db   :  { %v14728_v57 = vld [vmem:[#allocation6 + $0x2784] ss:$16 sps:$4 sm:$0xff]   ;;  %v14723_v39 = vld [vmem:[#allocation6 + $0x2580] ss:$16 sps:$4 sm:$0xff]  }
 0x2dc   :  { %9615 = vmatpush1.bf16.msra.mxu0 %v14693_v6  ;;  %v14726_v12 = vld [vmem:[#allocation6 + $0x2780] ss:$16 sps:$4 sm:$0xff]   ;;  %v14731_v4 = vld [vmem:[#allocation6 + $0x25a4] ss:$16 sps:$4 sm:$0xff]  }
 0x2dd   :  { %9656 = vmatpush1.bf16.msra.mxu1 %v14696_v56  ;;  %9616 = vmatprep.subr.bf16.mxu0 %v14701_v0  ;;  %v14734_v19 = vld [vmem:[#allocation6 + $0x27a4] ss:$16 sps:$4 sm:$0xff]   ;;  %v14729_v6 = vld [vmem:[#allocation6 + $0x25a0] ss:$16 sps:$4 sm:$0xff]  }
 0x2de   :  { %9657 = vmatprep.subr.bf16.mxu1 %v14704_v7  ;;  %v14732_v56 = vld [vmem:[#allocation6 + $0x27a0] ss:$16 sps:$4 sm:$0xff]   ;;  %v14737_v0 = vld [vmem:[#allocation6 + $0x25c4] ss:$16 sps:$4 sm:$0xff]  }
 0x2df   :  { %v14740_v7 = vld [vmem:[#allocation6 + $0x27c4] ss:$16 sps:$4 sm:$0xff]  }
 0x2e0   :  { %9617 = vmatpush1.bf16.msra.mxu0 %v14699_v13  ;;  %v14735_v13 = vld [vmem:[#allocation6 + $0x25c0] ss:$16 sps:$4 sm:$0xff]  }
 0x2e1   :  { %9658 = vmatpush1.bf16.msra.mxu1 %v14702_v16  ;;  %9618 = vmatprep.subr.bf16.mxu0 %v14707_v17  ;;  %v14738_v16 = vld [vmem:[#allocation6 + $0x27c0] ss:$16 sps:$4 sm:$0xff]   ;;  %v14743_v17 = vld [vmem:[#allocation6 + $0x25e4] ss:$16 sps:$4 sm:$0xff]  }
 0x2e2   :  { %9659 = vmatprep.subr.bf16.mxu1 %v14710_v18  ;;  %v14746_v18 = vld [vmem:[#allocation6 + $0x27e4] ss:$16 sps:$4 sm:$0xff]  }
 0x2e4   :  { %9619 = vmatpush1.bf16.msra.mxu0 %v14705_v59  ;;  %v14741_v59 = vld [vmem:[#allocation6 + $0x25e0] ss:$16 sps:$4 sm:$0xff]  }
 0x2e5   :  { %9660 = vmatpush1.bf16.msra.mxu1 %v14708_v23  ;;  %9620 = vmatprep.subr.bf16.mxu0 %v14713_v24  ;;  %v14744_v23 = vld [vmem:[#allocation6 + $0x27e0] ss:$16 sps:$4 sm:$0xff]   ;;  %v159_v24 = vld [vmem:[#allocation3 + $0x120] sm:$0xff] }
 0x2e6   :  { %9661 = vmatprep.subr.bf16.mxu1 %v14716_v25  ;;  %v161_v25 = vld [vmem:[#allocation3 + $0x130] sm:$0xff] }
 0x2e8   :  { %9621 = vmatpush1.bf16.msra.mxu0 %v14711_v28  ;;  %v14749_v28 = vld [vmem:[#allocation6 + $0x2804] ss:$16 sps:$4 sm:$0xff]  }
 0x2e9   :  { %9662 = vmatpush1.bf16.msra.mxu1 %v14714_v30  ;;  %9622 = vmatprep.subr.bf16.mxu0 %v14719_v34  ;;  %v14752_v30 = vld [vmem:[#allocation6 + $0x2a04] ss:$16 sps:$4 sm:$0xff]  }
 0x2ea   :  { %9663 = vmatprep.subr.bf16.mxu1 %v14722_v35  ;;  %v164_v34 = vld [vmem:[#allocation3 + $0x148] sm:$0xff]  ;;  %v166_v35 = vld [vmem:[#allocation3 + $0x158] sm:$0xff] }
 0x2ec   :  { %9623 = vmatpush1.bf16.msra.mxu0 %v14717_v44  ;;  %v14747_v44 = vld [vmem:[#allocation6 + $0x2800] ss:$16 sps:$4 sm:$0xff]  }
 0x2ed   :  { %9664 = vmatpush1.bf16.msra.mxu1 %v14720_v45  ;;  %9624 = vmatprep.subr.bf16.mxu0 %v14725_v47  ;;  %v14750_v45 = vld [vmem:[#allocation6 + $0x2a00] ss:$16 sps:$4 sm:$0xff]   ;;  %v16640_v47 = vpack.c.bf16 %v159_v24, %v159_v24  ;;  %v14773_v24 = vld [vmem:[#allocation6 + $0x2884] ss:$16 sps:$4 sm:$0xff]  }
 0x2ee   :  { %9665 = vmatprep.subr.bf16.mxu1 %v14728_v57  ;;  %v16642_v57 = vpack.c.bf16 %v161_v25, %v161_v25  ;;  %v14776_v25 = vld [vmem:[#allocation6 + $0x2a84] ss:$16 sps:$4 sm:$0xff]  }
 0x2f0   :  { %9625 = vmatpush1.bf16.msra.mxu0 %v14723_v39  ;;  %v14755_v39 = vld [vmem:[#allocation6 + $0x2824] ss:$16 sps:$4 sm:$0xff]  }
 0x2f1   :  { %9666 = vmatpush1.bf16.msra.mxu1 %v14726_v12  ;;  %9626 = vmatprep.subr.bf16.mxu0 %v14731_v4  ;;  %v14758_v12 = vld [vmem:[#allocation6 + $0x2a24] ss:$16 sps:$4 sm:$0xff]   ;;  %v16644_v4 = vpack.c.bf16 %v164_v34, %v164_v34 }
 0x2f2   :  { %9667 = vmatprep.subr.bf16.mxu1 %v14734_v19  ;;  %v16646_v19 = vpack.c.bf16 %v166_v35, %v166_v35  ;;  %v14779_v34 = vld [vmem:[#allocation6 + $0x28a4] ss:$16 sps:$4 sm:$0xff]  }
 0x2f3   :  { %v14782_v35 = vld [vmem:[#allocation6 + $0x2aa4] ss:$16 sps:$4 sm:$0xff]  }
 0x2f4   :  { %9627 = vmatpush1.bf16.msra.mxu0 %v14729_v6  ;;  %16909 = vst [vmem:[#allocation21_spill] sm:$0xff] %v16646_v19  ;;  %v14753_v6 = vld [vmem:[#allocation6 + $0x2820] ss:$16 sps:$4 sm:$0xff]  }
 0x2f5   :  { %9668 = vmatpush1.bf16.msra.mxu1 %v14732_v56  ;;  %9628 = vmatprep.subr.bf16.mxu0 %v14737_v0  ;;  %v14756_v56 = vld [vmem:[#allocation6 + $0x2a20] ss:$16 sps:$4 sm:$0xff]   ;;  %v14761_v0 = vld [vmem:[#allocation6 + $0x2844] ss:$16 sps:$4 sm:$0xff]  }
 0x2f6   :  { %9669 = vmatprep.subr.bf16.mxu1 %v14740_v7  ;;  %v14764_v7 = vld [vmem:[#allocation6 + $0x2a44] ss:$16 sps:$4 sm:$0xff]  }
 0x2f8   :  { %9629 = vmatpush1.bf16.msra.mxu0 %v14735_v13  ;;  %v14759_v13 = vld [vmem:[#allocation6 + $0x2840] ss:$16 sps:$4 sm:$0xff]  }
 0x2f9   :  { %9670 = vmatpush1.bf16.msra.mxu1 %v14738_v16  ;;  %9630 = vmatprep.subr.bf16.mxu0 %v14743_v17  ;;  %v14762_v16 = vld [vmem:[#allocation6 + $0x2a40] ss:$16 sps:$4 sm:$0xff]   ;;  %v14767_v17 = vld [vmem:[#allocation6 + $0x2864] ss:$16 sps:$4 sm:$0xff]  }
 0x2fa   :  { %9671 = vmatprep.subr.bf16.mxu1 %v14746_v18  ;;  %v14770_v18 = vld [vmem:[#allocation6 + $0x2a64] ss:$16 sps:$4 sm:$0xff]  }
 0x2fc   :  { %9631 = vmatpush1.bf16.msra.mxu0 %v14741_v59  ;;  %v14765_v59 = vld [vmem:[#allocation6 + $0x2860] ss:$16 sps:$4 sm:$0xff]  }
 0x2fd   :  { %9672 = vmatpush1.bf16.msra.mxu1 %v14744_v23  ;;  %9682 = vmatprep.subr.bf16.mxu0 %v14749_v28  ;;  %v14768_v23 = vld [vmem:[#allocation6 + $0x2a60] ss:$16 sps:$4 sm:$0xff]  }
 0x2fe   :  { %9723 = vmatprep.subr.bf16.mxu1 %v14752_v30  ;;  %v14771_v28 = vld [vmem:[#allocation6 + $0x2880] ss:$16 sps:$4 sm:$0xff]  }
 0x2ff   :  { %9633 = vmatmul.mubr.bf16.vlgmr.msra.gmra.mrb[36].mxu0 %v16640_v47  ;;  %v14774_v30 = vld [vmem:[#allocation6 + $0x2a80] ss:$16 sps:$4 sm:$0xff]  }
 0x300   :  { %9674 = vmatmul.mubr.bf16.vlgmr.msra.gmra.mrb[36].mxu1 %v16642_v57  ;;  %9683 = vmatpush1.bf16.msra.mxu0 %v14747_v44  ;;  %v14777_v44 = vld [vmem:[#allocation6 + $0x28a0] ss:$16 sps:$4 sm:$0xff]  }
 0x301   :  { %9724 = vmatpush1.bf16.msra.mxu1 %v14750_v45  ;;  %9684 = vmatprep.subr.bf16.mxu0 %v14755_v39  ;;  %v14780_v45 = vld [vmem:[#allocation6 + $0x2aa0] ss:$16 sps:$4 sm:$0xff]   ;;  %v14785_v39 = vld [vmem:[#allocation6 + $0x28c4] ss:$16 sps:$4 sm:$0xff]  }
 0x302   :  { %9725 = vmatprep.subr.bf16.mxu1 %v14758_v12  ;;  %9714 = vmatprep.mubr.bf16.mxu0 %v16644_v4  ;;  %v14788_v12 = vld [vmem:[#allocation6 + $0x2ac4] ss:$16 sps:$4 sm:$0xff]  }
 0x303   :  { %9755 = vmatprep.mubr.bf16.mxu1 %v16646_v19 }
 0x304   :  { %9685 = vmatpush1.bf16.msra.mxu0 %v14753_v6 }
 0x305   :  { %9726 = vmatpush1.bf16.msra.mxu1 %v14756_v56  ;;  %9686 = vmatprep.subr.bf16.mxu0 %v14761_v0  ;;  %v14783_v0 = vld [vmem:[#allocation6 + $0x28c0] ss:$16 sps:$4 sm:$0xff]  }
 0x306   :  { %9727 = vmatprep.subr.bf16.mxu1 %v14764_v7  ;;  %v14786_v7 = vld [vmem:[#allocation6 + $0x2ac0] ss:$16 sps:$4 sm:$0xff]  }
 0x308   :  { %9687 = vmatpush1.bf16.msra.mxu0 %v14759_v13 }
 0x309   :  { %9728 = vmatpush1.bf16.msra.mxu1 %v14762_v16  ;;  %9688 = vmatprep.subr.bf16.mxu0 %v14767_v17 }
 0x30a   :  { %9729 = vmatprep.subr.bf16.mxu1 %v14770_v18 }
 0x30c   :  { %9689 = vmatpush1.bf16.msra.mxu0 %v14765_v59 }
 0x30d   :  { %9730 = vmatpush1.bf16.msra.mxu1 %v14768_v23  ;;  %9690 = vmatprep.subr.bf16.mxu0 %v14773_v24 }
 0x30e   :  { %9731 = vmatprep.subr.bf16.mxu1 %v14776_v25 }
 0x310   :  { %9691 = vmatpush1.bf16.msra.mxu0 %v14771_v28 }
 0x311   :  { %9732 = vmatpush1.bf16.msra.mxu1 %v14774_v30  ;;  %9692 = vmatprep.subr.bf16.mxu0 %v14779_v34  ;;  %v14791_v30 = vld [vmem:[#allocation6 + $0x28e4] ss:$16 sps:$4 sm:$0xff]  }
 0x312   :  { %9733 = vmatprep.subr.bf16.mxu1 %v14782_v35  ;;  %v9388_v6 = vpop.f32.mrb[24].mxu0  ;;  %v14794_v34 = vld [vmem:[#allocation6 + $0x2ae4] ss:$16 sps:$4 sm:$0xff]  }
 0x313   :  { %v9429_v56 = vpop.f32.mrb[24].mxu1  ;;  %v9389_v13 = vadd.f32 %v9388_v6, %v16636_v58  ;;  %v9390_v16 = vpop.f32.mrb[25].mxu0  ;;  %v14789_v58 = vld [vmem:[#allocation6 + $0x28e0] ss:$16 sps:$4 sm:$0xff]  }
 0x314   :  { %v9431_v17 = vpop.f32.mrb[25].mxu1  ;;  %v9391_v18 = vadd.f32 %v9390_v16, %v16638_v5  ;;  %v9392_v59 = vpop.f32.mrb[26].mxu0  ;;  %9693 = vmatpush1.bf16.msra.mxu0 %v14777_v44  ;;  %v14792_v6 = vld [vmem:[#allocation6 + $0x2ae0] ss:$16 sps:$4 sm:$0xff]   ;;  %v14797_v5 = vld [vmem:[#allocation6 + $0x2904] ss:$16 sps:$4 sm:$0xff]  }
 0x315   :  { %v9433_v23 = vpop.f32.mrb[26].mxu1  ;;  %9734 = vmatpush1.bf16.msra.mxu1 %v14780_v45  ;;  %v16654_v24 = vadd.f32 %v9429_v56, %v9389_v13  ;;  %v9393_v25 = vpop.f32.mrb[27].mxu0  ;;  %9694 = vmatprep.subr.bf16.mxu0 %v14785_v39  ;;  %v14800_v16 = vld [vmem:[#allocation6 + $0x2b04] ss:$16 sps:$4 sm:$0xff]   ;;  %v14795_v44 = vld [vmem:[#allocation6 + $0x2900] ss:$16 sps:$4 sm:$0xff]  }
 0x316   :  { %v9434_v28 = vpop.f32.mrb[27].mxu1  ;;  %9735 = vmatprep.subr.bf16.mxu1 %v14788_v12  ;;  %v16656_v35 = vadd.f32 %v9431_v17, %v9391_v18  ;;  %v14798_v45 = vld [vmem:[#allocation6 + $0x2b00] ss:$16 sps:$4 sm:$0xff]   ;;  %v14803_v39 = vld [vmem:[#allocation6 + $0x2924] ss:$16 sps:$4 sm:$0xff]  }
 0x317   :  { %v14806_v12 = vld [vmem:[#allocation6 + $0x2b24] ss:$16 sps:$4 sm:$0xff]   ;;  %v14801_v56 = vld [vmem:[#allocation6 + $0x2920] ss:$16 sps:$4 sm:$0xff]  }
 0x318   :  { %9695 = vmatpush1.bf16.msra.mxu0 %v14783_v0  ;;  %v14804_v13 = vld [vmem:[#allocation6 + $0x2b20] ss:$16 sps:$4 sm:$0xff]   ;;  %v14809_v0 = vld [vmem:[#allocation6 + $0x2944] ss:$16 sps:$4 sm:$0xff]  }
 0x319   :  { %9736 = vmatpush1.bf16.msra.mxu1 %v14786_v7  ;;  %9696 = vmatprep.subr.bf16.mxu0 %v14791_v30  ;;  %v14812_v7 = vld [vmem:[#allocation6 + $0x2b44] ss:$16 sps:$4 sm:$0xff]   ;;  %v14807_v17 = vld [vmem:[#allocation6 + $0x2940] ss:$16 sps:$4 sm:$0xff]  }
 0x31a   :  { %9737 = vmatprep.subr.bf16.mxu1 %v14794_v34  ;;  %v14810_v18 = vld [vmem:[#allocation6 + $0x2b40] ss:$16 sps:$4 sm:$0xff]   ;;  %v14815_v59 = vld [vmem:[#allocation6 + $0x2964] ss:$16 sps:$4 sm:$0xff]  }
 0x31b   :  { %v14818_v23 = vld [vmem:[#allocation6 + $0x2b64] ss:$16 sps:$4 sm:$0xff]   ;;  %v14813_v25 = vld [vmem:[#allocation6 + $0x2960] ss:$16 sps:$4 sm:$0xff]  }
 0x31c   :  { %9697 = vmatpush1.bf16.msra.mxu0 %v14789_v58  ;;  %v14816_v28 = vld [vmem:[#allocation6 + $0x2b60] ss:$16 sps:$4 sm:$0xff]   ;;  %v14821_v30 = vld [vmem:[#allocation6 + $0x2984] ss:$16 sps:$4 sm:$0xff]  }
 0x31d   :  { %9738 = vmatpush1.bf16.msra.mxu1 %v14792_v6  ;;  %9698 = vmatprep.subr.bf16.mxu0 %v14797_v5  ;;  %v14824_v34 = vld [vmem:[#allocation6 + $0x2b84] ss:$16 sps:$4 sm:$0xff]   ;;  %v14819_v58 = vld [vmem:[#allocation6 + $0x2980] ss:$16 sps:$4 sm:$0xff]  }
 0x31e   :  { %9739 = vmatprep.subr.bf16.mxu1 %v14800_v16  ;;  %v14822_v6 = vld [vmem:[#allocation6 + $0x2b80] ss:$16 sps:$4 sm:$0xff]   ;;  %v14827_v5 = vld [vmem:[#allocation6 + $0x29a4] ss:$16 sps:$4 sm:$0xff]  }
 0x31f   :  { %v14830_v16 = vld [vmem:[#allocation6 + $0x2ba4] ss:$16 sps:$4 sm:$0xff]  }
 0x320   :  { %9699 = vmatpush1.bf16.msra.mxu0 %v14795_v44  ;;  %v14825_v44 = vld [vmem:[#allocation6 + $0x29a0] ss:$16 sps:$4 sm:$0xff]  }
 0x321   :  { %9740 = vmatpush1.bf16.msra.mxu1 %v14798_v45  ;;  %9700 = vmatprep.subr.bf16.mxu0 %v14803_v39  ;;  %v14828_v45 = vld [vmem:[#allocation6 + $0x2ba0] ss:$16 sps:$4 sm:$0xff]   ;;  %v14833_v39 = vld [vmem:[#allocation6 + $0x29c4] ss:$16 sps:$4 sm:$0xff]  }
 0x322   :  { %9741 = vmatprep.subr.bf16.mxu1 %v14806_v12  ;;  %v14836_v12 = vld [vmem:[#allocation6 + $0x2bc4] ss:$16 sps:$4 sm:$0xff]  }
 0x324   :  { %9701 = vmatpush1.bf16.msra.mxu0 %v14801_v56  ;;  %v14831_v56 = vld [vmem:[#allocation6 + $0x29c0] ss:$16 sps:$4 sm:$0xff]  }
 0x325   :  { %9742 = vmatpush1.bf16.msra.mxu1 %v14804_v13  ;;  %9702 = vmatprep.subr.bf16.mxu0 %v14809_v0  ;;  %v14834_v13 = vld [vmem:[#allocation6 + $0x2bc0] ss:$16 sps:$4 sm:$0xff]   ;;  %v14839_v0 = vld [vmem:[#allocation6 + $0x29e4] ss:$16 sps:$4 sm:$0xff]  }
 0x326   :  { %9743 = vmatprep.subr.bf16.mxu1 %v14812_v7  ;;  %v14842_v7 = vld [vmem:[#allocation6 + $0x2be4] ss:$16 sps:$4 sm:$0xff]  }
 0x328   :  { %9703 = vmatpush1.bf16.msra.mxu0 %v14807_v17  ;;  %v14837_v17 = vld [vmem:[#allocation6 + $0x29e0] ss:$16 sps:$4 sm:$0xff]  }
 0x329   :  { %9744 = vmatpush1.bf16.msra.mxu1 %v14810_v18  ;;  %9704 = vmatprep.subr.bf16.mxu0 %v14815_v59  ;;  %v14840_v18 = vld [vmem:[#allocation6 + $0x2be0] ss:$16 sps:$4 sm:$0xff]   ;;  %v163_v59 = vld [vmem:[#allocation3 + $0x140] sm:$0xff] }
 0x32a   :  { %9745 = vmatprep.subr.bf16.mxu1 %v14818_v23  ;;  %v165_v23 = vld [vmem:[#allocation3 + $0x150] sm:$0xff] }
 0x32c   :  { %9705 = vmatpush1.bf16.msra.mxu0 %v14813_v25  ;;  %v14845_v25 = vld [vmem:[#allocation6 + $0x2c04] ss:$16 sps:$4 sm:$0xff]  }
 0x32d   :  { %9746 = vmatpush1.bf16.msra.mxu1 %v14816_v28  ;;  %9706 = vmatprep.subr.bf16.mxu0 %v14821_v30  ;;  %v14848_v28 = vld [vmem:[#allocation6 + $0xc] ss:$16 sps:$4 sm:$0xff]   ;;  %v14843_v30 = vld [vmem:[#allocation6 + $0x2c00] ss:$16 sps:$4 sm:$0xff]  }
 0x32e   :  { %9747 = vmatprep.subr.bf16.mxu1 %v14824_v34  ;;  %v14846_v34 = vld [vmem:[#allocation6 + $0x8] ss:$16 sps:$4 sm:$0xff]  }
 0x330   :  { %9707 = vmatpush1.bf16.msra.mxu0 %v14819_v58  ;;  %v16658_v58 = vpack.c.bf16 %v163_v59, %v163_v59  ;;  %v14864_v59 = vld [vmem:[#allocation6 + $0x68] ss:$16 sps:$4 sm:$0xff]  }
 0x331   :  { %9748 = vmatpush1.bf16.msra.mxu1 %v14822_v6  ;;  %9708 = vmatprep.subr.bf16.mxu0 %v14827_v5  ;;  %v16660_v6 = vpack.c.bf16 %v165_v23, %v165_v23  ;;  %v14851_v5 = vld [vmem:[#allocation6 + $0x2c24] ss:$16 sps:$4 sm:$0xff]  }
 0x332   :  { %9749 = vmatprep.subr.bf16.mxu1 %v14830_v16  ;;  %16910 = vst [vmem:[#allocation22_spill] sm:$0xff] %v16658_v58  ;;  %v14854_v16 = vld [vmem:[#allocation6 + $0x2c] ss:$16 sps:$4 sm:$0xff]   ;;  %v14869_v23 = vld [vmem:[#allocation6 + $0x2c84] ss:$16 sps:$4 sm:$0xff]  }
 0x333   :  { %16911 = vst [vmem:[#allocation23_spill] sm:$0xff] %v16660_v6 }
 0x334   :  { %9709 = vmatpush1.bf16.msra.mxu0 %v14825_v44  ;;  %v14849_v44 = vld [vmem:[#allocation6 + $0x2c20] ss:$16 sps:$4 sm:$0xff]  }
 0x335   :  { %9750 = vmatpush1.bf16.msra.mxu1 %v14828_v45  ;;  %9710 = vmatprep.subr.bf16.mxu0 %v14833_v39  ;;  %v14852_v45 = vld [vmem:[#allocation6 + $0x28] ss:$16 sps:$4 sm:$0xff]   ;;  %v14857_v39 = vld [vmem:[#allocation6 + $0x2c44] ss:$16 sps:$4 sm:$0xff]  }
 0x336   :  { %9751 = vmatprep.subr.bf16.mxu1 %v14836_v12  ;;  %v14860_v12 = vld [vmem:[#allocation6 + $0x4c] ss:$16 sps:$4 sm:$0xff]  }
 0x338   :  { %9711 = vmatpush1.bf16.msra.mxu0 %v14831_v56  ;;  %v16905_v56 = vmov 0  }
 0x339   :  { %9752 = vmatpush1.bf16.msra.mxu1 %v14834_v13  ;;  %9712 = vmatprep.subr.bf16.mxu0 %v14839_v0  ;;  %v14855_v13 = vld [vmem:[#allocation6 + $0x2c40] ss:$16 sps:$4 sm:$0xff]   ;;  %v14858_v0 = vld [vmem:[#allocation6 + $0x48] ss:$16 sps:$4 sm:$0xff]  }
 0x33a   :  { %9753 = vmatprep.subr.bf16.mxu1 %v14842_v7  ;;  %v14863_v7 = vld [vmem:[#allocation6 + $0x2c64] ss:$16 sps:$4 sm:$0xff]  }
 0x33c   :  { %9713 = vmatpush1.bf16.msra.mxu0 %v14837_v17  ;;  %v14866_v17 = vld [vmem:[#allocation6 + $0x6c] ss:$16 sps:$4 sm:$0xff]  }
 0x33d   :  { %9754 = vmatpush1.bf16.msra.mxu1 %v14840_v18  ;;  %9764 = vmatprep.subr.bf16.mxu0 %v14845_v25  ;;  %v14861_v18 = vld [vmem:[#allocation6 + $0x2c60] ss:$16 sps:$4 sm:$0xff]   ;;  %v14872_v25 = vld [vmem:[#allocation6 + $0x8c] ss:$16 sps:$4 sm:$0xff]  }
 0x33e   :  { %9805 = vmatprep.subr.bf16.mxu1 %v14848_v28  ;;  %v14867_v28 = vld [vmem:[#allocation6 + $0x2c80] ss:$16 sps:$4 sm:$0xff]  }
 0x33f   :  { %9715 = vmatmul.mubr.bf16.vlgmr.msra.gmra.mrb[40].mxu0 %v16658_v58 }
 0x340   :  { %9756 = vmatmul.mubr.bf16.vlgmr.msra.gmra.mrb[40].mxu1 %v16660_v6  ;;  %9765 = vmatpush1.bf16.msra.mxu0 %v14843_v30  ;;  %v14875_v30 = vld [vmem:[#allocation6 + $0x2ca4] ss:$16 sps:$4 sm:$0xff]   ;;  %v14888_v6 = vld [vmem:[#allocation6 + $0xec] ss:$16 sps:$4 sm:$0xff]  }
 0x341   :  { %9806 = vmatpush1.bf16.msra.mxu1 %v14846_v34  ;;  %9766 = vmatprep.subr.bf16.mxu0 %v14851_v5  ;;  %v14878_v34 = vld [vmem:[#allocation6 + $0xac] ss:$16 sps:$4 sm:$0xff]   ;;  %v14873_v5 = vld [vmem:[#allocation6 + $0x2ca0] ss:$16 sps:$4 sm:$0xff]  }
 0x342   :  { %9807 = vmatprep.subr.bf16.mxu1 %v14854_v16  ;;  %9796 = vmatprep.mubr.bf16.mxu0 %v16905_v56  ;;  %v14876_v16 = vld [vmem:[#allocation6 + $0xa8] ss:$16 sps:$4 sm:$0xff]  }
 0x343   :  { %9837 = vmatprep.mubr.bf16.mxu1 %v16492_v49  ;;  %v14870_v49 = vld [vmem:[#allocation6 + $0x88] ss:$16 sps:$4 sm:$0xff]  }
 0x344   :  { %9767 = vmatpush1.bf16.msra.mxu0 %v14849_v44  ;;  %v14881_v44 = vld [vmem:[#allocation6 + $0x2cc4] ss:$16 sps:$4 sm:$0xff]  }
 0x345   :  { %9808 = vmatpush1.bf16.msra.mxu1 %v14852_v45  ;;  %9768 = vmatprep.subr.bf16.mxu0 %v14857_v39  ;;  %v14884_v45 = vld [vmem:[#allocation6 + $0xcc] ss:$16 sps:$4 sm:$0xff]  }
 0x346   :  { %9809 = vmatprep.subr.bf16.mxu1 %v14860_v12 }
 0x348   :  { %9769 = vmatpush1.bf16.msra.mxu0 %v14855_v13  ;;  %v14879_v13 = vld [vmem:[#allocation6 + $0x2cc0] ss:$16 sps:$4 sm:$0xff]  }
 0x349   :  { %9810 = vmatpush1.bf16.msra.mxu1 %v14858_v0  ;;  %9770 = vmatprep.subr.bf16.mxu0 %v14863_v7  ;;  %v14882_v0 = vld [vmem:[#allocation6 + $0xc8] ss:$16 sps:$4 sm:$0xff]   ;;  %v1604_v7 = vld [vmem:[#allocation6 + $0x2ce0] sm:$0x77] }
 0x34a   :  { %9811 = vmatprep.subr.bf16.mxu1 %v14866_v17  ;;  %v13549_v58 = vcombine.low %v1604_v7, %v1604_v7 }
 0x34c   :  { %9771 = vmatpush1.bf16.msra.mxu0 %v14861_v18 }
 0x34d   :  { %9812 = vmatpush1.bf16.msra.mxu1 %v14864_v59  ;;  %9772 = vmatprep.subr.bf16.mxu0 %v14869_v23 }
 0x34e   :  { %9813 = vmatprep.subr.bf16.mxu1 %v14872_v25 }
 0x350   :  { %9773 = vmatpush1.bf16.msra.mxu0 %v14867_v28 }
 0x351   :  { %9814 = vmatpush1.bf16.msra.mxu1 %v14870_v49  ;;  %9774 = vmatprep.subr.bf16.mxu0 %v14875_v30 }
 0x352   :  { %9815 = vmatprep.subr.bf16.mxu1 %v14878_v34  ;;  %v9470_v39 = vpop.f32.mrb[28].mxu0  ;;  %v13550_v34 = vcombine.high %v1604_v7, %v1604_v7  ;;  %v14907_v7 = vld [vmem:[#allocation6 + $0x24c] ss:$16 sps:$4 sm:$0xff]  }
 0x353   :  { %v9511_v12 = vpop.f32.mrb[28].mxu1  ;;  %v9471_v17 = vadd.f32 %v9470_v39, %v16654_v24  ;;  %v9472_v18 = vpop.f32.mrb[29].mxu0  ;;  %v14886_v24 = vld [vmem:[#allocation6 + $0xe8] ss:$16 sps:$4 sm:$0xff]  }
 0x354   :  { %v9513_v59 = vpop.f32.mrb[29].mxu1  ;;  %v9473_v23 = vadd.f32 %v9472_v18, %v16656_v35  ;;  %v9474_v25 = vpop.f32.mrb[30].mxu0  ;;  %9775 = vmatpush1.bf16.msra.mxu0 %v14873_v5  ;;  %v167_v35 = vld [vmem:[#allocation3 + $0x160] sm:$0xff] }
 0x355   :  { %v9515_v56 = vpop.f32.mrb[30].mxu1  ;;  %9816 = vmatpush1.bf16.msra.mxu1 %v14876_v16  ;;  %v16668_v28 = vadd.f32 %v9511_v12, %v9471_v17  ;;  %v9475_v49 = vpop.f32.mrb[31].mxu0  ;;  %9776 = vmatprep.subr.bf16.mxu0 %v14881_v44  ;;  %v14892_v5 = vld [vmem:[#allocation6 + $0x10c] ss:$16 sps:$4 sm:$0xff]   ;;  %v14890_v39 = vld [vmem:[#allocation6 + $0x108] ss:$16 sps:$4 sm:$0xff]  }
 0x356   :  { %v9516_v30 = vpop.f32.mrb[31].mxu1  ;;  %9817 = vmatprep.subr.bf16.mxu1 %v14884_v45  ;;  %v16670_v19 = vadd.f32 %v9513_v59, %v9473_v23  ;;  %v8851_v56 = vsel %vm8849_vm0, %v13549_v58, 0  ;;  %v14895_v16 = vld [vmem:[#allocation6 + $0x20c] ss:$16 sps:$4 sm:$0xff]   ;;  %v14893_v44 = vld [vmem:[#allocation6 + $0x208] ss:$16 sps:$4 sm:$0xff]   ;;  %v16674_v45 = vpack.c.bf16 %v167_v35, %v167_v35 }
 0x357   :  { %v14898_v12 = vld [vmem:[#allocation6 + $0x12c] ss:$16 sps:$4 sm:$0xff]   ;;  %v14899_v58 = vld [vmem:[#allocation6 + $0x228] ss:$16 sps:$4 sm:$0xff]  }
 0x358   :  { %9777 = vmatpush1.bf16.msra.mxu0 %v14879_v13  ;;  %v14901_v13 = vld [vmem:[#allocation6 + $0x22c] ss:$16 sps:$4 sm:$0xff]   ;;  %v14902_v17 = vld [vmem:[#allocation6 + $0x148] ss:$16 sps:$4 sm:$0xff]  }
 0x359   :  { %9818 = vmatpush1.bf16.msra.mxu1 %v14882_v0  ;;  %13553 = vmatprep.subr.msk.bf16.mxu0 %vm8849_vm0, %v13550_v34  ;;  %v14904_v0 = vld [vmem:[#allocation6 + $0x14c] ss:$16 sps:$4 sm:$0xff]   ;;  %v14905_v18 = vld [vmem:[#allocation6 + $0x248] ss:$16 sps:$4 sm:$0xff]  }
 0x35a   :  { %9819 = vmatprep.subr.bf16.mxu1 %v14888_v6  ;;  %v14896_v6 = vld [vmem:[#allocation6 + $0x128] ss:$16 sps:$4 sm:$0xff]   ;;  %v14910_v59 = vld [vmem:[#allocation6 + $0x16c] ss:$16 sps:$4 sm:$0xff]  }
 0x35b   :  { %v14913_v23 = vld [vmem:[#allocation6 + $0x26c] ss:$16 sps:$4 sm:$0xff]   ;;  %v14908_v25 = vld [vmem:[#allocation6 + $0x168] ss:$16 sps:$4 sm:$0xff]  }
 0x35c   :  { %9779 = vmatpush1.bf16.msra.mxu0 %v8851_v56  ;;  %v14911_v49 = vld [vmem:[#allocation6 + $0x268] ss:$16 sps:$4 sm:$0xff]   ;;  %v14916_v30 = vld [vmem:[#allocation6 + $0x18c] ss:$16 sps:$4 sm:$0xff]  }
 0x35d   :  { %9820 = vmatpush1.bf16.msra.mxu1 %v14886_v24  ;;  %9846 = vmatprep.subr.bf16.mxu0 %v14895_v16  ;;  %v14919_v34 = vld [vmem:[#allocation6 + $0x28c] ss:$16 sps:$4 sm:$0xff]   ;;  %v14914_v24 = vld [vmem:[#allocation6 + $0x188] ss:$16 sps:$4 sm:$0xff]  }
 0x35e   :  { %9821 = vmatprep.subr.bf16.mxu1 %v14892_v5  ;;  %v14922_v35 = vld [vmem:[#allocation6 + $0x1ac] ss:$16 sps:$4 sm:$0xff]   ;;  %v14920_v5 = vld [vmem:[#allocation6 + $0x1a8] ss:$16 sps:$4 sm:$0xff]  }
 0x35f   :  { %13554 = vmatmul.mubr.msk.bf16.vlgmr.msra.gmra.mrb[44].mxu0 %vm8845_vm1, %v16674_v45  ;;  %v14925_v56 = vld [vmem:[#allocation6 + $0x2ac] ss:$16 sps:$4 sm:$0xff]   ;;  %v14923_v16 = vld [vmem:[#allocation6 + $0x2a8] ss:$16 sps:$4 sm:$0xff]  }
 0x360   :  { %9847 = vmatpush1.bf16.msra.mxu0 %v14893_v44  ;;  %9878 = vmatprep.mubr.bf16.mxu0 %v16494_v52  ;;  %v14917_v52 = vld [vmem:[#allocation6 + $0x288] ss:$16 sps:$4 sm:$0xff]   ;;  %v14931_v44 = vld [vmem:[#allocation6 + $0x2cc] ss:$16 sps:$4 sm:$0xff]  }
 0x361   :  { %9822 = vmatpush1.bf16.msra.mxu1 %v14890_v39  ;;  %9848 = vmatprep.subr.bf16.mxu0 %v14901_v13  ;;  %v14928_v39 = vld [vmem:[#allocation6 + $0x1cc] ss:$16 sps:$4 sm:$0xff]   ;;  %v14929_v13 = vld [vmem:[#allocation6 + $0x2c8] ss:$16 sps:$4 sm:$0xff]  }
 0x362   :  { %9823 = vmatprep.subr.bf16.mxu1 %v14898_v12  ;;  %v14926_v12 = vld [vmem:[#allocation6 + $0x1c8] ss:$16 sps:$4 sm:$0xff]  }
 0x364   :  { %9849 = vmatpush1.bf16.msra.mxu0 %v14899_v58  ;;  %v14937_v58 = vld [vmem:[#allocation6 + $0x2ec] ss:$16 sps:$4 sm:$0xff]  }
 0x365   :  { %9824 = vmatpush1.bf16.msra.mxu1 %v14896_v6  ;;  %9850 = vmatprep.subr.bf16.mxu0 %v14907_v7  ;;  %v14934_v6 = vld [vmem:[#allocation6 + $0x1ec] ss:$16 sps:$4 sm:$0xff]   ;;  %v14935_v7 = vld [vmem:[#allocation6 + $0x2e8] ss:$16 sps:$4 sm:$0xff]  }
 0x366   :  { %9825 = vmatprep.subr.bf16.mxu1 %v14904_v0  ;;  %v14932_v0 = vld [vmem:[#allocation6 + $0x1e8] ss:$16 sps:$4 sm:$0xff]  }
 0x368   :  { %9851 = vmatpush1.bf16.msra.mxu0 %v14905_v18  ;;  %v14943_v18 = vld [vmem:[#allocation6 + $0x40c] ss:$16 sps:$4 sm:$0xff]  }
 0x369   :  { %9826 = vmatpush1.bf16.msra.mxu1 %v14902_v17  ;;  %9852 = vmatprep.subr.bf16.mxu0 %v14913_v23  ;;  %v14940_v17 = vld [vmem:[#allocation6 + $0x30c] ss:$16 sps:$4 sm:$0xff]   ;;  %v14941_v23 = vld [vmem:[#allocation6 + $0x408] ss:$16 sps:$4 sm:$0xff]  }
 0x36a   :  { %9827 = vmatprep.subr.bf16.mxu1 %v14910_v59  ;;  %v14938_v59 = vld [vmem:[#allocation6 + $0x308] ss:$16 sps:$4 sm:$0xff]  }
 0x36c   :  { %9853 = vmatpush1.bf16.msra.mxu0 %v14911_v49  ;;  %v14949_v49 = vld [vmem:[#allocation6 + $0x42c] ss:$16 sps:$4 sm:$0xff]  }
 0x36d   :  { %9828 = vmatpush1.bf16.msra.mxu1 %v14908_v25  ;;  %9854 = vmatprep.subr.bf16.mxu0 %v14919_v34  ;;  %v14946_v25 = vld [vmem:[#allocation6 + $0x32c] ss:$16 sps:$4 sm:$0xff]   ;;  %v14947_v34 = vld [vmem:[#allocation6 + $0x428] ss:$16 sps:$4 sm:$0xff]  }
 0x36e   :  { %9829 = vmatprep.subr.bf16.mxu1 %v14916_v30  ;;  %v14944_v30 = vld [vmem:[#allocation6 + $0x328] ss:$16 sps:$4 sm:$0xff]  }
 0x370   :  { %9855 = vmatpush1.bf16.msra.mxu0 %v14917_v52  ;;  %v14955_v52 = vld [vmem:[#allocation6 + $0x44c] ss:$16 sps:$4 sm:$0xff]  }
 0x371   :  { %9830 = vmatpush1.bf16.msra.mxu1 %v14914_v24  ;;  %9856 = vmatprep.subr.bf16.mxu0 %v14925_v56  ;;  %v14952_v24 = vld [vmem:[#allocation6 + $0x34c] ss:$16 sps:$4 sm:$0xff]   ;;  %v14953_v56 = vld [vmem:[#allocation6 + $0x448] ss:$16 sps:$4 sm:$0xff]  }
 0x372   :  { %9831 = vmatprep.subr.bf16.mxu1 %v14922_v35  ;;  %v14950_v35 = vld [vmem:[#allocation6 + $0x348] ss:$16 sps:$4 sm:$0xff]  }
 0x374   :  { %9857 = vmatpush1.bf16.msra.mxu0 %v14923_v16  ;;  %v14961_v16 = vld [vmem:[#allocation6 + $0x46c] ss:$16 sps:$4 sm:$0xff]  }
 0x375   :  { %9832 = vmatpush1.bf16.msra.mxu1 %v14920_v5  ;;  %9858 = vmatprep.subr.bf16.mxu0 %v14931_v44  ;;  %v14958_v5 = vld [vmem:[#allocation6 + $0x36c] ss:$16 sps:$4 sm:$0xff]  }
 0x376   :  { %9833 = vmatprep.subr.bf16.mxu1 %v14928_v39  ;;  %v14959_v39 = vld [vmem:[#allocation6 + $0x468] ss:$16 sps:$4 sm:$0xff]   ;;  %v14964_v44 = vld [vmem:[#allocation6 + $0x38c] ss:$16 sps:$4 sm:$0xff]  }
 0x378   :  { %9859 = vmatpush1.bf16.msra.mxu0 %v14929_v13  ;;  %v14962_v13 = vld [vmem:[#allocation6 + $0x388] ss:$16 sps:$4 sm:$0xff]  }
 0x379   :  { %9834 = vmatpush1.bf16.msra.mxu1 %v14926_v12  ;;  %9860 = vmatprep.subr.bf16.mxu0 %v14937_v58  ;;  %v14967_v12 = vld [vmem:[#allocation6 + $0x48c] ss:$16 sps:$4 sm:$0xff]  }
 0x37a   :  { %9835 = vmatprep.subr.bf16.mxu1 %v14934_v6  ;;  %v14970_v6 = vld [vmem:[#allocation6 + $0x3ac] ss:$16 sps:$4 sm:$0xff]  }
 0x37b   :  { %v14973_v58 = vld [vmem:[#allocation6 + $0x4ac] ss:$16 sps:$4 sm:$0xff]  }
 0x37c   :  { %9861 = vmatpush1.bf16.msra.mxu0 %v14935_v7  ;;  %v14971_v7 = vld [vmem:[#allocation6 + $0x4a8] ss:$16 sps:$4 sm:$0xff]  }
 0x37d   :  { %9836 = vmatpush1.bf16.msra.mxu1 %v14932_v0  ;;  %9862 = vmatprep.subr.bf16.mxu0 %v14940_v17  ;;  %v14968_v0 = vld [vmem:[#allocation6 + $0x3a8] ss:$16 sps:$4 sm:$0xff]   ;;  %v14976_v17 = vld [vmem:[#allocation6 + $0x3cc] ss:$16 sps:$4 sm:$0xff]  }
 0x37e   :  { %9887 = vmatprep.subr.bf16.mxu1 %v14943_v18  ;;  %v14979_v18 = vld [vmem:[#allocation6 + $0x4cc] ss:$16 sps:$4 sm:$0xff]  }
 0x380   :  { %9838 = vmatmul.mubr.bf16.vlgmr.msra.gmra.mrb[44].mxu1 %v16498_v8  ;;  %9863 = vmatpush1.bf16.msra.mxu0 %v14938_v59  ;;  %v14956_v8 = vld [vmem:[#allocation6 + $0x368] ss:$16 sps:$4 sm:$0xff]  }
 0x381   :  { %9888 = vmatpush1.bf16.msra.mxu1 %v14941_v23  ;;  %9864 = vmatprep.subr.bf16.mxu0 %v14946_v25  ;;  %v14974_v25 = vld [vmem:[#allocation6 + $0x3c8] ss:$16 sps:$4 sm:$0xff]  }
 0x382   :  { %9889 = vmatprep.subr.bf16.mxu1 %v14949_v49  ;;  %9919 = vmatprep.mubr.bf16.mxu1 %v16504_v37  ;;  %v14965_v37 = vld [vmem:[#allocation6 + $0x488] ss:$16 sps:$4 sm:$0xff]  }
 0x383   :  { %v14977_v49 = vld [vmem:[#allocation6 + $0x4c8] ss:$16 sps:$4 sm:$0xff]  }
 0x384   :  { %9865 = vmatpush1.bf16.msra.mxu0 %v14944_v30 }
 0x385   :  { %9890 = vmatpush1.bf16.msra.mxu1 %v14947_v34  ;;  %9866 = vmatprep.subr.bf16.mxu0 %v14952_v24 }
 0x386   :  { %9891 = vmatprep.subr.bf16.mxu1 %v14955_v52 }
 0x388   :  { %9867 = vmatpush1.bf16.msra.mxu0 %v14950_v35 }
 0x389   :  { %9892 = vmatpush1.bf16.msra.mxu1 %v14953_v56  ;;  %9868 = vmatprep.subr.bf16.mxu0 %v14958_v5 }
 0x38a   :  { %9893 = vmatprep.subr.bf16.mxu1 %v14961_v16 }
 0x38c   :  { %9869 = vmatpush1.bf16.msra.mxu0 %v14956_v8 }
 0x38d   :  { %9894 = vmatpush1.bf16.msra.mxu1 %v14959_v39  ;;  %9870 = vmatprep.subr.bf16.mxu0 %v14964_v44  ;;  %v14982_v39 = vld [vmem:[#allocation6 + $0x3ec] ss:$16 sps:$4 sm:$0xff]  }
 0x38e   :  { %9895 = vmatprep.subr.bf16.mxu1 %v14967_v12  ;;  %v14985_v44 = vld [vmem:[#allocation6 + $0x4ec] ss:$16 sps:$4 sm:$0xff]  }
 0x390   :  { %9871 = vmatpush1.bf16.msra.mxu0 %v14962_v13  ;;  %v14983_v13 = vld [vmem:[#allocation6 + $0x4e8] ss:$16 sps:$4 sm:$0xff]  }
 0x391   :  { %9896 = vmatpush1.bf16.msra.mxu1 %v14965_v37  ;;  %9872 = vmatprep.subr.bf16.mxu0 %v14970_v6  ;;  %v14991_v37 = vld [vmem:[#allocation6 + $0x60c] ss:$16 sps:$4 sm:$0xff]   ;;  %v14986_v6 = vld [vmem:[#allocation6 + $0x508] ss:$16 sps:$4 sm:$0xff]  }
 0x392   :  { %9897 = vmatprep.subr.bf16.mxu1 %v14973_v58  ;;  %v9552_v59 = vpop.f32.mrb[32].mxu0  ;;  %v14989_v58 = vld [vmem:[#allocation6 + $0x608] ss:$16 sps:$4 sm:$0xff]  }
 0x393   :  { %v9593_v23 = vpop.f32.mrb[32].mxu1  ;;  %v9553_v30 = vadd.f32 %v9552_v59, %v16668_v28  ;;  %v9554_v34 = vpop.f32.mrb[33].mxu0  ;;  %v14980_v28 = vld [vmem:[#allocation6 + $0x3e8] ss:$16 sps:$4 sm:$0xff]   ;;  %v15000_v59 = vld [vmem:[#allocation6 + $0x54c] ss:$16 sps:$4 sm:$0xff]  }
 0x394   :  { %v9595_v24 = vpop.f32.mrb[33].mxu1  ;;  %v9555_v52 = vadd.f32 %v9554_v34, %v16670_v19  ;;  %v9556_v35 = vpop.f32.mrb[34].mxu0  ;;  %9873 = vmatpush1.bf16.msra.mxu0 %v14968_v0  ;;  %v14988_v19 = vld [vmem:[#allocation6 + $0x50c] ss:$16 sps:$4 sm:$0xff]  }
 0x395   :  { %v9597_v56 = vpop.f32.mrb[34].mxu1  ;;  %9898 = vmatpush1.bf16.msra.mxu1 %v14971_v7  ;;  %v16683_v5 = vadd.f32 %v9593_v23, %v9553_v30  ;;  %v9557_v16 = vpop.f32.mrb[35].mxu0  ;;  %9874 = vmatprep.subr.bf16.mxu0 %v14976_v17  ;;  %v14994_v0 = vld [vmem:[#allocation6 + $0x52c] ss:$16 sps:$4 sm:$0xff]   ;;  %v14992_v17 = vld [vmem:[#allocation6 + $0x528] ss:$16 sps:$4 sm:$0xff]  }
 0x396   :  { %v9598_v8 = vpop.f32.mrb[35].mxu1  ;;  %9899 = vmatprep.subr.bf16.mxu1 %v14979_v18  ;;  %v16685_v12 = vadd.f32 %v9595_v24, %v9555_v52  ;;  %v14997_v7 = vld [vmem:[#allocation6 + $0x62c] ss:$16 sps:$4 sm:$0xff]   ;;  %v14995_v18 = vld [vmem:[#allocation6 + $0x628] ss:$16 sps:$4 sm:$0xff]  }
 0x397   :  { %v15003_v23 = vld [vmem:[#allocation6 + $0x64c] ss:$16 sps:$4 sm:$0xff]   ;;  %v15007_v24 = vld [vmem:[#allocation6 + $0x668] ss:$16 sps:$4 sm:$0xff]  }
 0x398   :  { %9875 = vmatpush1.bf16.msra.mxu0 %v14974_v25  ;;  %v14998_v25 = vld [vmem:[#allocation6 + $0x548] ss:$16 sps:$4 sm:$0xff]   ;;  %v15006_v30 = vld [vmem:[#allocation6 + $0x56c] ss:$16 sps:$4 sm:$0xff]  }
 0x399   :  { %9900 = vmatpush1.bf16.msra.mxu1 %v14977_v49  ;;  %9876 = vmatprep.subr.bf16.mxu0 %v14982_v39  ;;  %v15001_v49 = vld [vmem:[#allocation6 + $0x648] ss:$16 sps:$4 sm:$0xff]   ;;  %v15009_v34 = vld [vmem:[#allocation6 + $0x66c] ss:$16 sps:$4 sm:$0xff]  }
 0x39a   :  { %9901 = vmatprep.subr.bf16.mxu1 %v14985_v44  ;;  %v15012_v52 = vld [vmem:[#allocation6 + $0x58c] ss:$16 sps:$4 sm:$0xff]   ;;  %v15010_v56 = vld [vmem:[#allocation6 + $0x588] ss:$16 sps:$4 sm:$0xff]  }
 0x39b   :  { %v15015_v35 = vld [vmem:[#allocation6 + $0x68c] ss:$16 sps:$4 sm:$0xff]   ;;  %v15016_v39 = vld [vmem:[#allocation6 + $0x5a8] ss:$16 sps:$4 sm:$0xff]  }
 0x39c   :  { %9877 = vmatpush1.bf16.msra.mxu0 %v14980_v28  ;;  %v15018_v16 = vld [vmem:[#allocation6 + $0x5ac] ss:$16 sps:$4 sm:$0xff]   ;;  %v15019_v44 = vld [vmem:[#allocation6 + $0x6a8] ss:$16 sps:$4 sm:$0xff]  }
 0x39d   :  { %9902 = vmatpush1.bf16.msra.mxu1 %v14983_v13  ;;  %9928 = vmatprep.subr.bf16.mxu0 %v14991_v37  ;;  %v15021_v8 = vld [vmem:[#allocation6 + $0x6ac] ss:$16 sps:$4 sm:$0xff]   ;;  %v15025_v37 = vld [vmem:[#allocation6 + $0x6c8] ss:$16 sps:$4 sm:$0xff]  }
 0x39e   :  { %9903 = vmatprep.subr.bf16.mxu1 %v14988_v19  ;;  %v15024_v28 = vld [vmem:[#allocation6 + $0x5cc] ss:$16 sps:$4 sm:$0xff]   ;;  %v15022_v19 = vld [vmem:[#allocation6 + $0x5c8] ss:$16 sps:$4 sm:$0xff]  }
 0x39f   :  { %9879 = vmatmul.mubr.bf16.vlgmr.msra.gmra.mrb[48].mxu0 %v16500_v9  ;;  %v15004_v9 = vld [vmem:[#allocation6 + $0x568] ss:$16 sps:$4 sm:$0xff]   ;;  %v15027_v13 = vld [vmem:[#allocation6 + $0x6cc] ss:$16 sps:$4 sm:$0xff]  }
 0x3a0   :  { %9929 = vmatpush1.bf16.msra.mxu0 %v14989_v58  ;;  %9960 = vmatprep.mubr.bf16.mxu0 %v16506_v40  ;;  %v15013_v40 = vld [vmem:[#allocation6 + $0x688] ss:$16 sps:$4 sm:$0xff]   ;;  %v15033_v58 = vld [vmem:[#allocation6 + $0x6ec] ss:$16 sps:$4 sm:$0xff]  }
 0x3a1   :  { %9904 = vmatpush1.bf16.msra.mxu1 %v14986_v6  ;;  %9930 = vmatprep.subr.bf16.mxu0 %v14997_v7  ;;  %v15030_v6 = vld [vmem:[#allocation6 + $0x5ec] ss:$16 sps:$4 sm:$0xff]   ;;  %v15031_v7 = vld [vmem:[#allocation6 + $0x6e8] ss:$16 sps:$4 sm:$0xff]  }
 0x3a2   :  { %9905 = vmatprep.subr.bf16.mxu1 %v14994_v0  ;;  %v15028_v0 = vld [vmem:[#allocation6 + $0x5e8] ss:$16 sps:$4 sm:$0xff]  }
 0x3a4   :  { %9931 = vmatpush1.bf16.msra.mxu0 %v14995_v18  ;;  %v15039_v18 = vld [vmem:[#allocation6 + $0x80c] ss:$16 sps:$4 sm:$0xff]  }
 0x3a5   :  { %9906 = vmatpush1.bf16.msra.mxu1 %v14992_v17  ;;  %9932 = vmatprep.subr.bf16.mxu0 %v15003_v23  ;;  %v15036_v17 = vld [vmem:[#allocation6 + $0x70c] ss:$16 sps:$4 sm:$0xff]   ;;  %v15037_v23 = vld [vmem:[#allocation6 + $0x808] ss:$16 sps:$4 sm:$0xff]  }
 0x3a6   :  { %9907 = vmatprep.subr.bf16.mxu1 %v15000_v59  ;;  %v15034_v59 = vld [vmem:[#allocation6 + $0x708] ss:$16 sps:$4 sm:$0xff]  }
 0x3a8   :  { %9933 = vmatpush1.bf16.msra.mxu0 %v15001_v49  ;;  %v15045_v49 = vld [vmem:[#allocation6 + $0x82c] ss:$16 sps:$4 sm:$0xff]  }
 0x3a9   :  { %9908 = vmatpush1.bf16.msra.mxu1 %v14998_v25  ;;  %9934 = vmatprep.subr.bf16.mxu0 %v15009_v34  ;;  %v15042_v25 = vld [vmem:[#allocation6 + $0x72c] ss:$16 sps:$4 sm:$0xff]   ;;  %v15043_v34 = vld [vmem:[#allocation6 + $0x828] ss:$16 sps:$4 sm:$0xff]  }
 0x3aa   :  { %9909 = vmatprep.subr.bf16.mxu1 %v15006_v30  ;;  %v15040_v30 = vld [vmem:[#allocation6 + $0x728] ss:$16 sps:$4 sm:$0xff]  }
 0x3ac   :  { %9935 = vmatpush1.bf16.msra.mxu0 %v15007_v24  ;;  %v15051_v24 = vld [vmem:[#allocation6 + $0x84c] ss:$16 sps:$4 sm:$0xff]  }
 0x3ad   :  { %9910 = vmatpush1.bf16.msra.mxu1 %v15004_v9  ;;  %9936 = vmatprep.subr.bf16.mxu0 %v15015_v35  ;;  %v15048_v9 = vld [vmem:[#allocation6 + $0x74c] ss:$16 sps:$4 sm:$0xff]   ;;  %v15049_v35 = vld [vmem:[#allocation6 + $0x848] ss:$16 sps:$4 sm:$0xff]  }
 0x3ae   :  { %9911 = vmatprep.subr.bf16.mxu1 %v15012_v52  ;;  %v15046_v52 = vld [vmem:[#allocation6 + $0x748] ss:$16 sps:$4 sm:$0xff]  }
 0x3b0   :  { %9937 = vmatpush1.bf16.msra.mxu0 %v15013_v40  ;;  %v15057_v40 = vld [vmem:[#allocation6 + $0x86c] ss:$16 sps:$4 sm:$0xff]  }
 0x3b1   :  { %9912 = vmatpush1.bf16.msra.mxu1 %v15010_v56  ;;  %9938 = vmatprep.subr.bf16.mxu0 %v15021_v8  ;;  %v15054_v56 = vld [vmem:[#allocation6 + $0x76c] ss:$16 sps:$4 sm:$0xff]  }
 0x3b2   :  { %9913 = vmatprep.subr.bf16.mxu1 %v15018_v16  ;;  %v15055_v16 = vld [vmem:[#allocation6 + $0x868] ss:$16 sps:$4 sm:$0xff]   ;;  %v15060_v8 = vld [vmem:[#allocation6 + $0x78c] ss:$16 sps:$4 sm:$0xff]  }
 0x3b4   :  { %9939 = vmatpush1.bf16.msra.mxu0 %v15019_v44  ;;  %v15058_v44 = vld [vmem:[#allocation6 + $0x788] ss:$16 sps:$4 sm:$0xff]  }
 0x3b5   :  { %9914 = vmatpush1.bf16.msra.mxu1 %v15016_v39  ;;  %9940 = vmatprep.subr.bf16.mxu0 %v15027_v13  ;;  %v15063_v39 = vld [vmem:[#allocation6 + $0x88c] ss:$16 sps:$4 sm:$0xff]  }
 0x3b6   :  { %9915 = vmatprep.subr.bf16.mxu1 %v15024_v28  ;;  %v15066_v28 = vld [vmem:[#allocation6 + $0x7ac] ss:$16 sps:$4 sm:$0xff]  }
 0x3b7   :  { %v15069_v13 = vld [vmem:[#allocation6 + $0x8ac] ss:$16 sps:$4 sm:$0xff]  }
 0x3b8   :  { %9941 = vmatpush1.bf16.msra.mxu0 %v15025_v37  ;;  %v15067_v37 = vld [vmem:[#allocation6 + $0x8a8] ss:$16 sps:$4 sm:$0xff]  }
 0x3b9   :  { %9916 = vmatpush1.bf16.msra.mxu1 %v15022_v19  ;;  %9942 = vmatprep.subr.bf16.mxu0 %v15033_v58  ;;  %v15064_v19 = vld [vmem:[#allocation6 + $0x7a8] ss:$16 sps:$4 sm:$0xff]   ;;  %v15075_v58 = vld [vmem:[#allocation6 + $0x8cc] ss:$16 sps:$4 sm:$0xff]  }
 0x3ba   :  { %9917 = vmatprep.subr.bf16.mxu1 %v15030_v6  ;;  %v15072_v6 = vld [vmem:[#allocation6 + $0x7cc] ss:$16 sps:$4 sm:$0xff]  }
 0x3bc   :  { %9943 = vmatpush1.bf16.msra.mxu0 %v15031_v7 }
 0x3bd   :  { %9918 = vmatpush1.bf16.msra.mxu1 %v15028_v0  ;;  %9944 = vmatprep.subr.bf16.mxu0 %v15036_v17  ;;  %v15070_v17 = vld [vmem:[#allocation6 + $0x7c8] ss:$16 sps:$4 sm:$0xff]  }
 0x3be   :  { %9969 = vmatprep.subr.bf16.mxu1 %v15039_v18  ;;  %v15073_v18 = vld [vmem:[#allocation6 + $0x8c8] ss:$16 sps:$4 sm:$0xff]  }
 0x3c0   :  { %9920 = vmatmul.mubr.bf16.vlgmr.msra.gmra.mrb[48].mxu1 %v16510_v20  ;;  %9945 = vmatpush1.bf16.msra.mxu0 %v15034_v59  ;;  %v15052_v20 = vld [vmem:[#allocation6 + $0x768] ss:$16 sps:$4 sm:$0xff]  }
 0x3c1   :  { %9970 = vmatpush1.bf16.msra.mxu1 %v15037_v23  ;;  %9946 = vmatprep.subr.bf16.mxu0 %v15042_v25 }
 0x3c2   :  { %9971 = vmatprep.subr.bf16.mxu1 %v15045_v49  ;;  %10001 = vmatprep.mubr.bf16.mxu1 %v16516_v29  ;;  %v15061_v29 = vld [vmem:[#allocation6 + $0x888] ss:$16 sps:$4 sm:$0xff]  }
 0x3c4   :  { %9947 = vmatpush1.bf16.msra.mxu0 %v15040_v30 }
 0x3c5   :  { %9972 = vmatpush1.bf16.msra.mxu1 %v15043_v34  ;;  %9948 = vmatprep.subr.bf16.mxu0 %v15048_v9 }
 0x3c6   :  { %9973 = vmatprep.subr.bf16.mxu1 %v15051_v24 }
 0x3c8   :  { %9949 = vmatpush1.bf16.msra.mxu0 %v15046_v52 }
 0x3c9   :  { %9974 = vmatpush1.bf16.msra.mxu1 %v15049_v35  ;;  %9950 = vmatprep.subr.bf16.mxu0 %v15054_v56  ;;  %v15078_v35 = vld [vmem:[#allocation6 + $0x7ec] ss:$16 sps:$4 sm:$0xff]  }
 0x3ca   :  { %9975 = vmatprep.subr.bf16.mxu1 %v15057_v40  ;;  %v15081_v56 = vld [vmem:[#allocation6 + $0x8ec] ss:$16 sps:$4 sm:$0xff]  }
 0x3cc   :  { %9951 = vmatpush1.bf16.msra.mxu0 %v15052_v20  ;;  %v15079_v20 = vld [vmem:[#allocation6 + $0x8e8] ss:$16 sps:$4 sm:$0xff]  }
 0x3cd   :  { %9976 = vmatpush1.bf16.msra.mxu1 %v15055_v16  ;;  %9952 = vmatprep.subr.bf16.mxu0 %v15060_v8  ;;  %v15087_v16 = vld [vmem:[#allocation6 + $0xa0c] ss:$16 sps:$4 sm:$0xff]   ;;  %v15082_v8 = vld [vmem:[#allocation6 + $0x908] ss:$16 sps:$4 sm:$0xff]  }
 0x3ce   :  { %9977 = vmatprep.subr.bf16.mxu1 %v15063_v39  ;;  %v15085_v39 = vld [vmem:[#allocation6 + $0xa08] ss:$16 sps:$4 sm:$0xff]  }
 0x3d0   :  { %9953 = vmatpush1.bf16.msra.mxu0 %v15058_v44  ;;  %v15090_v44 = vld [vmem:[#allocation6 + $0x92c] ss:$16 sps:$4 sm:$0xff]  }
 0x3d1   :  { %9978 = vmatpush1.bf16.msra.mxu1 %v15061_v29  ;;  %9954 = vmatprep.subr.bf16.mxu0 %v15066_v28  ;;  %v15093_v29 = vld [vmem:[#allocation6 + $0xa2c] ss:$16 sps:$4 sm:$0xff]   ;;  %v15088_v28 = vld [vmem:[#allocation6 + $0x928] ss:$16 sps:$4 sm:$0xff]  }
 0x3d2   :  { %9979 = vmatprep.subr.bf16.mxu1 %v15069_v13  ;;  %v9634_v0 = vpop.f32.mrb[36].mxu0  ;;  %v15091_v13 = vld [vmem:[#allocation6 + $0xa28] ss:$16 sps:$4 sm:$0xff]  }
 0x3d3   :  { %v9675_v7 = vpop.f32.mrb[36].mxu1  ;;  %v9635_v59 = vadd.f32 %v9634_v0, %v16683_v5  ;;  %v9636_v23 = vpop.f32.mrb[37].mxu0  ;;  %v15076_v5 = vld [vmem:[#allocation6 + $0x7e8] ss:$16 sps:$4 sm:$0xff]   ;;  %v15102_v0 = vld [vmem:[#allocation6 + $0x96c] ss:$16 sps:$4 sm:$0xff]  }
 0x3d4   :  { %v9677_v25 = vpop.f32.mrb[37].mxu1  ;;  %v9637_v49 = vadd.f32 %v9636_v23, %v16685_v12  ;;  %v9638_v30 = vpop.f32.mrb[38].mxu0  ;;  %9955 = vmatpush1.bf16.msra.mxu0 %v15064_v19  ;;  %v15084_v12 = vld [vmem:[#allocation6 + $0x90c] ss:$16 sps:$4 sm:$0xff]   ;;  %v15106_v23 = vld [vmem:[#allocation6 + $0x988] ss:$16 sps:$4 sm:$0xff]  }
 0x3d5   :  { %v9679_v34 = vpop.f32.mrb[38].mxu1  ;;  %9980 = vmatpush1.bf16.msra.mxu1 %v15067_v37  ;;  %v16693_v9 = vadd.f32 %v9675_v7, %v9635_v59  ;;  %v9639_v24 = vpop.f32.mrb[39].mxu0  ;;  %9956 = vmatprep.subr.bf16.mxu0 %v15072_v6  ;;  %v15096_v19 = vld [vmem:[#allocation6 + $0x94c] ss:$16 sps:$4 sm:$0xff]   ;;  %v15094_v6 = vld [vmem:[#allocation6 + $0x948] ss:$16 sps:$4 sm:$0xff]  }
 0x3d6   :  { %v9680_v52 = vpop.f32.mrb[39].mxu1  ;;  %9981 = vmatprep.subr.bf16.mxu1 %v15075_v58  ;;  %v16695_v40 = vadd.f32 %v9677_v25, %v9637_v49  ;;  %v15099_v37 = vld [vmem:[#allocation6 + $0xa4c] ss:$16 sps:$4 sm:$0xff]   ;;  %v15097_v58 = vld [vmem:[#allocation6 + $0xa48] ss:$16 sps:$4 sm:$0xff]  }
 0x3d7   :  { %v15105_v7 = vld [vmem:[#allocation6 + $0xa6c] ss:$16 sps:$4 sm:$0xff]   ;;  %v15112_v30 = vld [vmem:[#allocation6 + $0x9a8] ss:$16 sps:$4 sm:$0xff]  }
 0x3d8   :  { %9957 = vmatpush1.bf16.msra.mxu0 %v15070_v17  ;;  %v15103_v17 = vld [vmem:[#allocation6 + $0xa68] ss:$16 sps:$4 sm:$0xff]   ;;  %v15111_v59 = vld [vmem:[#allocation6 + $0xa8c] ss:$16 sps:$4 sm:$0xff]  }
 0x3d9   :  { %9982 = vmatpush1.bf16.msra.mxu1 %v15073_v18  ;;  %9958 = vmatprep.subr.bf16.mxu0 %v15078_v35  ;;  %v15108_v18 = vld [vmem:[#allocation6 + $0x98c] ss:$16 sps:$4 sm:$0xff]   ;;  %v15115_v34 = vld [vmem:[#allocation6 + $0xaa8] ss:$16 sps:$4 sm:$0xff]  }
 0x3da   :  { %9983 = vmatprep.subr.bf16.mxu1 %v15081_v56  ;;  %v15114_v25 = vld [vmem:[#allocation6 + $0x9ac] ss:$16 sps:$4 sm:$0xff]   ;;  %v15118_v35 = vld [vmem:[#allocation6 + $0x9c8] ss:$16 sps:$4 sm:$0xff]  }
 0x3db   :  { %v15117_v49 = vld [vmem:[#allocation6 + $0xaac] ss:$16 sps:$4 sm:$0xff]   ;;  %v15121_v56 = vld [vmem:[#allocation6 + $0xac8] ss:$16 sps:$4 sm:$0xff]  }
 0x3dc   :  { %9959 = vmatpush1.bf16.msra.mxu0 %v15076_v5  ;;  %v15120_v24 = vld [vmem:[#allocation6 + $0x9cc] ss:$16 sps:$4 sm:$0xff]  }
 0x3dd   :  { %9984 = vmatpush1.bf16.msra.mxu1 %v15079_v20  ;;  %10010 = vmatprep.subr.bf16.mxu0 %v15087_v16  ;;  %v15123_v52 = vld [vmem:[#allocation6 + $0xacc] ss:$16 sps:$4 sm:$0xff]   ;;  %v15127_v16 = vld [vmem:[#allocation6 + $0xae8] ss:$16 sps:$4 sm:$0xff]  }
 0x3de   :  { %9985 = vmatprep.subr.bf16.mxu1 %v15084_v12  ;;  %v15126_v5 = vld [vmem:[#allocation6 + $0x9ec] ss:$16 sps:$4 sm:$0xff]   ;;  %v15124_v12 = vld [vmem:[#allocation6 + $0x9e8] ss:$16 sps:$4 sm:$0xff]  }
 0x3df   :  { %9961 = vmatmul.mubr.bf16.vlgmr.msra.gmra.mrb[52].mxu0 %v16512_v21  ;;  %v15100_v21 = vld [vmem:[#allocation6 + $0x968] ss:$16 sps:$4 sm:$0xff]   ;;  %v15129_v20 = vld [vmem:[#allocation6 + $0xaec] ss:$16 sps:$4 sm:$0xff]  }
 0x3e0   :  { %10011 = vmatpush1.bf16.msra.mxu0 %v15085_v39  ;;  %10042 = vmatprep.mubr.bf16.mxu0 %v16518_v32  ;;  %v15109_v32 = vld [vmem:[#allocation6 + $0xa88] ss:$16 sps:$4 sm:$0xff]   ;;  %v15135_v39 = vld [vmem:[#allocation6 + $0xc0c] ss:$16 sps:$4 sm:$0xff]  }
 0x3e1   :  { %9986 = vmatpush1.bf16.msra.mxu1 %v15082_v8  ;;  %10012 = vmatprep.subr.bf16.mxu0 %v15093_v29  ;;  %v15132_v8 = vld [vmem:[#allocation6 + $0xb0c] ss:$16 sps:$4 sm:$0xff]   ;;  %v15133_v29 = vld [vmem:[#allocation6 + $0xc08] ss:$16 sps:$4 sm:$0xff]  }
 0x3e2   :  { %9987 = vmatprep.subr.bf16.mxu1 %v15090_v44  ;;  %v15130_v44 = vld [vmem:[#allocation6 + $0xb08] ss:$16 sps:$4 sm:$0xff]  }
 0x3e4   :  { %10013 = vmatpush1.bf16.msra.mxu0 %v15091_v13  ;;  %v15141_v13 = vld [vmem:[#allocation6 + $0xc2c] ss:$16 sps:$4 sm:$0xff]  }
 0x3e5   :  { %9988 = vmatpush1.bf16.msra.mxu1 %v15088_v28  ;;  %10014 = vmatprep.subr.bf16.mxu0 %v15099_v37  ;;  %v15138_v28 = vld [vmem:[#allocation6 + $0xb2c] ss:$16 sps:$4 sm:$0xff]   ;;  %v15139_v37 = vld [vmem:[#allocation6 + $0xc28] ss:$16 sps:$4 sm:$0xff]  }
 0x3e6   :  { %9989 = vmatprep.subr.bf16.mxu1 %v15096_v19  ;;  %v15136_v19 = vld [vmem:[#allocation6 + $0xb28] ss:$16 sps:$4 sm:$0xff]  }
 0x3e8   :  { %10015 = vmatpush1.bf16.msra.mxu0 %v15097_v58  ;;  %v15147_v58 = vld [vmem:[#allocation6 + $0xc4c] ss:$16 sps:$4 sm:$0xff]  }
 0x3e9   :  { %9990 = vmatpush1.bf16.msra.mxu1 %v15094_v6  ;;  %10016 = vmatprep.subr.bf16.mxu0 %v15105_v7  ;;  %v15144_v6 = vld [vmem:[#allocation6 + $0xb4c] ss:$16 sps:$4 sm:$0xff]   ;;  %v15145_v7 = vld [vmem:[#allocation6 + $0xc48] ss:$16 sps:$4 sm:$0xff]  }
 0x3ea   :  { %9991 = vmatprep.subr.bf16.mxu1 %v15102_v0  ;;  %v15142_v0 = vld [vmem:[#allocation6 + $0xb48] ss:$16 sps:$4 sm:$0xff]  }
 0x3ec   :  { %10017 = vmatpush1.bf16.msra.mxu0 %v15103_v17  ;;  %v15153_v17 = vld [vmem:[#allocation6 + $0xc6c] ss:$16 sps:$4 sm:$0xff]  }
 0x3ed   :  { %9992 = vmatpush1.bf16.msra.mxu1 %v15100_v21  ;;  %10018 = vmatprep.subr.bf16.mxu0 %v15111_v59  ;;  %v15150_v21 = vld [vmem:[#allocation6 + $0xb6c] ss:$16 sps:$4 sm:$0xff]  }
 0x3ee   :  { %9993 = vmatprep.subr.bf16.mxu1 %v15108_v18  ;;  %v15151_v18 = vld [vmem:[#allocation6 + $0xc68] ss:$16 sps:$4 sm:$0xff]   ;;  %v15156_v59 = vld [vmem:[#allocation6 + $0xb8c] ss:$16 sps:$4 sm:$0xff]  }
 0x3f0   :  { %10019 = vmatpush1.bf16.msra.mxu0 %v15109_v32  ;;  %v15154_v32 = vld [vmem:[#allocation6 + $0xb88] ss:$16 sps:$4 sm:$0xff]  }
 0x3f1   :  { %9994 = vmatpush1.bf16.msra.mxu1 %v15106_v23  ;;  %10020 = vmatprep.subr.bf16.mxu0 %v15117_v49  ;;  %v15159_v23 = vld [vmem:[#allocation6 + $0xc8c] ss:$16 sps:$4 sm:$0xff]  }
 0x3f2   :  { %9995 = vmatprep.subr.bf16.mxu1 %v15114_v25  ;;  %v15162_v25 = vld [vmem:[#allocation6 + $0xbac] ss:$16 sps:$4 sm:$0xff]  }
 0x3f3   :  { %v15165_v49 = vld [vmem:[#allocation6 + $0xcac] ss:$16 sps:$4 sm:$0xff]  }
 0x3f4   :  { %10021 = vmatpush1.bf16.msra.mxu0 %v15115_v34  ;;  %v15163_v34 = vld [vmem:[#allocation6 + $0xca8] ss:$16 sps:$4 sm:$0xff]  }
 0x3f5   :  { %9996 = vmatpush1.bf16.msra.mxu1 %v15112_v30  ;;  %10022 = vmatprep.subr.bf16.mxu0 %v15123_v52  ;;  %v15160_v30 = vld [vmem:[#allocation6 + $0xba8] ss:$16 sps:$4 sm:$0xff]   ;;  %v15171_v52 = vld [vmem:[#allocation6 + $0xccc] ss:$16 sps:$4 sm:$0xff]  }
 0x3f6   :  { %9997 = vmatprep.subr.bf16.mxu1 %v15120_v24  ;;  %v15168_v24 = vld [vmem:[#allocation6 + $0xbcc] ss:$16 sps:$4 sm:$0xff]  }
 0x3f8   :  { %10023 = vmatpush1.bf16.msra.mxu0 %v15121_v56 }
 0x3f9   :  { %9998 = vmatpush1.bf16.msra.mxu1 %v15118_v35  ;;  %10024 = vmatprep.subr.bf16.mxu0 %v15129_v20 }
 0x3fa   :  { %9999 = vmatprep.subr.bf16.mxu1 %v15126_v5 }
 0x3fc   :  { %10025 = vmatpush1.bf16.msra.mxu0 %v15127_v16 }
 0x3fd   :  { %10000 = vmatpush1.bf16.msra.mxu1 %v15124_v12  ;;  %10026 = vmatprep.subr.bf16.mxu0 %v15132_v8 }
 0x3fe   :  { %10051 = vmatprep.subr.bf16.mxu1 %v15135_v39 }
 0x400   :  { %10002 = vmatmul.mubr.bf16.vlgmr.msra.gmra.mrb[52].mxu1 %v16522_v42  ;;  %10027 = vmatpush1.bf16.msra.mxu0 %v15130_v44  ;;  %v15148_v42 = vld [vmem:[#allocation6 + $0xb68] ss:$16 sps:$4 sm:$0xff]  }
 0x401   :  { %10052 = vmatpush1.bf16.msra.mxu1 %v15133_v29  ;;  %10028 = vmatprep.subr.bf16.mxu0 %v15138_v28  ;;  %v15166_v44 = vld [vmem:[#allocation6 + $0xbc8] ss:$16 sps:$4 sm:$0xff]  }
 0x402   :  { %10053 = vmatprep.subr.bf16.mxu1 %v15141_v13  ;;  %10083 = vmatprep.mubr.bf16.mxu1 %v16526_v48  ;;  %v15157_v48 = vld [vmem:[#allocation6 + $0xc88] ss:$16 sps:$4 sm:$0xff]  }
 0x403   :  { %v15169_v29 = vld [vmem:[#allocation6 + $0xcc8] ss:$16 sps:$4 sm:$0xff]  }
 0x404   :  { %10029 = vmatpush1.bf16.msra.mxu0 %v15136_v19 }
 0x405   :  { %10054 = vmatpush1.bf16.msra.mxu1 %v15139_v37  ;;  %10030 = vmatprep.subr.bf16.mxu0 %v15144_v6  ;;  %v15174_v37 = vld [vmem:[#allocation6 + $0xbec] ss:$16 sps:$4 sm:$0xff]  }
 0x406   :  { %10055 = vmatprep.subr.bf16.mxu1 %v15147_v58  ;;  %v15177_v6 = vld [vmem:[#allocation6 + $0xcec] ss:$16 sps:$4 sm:$0xff]  }
 0x408   :  { %10031 = vmatpush1.bf16.msra.mxu0 %v15142_v0  ;;  %v15175_v0 = vld [vmem:[#allocation6 + $0xce8] ss:$16 sps:$4 sm:$0xff]  }
 0x409   :  { %10056 = vmatpush1.bf16.msra.mxu1 %v15145_v7  ;;  %10032 = vmatprep.subr.bf16.mxu0 %v15150_v21  ;;  %v15183_v7 = vld [vmem:[#allocation6 + $0xe0c] ss:$16 sps:$4 sm:$0xff]   ;;  %v15178_v21 = vld [vmem:[#allocation6 + $0xd08] ss:$16 sps:$4 sm:$0xff]  }
 0x40a   :  { %10057 = vmatprep.subr.bf16.mxu1 %v15153_v17  ;;  %v15181_v17 = vld [vmem:[#allocation6 + $0xe08] ss:$16 sps:$4 sm:$0xff]  }
 0x40c   :  { %10033 = vmatpush1.bf16.msra.mxu0 %v15148_v42  ;;  %v15186_v42 = vld [vmem:[#allocation6 + $0xd2c] ss:$16 sps:$4 sm:$0xff]  }
 0x40d   :  { %10058 = vmatpush1.bf16.msra.mxu1 %v15151_v18  ;;  %10034 = vmatprep.subr.bf16.mxu0 %v15156_v59  ;;  %v15189_v18 = vld [vmem:[#allocation6 + $0xe2c] ss:$16 sps:$4 sm:$0xff]   ;;  %v15184_v59 = vld [vmem:[#allocation6 + $0xd28] ss:$16 sps:$4 sm:$0xff]  }
 0x40e   :  { %10059 = vmatprep.subr.bf16.mxu1 %v15159_v23  ;;  %v15187_v23 = vld [vmem:[#allocation6 + $0xe28] ss:$16 sps:$4 sm:$0xff]  }
 0x410   :  { %10035 = vmatpush1.bf16.msra.mxu0 %v15154_v32  ;;  %v15192_v32 = vld [vmem:[#allocation6 + $0xd4c] ss:$16 sps:$4 sm:$0xff]  }
 0x411   :  { %10060 = vmatpush1.bf16.msra.mxu1 %v15157_v48  ;;  %10036 = vmatprep.subr.bf16.mxu0 %v15162_v25  ;;  %v15195_v48 = vld [vmem:[#allocation6 + $0xe4c] ss:$16 sps:$4 sm:$0xff]   ;;  %v15190_v25 = vld [vmem:[#allocation6 + $0xd48] ss:$16 sps:$4 sm:$0xff]  }
 0x412   :  { %10061 = vmatprep.subr.bf16.mxu1 %v15165_v49  ;;  %v9716_v35 = vpop.f32.mrb[40].mxu0  ;;  %v15193_v49 = vld [vmem:[#allocation6 + $0xe48] ss:$16 sps:$4 sm:$0xff]  }
 0x413   :  { %v9757_v56 = vpop.f32.mrb[40].mxu1  ;;  %v9717_v5 = vadd.f32 %v9716_v35, %v16693_v9  ;;  %v9718_v20 = vpop.f32.mrb[41].mxu0  ;;  %v15172_v9 = vld [vmem:[#allocation6 + $0xbe8] ss:$16 sps:$4 sm:$0xff]   ;;  %v15207_v35 = vld [vmem:[#allocation6 + $0xe8c] ss:$16 sps:$4 sm:$0xff]  }
 0x414   :  { %v9759_v12 = vpop.f32.mrb[41].mxu1  ;;  %v9719_v16 = vadd.f32 %v9718_v20, %v16695_v40  ;;  %v9720_v8 = vpop.f32.mrb[42].mxu0  ;;  %10037 = vmatpush1.bf16.msra.mxu0 %v15160_v30  ;;  %v15180_v40 = vld [vmem:[#allocation6 + $0xd0c] ss:$16 sps:$4 sm:$0xff]  }
 0x415   :  { %v9761_v39 = vpop.f32.mrb[42].mxu1  ;;  %10062 = vmatpush1.bf16.msra.mxu1 %v15163_v34  ;;  %v16703_v28 = vadd.f32 %v9757_v56, %v9717_v5  ;;  %v9721_v13 = vpop.f32.mrb[43].mxu0  ;;  %10038 = vmatprep.subr.bf16.mxu0 %v15168_v24  ;;  %v15198_v30 = vld [vmem:[#allocation6 + $0xd6c] ss:$16 sps:$4 sm:$0xff]   ;;  %v15199_v24 = vld [vmem:[#allocation6 + $0xe68] ss:$16 sps:$4 sm:$0xff]  }
 0x416   :  { %v9762_v19 = vpop.f32.mrb[43].mxu1  ;;  %10063 = vmatprep.subr.bf16.mxu1 %v15171_v52  ;;  %v9760_v58 = vadd.f32 %v9759_v12, %v9719_v16  ;;  %v15201_v34 = vld [vmem:[#allocation6 + $0xe6c] ss:$16 sps:$4 sm:$0xff]   ;;  %v15202_v56 = vld [vmem:[#allocation6 + $0xd88] ss:$16 sps:$4 sm:$0xff]  }
 0x417   :  { %v15204_v52 = vld [vmem:[#allocation6 + $0xd8c] ss:$16 sps:$4 sm:$0xff]   ;;  %v15208_v12 = vld [vmem:[#allocation6 + $0xda8] ss:$16 sps:$4 sm:$0xff]  }
 0x418   :  { %10039 = vmatpush1.bf16.msra.mxu0 %v15166_v44  ;;  %v15210_v5 = vld [vmem:[#allocation6 + $0xdac] ss:$16 sps:$4 sm:$0xff]   ;;  %v15211_v16 = vld [vmem:[#allocation6 + $0xea8] ss:$16 sps:$4 sm:$0xff]  }
 0x419   :  { %10064 = vmatpush1.bf16.msra.mxu1 %v15169_v29  ;;  %10040 = vmatprep.subr.bf16.mxu0 %v15174_v37  ;;  %v15213_v20 = vld [vmem:[#allocation6 + $0xeac] ss:$16 sps:$4 sm:$0xff]  }
 0x41a   :  { %10065 = vmatprep.subr.bf16.mxu1 %v15177_v6  ;;  %v15216_v8 = vld [vmem:[#allocation6 + $0xdcc] ss:$16 sps:$4 sm:$0xff]   ;;  %v15214_v6 = vld [vmem:[#allocation6 + $0xdc8] ss:$16 sps:$4 sm:$0xff]  }
 0x41b   :  { %v15219_v39 = vld [vmem:[#allocation6 + $0xecc] ss:$16 sps:$4 sm:$0xff]  }
 0x41c   :  { %10041 = vmatpush1.bf16.msra.mxu0 %v15172_v9  ;;  %v15217_v9 = vld [vmem:[#allocation6 + $0xec8] ss:$16 sps:$4 sm:$0xff]  }
 0x41d   :  { %10066 = vmatpush1.bf16.msra.mxu1 %v15175_v0  ;;  %10092 = vmatprep.subr.bf16.mxu0 %v15183_v7  ;;  %v15225_v7 = vld [vmem:[#allocation6 + $0xeec] ss:$16 sps:$4 sm:$0xff]  }
 0x41e   :  { %10067 = vmatprep.subr.bf16.mxu1 %v15180_v40  ;;  %v15222_v40 = vld [vmem:[#allocation6 + $0xdec] ss:$16 sps:$4 sm:$0xff]  }
 0x41f   :  { %10043 = vmatmul.mubr.bf16.vlgmr.msra.gmra.mrb[56].mxu0 %v16524_v43  ;;  %v15196_v43 = vld [vmem:[#allocation6 + $0xd68] ss:$16 sps:$4 sm:$0xff]  }
 0x420   :  { %10093 = vmatpush1.bf16.msra.mxu0 %v15181_v17  ;;  %10124 = vmatprep.mubr.bf16.mxu0 %v16528_v50  ;;  %v15205_v50 = vld [vmem:[#allocation6 + $0xe88] ss:$16 sps:$4 sm:$0xff]  }
 0x421   :  { %10068 = vmatpush1.bf16.msra.mxu1 %v15178_v21  ;;  %10094 = vmatprep.subr.bf16.mxu0 %v15189_v18  ;;  %v15220_v21 = vld [vmem:[#allocation6 + $0xde8] ss:$16 sps:$4 sm:$0xff]  }
 0x422   :  { %10069 = vmatprep.subr.bf16.mxu1 %v15186_v42  ;;  %v15223_v17 = vld [vmem:[#allocation6 + $0xee8] ss:$16 sps:$4 sm:$0xff]   ;;  %v15231_v42 = vld [vmem:[#allocation6 + $0x100c] ss:$16 sps:$4 sm:$0xff]  }
 0x423   :  { %v15229_v18 = vld [vmem:[#allocation6 + $0x1008] ss:$16 sps:$4 sm:$0xff]  }
 0x424   :  { %10095 = vmatpush1.bf16.msra.mxu0 %v15187_v23  ;;  %v15237_v23 = vld [vmem:[#allocation6 + $0x102c] ss:$16 sps:$4 sm:$0xff]  }
 0x425   :  { %10070 = vmatpush1.bf16.msra.mxu1 %v15184_v59  ;;  %10096 = vmatprep.subr.bf16.mxu0 %v15195_v48  ;;  %v15234_v59 = vld [vmem:[#allocation6 + $0xf2c] ss:$16 sps:$4 sm:$0xff]   ;;  %v15235_v48 = vld [vmem:[#allocation6 + $0x1028] ss:$16 sps:$4 sm:$0xff]  }
 0x426   :  { %10071 = vmatprep.subr.bf16.mxu1 %v15192_v32  ;;  %v15232_v32 = vld [vmem:[#allocation6 + $0xf28] ss:$16 sps:$4 sm:$0xff]  }
 0x428   :  { %10097 = vmatpush1.bf16.msra.mxu0 %v15193_v49  ;;  %v15243_v49 = vld [vmem:[#allocation6 + $0x104c] ss:$16 sps:$4 sm:$0xff]  }
 0x429   :  { %10072 = vmatpush1.bf16.msra.mxu1 %v15190_v25  ;;  %10098 = vmatprep.subr.bf16.mxu0 %v15201_v34  ;;  %v15240_v25 = vld [vmem:[#allocation6 + $0xf4c] ss:$16 sps:$4 sm:$0xff]   ;;  %v15241_v34 = vld [vmem:[#allocation6 + $0x1048] ss:$16 sps:$4 sm:$0xff]  }
 0x42a   :  { %10073 = vmatprep.subr.bf16.mxu1 %v15198_v30  ;;  %v15238_v30 = vld [vmem:[#allocation6 + $0xf48] ss:$16 sps:$4 sm:$0xff]  }
 0x42c   :  { %10099 = vmatpush1.bf16.msra.mxu0 %v15199_v24  ;;  %v15249_v24 = vld [vmem:[#allocation6 + $0x106c] ss:$16 sps:$4 sm:$0xff]  }
 0x42d   :  { %10074 = vmatpush1.bf16.msra.mxu1 %v15196_v43  ;;  %10100 = vmatprep.subr.bf16.mxu0 %v15207_v35  ;;  %v15246_v43 = vld [vmem:[#allocation6 + $0xf6c] ss:$16 sps:$4 sm:$0xff]  }
 0x42e   :  { %10075 = vmatprep.subr.bf16.mxu1 %v15204_v52  ;;  %v15247_v52 = vld [vmem:[#allocation6 + $0x1068] ss:$16 sps:$4 sm:$0xff]   ;;  %v15252_v35 = vld [vmem:[#allocation6 + $0xf8c] ss:$16 sps:$4 sm:$0xff]  }
 0x430   :  { %10101 = vmatpush1.bf16.msra.mxu0 %v15205_v50  ;;  %v15250_v50 = vld [vmem:[#allocation6 + $0xf88] ss:$16 sps:$4 sm:$0xff]  }
 0x431   :  { %10076 = vmatpush1.bf16.msra.mxu1 %v15202_v56  ;;  %10102 = vmatprep.subr.bf16.mxu0 %v15213_v20  ;;  %v15255_v56 = vld [vmem:[#allocation6 + $0x108c] ss:$16 sps:$4 sm:$0xff]  }
 0x432   :  { %10077 = vmatprep.subr.bf16.mxu1 %v15210_v5  ;;  %v9798_v44 = vpop.f32.mrb[44].mxu0  ;;  %v15258_v5 = vld [vmem:[#allocation6 + $0xfac] ss:$16 sps:$4 sm:$0xff]  }
 0x433   :  { %v16708_v29 = vadd.f32 %v9798_v44, %v16703_v28  ;;  %v9800_v13 = vpop.f32.mrb[45].mxu0  ;;  %v15228_v28 = vld [vmem:[#allocation6 + $0xf0c] ss:$16 sps:$4 sm:$0xff]  }
 0x434   :  { %v16710_v19 = vadd.f32 %v9800_v13, %v9760_v58  ;;  %v9802_v37 = vpop.f32.mrb[46].mxu0  ;;  %10103 = vmatpush1.bf16.msra.mxu0 %v15211_v16  ;;  %v15226_v58 = vld [vmem:[#allocation6 + $0xf08] ss:$16 sps:$4 sm:$0xff]   ;;  %v15261_v20 = vld [vmem:[#allocation6 + $0x10ac] ss:$16 sps:$4 sm:$0xff]  }
 0x435   :  { %10078 = vmatpush1.bf16.msra.mxu1 %v15208_v12  ;;  %v9803_v0 = vpop.f32.mrb[47].mxu0  ;;  %10104 = vmatprep.subr.bf16.mxu0 %v15219_v39  ;;  %v15256_v12 = vld [vmem:[#allocation6 + $0xfa8] ss:$16 sps:$4 sm:$0xff]   ;;  %v15267_v39 = vld [vmem:[#allocation6 + $0x10cc] ss:$16 sps:$4 sm:$0xff]  }
 0x436   :  { %10079 = vmatprep.subr.bf16.mxu1 %v15216_v8  ;;  %v15259_v16 = vld [vmem:[#allocation6 + $0x10a8] ss:$16 sps:$4 sm:$0xff]   ;;  %v15264_v8 = vld [vmem:[#allocation6 + $0xfcc] ss:$16 sps:$4 sm:$0xff]  }
 0x438   :  { %10105 = vmatpush1.bf16.msra.mxu0 %v15217_v9  ;;  %v15265_v9 = vld [vmem:[#allocation6 + $0x10c8] ss:$16 sps:$4 sm:$0xff]  }
 0x439   :  { %10080 = vmatpush1.bf16.msra.mxu1 %v15214_v6  ;;  %10106 = vmatprep.subr.bf16.mxu0 %v15225_v7  ;;  %v15262_v6 = vld [vmem:[#allocation6 + $0xfc8] ss:$16 sps:$4 sm:$0xff]   ;;  %v15273_v7 = vld [vmem:[#allocation6 + $0x10ec] ss:$16 sps:$4 sm:$0xff]  }
 0x43a   :  { %10081 = vmatprep.subr.bf16.mxu1 %v15222_v40  ;;  %v15270_v40 = vld [vmem:[#allocation6 + $0xfec] ss:$16 sps:$4 sm:$0xff]  }
 0x43c   :  { %10107 = vmatpush1.bf16.msra.mxu0 %v15223_v17  ;;  %v15271_v17 = vld [vmem:[#allocation6 + $0x10e8] ss:$16 sps:$4 sm:$0xff]  }
 0x43d   :  { %10082 = vmatpush1.bf16.msra.mxu1 %v15220_v21  ;;  %10108 = vmatprep.subr.bf16.mxu0 %v15228_v28  ;;  %v15268_v21 = vld [vmem:[#allocation6 + $0xfe8] ss:$16 sps:$4 sm:$0xff]   ;;  %v15276_v28 = vld [vmem:[#allocation6 + $0x110c] ss:$16 sps:$4 sm:$0xff]  }
 0x43e   :  { %10133 = vmatprep.subr.bf16.mxu1 %v15231_v42  ;;  %v15279_v42 = vld [vmem:[#allocation6 + $0x120c] ss:$16 sps:$4 sm:$0xff]  }
 0x440   :  { %10084 = vmatmul.mubr.bf16.vlgmr.msra.gmra.mrb[56].mxu1 %v16534_v2  ;;  %10109 = vmatpush1.bf16.msra.mxu0 %v15226_v58  ;;  %v15244_v2 = vld [vmem:[#allocation6 + $0xf68] ss:$16 sps:$4 sm:$0xff]  }
 0x441   :  { %10134 = vmatpush1.bf16.msra.mxu1 %v15229_v18  ;;  %10110 = vmatprep.subr.bf16.mxu0 %v15234_v59  ;;  %v15274_v58 = vld [vmem:[#allocation6 + $0x1108] ss:$16 sps:$4 sm:$0xff]   ;;  %v15282_v59 = vld [vmem:[#allocation6 + $0x112c] ss:$16 sps:$4 sm:$0xff]  }
 0x442   :  { %10135 = vmatprep.subr.bf16.mxu1 %v15237_v23  ;;  %10165 = vmatprep.mubr.bf16.mxu1 %v16538_v10  ;;  %v15253_v10 = vld [vmem:[#allocation6 + $0x1088] ss:$16 sps:$4 sm:$0xff]   ;;  %v15285_v23 = vld [vmem:[#allocation6 + $0x122c] ss:$16 sps:$4 sm:$0xff]  }
 0x443   :  { %v15277_v18 = vld [vmem:[#allocation6 + $0x1208] ss:$16 sps:$4 sm:$0xff]  }
 0x444   :  { %10111 = vmatpush1.bf16.msra.mxu0 %v15232_v32  ;;  %v15280_v32 = vld [vmem:[#allocation6 + $0x1128] ss:$16 sps:$4 sm:$0xff]  }
 0x445   :  { %10136 = vmatpush1.bf16.msra.mxu1 %v15235_v48  ;;  %10112 = vmatprep.subr.bf16.mxu0 %v15240_v25  ;;  %v15283_v48 = vld [vmem:[#allocation6 + $0x1228] ss:$16 sps:$4 sm:$0xff]   ;;  %v15288_v25 = vld [vmem:[#allocation6 + $0x114c] ss:$16 sps:$4 sm:$0xff]  }
 0x446   :  { %10137 = vmatprep.subr.bf16.mxu1 %v15243_v49  ;;  %v15291_v49 = vld [vmem:[#allocation6 + $0x124c] ss:$16 sps:$4 sm:$0xff]  }
 0x448   :  { %10113 = vmatpush1.bf16.msra.mxu0 %v15238_v30  ;;  %v15286_v30 = vld [vmem:[#allocation6 + $0x1148] ss:$16 sps:$4 sm:$0xff]  }
 0x449   :  { %10138 = vmatpush1.bf16.msra.mxu1 %v15241_v34  ;;  %10114 = vmatprep.subr.bf16.mxu0 %v15246_v43  ;;  %v15289_v34 = vld [vmem:[#allocation6 + $0x1248] ss:$16 sps:$4 sm:$0xff]   ;;  %v15294_v43 = vld [vmem:[#allocation6 + $0x116c] ss:$16 sps:$4 sm:$0xff]  }
 0x44a   :  { %10139 = vmatprep.subr.bf16.mxu1 %v15249_v24  ;;  %v15297_v24 = vld [vmem:[#allocation6 + $0x126c] ss:$16 sps:$4 sm:$0xff]  }
 0x44c   :  { %10115 = vmatpush1.bf16.msra.mxu0 %v15244_v2  ;;  %v15295_v2 = vld [vmem:[#allocation6 + $0x1268] ss:$16 sps:$4 sm:$0xff]  }
 0x44d   :  { %10140 = vmatpush1.bf16.msra.mxu1 %v15247_v52  ;;  %10116 = vmatprep.subr.bf16.mxu0 %v15252_v35  ;;  %v15300_v52 = vld [vmem:[#allocation6 + $0x118c] ss:$16 sps:$4 sm:$0xff]  }
 0x44e   :  { %10141 = vmatprep.subr.bf16.mxu1 %v15255_v56  ;;  %v15303_v35 = vld [vmem:[#allocation6 + $0x128c] ss:$16 sps:$4 sm:$0xff]   ;;  %v15298_v56 = vld [vmem:[#allocation6 + $0x1188] ss:$16 sps:$4 sm:$0xff]  }
 0x450   :  { %10117 = vmatpush1.bf16.msra.mxu0 %v15250_v50  ;;  %v15306_v50 = vld [vmem:[#allocation6 + $0x11ac] ss:$16 sps:$4 sm:$0xff]  }
 0x451   :  { %10142 = vmatpush1.bf16.msra.mxu1 %v15253_v10  ;;  %10118 = vmatprep.subr.bf16.mxu0 %v15258_v5  ;;  %v15309_v10 = vld [vmem:[#allocation6 + $0x12ac] ss:$16 sps:$4 sm:$0xff]   ;;  %v15304_v5 = vld [vmem:[#allocation6 + $0x11a8] ss:$16 sps:$4 sm:$0xff]  }
 0x452   :  { %10143 = vmatprep.subr.bf16.mxu1 %v15261_v20  ;;  %v15307_v20 = vld [vmem:[#allocation6 + $0x12a8] ss:$16 sps:$4 sm:$0xff]  }
 0x453   :  { %v16714_v44 = vpop.f32.mrb[44].mxu1 }
 0x454   :  { %v16716_v13 = vpop.f32.mrb[45].mxu1  ;;  %10119 = vmatpush1.bf16.msra.mxu0 %v15256_v12  ;;  %v15312_v12 = vld [vmem:[#allocation6 + $0x11cc] ss:$16 sps:$4 sm:$0xff]  }
 0x455   :  { %v9843_v37 = vpop.f32.mrb[46].mxu1  ;;  %10144 = vmatpush1.bf16.msra.mxu1 %v15259_v16  ;;  %10120 = vmatprep.subr.bf16.mxu0 %v15264_v8  ;;  %v15315_v16 = vld [vmem:[#allocation6 + $0x12cc] ss:$16 sps:$4 sm:$0xff]  }
 0x456   :  { %v9844_v0 = vpop.f32.mrb[47].mxu1  ;;  %10145 = vmatprep.subr.bf16.mxu1 %v15267_v39 }
 0x457   :  { %v15310_v0 = vld [vmem:[#allocation6 + $0x11c8] ss:$16 sps:$4 sm:$0xff]  }
 0x458   :  { %10121 = vmatpush1.bf16.msra.mxu0 %v15262_v6 }
 0x459   :  { %10146 = vmatpush1.bf16.msra.mxu1 %v15265_v9  ;;  %10122 = vmatprep.subr.bf16.mxu0 %v15270_v40  ;;  %v15313_v40 = vld [vmem:[#allocation6 + $0x12c8] ss:$16 sps:$4 sm:$0xff]  }
 0x45a   :  { %10147 = vmatprep.subr.bf16.mxu1 %v15273_v7 }
 0x45c   :  { %10123 = vmatpush1.bf16.msra.mxu0 %v15268_v21  ;;  %v15318_v21 = vld [vmem:[#allocation6 + $0x11ec] ss:$16 sps:$4 sm:$0xff]  }
 0x45d   :  { %10148 = vmatpush1.bf16.msra.mxu1 %v15271_v17  ;;  %10174 = vmatprep.subr.bf16.mxu0 %v15279_v42  ;;  %v15321_v17 = vld [vmem:[#allocation6 + $0x12ec] ss:$16 sps:$4 sm:$0xff]   ;;  %v15319_v42 = vld [vmem:[#allocation6 + $0x12e8] ss:$16 sps:$4 sm:$0xff]  }
 0x45e   :  { %10149 = vmatprep.subr.bf16.mxu1 %v15276_v28  ;;  %v15316_v28 = vld [vmem:[#allocation6 + $0x11e8] ss:$16 sps:$4 sm:$0xff]  }
 0x45f   :  { %10125 = vmatmul.mubr.bf16.vlgmr.msra.gmra.mrb[60].mxu0 %v16536_v3  ;;  %v15292_v3 = vld [vmem:[#allocation6 + $0x1168] ss:$16 sps:$4 sm:$0xff]  }
 0x460   :  { %10175 = vmatpush1.bf16.msra.mxu0 %v15277_v18  ;;  %10206 = vmatprep.mubr.bf16.mxu0 %v16540_v11  ;;  %v15301_v11 = vld [vmem:[#allocation6 + $0x1288] ss:$16 sps:$4 sm:$0xff]  }
 0x461   :  { %10150 = vmatpush1.bf16.msra.mxu1 %v15274_v58  ;;  %10176 = vmatprep.subr.bf16.mxu0 %v15285_v23  ;;  %v15327_v58 = vld [vmem:[#allocation6 + $0x140c] ss:$16 sps:$4 sm:$0xff]   ;;  %v15325_v18 = vld [vmem:[#allocation6 + $0x1408] ss:$16 sps:$4 sm:$0xff]  }
 0x462   :  { %10151 = vmatprep.subr.bf16.mxu1 %v15282_v59  ;;  %v15330_v59 = vld [vmem:[#allocation6 + $0x132c] ss:$16 sps:$4 sm:$0xff]  }
 0x463   :  { %v15333_v23 = vld [vmem:[#allocation6 + $0x142c] ss:$16 sps:$4 sm:$0xff]  }
 0x464   :  { %10177 = vmatpush1.bf16.msra.mxu0 %v15283_v48  ;;  %v15331_v48 = vld [vmem:[#allocation6 + $0x1428] ss:$16 sps:$4 sm:$0xff]  }
 0x465   :  { %10152 = vmatpush1.bf16.msra.mxu1 %v15280_v32  ;;  %10178 = vmatprep.subr.bf16.mxu0 %v15291_v49  ;;  %v15328_v32 = vld [vmem:[#allocation6 + $0x1328] ss:$16 sps:$4 sm:$0xff]   ;;  %v15339_v49 = vld [vmem:[#allocation6 + $0x144c] ss:$16 sps:$4 sm:$0xff]  }
 0x466   :  { %10153 = vmatprep.subr.bf16.mxu1 %v15288_v25  ;;  %v15336_v25 = vld [vmem:[#allocation6 + $0x134c] ss:$16 sps:$4 sm:$0xff]  }
 0x468   :  { %10179 = vmatpush1.bf16.msra.mxu0 %v15289_v34  ;;  %v15337_v34 = vld [vmem:[#allocation6 + $0x1448] ss:$16 sps:$4 sm:$0xff]  }
 0x469   :  { %10154 = vmatpush1.bf16.msra.mxu1 %v15286_v30  ;;  %10180 = vmatprep.subr.bf16.mxu0 %v15297_v24  ;;  %v15334_v30 = vld [vmem:[#allocation6 + $0x1348] ss:$16 sps:$4 sm:$0xff]   ;;  %v15345_v24 = vld [vmem:[#allocation6 + $0x146c] ss:$16 sps:$4 sm:$0xff]  }
 0x46a   :  { %10155 = vmatprep.subr.bf16.mxu1 %v15294_v43  ;;  %v15342_v43 = vld [vmem:[#allocation6 + $0x136c] ss:$16 sps:$4 sm:$0xff]  }
 0x46c   :  { %10181 = vmatpush1.bf16.msra.mxu0 %v15295_v2  ;;  %v15348_v2 = vld [vmem:[#allocation6 + $0x138c] ss:$16 sps:$4 sm:$0xff]  }
 0x46d   :  { %10156 = vmatpush1.bf16.msra.mxu1 %v15292_v3  ;;  %10182 = vmatprep.subr.bf16.mxu0 %v15303_v35  ;;  %v15343_v3 = vld [vmem:[#allocation6 + $0x1468] ss:$16 sps:$4 sm:$0xff]  }
 0x46e   :  { %10157 = vmatprep.subr.bf16.mxu1 %v15300_v52  ;;  %v15351_v52 = vld [vmem:[#allocation6 + $0x148c] ss:$16 sps:$4 sm:$0xff]   ;;  %v15346_v35 = vld [vmem:[#allocation6 + $0x1388] ss:$16 sps:$4 sm:$0xff]  }
 0x470   :  { %10183 = vmatpush1.bf16.msra.mxu0 %v15301_v11  ;;  %v15357_v11 = vld [vmem:[#allocation6 + $0x14ac] ss:$16 sps:$4 sm:$0xff]  }
 0x471   :  { %10158 = vmatpush1.bf16.msra.mxu1 %v15298_v56  ;;  %10184 = vmatprep.subr.bf16.mxu0 %v15309_v10  ;;  %v15354_v56 = vld [vmem:[#allocation6 + $0x13ac] ss:$16 sps:$4 sm:$0xff]   ;;  %v15355_v10 = vld [vmem:[#allocation6 + $0x14a8] ss:$16 sps:$4 sm:$0xff]  }
 0x472   :  { %10159 = vmatprep.subr.bf16.mxu1 %v15306_v50  ;;  %v9880_v8 = vpop.f32.mrb[48].mxu0  ;;  %v15352_v50 = vld [vmem:[#allocation6 + $0x13a8] ss:$16 sps:$4 sm:$0xff]  }
 0x473   :  { %v16721_v39 = vadd.f32 %v9880_v8, %v16714_v44  ;;  %v9882_v37 = vpop.f32.mrb[49].mxu0  ;;  %v15324_v44 = vld [vmem:[#allocation6 + $0x130c] ss:$16 sps:$4 sm:$0xff]  }
 0x474   :  { %v16724_v6 = vadd.f32 %v9882_v37, %v16716_v13  ;;  %v9884_v9 = vpop.f32.mrb[50].mxu0  ;;  %10185 = vmatpush1.bf16.msra.mxu0 %v15307_v20  ;;  %v15322_v13 = vld [vmem:[#allocation6 + $0x1308] ss:$16 sps:$4 sm:$0xff]   ;;  %v15363_v20 = vld [vmem:[#allocation6 + $0x14cc] ss:$16 sps:$4 sm:$0xff]  }
 0x475   :  { %10160 = vmatpush1.bf16.msra.mxu1 %v15304_v5  ;;  %v9885_v7 = vpop.f32.mrb[51].mxu0  ;;  %10186 = vmatprep.subr.bf16.mxu0 %v15315_v16  ;;  %v15360_v5 = vld [vmem:[#allocation6 + $0x13cc] ss:$16 sps:$4 sm:$0xff]  }
 0x476   :  { %10161 = vmatprep.subr.bf16.mxu1 %v15312_v12 }
 0x478   :  { %10187 = vmatpush1.bf16.msra.mxu0 %v15313_v40  ;;  %v15361_v40 = vld [vmem:[#allocation6 + $0x14c8] ss:$16 sps:$4 sm:$0xff]  }
 0x479   :  { %10162 = vmatpush1.bf16.msra.mxu1 %v15310_v0  ;;  %10188 = vmatprep.subr.bf16.mxu0 %v15321_v17  ;;  %v15358_v0 = vld [vmem:[#allocation6 + $0x13c8] ss:$16 sps:$4 sm:$0xff]   ;;  %v15369_v17 = vld [vmem:[#allocation6 + $0x14ec] ss:$16 sps:$4 sm:$0xff]  }
 0x47a   :  { %10163 = vmatprep.subr.bf16.mxu1 %v15318_v21  ;;  %v15366_v21 = vld [vmem:[#allocation6 + $0x13ec] ss:$16 sps:$4 sm:$0xff]  }
 0x47c   :  { %10189 = vmatpush1.bf16.msra.mxu0 %v15319_v42  ;;  %v15367_v42 = vld [vmem:[#allocation6 + $0x14e8] ss:$16 sps:$4 sm:$0xff]  }
 0x47d   :  { %10164 = vmatpush1.bf16.msra.mxu1 %v15316_v28  ;;  %10190 = vmatprep.subr.bf16.mxu0 %v15324_v44  ;;  %v15364_v28 = vld [vmem:[#allocation6 + $0x13e8] ss:$16 sps:$4 sm:$0xff]   ;;  %v15375_v44 = vld [vmem:[#allocation6 + $0x160c] ss:$16 sps:$4 sm:$0xff]  }
 0x47e   :  { %10215 = vmatprep.subr.bf16.mxu1 %v15327_v58  ;;  %v15373_v58 = vld [vmem:[#allocation6 + $0x1608] ss:$16 sps:$4 sm:$0xff]  }
 0x480   :  { %10166 = vmatmul.mubr.bf16.vlgmr.msra.gmra.mrb[60].mxu1 %v16550_v51  ;;  %10191 = vmatpush1.bf16.msra.mxu0 %v15322_v13  ;;  %v15340_v51 = vld [vmem:[#allocation6 + $0x1368] ss:$16 sps:$4 sm:$0xff]   ;;  %v15378_v13 = vld [vmem:[#allocation6 + $0x152c] ss:$16 sps:$4 sm:$0xff]  }
 0x481   :  { %10216 = vmatpush1.bf16.msra.mxu1 %v15325_v18  ;;  %10192 = vmatprep.subr.bf16.mxu0 %v15330_v59  ;;  %v15381_v18 = vld [vmem:[#allocation6 + $0x162c] ss:$16 sps:$4 sm:$0xff]   ;;  %v15376_v59 = vld [vmem:[#allocation6 + $0x1528] ss:$16 sps:$4 sm:$0xff]  }
 0x482   :  { %10217 = vmatprep.subr.bf16.mxu1 %v15333_v23  ;;  %10247 = vmatprep.mubr.bf16.mxu1 %v16554_v60  ;;  %v15349_v60 = vld [vmem:[#allocation6 + $0x1488] ss:$16 sps:$4 sm:$0xff]  }
 0x483   :  { %v15379_v23 = vld [vmem:[#allocation6 + $0x1628] ss:$16 sps:$4 sm:$0xff]  }
 0x484   :  { %10193 = vmatpush1.bf16.msra.mxu0 %v15328_v32  ;;  %v15384_v32 = vld [vmem:[#allocation6 + $0x154c] ss:$16 sps:$4 sm:$0xff]  }
 0x485   :  { %10218 = vmatpush1.bf16.msra.mxu1 %v15331_v48  ;;  %10194 = vmatprep.subr.bf16.mxu0 %v15336_v25  ;;  %v15387_v48 = vld [vmem:[#allocation6 + $0x164c] ss:$16 sps:$4 sm:$0xff]   ;;  %v15382_v25 = vld [vmem:[#allocation6 + $0x1548] ss:$16 sps:$4 sm:$0xff]  }
 0x486   :  { %10219 = vmatprep.subr.bf16.mxu1 %v15339_v49  ;;  %v15385_v49 = vld [vmem:[#allocation6 + $0x1648] ss:$16 sps:$4 sm:$0xff]  }
 0x488   :  { %10195 = vmatpush1.bf16.msra.mxu0 %v15334_v30  ;;  %v15390_v30 = vld [vmem:[#allocation6 + $0x156c] ss:$16 sps:$4 sm:$0xff]  }
 0x489   :  { %10220 = vmatpush1.bf16.msra.mxu1 %v15337_v34  ;;  %10196 = vmatprep.subr.bf16.mxu0 %v15342_v43  ;;  %v15393_v34 = vld [vmem:[#allocation6 + $0x166c] ss:$16 sps:$4 sm:$0xff]   ;;  %v15391_v43 = vld [vmem:[#allocation6 + $0x1668] ss:$16 sps:$4 sm:$0xff]  }
 0x48a   :  { %10221 = vmatprep.subr.bf16.mxu1 %v15345_v24  ;;  %v15396_v24 = vld [vmem:[#allocation6 + $0x158c] ss:$16 sps:$4 sm:$0xff]  }
 0x48c   :  { %10197 = vmatpush1.bf16.msra.mxu0 %v15340_v51  ;;  %v15399_v51 = vld [vmem:[#allocation6 + $0x168c] ss:$16 sps:$4 sm:$0xff]  }
 0x48d   :  { %10222 = vmatpush1.bf16.msra.mxu1 %v15343_v3  ;;  %10198 = vmatprep.subr.bf16.mxu0 %v15348_v2  ;;  %v15394_v3 = vld [vmem:[#allocation6 + $0x1588] ss:$16 sps:$4 sm:$0xff]   ;;  %v15402_v2 = vld [vmem:[#allocation6 + $0x15ac] ss:$16 sps:$4 sm:$0xff]  }
 0x48e   :  { %10223 = vmatprep.subr.bf16.mxu1 %v15351_v52  ;;  %v15405_v52 = vld [vmem:[#allocation6 + $0x16ac] ss:$16 sps:$4 sm:$0xff]  }
 0x490   :  { %10199 = vmatpush1.bf16.msra.mxu0 %v15346_v35  ;;  %v15400_v35 = vld [vmem:[#allocation6 + $0x15a8] ss:$16 sps:$4 sm:$0xff]  }
 0x491   :  { %10224 = vmatpush1.bf16.msra.mxu1 %v15349_v60  ;;  %10200 = vmatprep.subr.bf16.mxu0 %v15354_v56  ;;  %v15403_v60 = vld [vmem:[#allocation6 + $0x16a8] ss:$16 sps:$4 sm:$0xff]   ;;  %v15408_v56 = vld [vmem:[#allocation6 + $0x15cc] ss:$16 sps:$4 sm:$0xff]  }
 0x492   :  { %10225 = vmatprep.subr.bf16.mxu1 %v15357_v11  ;;  %v15411_v11 = vld [vmem:[#allocation6 + $0x16cc] ss:$16 sps:$4 sm:$0xff]  }
 0x493   :  { %v9921_v12 = vpop.f32.mrb[48].mxu1 }
 0x494   :  { %v16729_v16 = vadd.f32 %v9921_v12, %v16721_v39  ;;  %v9923_v8 = vpop.f32.mrb[49].mxu1  ;;  %10201 = vmatpush1.bf16.msra.mxu0 %v15352_v50  ;;  %v15372_v39 = vld [vmem:[#allocation6 + $0x150c] ss:$16 sps:$4 sm:$0xff]  }
 0x495   :  { %v16732_v37 = vadd.f32 %v9923_v8, %v16724_v6  ;;  %v9925_v9 = vpop.f32.mrb[50].mxu1  ;;  %10226 = vmatpush1.bf16.msra.mxu1 %v15355_v10  ;;  %10202 = vmatprep.subr.bf16.mxu0 %v15360_v5  ;;  %v15370_v6 = vld [vmem:[#allocation6 + $0x1508] ss:$16 sps:$4 sm:$0xff]  }
 0x496   :  { %v9926_v7 = vpop.f32.mrb[51].mxu1  ;;  %10227 = vmatprep.subr.bf16.mxu1 %v15363_v20  ;;  %v15406_v8 = vld [vmem:[#allocation6 + $0x15c8] ss:$16 sps:$4 sm:$0xff]  }
 0x497   :  { %v15409_v9 = vld [vmem:[#allocation6 + $0x16c8] ss:$16 sps:$4 sm:$0xff]   ;;  %v15417_v7 = vld [vmem:[#allocation6 + $0x16ec] ss:$16 sps:$4 sm:$0xff]  }
 0x498   :  { %10203 = vmatpush1.bf16.msra.mxu0 %v15358_v0 }
 0x499   :  { %10228 = vmatpush1.bf16.msra.mxu1 %v15361_v40  ;;  %10204 = vmatprep.subr.bf16.mxu0 %v15366_v21  ;;  %v15414_v40 = vld [vmem:[#allocation6 + $0x15ec] ss:$16 sps:$4 sm:$0xff]   ;;  %v15412_v21 = vld [vmem:[#allocation6 + $0x15e8] ss:$16 sps:$4 sm:$0xff]  }
 0x49a   :  { %10229 = vmatprep.subr.bf16.mxu1 %v15369_v17  ;;  %v15415_v17 = vld [vmem:[#allocation6 + $0x16e8] ss:$16 sps:$4 sm:$0xff]  }
 0x49c   :  { %10205 = vmatpush1.bf16.msra.mxu0 %v15364_v28  ;;  %v15423_v28 = vld [vmem:[#allocation6 + $0x180c] ss:$16 sps:$4 sm:$0xff]  }
 0x49d   :  { %10230 = vmatpush1.bf16.msra.mxu1 %v15367_v42  ;;  %10256 = vmatprep.subr.bf16.mxu0 %v15375_v44  ;;  %v15421_v42 = vld [vmem:[#allocation6 + $0x1808] ss:$16 sps:$4 sm:$0xff]   ;;  %v15429_v44 = vld [vmem:[#allocation6 + $0x182c] ss:$16 sps:$4 sm:$0xff]  }
 0x49e   :  { %10231 = vmatprep.subr.bf16.mxu1 %v15372_v39  ;;  %v15426_v39 = vld [vmem:[#allocation6 + $0x172c] ss:$16 sps:$4 sm:$0xff]  }
 0x49f   :  { %10207 = vmatmul.mubr.bf16.vlgmr.msra.gmra.mrb[64].mxu0 %v16552_v53  ;;  %v15388_v53 = vld [vmem:[#allocation6 + $0x1568] ss:$16 sps:$4 sm:$0xff]  }
 0x4a0   :  { %10257 = vmatpush1.bf16.msra.mxu0 %v15373_v58  ;;  %10288 = vmatprep.mubr.bf16.mxu0 %v16556_v61  ;;  %v15397_v61 = vld [vmem:[#allocation6 + $0x1688] ss:$16 sps:$4 sm:$0xff]  }
 0x4a1   :  { %10232 = vmatpush1.bf16.msra.mxu1 %v15370_v6  ;;  %10258 = vmatprep.subr.bf16.mxu0 %v15381_v18  ;;  %v15424_v6 = vld [vmem:[#allocation6 + $0x1728] ss:$16 sps:$4 sm:$0xff]   ;;  %v15435_v18 = vld [vmem:[#allocation6 + $0x184c] ss:$16 sps:$4 sm:$0xff]  }
 0x4a2   :  { %10233 = vmatprep.subr.bf16.mxu1 %v15378_v13  ;;  %v15427_v58 = vld [vmem:[#allocation6 + $0x1828] ss:$16 sps:$4 sm:$0xff]   ;;  %v15432_v13 = vld [vmem:[#allocation6 + $0x174c] ss:$16 sps:$4 sm:$0xff]  }
 0x4a4   :  { %10259 = vmatpush1.bf16.msra.mxu0 %v15379_v23  ;;  %v15433_v23 = vld [vmem:[#allocation6 + $0x1848] ss:$16 sps:$4 sm:$0xff]  }
 0x4a5   :  { %10234 = vmatpush1.bf16.msra.mxu1 %v15376_v59  ;;  %10260 = vmatprep.subr.bf16.mxu0 %v15387_v48  ;;  %v15430_v59 = vld [vmem:[#allocation6 + $0x1748] ss:$16 sps:$4 sm:$0xff]   ;;  %v15441_v48 = vld [vmem:[#allocation6 + $0x186c] ss:$16 sps:$4 sm:$0xff]  }
 0x4a6   :  { %10235 = vmatprep.subr.bf16.mxu1 %v15384_v32  ;;  %v15438_v32 = vld [vmem:[#allocation6 + $0x176c] ss:$16 sps:$4 sm:$0xff]  }
 0x4a8   :  { %10261 = vmatpush1.bf16.msra.mxu0 %v15385_v49  ;;  %v15444_v49 = vld [vmem:[#allocation6 + $0x178c] ss:$16 sps:$4 sm:$0xff]  }
 0x4a9   :  { %10236 = vmatpush1.bf16.msra.mxu1 %v15382_v25  ;;  %10262 = vmatprep.subr.bf16.mxu0 %v15393_v34  ;;  %v15439_v25 = vld [vmem:[#allocation6 + $0x1868] ss:$16 sps:$4 sm:$0xff]  }
 0x4aa   :  { %10237 = vmatprep.subr.bf16.mxu1 %v15390_v30  ;;  %v15447_v30 = vld [vmem:[#allocation6 + $0x188c] ss:$16 sps:$4 sm:$0xff]   ;;  %v15442_v34 = vld [vmem:[#allocation6 + $0x1788] ss:$16 sps:$4 sm:$0xff]  }
 0x4ac   :  { %10263 = vmatpush1.bf16.msra.mxu0 %v15391_v43  ;;  %v15453_v43 = vld [vmem:[#allocation6 + $0x18ac] ss:$16 sps:$4 sm:$0xff]  }
 0x4ad   :  { %10238 = vmatpush1.bf16.msra.mxu1 %v15388_v53  ;;  %10264 = vmatprep.subr.bf16.mxu0 %v15399_v51  ;;  %v15450_v53 = vld [vmem:[#allocation6 + $0x17ac] ss:$16 sps:$4 sm:$0xff]   ;;  %v15451_v51 = vld [vmem:[#allocation6 + $0x18a8] ss:$16 sps:$4 sm:$0xff]  }
 0x4ae   :  { %10239 = vmatprep.subr.bf16.mxu1 %v15396_v24  ;;  %v15448_v24 = vld [vmem:[#allocation6 + $0x17a8] ss:$16 sps:$4 sm:$0xff]  }
 0x4b0   :  { %10265 = vmatpush1.bf16.msra.mxu0 %v15397_v61  ;;  %v15459_v61 = vld [vmem:[#allocation6 + $0x18cc] ss:$16 sps:$4 sm:$0xff]  }
 0x4b1   :  { %10240 = vmatpush1.bf16.msra.mxu1 %v15394_v3  ;;  %10266 = vmatprep.subr.bf16.mxu0 %v15405_v52  ;;  %v15456_v3 = vld [vmem:[#allocation6 + $0x17cc] ss:$16 sps:$4 sm:$0xff]  }
 0x4b2   :  { %10241 = vmatprep.subr.bf16.mxu1 %v15402_v2  ;;  %v9962_v50 = vpop.f32.mrb[52].mxu0 }
 0x4b3   :  { %v16737_v10 = vadd.f32 %v9962_v50, %v16729_v16  ;;  %v9964_v5 = vpop.f32.mrb[53].mxu0  ;;  %v15420_v16 = vld [vmem:[#allocation6 + $0x170c] ss:$16 sps:$4 sm:$0xff]   ;;  %v15457_v50 = vld [vmem:[#allocation6 + $0x18c8] ss:$16 sps:$4 sm:$0xff]  }
 0x4b4   :  { %v16740_v20 = vadd.f32 %v9964_v5, %v16732_v37  ;;  %v9966_v12 = vpop.f32.mrb[54].mxu0  ;;  %10267 = vmatpush1.bf16.msra.mxu0 %v15403_v60  ;;  %v15418_v37 = vld [vmem:[#allocation6 + $0x1708] ss:$16 sps:$4 sm:$0xff]  }
 0x4b5   :  { %10242 = vmatpush1.bf16.msra.mxu1 %v15400_v35  ;;  %v9967_v0 = vpop.f32.mrb[55].mxu0  ;;  %10268 = vmatprep.subr.bf16.mxu0 %v15411_v11  ;;  %v15454_v11 = vld [vmem:[#allocation6 + $0x17c8] ss:$16 sps:$4 sm:$0xff]   ;;  %v15462_v12 = vld [vmem:[#allocation6 + $0x17ec] ss:$16 sps:$4 sm:$0xff]  }
 0x4b6   :  { %10243 = vmatprep.subr.bf16.mxu1 %v15408_v56  ;;  %v15463_v0 = vld [vmem:[#allocation6 + $0x18e8] ss:$16 sps:$4 sm:$0xff]  }
 0x4b8   :  { %10269 = vmatpush1.bf16.msra.mxu0 %v15409_v9  ;;  %v15460_v9 = vld [vmem:[#allocation6 + $0x17e8] ss:$16 sps:$4 sm:$0xff]  }
 0x4b9   :  { %10244 = vmatpush1.bf16.msra.mxu1 %v15406_v8  ;;  %10270 = vmatprep.subr.bf16.mxu0 %v15417_v7  ;;  %v15465_v8 = vld [vmem:[#allocation6 + $0x18ec] ss:$16 sps:$4 sm:$0xff]   ;;  %v15469_v7 = vld [vmem:[#allocation6 + $0x1a08] ss:$16 sps:$4 sm:$0xff]  }
 0x4ba   :  { %10245 = vmatprep.subr.bf16.mxu1 %v15414_v40  ;;  %v15471_v40 = vld [vmem:[#allocation6 + $0x1a0c] ss:$16 sps:$4 sm:$0xff]  }
 0x4bc   :  { %10271 = vmatpush1.bf16.msra.mxu0 %v15415_v17  ;;  %v15477_v17 = vld [vmem:[#allocation6 + $0x1a2c] ss:$16 sps:$4 sm:$0xff]  }
 0x4bd   :  { %10246 = vmatpush1.bf16.msra.mxu1 %v15412_v21  ;;  %10272 = vmatprep.subr.bf16.mxu0 %v15420_v16  ;;  %v15474_v21 = vld [vmem:[#allocation6 + $0x192c] ss:$16 sps:$4 sm:$0xff]   ;;  %v15472_v16 = vld [vmem:[#allocation6 + $0x1928] ss:$16 sps:$4 sm:$0xff]  }
 0x4be   :  { %10297 = vmatprep.subr.bf16.mxu1 %v15423_v28  ;;  %v15475_v28 = vld [vmem:[#allocation6 + $0x1a28] ss:$16 sps:$4 sm:$0xff]  }
 0x4c0   :  { %10248 = vmatmul.mubr.bf16.vlgmr.msra.gmra.mrb[64].mxu1 %v16568_v46  ;;  %10273 = vmatpush1.bf16.msra.mxu0 %v15418_v37  ;;  %v15436_v46 = vld [vmem:[#allocation6 + $0x1768] ss:$16 sps:$4 sm:$0xff]   ;;  %v15480_v37 = vld [vmem:[#allocation6 + $0x194c] ss:$16 sps:$4 sm:$0xff]  }
 0x4c1   :  { %10298 = vmatpush1.bf16.msra.mxu1 %v15421_v42  ;;  %10274 = vmatprep.subr.bf16.mxu0 %v15426_v39  ;;  %v15483_v42 = vld [vmem:[#allocation6 + $0x1a4c] ss:$16 sps:$4 sm:$0xff]   ;;  %v15478_v39 = vld [vmem:[#allocation6 + $0x1948] ss:$16 sps:$4 sm:$0xff]  }
 0x4c2   :  { %10299 = vmatprep.subr.bf16.mxu1 %v15429_v44  ;;  %10329 = vmatprep.mubr.bf16.mxu1 %v16572_v62  ;;  %v15445_v62 = vld [vmem:[#allocation6 + $0x1888] ss:$16 sps:$4 sm:$0xff]  }
 0x4c3   :  { %v15481_v44 = vld [vmem:[#allocation6 + $0x1a48] ss:$16 sps:$4 sm:$0xff]  }
 0x4c4   :  { %10275 = vmatpush1.bf16.msra.mxu0 %v15424_v6  ;;  %v15486_v6 = vld [vmem:[#allocation6 + $0x196c] ss:$16 sps:$4 sm:$0xff]  }
 0x4c5   :  { %10300 = vmatpush1.bf16.msra.mxu1 %v15427_v58  ;;  %10276 = vmatprep.subr.bf16.mxu0 %v15432_v13  ;;  %v15489_v58 = vld [vmem:[#allocation6 + $0x1a6c] ss:$16 sps:$4 sm:$0xff]   ;;  %v15487_v13 = vld [vmem:[#allocation6 + $0x1a68] ss:$16 sps:$4 sm:$0xff]  }
 0x4c6   :  { %10301 = vmatprep.subr.bf16.mxu1 %v15435_v18  ;;  %v15492_v18 = vld [vmem:[#allocation6 + $0x198c] ss:$16 sps:$4 sm:$0xff]  }
 0x4c8   :  { %10277 = vmatpush1.bf16.msra.mxu0 %v15430_v59  ;;  %v15495_v59 = vld [vmem:[#allocation6 + $0x1a8c] ss:$16 sps:$4 sm:$0xff]  }
 0x4c9   :  { %10302 = vmatpush1.bf16.msra.mxu1 %v15433_v23  ;;  %10278 = vmatprep.subr.bf16.mxu0 %v15438_v32  ;;  %v15490_v23 = vld [vmem:[#allocation6 + $0x1988] ss:$16 sps:$4 sm:$0xff]   ;;  %v15498_v32 = vld [vmem:[#allocation6 + $0x19ac] ss:$16 sps:$4 sm:$0xff]  }
 0x4ca   :  { %10303 = vmatprep.subr.bf16.mxu1 %v15441_v48  ;;  %v15501_v48 = vld [vmem:[#allocation6 + $0x1aac] ss:$16 sps:$4 sm:$0xff]  }
 0x4cc   :  { %10279 = vmatpush1.bf16.msra.mxu0 %v15436_v46  ;;  %v15496_v46 = vld [vmem:[#allocation6 + $0x19a8] ss:$16 sps:$4 sm:$0xff]  }
 0x4cd   :  { %10304 = vmatpush1.bf16.msra.mxu1 %v15439_v25  ;;  %10280 = vmatprep.subr.bf16.mxu0 %v15444_v49  ;;  %v15499_v25 = vld [vmem:[#allocation6 + $0x1aa8] ss:$16 sps:$4 sm:$0xff]   ;;  %v15504_v49 = vld [vmem:[#allocation6 + $0x19cc] ss:$16 sps:$4 sm:$0xff]  }
 0x4ce   :  { %10305 = vmatprep.subr.bf16.mxu1 %v15447_v30  ;;  %v15507_v30 = vld [vmem:[#allocation6 + $0x1acc] ss:$16 sps:$4 sm:$0xff]  }
 0x4d0   :  { %10281 = vmatpush1.bf16.msra.mxu0 %v15442_v34 }
 0x4d1   :  { %10306 = vmatpush1.bf16.msra.mxu1 %v15445_v62  ;;  %10282 = vmatprep.subr.bf16.mxu0 %v15450_v53 }
 0x4d2   :  { %10307 = vmatprep.subr.bf16.mxu1 %v15453_v43 }
 0x4d3   :  { %v10003_v2 = vpop.f32.mrb[52].mxu1 }
 0x4d4   :  { %v16745_v52 = vadd.f32 %v10003_v2, %v16737_v10  ;;  %v10005_v35 = vpop.f32.mrb[53].mxu1  ;;  %10283 = vmatpush1.bf16.msra.mxu0 %v15448_v24  ;;  %v15468_v10 = vld [vmem:[#allocation6 + $0x190c] ss:$16 sps:$4 sm:$0xff]  }
 0x4d5   :  { %v16748_v60 = vadd.f32 %v10005_v35, %v16740_v20  ;;  %v10007_v56 = vpop.f32.mrb[54].mxu1  ;;  %10308 = vmatpush1.bf16.msra.mxu1 %v15451_v51  ;;  %10284 = vmatprep.subr.bf16.mxu0 %v15456_v3  ;;  %v15466_v20 = vld [vmem:[#allocation6 + $0x1908] ss:$16 sps:$4 sm:$0xff]   ;;  %v15510_v2 = vld [vmem:[#allocation6 + $0x19ec] ss:$16 sps:$4 sm:$0xff]  }
 0x4d6   :  { %v10008_v5 = vpop.f32.mrb[55].mxu1  ;;  %10309 = vmatprep.subr.bf16.mxu1 %v15459_v61  ;;  %v15502_v51 = vld [vmem:[#allocation6 + $0x19c8] ss:$16 sps:$4 sm:$0xff]   ;;  %v15513_v35 = vld [vmem:[#allocation6 + $0x1aec] ss:$16 sps:$4 sm:$0xff]  }
 0x4d7   :  { %v15505_v3 = vld [vmem:[#allocation6 + $0x1ac8] ss:$16 sps:$4 sm:$0xff]  }
 0x4d8   :  { %10285 = vmatpush1.bf16.msra.mxu0 %v15454_v11  ;;  %v15508_v56 = vld [vmem:[#allocation6 + $0x19e8] ss:$16 sps:$4 sm:$0xff]  }
 0x4d9   :  { %10310 = vmatpush1.bf16.msra.mxu1 %v15457_v50  ;;  %10286 = vmatprep.subr.bf16.mxu0 %v15462_v12  ;;  %v15511_v11 = vld [vmem:[#allocation6 + $0x1ae8] ss:$16 sps:$4 sm:$0xff]   ;;  %v15519_v50 = vld [vmem:[#allocation6 + $0x1c0c] ss:$16 sps:$4 sm:$0xff]  }
 0x4da   :  { %10311 = vmatprep.subr.bf16.mxu1 %v15465_v8  ;;  %v15517_v5 = vld [vmem:[#allocation6 + $0x1c08] ss:$16 sps:$4 sm:$0xff]   ;;  %v15522_v12 = vld [vmem:[#allocation6 + $0x1b2c] ss:$16 sps:$4 sm:$0xff]  }
 0x4db   :  { %v15525_v8 = vld [vmem:[#allocation6 + $0x1c2c] ss:$16 sps:$4 sm:$0xff]  }
 0x4dc   :  { %10287 = vmatpush1.bf16.msra.mxu0 %v15460_v9  ;;  %v15520_v9 = vld [vmem:[#allocation6 + $0x1b28] ss:$16 sps:$4 sm:$0xff]  }
 0x4dd   :  { %10312 = vmatpush1.bf16.msra.mxu1 %v15463_v0  ;;  %10338 = vmatprep.subr.bf16.mxu0 %v15471_v40  ;;  %v15523_v0 = vld [vmem:[#allocation6 + $0x1c28] ss:$16 sps:$4 sm:$0xff]   ;;  %v15531_v40 = vld [vmem:[#allocation6 + $0x1c4c] ss:$16 sps:$4 sm:$0xff]  }
 0x4de   :  { %10313 = vmatprep.subr.bf16.mxu1 %v15468_v10  ;;  %v15528_v10 = vld [vmem:[#allocation6 + $0x1b4c] ss:$16 sps:$4 sm:$0xff]  }
 0x4df   :  { %10289 = vmatmul.mubr.bf16.vlgmr.msra.gmra.mrb[68].mxu0 %v16570_v54  ;;  %v15484_v54 = vld [vmem:[#allocation6 + $0x1968] ss:$16 sps:$4 sm:$0xff]  }
 0x4e0   :  { %10339 = vmatpush1.bf16.msra.mxu0 %v15469_v7  ;;  %10370 = vmatprep.mubr.bf16.mxu0 %v16574_v63  ;;  %v15493_v63 = vld [vmem:[#allocation6 + $0x1a88] ss:$16 sps:$4 sm:$0xff]  }
 0x4e1   :  { %10314 = vmatpush1.bf16.msra.mxu1 %v15466_v20  ;;  %10340 = vmatprep.subr.bf16.mxu0 %v15477_v17  ;;  %v15526_v20 = vld [vmem:[#allocation6 + $0x1b48] ss:$16 sps:$4 sm:$0xff]   ;;  %v15537_v17 = vld [vmem:[#allocation6 + $0x1c6c] ss:$16 sps:$4 sm:$0xff]  }
 0x4e2   :  { %10315 = vmatprep.subr.bf16.mxu1 %v15474_v21  ;;  %v15529_v7 = vld [vmem:[#allocation6 + $0x1c48] ss:$16 sps:$4 sm:$0xff]   ;;  %v15534_v21 = vld [vmem:[#allocation6 + $0x1b6c] ss:$16 sps:$4 sm:$0xff]  }
 0x4e4   :  { %10341 = vmatpush1.bf16.msra.mxu0 %v15475_v28  ;;  %v15540_v28 = vld [vmem:[#allocation6 + $0x1b8c] ss:$16 sps:$4 sm:$0xff]  }
 0x4e5   :  { %10316 = vmatpush1.bf16.msra.mxu1 %v15472_v16  ;;  %10342 = vmatprep.subr.bf16.mxu0 %v15483_v42  ;;  %v15535_v16 = vld [vmem:[#allocation6 + $0x1c68] ss:$16 sps:$4 sm:$0xff]  }
 0x4e6   :  { %10317 = vmatprep.subr.bf16.mxu1 %v15480_v37  ;;  %v15543_v37 = vld [vmem:[#allocation6 + $0x1c8c] ss:$16 sps:$4 sm:$0xff]   ;;  %v15538_v42 = vld [vmem:[#allocation6 + $0x1b88] ss:$16 sps:$4 sm:$0xff]  }
 0x4e8   :  { %10343 = vmatpush1.bf16.msra.mxu0 %v15481_v44  ;;  %v15549_v44 = vld [vmem:[#allocation6 + $0x1cac] ss:$16 sps:$4 sm:$0xff]  }
 0x4e9   :  { %10318 = vmatpush1.bf16.msra.mxu1 %v15478_v39  ;;  %10344 = vmatprep.subr.bf16.mxu0 %v15489_v58  ;;  %v15546_v39 = vld [vmem:[#allocation6 + $0x1bac] ss:$16 sps:$4 sm:$0xff]   ;;  %v15547_v58 = vld [vmem:[#allocation6 + $0x1ca8] ss:$16 sps:$4 sm:$0xff]  }
 0x4ea   :  { %10319 = vmatprep.subr.bf16.mxu1 %v15486_v6  ;;  %v15544_v6 = vld [vmem:[#allocation6 + $0x1ba8] ss:$16 sps:$4 sm:$0xff]  }
 0x4ec   :  { %10345 = vmatpush1.bf16.msra.mxu0 %v15487_v13  ;;  %v15555_v13 = vld [vmem:[#allocation6 + $0x1ccc] ss:$16 sps:$4 sm:$0xff]  }
 0x4ed   :  { %10320 = vmatpush1.bf16.msra.mxu1 %v15484_v54  ;;  %10346 = vmatprep.subr.bf16.mxu0 %v15495_v59  ;;  %v15552_v54 = vld [vmem:[#allocation6 + $0x1bcc] ss:$16 sps:$4 sm:$0xff]  }
 0x4ee   :  { %10321 = vmatprep.subr.bf16.mxu1 %v15492_v18 }
 0x4f0   :  { %10347 = vmatpush1.bf16.msra.mxu0 %v15493_v63 }
 0x4f1   :  { %10322 = vmatpush1.bf16.msra.mxu1 %v15490_v23  ;;  %10348 = vmatprep.subr.bf16.mxu0 %v15501_v48  ;;  %v15550_v48 = vld [vmem:[#allocation6 + $0x1bc8] ss:$16 sps:$4 sm:$0xff]  }
 0x4f2   :  { %10323 = vmatprep.subr.bf16.mxu1 %v15498_v32  ;;  %v10044_v34 = vpop.f32.mrb[56].mxu0 }
 0x4f3   :  { %v16753_v62 = vadd.f32 %v10044_v34, %v16745_v52  ;;  %v10046_v53 = vpop.f32.mrb[57].mxu0  ;;  %v15516_v52 = vld [vmem:[#allocation6 + $0x1b0c] ss:$16 sps:$4 sm:$0xff]   ;;  %v15556_v34 = vld [vmem:[#allocation6 + $0x1be8] ss:$16 sps:$4 sm:$0xff]  }
 0x4f4   :  { %v16756_v43 = vadd.f32 %v10046_v53, %v16748_v60  ;;  %v10048_v24 = vpop.f32.mrb[58].mxu0  ;;  %10349 = vmatpush1.bf16.msra.mxu0 %v15499_v25  ;;  %v15514_v60 = vld [vmem:[#allocation6 + $0x1b08] ss:$16 sps:$4 sm:$0xff]  }
 0x4f5   :  { %10324 = vmatpush1.bf16.msra.mxu1 %v15496_v46  ;;  %v10049_v61 = vpop.f32.mrb[59].mxu0  ;;  %10350 = vmatprep.subr.bf16.mxu0 %v15507_v30  ;;  %v15553_v46 = vld [vmem:[#allocation6 + $0x1cc8] ss:$16 sps:$4 sm:$0xff]   ;;  %v15561_v30 = vld [vmem:[#allocation6 + $0x1cec] ss:$16 sps:$4 sm:$0xff]  }
 0x4f6   :  { %10325 = vmatprep.subr.bf16.mxu1 %v15504_v49  ;;  %v15558_v49 = vld [vmem:[#allocation6 + $0x1bec] ss:$16 sps:$4 sm:$0xff]   ;;  %v15559_v53 = vld [vmem:[#allocation6 + $0x1ce8] ss:$16 sps:$4 sm:$0xff]  }
 0x4f7   :  { %v15567_v24 = vld [vmem:[#allocation6 + $0x1e0c] ss:$16 sps:$4 sm:$0xff]  }
 0x4f8   :  { %10351 = vmatpush1.bf16.msra.mxu0 %v15505_v3  ;;  %v15570_v3 = vld [vmem:[#allocation6 + $0x1d2c] ss:$16 sps:$4 sm:$0xff]  }
 0x4f9   :  { %10326 = vmatpush1.bf16.msra.mxu1 %v15502_v51  ;;  %10352 = vmatprep.subr.bf16.mxu0 %v15513_v35  ;;  %v15565_v51 = vld [vmem:[#allocation6 + $0x1e08] ss:$16 sps:$4 sm:$0xff]   ;;  %v15573_v61 = vld [vmem:[#allocation6 + $0x1e2c] ss:$16 sps:$4 sm:$0xff]  }
 0x4fa   :  { %10327 = vmatprep.subr.bf16.mxu1 %v15510_v2  ;;  %v15568_v2 = vld [vmem:[#allocation6 + $0x1d28] ss:$16 sps:$4 sm:$0xff]  }
 0x4fb   :  { %v15571_v35 = vld [vmem:[#allocation6 + $0x1e28] ss:$16 sps:$4 sm:$0xff]  }
 0x4fc   :  { %10353 = vmatpush1.bf16.msra.mxu0 %v15511_v11  ;;  %v15579_v11 = vld [vmem:[#allocation6 + $0x1e4c] ss:$16 sps:$4 sm:$0xff]  }
 0x4fd   :  { %10328 = vmatpush1.bf16.msra.mxu1 %v15508_v56  ;;  %10354 = vmatprep.subr.bf16.mxu0 %v15516_v52  ;;  %v15576_v56 = vld [vmem:[#allocation6 + $0x1d4c] ss:$16 sps:$4 sm:$0xff]   ;;  %v15574_v52 = vld [vmem:[#allocation6 + $0x1d48] ss:$16 sps:$4 sm:$0xff]  }
 0x4fe   :  { %10379 = vmatprep.subr.bf16.mxu1 %v15519_v50  ;;  %v15577_v50 = vld [vmem:[#allocation6 + $0x1e48] ss:$16 sps:$4 sm:$0xff]  }
 0x500   :  { %10330 = vmatmul.mubr.bf16.vlgmr.msra.gmra.mrb[68].mxu1 %v16586_v55  ;;  %10355 = vmatpush1.bf16.msra.mxu0 %v15514_v60  ;;  %v15532_v55 = vld [vmem:[#allocation6 + $0x1b68] ss:$16 sps:$4 sm:$0xff]   ;;  %v15582_v60 = vld [vmem:[#allocation6 + $0x1d6c] ss:$16 sps:$4 sm:$0xff]  }
 0x501   :  { %10380 = vmatpush1.bf16.msra.mxu1 %v15517_v5  ;;  %10356 = vmatprep.subr.bf16.mxu0 %v15522_v12  ;;  %v15585_v5 = vld [vmem:[#allocation6 + $0x1e6c] ss:$16 sps:$4 sm:$0xff]   ;;  %v15583_v12 = vld [vmem:[#allocation6 + $0x1e68] ss:$16 sps:$4 sm:$0xff]  }
 0x502   :  { %10381 = vmatprep.subr.bf16.mxu1 %v15525_v8  ;;  %10411 = vmatprep.mubr.bf16.mxu1 %v16590_v14  ;;  %v15541_v14 = vld [vmem:[#allocation6 + $0x1c88] ss:$16 sps:$4 sm:$0xff]   ;;  %v15588_v8 = vld [vmem:[#allocation6 + $0x1d8c] ss:$16 sps:$4 sm:$0xff]  }
 0x504   :  { %10357 = vmatpush1.bf16.msra.mxu0 %v15520_v9  ;;  %v15591_v9 = vld [vmem:[#allocation6 + $0x1e8c] ss:$16 sps:$4 sm:$0xff]  }
 0x505   :  { %10382 = vmatpush1.bf16.msra.mxu1 %v15523_v0  ;;  %10358 = vmatprep.subr.bf16.mxu0 %v15528_v10  ;;  %v15586_v0 = vld [vmem:[#allocation6 + $0x1d88] ss:$16 sps:$4 sm:$0xff]   ;;  %v15594_v10 = vld [vmem:[#allocation6 + $0x1dac] ss:$16 sps:$4 sm:$0xff]  }
 0x506   :  { %10383 = vmatprep.subr.bf16.mxu1 %v15531_v40  ;;  %v15597_v40 = vld [vmem:[#allocation6 + $0x1eac] ss:$16 sps:$4 sm:$0xff]  }
 0x508   :  { %10359 = vmatpush1.bf16.msra.mxu0 %v15526_v20  ;;  %v15592_v20 = vld [vmem:[#allocation6 + $0x1da8] ss:$16 sps:$4 sm:$0xff]  }
 0x509   :  { %10384 = vmatpush1.bf16.msra.mxu1 %v15529_v7  ;;  %10360 = vmatprep.subr.bf16.mxu0 %v15534_v21  ;;  %v15595_v7 = vld [vmem:[#allocation6 + $0x1ea8] ss:$16 sps:$4 sm:$0xff]   ;;  %v15600_v21 = vld [vmem:[#allocation6 + $0x1dcc] ss:$16 sps:$4 sm:$0xff]  }
 0x50a   :  { %10385 = vmatprep.subr.bf16.mxu1 %v15537_v17  ;;  %v15603_v17 = vld [vmem:[#allocation6 + $0x1ecc] ss:$16 sps:$4 sm:$0xff]  }
 0x50c   :  { %10361 = vmatpush1.bf16.msra.mxu0 %v15532_v55 }
 0x50d   :  { %10386 = vmatpush1.bf16.msra.mxu1 %v15535_v16  ;;  %10362 = vmatprep.subr.bf16.mxu0 %v15540_v28 }
 0x50e   :  { %10387 = vmatprep.subr.bf16.mxu1 %v15543_v37 }
 0x510   :  { %10363 = vmatpush1.bf16.msra.mxu0 %v15538_v42 }
 0x511   :  { %10388 = vmatpush1.bf16.msra.mxu1 %v15541_v14  ;;  %10364 = vmatprep.subr.bf16.mxu0 %v15546_v39  ;;  %v15598_v14 = vld [vmem:[#allocation6 + $0x1dc8] ss:$16 sps:$4 sm:$0xff]  }
 0x512   :  { %10389 = vmatprep.subr.bf16.mxu1 %v15549_v44  ;;  %v15601_v39 = vld [vmem:[#allocation6 + $0x1ec8] ss:$16 sps:$4 sm:$0xff]  }
 0x513   :  { %v10085_v18 = vpop.f32.mrb[56].mxu1 }
 0x514   :  { %v16761_v59 = vadd.f32 %v10085_v18, %v16753_v62  ;;  %v10087_v23 = vpop.f32.mrb[57].mxu1  ;;  %10365 = vmatpush1.bf16.msra.mxu0 %v15544_v6  ;;  %v15564_v62 = vld [vmem:[#allocation6 + $0x1d0c] ss:$16 sps:$4 sm:$0xff]  }
 0x515   :  { %v16764_v63 = vadd.f32 %v10087_v23, %v16756_v43  ;;  %v10089_v32 = vpop.f32.mrb[58].mxu1  ;;  %10390 = vmatpush1.bf16.msra.mxu1 %v15547_v58  ;;  %10366 = vmatprep.subr.bf16.mxu0 %v15552_v54  ;;  %v15562_v43 = vld [vmem:[#allocation6 + $0x1d08] ss:$16 sps:$4 sm:$0xff]   ;;  %v15606_v6 = vld [vmem:[#allocation6 + $0x1dec] ss:$16 sps:$4 sm:$0xff]  }
 0x516   :  { %v10090_v25 = vpop.f32.mrb[59].mxu1  ;;  %10391 = vmatprep.subr.bf16.mxu1 %v15555_v13  ;;  %v15609_v58 = vld [vmem:[#allocation6 + $0x1eec] ss:$16 sps:$4 sm:$0xff]   ;;  %v15604_v54 = vld [vmem:[#allocation6 + $0x1de8] ss:$16 sps:$4 sm:$0xff]  }
 0x517   :  { %v15607_v13 = vld [vmem:[#allocation6 + $0x1ee8] ss:$16 sps:$4 sm:$0xff]   ;;  %v15612_v18 = vld [vmem:[#allocation6 + $0x1f0c] ss:$16 sps:$4 sm:$0xff]  }
 0x518   :  { %10367 = vmatpush1.bf16.msra.mxu0 %v15550_v48  ;;  %v15610_v23 = vld [vmem:[#allocation6 + $0x1f08] ss:$16 sps:$4 sm:$0xff]   ;;  %v15618_v32 = vld [vmem:[#allocation6 + $0x1f2c] ss:$16 sps:$4 sm:$0xff]  }
 0x519   :  { %10392 = vmatpush1.bf16.msra.mxu1 %v15553_v46  ;;  %10368 = vmatprep.subr.bf16.mxu0 %v15558_v49  ;;  %v15621_v48 = vld [vmem:[#allocation6 + $0x202c] ss:$16 sps:$4 sm:$0xff]   ;;  %v15616_v46 = vld [vmem:[#allocation6 + $0x1f28] ss:$16 sps:$4 sm:$0xff]  }
 0x51a   :  { %10393 = vmatprep.subr.bf16.mxu1 %v15561_v30  ;;  %v15619_v25 = vld [vmem:[#allocation6 + $0x2028] ss:$16 sps:$4 sm:$0xff]   ;;  %v15624_v49 = vld [vmem:[#allocation6 + $0x1f4c] ss:$16 sps:$4 sm:$0xff]  }
 0x51b   :  { %v15627_v30 = vld [vmem:[#allocation6 + $0x204c] ss:$16 sps:$4 sm:$0xff]  }
 0x51c   :  { %10369 = vmatpush1.bf16.msra.mxu0 %v15556_v34  ;;  %v15622_v34 = vld [vmem:[#allocation6 + $0x1f48] ss:$16 sps:$4 sm:$0xff]  }
 0x51d   :  { %10394 = vmatpush1.bf16.msra.mxu1 %v15559_v53  ;;  %10420 = vmatprep.subr.bf16.mxu0 %v15567_v24  ;;  %v15625_v53 = vld [vmem:[#allocation6 + $0x2048] ss:$16 sps:$4 sm:$0xff]   ;;  %v15633_v24 = vld [vmem:[#allocation6 + $0x206c] ss:$16 sps:$4 sm:$0xff]  }
 0x51e   :  { %10395 = vmatprep.subr.bf16.mxu1 %v15564_v62  ;;  %v15630_v62 = vld [vmem:[#allocation6 + $0x1f6c] ss:$16 sps:$4 sm:$0xff]  }
 0x51f   :  { %10371 = vmatmul.mubr.bf16.vlgmr.msra.gmra.mrb[72].mxu0 %v16588_v1  ;;  %v15580_v1 = vld [vmem:[#allocation6 + $0x1d68] ss:$16 sps:$4 sm:$0xff]  }
 0x520   :  { %10421 = vmatpush1.bf16.msra.mxu0 %v15565_v51  ;;  %10452 = vmatprep.mubr.bf16.mxu0 %v16592_v15  ;;  %v15589_v15 = vld [vmem:[#allocation6 + $0x1e88] ss:$16 sps:$4 sm:$0xff]   ;;  %v15636_v51 = vld [vmem:[#allocation6 + $0x1f8c] ss:$16 sps:$4 sm:$0xff]  }
 0x521   :  { %10396 = vmatpush1.bf16.msra.mxu1 %v15562_v43  ;;  %10422 = vmatprep.subr.bf16.mxu0 %v15573_v61  ;;  %v15631_v43 = vld [vmem:[#allocation6 + $0x2068] ss:$16 sps:$4 sm:$0xff]  }
 0x522   :  { %10397 = vmatprep.subr.bf16.mxu1 %v15570_v3  ;;  %v15639_v3 = vld [vmem:[#allocation6 + $0x208c] ss:$16 sps:$4 sm:$0xff]   ;;  %v15634_v61 = vld [vmem:[#allocation6 + $0x1f88] ss:$16 sps:$4 sm:$0xff]  }
 0x524   :  { %10423 = vmatpush1.bf16.msra.mxu0 %v15571_v35  ;;  %v15645_v35 = vld [vmem:[#allocation6 + $0x20ac] ss:$16 sps:$4 sm:$0xff]  }
 0x525   :  { %10398 = vmatpush1.bf16.msra.mxu1 %v15568_v2  ;;  %10424 = vmatprep.subr.bf16.mxu0 %v15579_v11  ;;  %v15642_v2 = vld [vmem:[#allocation6 + $0x1fac] ss:$16 sps:$4 sm:$0xff]   ;;  %v15643_v11 = vld [vmem:[#allocation6 + $0x20a8] ss:$16 sps:$4 sm:$0xff]  }
 0x526   :  { %10399 = vmatprep.subr.bf16.mxu1 %v15576_v56  ;;  %v15640_v56 = vld [vmem:[#allocation6 + $0x1fa8] ss:$16 sps:$4 sm:$0xff]  }
 0x528   :  { %10425 = vmatpush1.bf16.msra.mxu0 %v15577_v50  ;;  %v15651_v50 = vld [vmem:[#allocation6 + $0x20cc] ss:$16 sps:$4 sm:$0xff]  }
 0x529   :  { %10400 = vmatpush1.bf16.msra.mxu1 %v15574_v52  ;;  %10426 = vmatprep.subr.bf16.mxu0 %v15585_v5  ;;  %v15648_v52 = vld [vmem:[#allocation6 + $0x1fcc] ss:$16 sps:$4 sm:$0xff]  }
 0x52a   :  { %10401 = vmatprep.subr.bf16.mxu1 %v15582_v60 }
 0x52c   :  { %10427 = vmatpush1.bf16.msra.mxu0 %v15583_v12 }
 0x52d   :  { %10402 = vmatpush1.bf16.msra.mxu1 %v15580_v1  ;;  %10428 = vmatprep.subr.bf16.mxu0 %v15591_v9  ;;  %v15646_v9 = vld [vmem:[#allocation6 + $0x1fc8] ss:$16 sps:$4 sm:$0xff]  }
 0x52e   :  { %10403 = vmatprep.subr.bf16.mxu1 %v15588_v8 }
 0x530   :  { %10429 = vmatpush1.bf16.msra.mxu0 %v15589_v15 }
 0x531   :  { %10404 = vmatpush1.bf16.msra.mxu1 %v15586_v0  ;;  %10430 = vmatprep.subr.bf16.mxu0 %v15597_v40  ;;  %v15649_v0 = vld [vmem:[#allocation6 + $0x20c8] ss:$16 sps:$4 sm:$0xff]   ;;  %v15657_v40 = vld [vmem:[#allocation6 + $0x20ec] ss:$16 sps:$4 sm:$0xff]  }
 0x532   :  { %10405 = vmatprep.subr.bf16.mxu1 %v15594_v10  ;;  %v10126_v55 = vpop.f32.mrb[60].mxu0  ;;  %v15654_v10 = vld [vmem:[#allocation6 + $0x1fec] ss:$16 sps:$4 sm:$0xff]  }
 0x533   :  { %v16769_v16 = vadd.f32 %v10126_v55, %v16761_v59  ;;  %v10128_v28 = vpop.f32.mrb[61].mxu0  ;;  %v15615_v59 = vld [vmem:[#allocation6 + $0x200c] ss:$16 sps:$4 sm:$0xff]   ;;  %v15658_v55 = vld [vmem:[#allocation6 + $0x2108] ss:$16 sps:$4 sm:$0xff]  }
 0x534   :  { %v16772_v37 = vadd.f32 %v10128_v28, %v16764_v63  ;;  %v10130_v42 = vpop.f32.mrb[62].mxu0  ;;  %10431 = vmatpush1.bf16.msra.mxu0 %v15595_v7  ;;  %v15613_v63 = vld [vmem:[#allocation6 + $0x2008] ss:$16 sps:$4 sm:$0xff]   ;;  %v15666_v28 = vld [vmem:[#allocation6 + $0x212c] ss:$16 sps:$4 sm:$0xff]  }
 0x535   :  { %10406 = vmatpush1.bf16.msra.mxu1 %v15592_v20  ;;  %v10131_v44 = vpop.f32.mrb[63].mxu0  ;;  %10432 = vmatprep.subr.bf16.mxu0 %v15603_v17  ;;  %v15652_v20 = vld [vmem:[#allocation6 + $0x1fe8] ss:$16 sps:$4 sm:$0xff]   ;;  %v15663_v17 = vld [vmem:[#allocation6 + $0x220c] ss:$16 sps:$4 sm:$0xff]  }
 0x536   :  { %10407 = vmatprep.subr.bf16.mxu1 %v15600_v21  ;;  %v15655_v7 = vld [vmem:[#allocation6 + $0x20e8] ss:$16 sps:$4 sm:$0xff]   ;;  %v15660_v21 = vld [vmem:[#allocation6 + $0x210c] ss:$16 sps:$4 sm:$0xff]  }
 0x537   :  { %v15664_v42 = vld [vmem:[#allocation6 + $0x2128] ss:$16 sps:$4 sm:$0xff]   ;;  %v15675_v44 = vld [vmem:[#allocation6 + $0x224c] ss:$16 sps:$4 sm:$0xff]  }
 0x538   :  { %10433 = vmatpush1.bf16.msra.mxu0 %v15601_v39  ;;  %v15672_v39 = vld [vmem:[#allocation6 + $0x214c] ss:$16 sps:$4 sm:$0xff]  }
 0x539   :  { %10408 = vmatpush1.bf16.msra.mxu1 %v15598_v14  ;;  %10434 = vmatprep.subr.bf16.mxu0 %v15609_v58  ;;  %v15667_v14 = vld [vmem:[#allocation6 + $0x2228] ss:$16 sps:$4 sm:$0xff]  }
 0x53a   :  { %10409 = vmatprep.subr.bf16.mxu1 %v15606_v6  ;;  %v15670_v6 = vld [vmem:[#allocation6 + $0x2148] ss:$16 sps:$4 sm:$0xff]  }
 0x53b   :  { %v15673_v58 = vld [vmem:[#allocation6 + $0x2248] ss:$16 sps:$4 sm:$0xff]  }
 0x53c   :  { %10435 = vmatpush1.bf16.msra.mxu0 %v15607_v13  ;;  %v15681_v13 = vld [vmem:[#allocation6 + $0x226c] ss:$16 sps:$4 sm:$0xff]  }
 0x53d   :  { %10410 = vmatpush1.bf16.msra.mxu1 %v15604_v54  ;;  %10436 = vmatprep.subr.bf16.mxu0 %v15612_v18  ;;  %v15678_v54 = vld [vmem:[#allocation6 + $0x216c] ss:$16 sps:$4 sm:$0xff]   ;;  %v15679_v18 = vld [vmem:[#allocation6 + $0x2268] ss:$16 sps:$4 sm:$0xff]  }
 0x53e   :  { %10461 = vmatprep.subr.bf16.mxu1 %v15615_v59  ;;  %v15684_v59 = vld [vmem:[#allocation6 + $0x218c] ss:$16 sps:$4 sm:$0xff]  }
 0x540   :  { %10412 = vmatmul.mubr.bf16.vlgmr.msra.gmra.mrb[72].mxu1 %v16604_v26  ;;  %10437 = vmatpush1.bf16.msra.mxu0 %v15610_v23  ;;  %v15628_v26 = vld [vmem:[#allocation6 + $0x1f68] ss:$16 sps:$4 sm:$0xff]   ;;  %v15687_v23 = vld [vmem:[#allocation6 + $0x228c] ss:$16 sps:$4 sm:$0xff]  }
 0x541   :  { %10462 = vmatpush1.bf16.msra.mxu1 %v15613_v63  ;;  %10438 = vmatprep.subr.bf16.mxu0 %v15618_v32  ;;  %v15682_v63 = vld [vmem:[#allocation6 + $0x2188] ss:$16 sps:$4 sm:$0xff]   ;;  %v15690_v32 = vld [vmem:[#allocation6 + $0x21ac] ss:$16 sps:$4 sm:$0xff]  }
 0x542   :  { %10463 = vmatprep.subr.bf16.mxu1 %v15621_v48  ;;  %10493 = vmatprep.mubr.bf16.mxu1 %v16608_v36  ;;  %v15637_v36 = vld [vmem:[#allocation6 + $0x2088] ss:$16 sps:$4 sm:$0xff]   ;;  %v15693_v48 = vld [vmem:[#allocation6 + $0x22ac] ss:$16 sps:$4 sm:$0xff]  }
 0x544   :  { %10439 = vmatpush1.bf16.msra.mxu0 %v15616_v46  ;;  %v15688_v46 = vld [vmem:[#allocation6 + $0x21a8] ss:$16 sps:$4 sm:$0xff]  }
 0x545   :  { %10464 = vmatpush1.bf16.msra.mxu1 %v15619_v25  ;;  %10440 = vmatprep.subr.bf16.mxu0 %v15624_v49  ;;  %v15691_v25 = vld [vmem:[#allocation6 + $0x22a8] ss:$16 sps:$4 sm:$0xff]   ;;  %v15696_v49 = vld [vmem:[#allocation6 + $0x21cc] ss:$16 sps:$4 sm:$0xff]  }
 0x546   :  { %10465 = vmatprep.subr.bf16.mxu1 %v15627_v30  ;;  %v15699_v30 = vld [vmem:[#allocation6 + $0x22cc] ss:$16 sps:$4 sm:$0xff]  }
 0x548   :  { %10441 = vmatpush1.bf16.msra.mxu0 %v15622_v34 }
 0x549   :  { %10466 = vmatpush1.bf16.msra.mxu1 %v15625_v53  ;;  %10442 = vmatprep.subr.bf16.mxu0 %v15630_v62 }
 0x54a   :  { %10467 = vmatprep.subr.bf16.mxu1 %v15633_v24 }
 0x54c   :  { %10443 = vmatpush1.bf16.msra.mxu0 %v15628_v26 }
 0x54d   :  { %10468 = vmatpush1.bf16.msra.mxu1 %v15631_v43  ;;  %10444 = vmatprep.subr.bf16.mxu0 %v15636_v51  ;;  %v15694_v43 = vld [vmem:[#allocation6 + $0x21c8] ss:$16 sps:$4 sm:$0xff]  }
 0x54e   :  { %10469 = vmatprep.subr.bf16.mxu1 %v15639_v3  ;;  %v15697_v51 = vld [vmem:[#allocation6 + $0x22c8] ss:$16 sps:$4 sm:$0xff]  }
 0x550   :  { %10445 = vmatpush1.bf16.msra.mxu0 %v15634_v61  ;;  %v15702_v61 = vld [vmem:[#allocation6 + $0x21ec] ss:$16 sps:$4 sm:$0xff]  }
 0x551   :  { %10470 = vmatpush1.bf16.msra.mxu1 %v15637_v36  ;;  %10446 = vmatprep.subr.bf16.mxu0 %v15642_v2  ;;  %v15705_v36 = vld [vmem:[#allocation6 + $0x22ec] ss:$16 sps:$4 sm:$0xff]   ;;  %v15700_v2 = vld [vmem:[#allocation6 + $0x21e8] ss:$16 sps:$4 sm:$0xff]  }
 0x552   :  { %10471 = vmatprep.subr.bf16.mxu1 %v15645_v35  ;;  %v15703_v35 = vld [vmem:[#allocation6 + $0x22e8] ss:$16 sps:$4 sm:$0xff]  }
 0x553   :  { %v10167_v60 = vpop.f32.mrb[60].mxu1 }
 0x554   :  { %v16777_v5 = vadd.f32 %v10167_v60, %v16769_v16  ;;  %v10169_v1 = vpop.f32.mrb[61].mxu1  ;;  %10447 = vmatpush1.bf16.msra.mxu0 %v15640_v56  ;;  %v15661_v16 = vld [vmem:[#allocation6 + $0x2208] ss:$16 sps:$4 sm:$0xff]   ;;  %v15708_v56 = vld [vmem:[#allocation6 + $0x230c] ss:$16 sps:$4 sm:$0xff]  }
 0x555   :  { %v16780_v12 = vadd.f32 %v10169_v1, %v16772_v37  ;;  %v10171_v8 = vpop.f32.mrb[62].mxu1  ;;  %10472 = vmatpush1.bf16.msra.mxu1 %v15643_v11  ;;  %10448 = vmatprep.subr.bf16.mxu0 %v15648_v52  ;;  %v15669_v37 = vld [vmem:[#allocation6 + $0x222c] ss:$16 sps:$4 sm:$0xff]   ;;  %v15706_v52 = vld [vmem:[#allocation6 + $0x2308] ss:$16 sps:$4 sm:$0xff]  }
 0x556   :  { %v10172_v15 = vpop.f32.mrb[63].mxu1  ;;  %10473 = vmatprep.subr.bf16.mxu1 %v15651_v50  ;;  %v15711_v11 = vld [vmem:[#allocation6 + $0x240c] ss:$16 sps:$4 sm:$0xff]   ;;  %v15709_v50 = vld [vmem:[#allocation6 + $0x2408] ss:$16 sps:$4 sm:$0xff]  }
 0x557   :  { %v15714_v60 = vld [vmem:[#allocation6 + $0x232c] ss:$16 sps:$4 sm:$0xff]   ;;  %v15712_v1 = vld [vmem:[#allocation6 + $0x2328] ss:$16 sps:$4 sm:$0xff]  }
 0x558   :  { %10449 = vmatpush1.bf16.msra.mxu0 %v15646_v9  ;;  %v15720_v8 = vld [vmem:[#allocation6 + $0x234c] ss:$16 sps:$4 sm:$0xff]   ;;  %v15721_v15 = vld [vmem:[#allocation6 + $0x2448] ss:$16 sps:$4 sm:$0xff]  }
 0x559   :  { %10474 = vmatpush1.bf16.msra.mxu1 %v15649_v0  ;;  %10450 = vmatprep.subr.bf16.mxu0 %v15654_v10  ;;  %v15723_v9 = vld [vmem:[#allocation6 + $0x244c] ss:$16 sps:$4 sm:$0xff]   ;;  %v15718_v0 = vld [vmem:[#allocation6 + $0x2348] ss:$16 sps:$4 sm:$0xff]  }
 0x55a   :  { %10475 = vmatprep.subr.bf16.mxu1 %v15657_v40  ;;  %v15726_v10 = vld [vmem:[#allocation6 + $0x236c] ss:$16 sps:$4 sm:$0xff]  }
 0x55b   :  { %v15729_v40 = vld [vmem:[#allocation6 + $0x246c] ss:$16 sps:$4 sm:$0xff]  }
 0x55c   :  { %10451 = vmatpush1.bf16.msra.mxu0 %v15652_v20  ;;  %v15727_v20 = vld [vmem:[#allocation6 + $0x2468] ss:$16 sps:$4 sm:$0xff]  }
 0x55d   :  { %10476 = vmatpush1.bf16.msra.mxu1 %v15655_v7  ;;  %10502 = vmatprep.subr.bf16.mxu0 %v15663_v17  ;;  %v15732_v7 = vld [vmem:[#allocation6 + $0x238c] ss:$16 sps:$4 sm:$0xff]   ;;  %v15730_v17 = vld [vmem:[#allocation6 + $0x2388] ss:$16 sps:$4 sm:$0xff]  }
 0x55e   :  { %10477 = vmatprep.subr.bf16.mxu1 %v15660_v21  ;;  %v15735_v21 = vld [vmem:[#allocation6 + $0x248c] ss:$16 sps:$4 sm:$0xff]  }
 0x55f   :  { %10453 = vmatmul.mubr.bf16.vlgmr.msra.gmra.mrb[76].mxu0 %v16606_v27  ;;  %v15676_v27 = vld [vmem:[#allocation6 + $0x2168] ss:$16 sps:$4 sm:$0xff]  }
 0x560   :  { %10503 = vmatpush1.bf16.msra.mxu0 %v15661_v16  ;;  %10534 = vmatprep.mubr.bf16.mxu0 %v16610_v38  ;;  %v15685_v38 = vld [vmem:[#allocation6 + $0x2288] ss:$16 sps:$4 sm:$0xff]   ;;  %v15741_v16 = vld [vmem:[#allocation6 + $0x24ac] ss:$16 sps:$4 sm:$0xff]  }
 0x561   :  { %10478 = vmatpush1.bf16.msra.mxu1 %v15658_v55  ;;  %10504 = vmatprep.subr.bf16.mxu0 %v15669_v37  ;;  %v15738_v55 = vld [vmem:[#allocation6 + $0x23ac] ss:$16 sps:$4 sm:$0xff]   ;;  %v15739_v37 = vld [vmem:[#allocation6 + $0x24a8] ss:$16 sps:$4 sm:$0xff]  }
 0x562   :  { %10479 = vmatprep.subr.bf16.mxu1 %v15666_v28  ;;  %v15736_v28 = vld [vmem:[#allocation6 + $0x23a8] ss:$16 sps:$4 sm:$0xff]  }
 0x564   :  { %10505 = vmatpush1.bf16.msra.mxu0 %v15667_v14  ;;  %v15747_v14 = vld [vmem:[#allocation6 + $0x24cc] ss:$16 sps:$4 sm:$0xff]  }
 0x565   :  { %10480 = vmatpush1.bf16.msra.mxu1 %v15664_v42  ;;  %10506 = vmatprep.subr.bf16.mxu0 %v15675_v44  ;;  %v15744_v42 = vld [vmem:[#allocation6 + $0x23cc] ss:$16 sps:$4 sm:$0xff]  }
 0x566   :  { %10481 = vmatprep.subr.bf16.mxu1 %v15672_v39 }
 0x568   :  { %10507 = vmatpush1.bf16.msra.mxu0 %v15673_v58 }
 0x569   :  { %10482 = vmatpush1.bf16.msra.mxu1 %v15670_v6  ;;  %10508 = vmatprep.subr.bf16.mxu0 %v15681_v13  ;;  %v15742_v13 = vld [vmem:[#allocation6 + $0x23c8] ss:$16 sps:$4 sm:$0xff]  }
 0x56a   :  { %10483 = vmatprep.subr.bf16.mxu1 %v15678_v54 }
 0x56c   :  { %10509 = vmatpush1.bf16.msra.mxu0 %v15679_v18 }
 0x56d   :  { %10484 = vmatpush1.bf16.msra.mxu1 %v15676_v27  ;;  %10510 = vmatprep.subr.bf16.mxu0 %v15687_v23  ;;  %v15745_v27 = vld [vmem:[#allocation6 + $0x24c8] ss:$16 sps:$4 sm:$0xff]   ;;  %v15753_v23 = vld [vmem:[#allocation6 + $0x24ec] ss:$16 sps:$4 sm:$0xff]  }
 0x56e   :  { %10485 = vmatprep.subr.bf16.mxu1 %v15684_v59  ;;  %v15750_v59 = vld [vmem:[#allocation6 + $0x23ec] ss:$16 sps:$4 sm:$0xff]  }
 0x570   :  { %10511 = vmatpush1.bf16.msra.mxu0 %v15685_v38  ;;  %v15751_v38 = vld [vmem:[#allocation6 + $0x24e8] ss:$16 sps:$4 sm:$0xff]  }
 0x571   :  { %10486 = vmatpush1.bf16.msra.mxu1 %v15682_v63  ;;  %10512 = vmatprep.subr.bf16.mxu0 %v15693_v48  ;;  %v15748_v63 = vld [vmem:[#allocation6 + $0x23e8] ss:$16 sps:$4 sm:$0xff]   ;;  %v15759_v48 = vld [vmem:[#allocation6 + $0x260c] ss:$16 sps:$4 sm:$0xff]  }
 0x572   :  { %10487 = vmatprep.subr.bf16.mxu1 %v15690_v32  ;;  %v10208_v34 = vpop.f32.mrb[64].mxu0  ;;  %v15756_v32 = vld [vmem:[#allocation6 + $0x250c] ss:$16 sps:$4 sm:$0xff]  }
 0x573   :  { %v16785_v53 = vadd.f32 %v10208_v34, %v16777_v5  ;;  %v10210_v62 = vpop.f32.mrb[65].mxu0  ;;  %v15717_v5 = vld [vmem:[#allocation6 + $0x242c] ss:$16 sps:$4 sm:$0xff]   ;;  %v15760_v34 = vld [vmem:[#allocation6 + $0x2528] ss:$16 sps:$4 sm:$0xff]  }
 0x574   :  { %v16788_v24 = vadd.f32 %v10210_v62, %v16780_v12  ;;  %v10212_v26 = vpop.f32.mrb[66].mxu0  ;;  %10513 = vmatpush1.bf16.msra.mxu0 %v15691_v25  ;;  %v15715_v12 = vld [vmem:[#allocation6 + $0x2428] ss:$16 sps:$4 sm:$0xff]   ;;  %v15768_v62 = vld [vmem:[#allocation6 + $0x254c] ss:$16 sps:$4 sm:$0xff]  }
 0x575   :  { %10488 = vmatpush1.bf16.msra.mxu1 %v15688_v46  ;;  %v10213_v3 = vpop.f32.mrb[67].mxu0  ;;  %10514 = vmatprep.subr.bf16.mxu0 %v15699_v30  ;;  %v15754_v46 = vld [vmem:[#allocation6 + $0x2508] ss:$16 sps:$4 sm:$0xff]   ;;  %v15765_v30 = vld [vmem:[#allocation6 + $0x262c] ss:$16 sps:$4 sm:$0xff]  }
 0x576   :  { %10489 = vmatprep.subr.bf16.mxu1 %v15696_v49  ;;  %v15757_v25 = vld [vmem:[#allocation6 + $0x2608] ss:$16 sps:$4 sm:$0xff]   ;;  %v15762_v49 = vld [vmem:[#allocation6 + $0x252c] ss:$16 sps:$4 sm:$0xff]  }
 0x577   :  { %v15766_v26 = vld [vmem:[#allocation6 + $0x2548] ss:$16 sps:$4 sm:$0xff]   ;;  %v15777_v3 = vld [vmem:[#allocation6 + $0x266c] ss:$16 sps:$4 sm:$0xff]  }
 0x578   :  { %10515 = vmatpush1.bf16.msra.mxu0 %v15697_v51  ;;  %v15774_v51 = vld [vmem:[#allocation6 + $0x256c] ss:$16 sps:$4 sm:$0xff]  }
 0x579   :  { %10490 = vmatpush1.bf16.msra.mxu1 %v15694_v43  ;;  %10516 = vmatprep.subr.bf16.mxu0 %v15705_v36  ;;  %v15769_v43 = vld [vmem:[#allocation6 + $0x2648] ss:$16 sps:$4 sm:$0xff]   ;;  %v15780_v36 = vld [vmem:[#allocation6 + $0x258c] ss:$16 sps:$4 sm:$0xff]  }
 0x57a   :  { %10491 = vmatprep.subr.bf16.mxu1 %v15702_v61  ;;  %v15775_v61 = vld [vmem:[#allocation6 + $0x2668] ss:$16 sps:$4 sm:$0xff]  }
 0x57c   :  { %10517 = vmatpush1.bf16.msra.mxu0 %v15703_v35  ;;  %v15778_v35 = vld [vmem:[#allocation6 + $0x2588] ss:$16 sps:$4 sm:$0xff]  }
 0x57d   :  { %10492 = vmatpush1.bf16.msra.mxu1 %v15700_v2  ;;  %10518 = vmatprep.subr.bf16.mxu0 %v15708_v56  ;;  %v15783_v2 = vld [vmem:[#allocation6 + $0x268c] ss:$16 sps:$4 sm:$0xff]  }
 0x57e   :  { %10543 = vmatprep.subr.bf16.mxu1 %v15711_v11  ;;  %v15786_v56 = vld [vmem:[#allocation6 + $0x25ac] ss:$16 sps:$4 sm:$0xff]  }
 0x57f   :  { %v15789_v11 = vld [vmem:[#allocation6 + $0x26ac] ss:$16 sps:$4 sm:$0xff]  }
 0x580   :  { %10494 = vmatmul.mubr.bf16.vlgmr.msra.gmra.mrb[76].mxu1 %v16622_v41  ;;  %10519 = vmatpush1.bf16.msra.mxu0 %v15706_v52  ;;  %v15724_v41 = vld [vmem:[#allocation6 + $0x2368] ss:$16 sps:$4 sm:$0xff]  }
 0x581   :  { %10544 = vmatpush1.bf16.msra.mxu1 %v15709_v50  ;;  %10520 = vmatprep.subr.bf16.mxu0 %v15714_v60  ;;  %v15784_v52 = vld [vmem:[#allocation6 + $0x25a8] ss:$16 sps:$4 sm:$0xff]   ;;  %v15792_v60 = vld [vmem:[#allocation6 + $0x25cc] ss:$16 sps:$4 sm:$0xff]  }
 0x582   :  { %10545 = vmatprep.subr.bf16.mxu1 %v15717_v5  ;;  %10575 = vmatprep.mubr.bf16.mxu1 %v16626_v31  ;;  %v15733_v31 = vld [vmem:[#allocation6 + $0x2488] ss:$16 sps:$4 sm:$0xff]   ;;  %v15795_v5 = vld [vmem:[#allocation6 + $0x26cc] ss:$16 sps:$4 sm:$0xff]  }
 0x583   :  { %v15787_v50 = vld [vmem:[#allocation6 + $0x26a8] ss:$16 sps:$4 sm:$0xff]  }
 0x584   :  { %10521 = vmatpush1.bf16.msra.mxu0 %v15712_v1 }
 0x585   :  { %10546 = vmatpush1.bf16.msra.mxu1 %v15715_v12  ;;  %10522 = vmatprep.subr.bf16.mxu0 %v15720_v8 }
 0x586   :  { %10547 = vmatprep.subr.bf16.mxu1 %v15723_v9 }
 0x588   :  { %10523 = vmatpush1.bf16.msra.mxu0 %v15718_v0 }
 0x589   :  { %10548 = vmatpush1.bf16.msra.mxu1 %v15721_v15  ;;  %10524 = vmatprep.subr.bf16.mxu0 %v15726_v10  ;;  %v15790_v15 = vld [vmem:[#allocation6 + $0x25c8] ss:$16 sps:$4 sm:$0xff]  }
 0x58a   :  { %10549 = vmatprep.subr.bf16.mxu1 %v15729_v40  ;;  %v15793_v10 = vld [vmem:[#allocation6 + $0x26c8] ss:$16 sps:$4 sm:$0xff]  }
 0x58c   :  { %10525 = vmatpush1.bf16.msra.mxu0 %v15724_v41  ;;  %v15798_v41 = vld [vmem:[#allocation6 + $0x25ec] ss:$16 sps:$4 sm:$0xff]  }
 0x58d   :  { %10550 = vmatpush1.bf16.msra.mxu1 %v15727_v20  ;;  %10526 = vmatprep.subr.bf16.mxu0 %v15732_v7  ;;  %v15801_v20 = vld [vmem:[#allocation6 + $0x26ec] ss:$16 sps:$4 sm:$0xff]   ;;  %v15796_v7 = vld [vmem:[#allocation6 + $0x25e8] ss:$16 sps:$4 sm:$0xff]  }
 0x58e   :  { %10551 = vmatprep.subr.bf16.mxu1 %v15735_v21  ;;  %v15799_v21 = vld [vmem:[#allocation6 + $0x26e8] ss:$16 sps:$4 sm:$0xff]  }
 0x590   :  { %10527 = vmatpush1.bf16.msra.mxu0 %v15730_v17  ;;  %v15804_v17 = vld [vmem:[#allocation6 + $0x270c] ss:$16 sps:$4 sm:$0xff]  }
 0x591   :  { %10552 = vmatpush1.bf16.msra.mxu1 %v15733_v31  ;;  %10528 = vmatprep.subr.bf16.mxu0 %v15738_v55  ;;  %v15807_v31 = vld [vmem:[#allocation6 + $0x280c] ss:$16 sps:$4 sm:$0xff]   ;;  %v15802_v55 = vld [vmem:[#allocation6 + $0x2708] ss:$16 sps:$4 sm:$0xff]  }
 0x592   :  { %10553 = vmatprep.subr.bf16.mxu1 %v15741_v16  ;;  %v15805_v16 = vld [vmem:[#allocation6 + $0x2808] ss:$16 sps:$4 sm:$0xff]  }
 0x593   :  { %v10249_v39 = vpop.f32.mrb[64].mxu1 }
 0x594   :  { %v16793_v44 = vadd.f32 %v10249_v39, %v16785_v53  ;;  %v10251_v6 = vpop.f32.mrb[65].mxu1  ;;  %10529 = vmatpush1.bf16.msra.mxu0 %v15736_v28  ;;  %v15763_v53 = vld [vmem:[#allocation6 + $0x2628] ss:$16 sps:$4 sm:$0xff]   ;;  %v15810_v28 = vld [vmem:[#allocation6 + $0x272c] ss:$16 sps:$4 sm:$0xff]  }
 0x595   :  { %v16796_v58 = vadd.f32 %v10251_v6, %v16788_v24  ;;  %v10253_v54 = vpop.f32.mrb[66].mxu1  ;;  %10554 = vmatpush1.bf16.msra.mxu1 %v15739_v37  ;;  %10530 = vmatprep.subr.bf16.mxu0 %v15744_v42  ;;  %v15771_v24 = vld [vmem:[#allocation6 + $0x264c] ss:$16 sps:$4 sm:$0xff]   ;;  %v15808_v42 = vld [vmem:[#allocation6 + $0x2728] ss:$16 sps:$4 sm:$0xff]  }
 0x596   :  { %v10254_v18 = vpop.f32.mrb[67].mxu1  ;;  %10555 = vmatprep.subr.bf16.mxu1 %v15747_v14  ;;  %v15813_v37 = vld [vmem:[#allocation6 + $0x282c] ss:$16 sps:$4 sm:$0xff]   ;;  %v15811_v14 = vld [vmem:[#allocation6 + $0x2828] ss:$16 sps:$4 sm:$0xff]  }
 0x597   :  { %v15816_v39 = vld [vmem:[#allocation6 + $0x274c] ss:$16 sps:$4 sm:$0xff]   ;;  %v15814_v6 = vld [vmem:[#allocation6 + $0x2748] ss:$16 sps:$4 sm:$0xff]  }
 0x598   :  { %10531 = vmatpush1.bf16.msra.mxu0 %v15742_v13  ;;  %v15822_v54 = vld [vmem:[#allocation6 + $0x276c] ss:$16 sps:$4 sm:$0xff]  }
 0x599   :  { %10556 = vmatpush1.bf16.msra.mxu1 %v15745_v27  ;;  %10532 = vmatprep.subr.bf16.mxu0 %v15750_v59  ;;  %v15825_v13 = vld [vmem:[#allocation6 + $0x286c] ss:$16 sps:$4 sm:$0xff]   ;;  %v15823_v27 = vld [vmem:[#allocation6 + $0x2868] ss:$16 sps:$4 sm:$0xff]  }
 0x59a   :  { %10557 = vmatprep.subr.bf16.mxu1 %v15753_v23  ;;  %v15828_v18 = vld [vmem:[#allocation6 + $0x278c] ss:$16 sps:$4 sm:$0xff]   ;;  %v15826_v23 = vld [vmem:[#allocation6 + $0x2788] ss:$16 sps:$4 sm:$0xff]  }
 0x59b   :  { %v15831_v59 = vld [vmem:[#allocation6 + $0x288c] ss:$16 sps:$4 sm:$0xff]  }
 0x59c   :  { %10533 = vmatpush1.bf16.msra.mxu0 %v15748_v63  ;;  %v15834_v63 = vld [vmem:[#allocation6 + $0x27ac] ss:$16 sps:$4 sm:$0xff]  }
 0x59d   :  { %10558 = vmatpush1.bf16.msra.mxu1 %v15751_v38  ;;  %10584 = vmatprep.subr.bf16.mxu0 %v15759_v48  ;;  %v15837_v38 = vld [vmem:[#allocation6 + $0x28ac] ss:$16 sps:$4 sm:$0xff]   ;;  %v15835_v48 = vld [vmem:[#allocation6 + $0x28a8] ss:$16 sps:$4 sm:$0xff]  }
 0x59e   :  { %10559 = vmatprep.subr.bf16.mxu1 %v15756_v32  ;;  %v15832_v32 = vld [vmem:[#allocation6 + $0x27a8] ss:$16 sps:$4 sm:$0xff]  }
 0x59f   :  { %10535 = vmatmul.mubr.bf16.vlgmr.msra.gmra.mrb[80].mxu0 %v16624_v22  ;;  %v15772_v22 = vld [vmem:[#allocation6 + $0x2568] ss:$16 sps:$4 sm:$0xff]  }
 0x5a0   :  { %10585 = vmatpush1.bf16.msra.mxu0 %v15757_v25  ;;  %10616 = vmatprep.mubr.bf16.mxu0 %v16628_v33  ;;  %v15781_v33 = vld [vmem:[#allocation6 + $0x2688] ss:$16 sps:$4 sm:$0xff]   ;;  %v15843_v25 = vld [vmem:[#allocation6 + $0x28cc] ss:$16 sps:$4 sm:$0xff]  }
 0x5a1   :  { %10560 = vmatpush1.bf16.msra.mxu1 %v15754_v46  ;;  %10586 = vmatprep.subr.bf16.mxu0 %v15765_v30  ;;  %v15840_v46 = vld [vmem:[#allocation6 + $0x27cc] ss:$16 sps:$4 sm:$0xff]  }
 0x5a2   :  { %10561 = vmatprep.subr.bf16.mxu1 %v15762_v49 }
 0x5a4   :  { %10587 = vmatpush1.bf16.msra.mxu0 %v15763_v53 }
 0x5a5   :  { %10562 = vmatpush1.bf16.msra.mxu1 %v15760_v34  ;;  %10588 = vmatprep.subr.bf16.mxu0 %v15771_v24  ;;  %v15838_v24 = vld [vmem:[#allocation6 + $0x27c8] ss:$16 sps:$4 sm:$0xff]  }
 0x5a6   :  { %10563 = vmatprep.subr.bf16.mxu1 %v15768_v62 }
 0x5a8   :  { %10589 = vmatpush1.bf16.msra.mxu0 %v15769_v43 }
 0x5a9   :  { %10564 = vmatpush1.bf16.msra.mxu1 %v15766_v26  ;;  %10590 = vmatprep.subr.bf16.mxu0 %v15777_v3  ;;  %v15841_v26 = vld [vmem:[#allocation6 + $0x28c8] ss:$16 sps:$4 sm:$0xff]   ;;  %v15849_v3 = vld [vmem:[#allocation6 + $0x28ec] ss:$16 sps:$4 sm:$0xff]  }
 0x5aa   :  { %10565 = vmatprep.subr.bf16.mxu1 %v15774_v51  ;;  %v15846_v51 = vld [vmem:[#allocation6 + $0x27ec] ss:$16 sps:$4 sm:$0xff]  }
 0x5ac   :  { %10591 = vmatpush1.bf16.msra.mxu0 %v15775_v61  ;;  %v15847_v61 = vld [vmem:[#allocation6 + $0x28e8] ss:$16 sps:$4 sm:$0xff]  }
 0x5ad   :  { %10566 = vmatpush1.bf16.msra.mxu1 %v15772_v22  ;;  %10592 = vmatprep.subr.bf16.mxu0 %v15783_v2  ;;  %v15844_v22 = vld [vmem:[#allocation6 + $0x27e8] ss:$16 sps:$4 sm:$0xff]   ;;  %v15855_v2 = vld [vmem:[#allocation6 + $0x2a0c] ss:$16 sps:$4 sm:$0xff]  }
 0x5ae   :  { %10567 = vmatprep.subr.bf16.mxu1 %v15780_v36  ;;  %v15852_v36 = vld [vmem:[#allocation6 + $0x290c] ss:$16 sps:$4 sm:$0xff]  }
 0x5b0   :  { %10593 = vmatpush1.bf16.msra.mxu0 %v15781_v33  ;;  %v15853_v33 = vld [vmem:[#allocation6 + $0x2a08] ss:$16 sps:$4 sm:$0xff]  }
 0x5b1   :  { %10568 = vmatpush1.bf16.msra.mxu1 %v15778_v35  ;;  %10594 = vmatprep.subr.bf16.mxu0 %v15789_v11  ;;  %v15850_v35 = vld [vmem:[#allocation6 + $0x2908] ss:$16 sps:$4 sm:$0xff]   ;;  %v15861_v11 = vld [vmem:[#allocation6 + $0x2a2c] ss:$16 sps:$4 sm:$0xff]  }
 0x5b2   :  { %10569 = vmatprep.subr.bf16.mxu1 %v15786_v56  ;;  %v10290_v1 = vpop.f32.mrb[68].mxu0  ;;  %v15858_v56 = vld [vmem:[#allocation6 + $0x292c] ss:$16 sps:$4 sm:$0xff]  }
 0x5b3   :  { %v16801_v12 = vadd.f32 %v10290_v1, %v16793_v44  ;;  %v10292_v8 = vpop.f32.mrb[69].mxu0  ;;  %v15819_v44 = vld [vmem:[#allocation6 + $0x284c] ss:$16 sps:$4 sm:$0xff]   ;;  %v16912_v1 = vld [vmem:[#allocation21_spill] sm:$0xff] }
 0x5b4   :  { %v16804_v9 = vadd.f32 %v10292_v8, %v16796_v58  ;;  %v10294_v0 = vpop.f32.mrb[70].mxu0  ;;  %10595 = vmatpush1.bf16.msra.mxu0 %v15787_v50  ;;  %v15817_v58 = vld [vmem:[#allocation6 + $0x2848] ss:$16 sps:$4 sm:$0xff]  }
 0x5b5   :  { %10570 = vmatpush1.bf16.msra.mxu1 %v15784_v52  ;;  %v10295_v40 = vpop.f32.mrb[71].mxu0  ;;  %10596 = vmatprep.subr.bf16.mxu0 %v15795_v5  ;;  %v15856_v52 = vld [vmem:[#allocation6 + $0x2928] ss:$16 sps:$4 sm:$0xff]   ;;  %v15867_v5 = vld [vmem:[#allocation6 + $0x2a4c] ss:$16 sps:$4 sm:$0xff]  }
 0x5b6   :  { %10571 = vmatprep.subr.bf16.mxu1 %v15792_v60  ;;  %v15859_v50 = vld [vmem:[#allocation6 + $0x2a28] ss:$16 sps:$4 sm:$0xff]   ;;  %v15864_v60 = vld [vmem:[#allocation6 + $0x294c] ss:$16 sps:$4 sm:$0xff]  }
 0x5b7   :  { %v15865_v8 = vld [vmem:[#allocation6 + $0x2a48] ss:$16 sps:$4 sm:$0xff]   ;;  %v15873_v0 = vld [vmem:[#allocation6 + $0x2a6c] ss:$16 sps:$4 sm:$0xff]  }
 0x5b8   :  { %10597 = vmatpush1.bf16.msra.mxu0 %v15793_v10  ;;  %v15876_v10 = vld [vmem:[#allocation6 + $0x298c] ss:$16 sps:$4 sm:$0xff]  }
 0x5b9   :  { %10572 = vmatpush1.bf16.msra.mxu1 %v15790_v15  ;;  %10598 = vmatprep.subr.bf16.mxu0 %v15801_v20  ;;  %v15871_v15 = vld [vmem:[#allocation6 + $0x2a68] ss:$16 sps:$4 sm:$0xff]   ;;  %v15879_v40 = vld [vmem:[#allocation6 + $0x2a8c] ss:$16 sps:$4 sm:$0xff]  }
 0x5ba   :  { %10573 = vmatprep.subr.bf16.mxu1 %v15798_v41  ;;  %v15874_v41 = vld [vmem:[#allocation6 + $0x2988] ss:$16 sps:$4 sm:$0xff]  }
 0x5bb   :  { %v15877_v20 = vld [vmem:[#allocation6 + $0x2a88] ss:$16 sps:$4 sm:$0xff]  }
 0x5bc   :  { %10599 = vmatpush1.bf16.msra.mxu0 %v15799_v21  ;;  %v15885_v21 = vld [vmem:[#allocation6 + $0x2aac] ss:$16 sps:$4 sm:$0xff]  }
 0x5bd   :  { %10574 = vmatpush1.bf16.msra.mxu1 %v15796_v7  ;;  %10600 = vmatprep.subr.bf16.mxu0 %v15804_v17  ;;  %v15882_v7 = vld [vmem:[#allocation6 + $0x29ac] ss:$16 sps:$4 sm:$0xff]   ;;  %v15880_v17 = vld [vmem:[#allocation6 + $0x29a8] ss:$16 sps:$4 sm:$0xff]  }
 0x5be   :  { %10625 = vmatprep.subr.bf16.mxu1 %v15807_v31  ;;  %v15883_v31 = vld [vmem:[#allocation6 + $0x2aa8] ss:$16 sps:$4 sm:$0xff]  }
 0x5c0   :  { %10576 = vmatmul.mubr.bf16.vlgmr.msra.gmra.mrb[80].mxu1 %v16640_v47  ;;  %10601 = vmatpush1.bf16.msra.mxu0 %v15802_v55  ;;  %v15820_v47 = vld [vmem:[#allocation6 + $0x2768] ss:$16 sps:$4 sm:$0xff]   ;;  %v15888_v55 = vld [vmem:[#allocation6 + $0x29cc] ss:$16 sps:$4 sm:$0xff]  }
 0x5c1   :  { %10626 = vmatpush1.bf16.msra.mxu1 %v15805_v16  ;;  %10602 = vmatprep.subr.bf16.mxu0 %v15810_v28  ;;  %v15891_v16 = vld [vmem:[#allocation6 + $0x2acc] ss:$16 sps:$4 sm:$0xff]  }
 0x5c2   :  { %10627 = vmatprep.subr.bf16.mxu1 %v15813_v37  ;;  %10657 = vmatprep.mubr.bf16.mxu1 %v16644_v4  ;;  %v15829_v4 = vld [vmem:[#allocation6 + $0x2888] ss:$16 sps:$4 sm:$0xff]  }
 0x5c4   :  { %10603 = vmatpush1.bf16.msra.mxu0 %v15808_v42 }
 0x5c5   :  { %10628 = vmatpush1.bf16.msra.mxu1 %v15811_v14  ;;  %10604 = vmatprep.subr.bf16.mxu0 %v15816_v39 }
 0x5c6   :  { %10629 = vmatprep.subr.bf16.mxu1 %v15819_v44  ;;  %v15886_v44 = vld [vmem:[#allocation6 + $0x29c8] ss:$16 sps:$4 sm:$0xff]  }
 0x5c8   :  { %10605 = vmatpush1.bf16.msra.mxu0 %v15814_v6  ;;  %v15889_v6 = vld [vmem:[#allocation6 + $0x2ac8] ss:$16 sps:$4 sm:$0xff]  }
 0x5c9   :  { %10630 = vmatpush1.bf16.msra.mxu1 %v15817_v58  ;;  %10606 = vmatprep.subr.bf16.mxu0 %v15822_v54  ;;  %v15894_v54 = vld [vmem:[#allocation6 + $0x29ec] ss:$16 sps:$4 sm:$0xff]  }
 0x5ca   :  { %10631 = vmatprep.subr.bf16.mxu1 %v15825_v13  ;;  %v15897_v13 = vld [vmem:[#allocation6 + $0x2aec] ss:$16 sps:$4 sm:$0xff]  }
 0x5cc   :  { %10607 = vmatpush1.bf16.msra.mxu0 %v15820_v47  ;;  %v15892_v47 = vld [vmem:[#allocation6 + $0x29e8] ss:$16 sps:$4 sm:$0xff]  }
 0x5cd   :  { %10632 = vmatpush1.bf16.msra.mxu1 %v15823_v27  ;;  %10608 = vmatprep.subr.bf16.mxu0 %v15828_v18  ;;  %v15895_v27 = vld [vmem:[#allocation6 + $0x2ae8] ss:$16 sps:$4 sm:$0xff]   ;;  %v15900_v18 = vld [vmem:[#allocation6 + $0x2b0c] ss:$16 sps:$4 sm:$0xff]  }
 0x5ce   :  { %10633 = vmatprep.subr.bf16.mxu1 %v15831_v59  ;;  %v15903_v59 = vld [vmem:[#allocation6 + $0x2c0c] ss:$16 sps:$4 sm:$0xff]  }
 0x5d0   :  { %10609 = vmatpush1.bf16.msra.mxu0 %v15826_v23  ;;  %v15898_v23 = vld [vmem:[#allocation6 + $0x2b08] ss:$16 sps:$4 sm:$0xff]  }
 0x5d1   :  { %10634 = vmatpush1.bf16.msra.mxu1 %v15829_v4  ;;  %10610 = vmatprep.subr.bf16.mxu0 %v15834_v63  ;;  %v15901_v4 = vld [vmem:[#allocation6 + $0x2c08] ss:$16 sps:$4 sm:$0xff]   ;;  %v15906_v63 = vld [vmem:[#allocation6 + $0x2b2c] ss:$16 sps:$4 sm:$0xff]  }
 0x5d2   :  { %10635 = vmatprep.subr.bf16.mxu1 %v15837_v38  ;;  %v15909_v38 = vld [vmem:[#allocation6 + $0x2c2c] ss:$16 sps:$4 sm:$0xff]  }
 0x5d3   :  { %v10331_v49 = vpop.f32.mrb[68].mxu1 }
 0x5d4   :  { %v16809_v30 = vadd.f32 %v10331_v49, %v16801_v12  ;;  %v10333_v34 = vpop.f32.mrb[69].mxu1  ;;  %10611 = vmatpush1.bf16.msra.mxu0 %v15832_v32  ;;  %v15862_v12 = vld [vmem:[#allocation6 + $0x2948] ss:$16 sps:$4 sm:$0xff]   ;;  %v15915_v49 = vld [vmem:[#allocation6 + $0x2c4c] ss:$16 sps:$4 sm:$0xff]  }
 0x5d5   :  { %v16812_v53 = vadd.f32 %v10333_v34, %v16804_v9  ;;  %v10335_v62 = vpop.f32.mrb[70].mxu1  ;;  %10636 = vmatpush1.bf16.msra.mxu1 %v15835_v48  ;;  %10612 = vmatprep.subr.bf16.mxu0 %v15840_v46  ;;  %v15870_v9 = vld [vmem:[#allocation6 + $0x296c] ss:$16 sps:$4 sm:$0xff]   ;;  %v15904_v48 = vld [vmem:[#allocation6 + $0x2b28] ss:$16 sps:$4 sm:$0xff]  }
 0x5d6   :  { %v10336_v43 = vpop.f32.mrb[71].mxu1  ;;  %10637 = vmatprep.subr.bf16.mxu1 %v15843_v25  ;;  %v16913_v32 = vld [vmem:[#allocation22_spill] sm:$0xff] }
 0x5d7   :  { %v15907_v46 = vld [vmem:[#allocation6 + $0x2c28] ss:$16 sps:$4 sm:$0xff]   ;;  %v15912_v25 = vld [vmem:[#allocation6 + $0x2b4c] ss:$16 sps:$4 sm:$0xff]  }
 0x5d8   :  { %10613 = vmatpush1.bf16.msra.mxu0 %v15838_v24  ;;  %v15910_v34 = vld [vmem:[#allocation6 + $0x2b48] ss:$16 sps:$4 sm:$0xff]   ;;  %v15918_v62 = vld [vmem:[#allocation6 + $0x2b6c] ss:$16 sps:$4 sm:$0xff]  }
 0x5d9   :  { %10638 = vmatpush1.bf16.msra.mxu1 %v15841_v26  ;;  %10614 = vmatprep.subr.bf16.mxu0 %v15846_v51  ;;  %v15921_v24 = vld [vmem:[#allocation6 + $0x2c6c] ss:$16 sps:$4 sm:$0xff]   ;;  %v15916_v26 = vld [vmem:[#allocation6 + $0x2b68] ss:$16 sps:$4 sm:$0xff]  }
 0x5da   :  { %10639 = vmatprep.subr.bf16.mxu1 %v15849_v3  ;;  %v15919_v43 = vld [vmem:[#allocation6 + $0x2c68] ss:$16 sps:$4 sm:$0xff]   ;;  %v15924_v51 = vld [vmem:[#allocation6 + $0x2b8c] ss:$16 sps:$4 sm:$0xff]  }
 0x5db   :  { %v15927_v3 = vld [vmem:[#allocation6 + $0x2c8c] ss:$16 sps:$4 sm:$0xff]  }
 0x5dc   :  { %10615 = vmatpush1.bf16.msra.mxu0 %v15844_v22  ;;  %v10765_v22 = vlaneseq }
 0x5dd   :  { %10640 = vmatpush1.bf16.msra.mxu1 %v15847_v61  ;;  %10666 = vmatprep.subr.bf16.mxu0 %v15855_v2  ;;  %v15922_v61 = vld [vmem:[#allocation6 + $0x2b88] ss:$16 sps:$4 sm:$0xff]   ;;  %v15930_v2 = vld [vmem:[#allocation6 + $0x2bac] ss:$16 sps:$4 sm:$0xff]  }
 0x5de   :  { %10641 = vmatprep.subr.bf16.mxu1 %v15852_v36  ;;  %v15925_v36 = vld [vmem:[#allocation6 + $0x2c88] ss:$16 sps:$4 sm:$0xff]  }
 0x5df   :  { %10617 = vmatmul.mubr.bf16.vlgmr.msra.gmra.mrb[84].mxu0 %v16642_v57  ;;  %v15868_v57 = vld [vmem:[#allocation6 + $0x2968] ss:$16 sps:$4 sm:$0xff]  }
 0x5e0   :  { %10667 = vmatpush1.bf16.msra.mxu0 %v15853_v33  ;;  %10698 = vmatprep.mubr.bf16.mxu0 %v16912_v1  ;;  %v16824_v33 = vshrl.u32 %v10765_v22, 7  ;;  %v1605_v1 = vld [vmem:[#allocation6 + $0x2ce8] sm:$0x77] }
 0x5e1   :  { %10642 = vmatpush1.bf16.msra.mxu1 %v15850_v35  ;;  %10668 = vmatprep.subr.bf16.mxu0 %v15861_v11  ;;  %v15933_v35 = vld [vmem:[#allocation6 + $0x2cac] ss:$16 sps:$4 sm:$0xff]   ;;  %v15931_v11 = vld [vmem:[#allocation6 + $0x2ca8] ss:$16 sps:$4 sm:$0xff]  }
 0x5e2   :  { %10643 = vmatprep.subr.bf16.mxu1 %v15858_v56  ;;  %v15928_v56 = vld [vmem:[#allocation6 + $0x2ba8] ss:$16 sps:$4 sm:$0xff]   ;;  %v15984_v22 = vld [vmem:[#allocation9 + $0xc8] ss:$16 sps:$4 sm:$0xff]  }
 0x5e4   :  { %10669 = vmatpush1.bf16.msra.mxu0 %v15859_v50  ;;  %v15939_v50 = vld [vmem:[#allocation6 + $0x2ccc] ss:$16 sps:$4 sm:$0xff]  }
 0x5e5   :  { %10644 = vmatpush1.bf16.msra.mxu1 %v15856_v52  ;;  %10670 = vmatprep.subr.bf16.mxu0 %v15867_v5  ;;  %v15936_v52 = vld [vmem:[#allocation6 + $0x2bcc] ss:$16 sps:$4 sm:$0xff]  }
 0x5e6   :  { %10645 = vmatprep.subr.bf16.mxu1 %v15864_v60  ;;  %v10771_v60 = vsub.s32 1, %v16824_v33 }
 0x5e8   :  { %10671 = vmatpush1.bf16.msra.mxu0 %v15865_v8 }
 0x5e9   :  { %10646 = vmatpush1.bf16.msra.mxu1 %v15862_v12  ;;  %10672 = vmatprep.subr.bf16.mxu0 %v15873_v0  ;;  %v16827_v12 = vld [vmem:[#allocation8] sm:$0xf] }
 0x5ea   :  { %10647 = vmatprep.subr.bf16.mxu1 %v15870_v9 }
 0x5ec   :  { %10673 = vmatpush1.bf16.msra.mxu0 %v15871_v15  ;;  %v15934_v15 = vld [vmem:[#allocation6 + $0x2bc8] ss:$16 sps:$4 sm:$0xff]  }
 0x5ed   :  { %10648 = vmatpush1.bf16.msra.mxu1 %v15868_v57  ;;  %10674 = vmatprep.subr.bf16.mxu0 %v15879_v40 }
 0x5ee   :  { %10649 = vmatprep.subr.bf16.mxu1 %v15876_v10  ;;  %v15937_v10 = vld [vmem:[#allocation6 + $0x2cc8] ss:$16 sps:$4 sm:$0xff]  }
 0x5f0   :  { %10675 = vmatpush1.bf16.msra.mxu0 %v15877_v20  ;;  %v13552_v20 = vcombine.high %v1605_v1, %v1605_v1 }
 0x5f1   :  { %10650 = vmatpush1.bf16.msra.mxu1 %v15874_v41  ;;  %10676 = vmatprep.subr.bf16.mxu0 %v15885_v21  ;;  %v15942_v41 = vld [vmem:[#allocation6 + $0x2bec] ss:$16 sps:$4 sm:$0xff]   ;;  %v10772_v21 = vrot.slane %v16827_v12, %v10771_v60 }
 0x5f2   :  { %10651 = vmatprep.subr.bf16.mxu1 %v15882_v7  ;;  %v10372_v28 = vpop.f32.mrb[72].mxu0  ;;  %v13551_v7 = vcombine.low %v1605_v1, %v1605_v1  ;;  %v16004_v1 = vld [vmem:[#allocation9 + $0x12c] ss:$16 sps:$4 sm:$0xff]  }
 0x5f3   :  { %v16817_v37 = vadd.f32 %v10372_v28, %v16809_v30  ;;  %v10374_v42 = vpop.f32.mrb[73].mxu0  ;;  %v16914_v30 = vmov 0   ;;  %v10786_v28 = vadd.f32 %v10772_v21, %v16710_v19  ;;  %v15954_v19 = vld [vmem:[#allocation9 + $0x28] ss:$16 sps:$4 sm:$0xff]   ;;  %v16019_v21 = vld [vmem:[#allocation9 + $0x184] ss:$16 sps:$4 sm:$0xff]  }
 0x5f4   :  { %v16820_v14 = vadd.f32 %v10374_v42, %v16812_v53  ;;  %v10376_v39 = vpop.f32.mrb[74].mxu0  ;;  %10677 = vmatpush1.bf16.msra.mxu0 %v15883_v31  ;;  %v15913_v53 = vld [vmem:[#allocation6 + $0x2c48] ss:$16 sps:$4 sm:$0xff]   ;;  %v8857_v31 = vsel %vm8849_vm0, %v13551_v7, 0  ;;  %v15948_v42 = vld [vmem:[#allocation9 + $0x8] ss:$16 sps:$4 sm:$0xff]  }
 0x5f5   :  { %10652 = vmatpush1.bf16.msra.mxu1 %v15880_v17  ;;  %v10377_v58 = vpop.f32.mrb[75].mxu0  ;;  %10678 = vmatprep.subr.bf16.mxu0 %v15891_v16  ;;  %v15940_v17 = vld [vmem:[#allocation6 + $0x2be8] ss:$16 sps:$4 sm:$0xff]   ;;  %v15950_v16 = vld [vmem:[#allocation9 + $0xc] ss:$16 sps:$4 sm:$0xff]  }
 0x5f6   :  { %10653 = vmatprep.subr.bf16.mxu1 %v15888_v55  ;;  %v15947_v55 = vld [vmem:[#allocation9 + $0x4] ss:$16 sps:$4 sm:$0xff]   ;;  %v15951_v58 = vld [vmem:[#allocation9 + $0x20] ss:$16 sps:$4 sm:$0xff]   ;;  %v16014_v7 = vld [vmem:[#allocation9 + $0x168] ss:$16 sps:$4 sm:$0xff]  }
 0x5f7   :  { %v15953_v39 = vld [vmem:[#allocation9 + $0x24] ss:$16 sps:$4 sm:$0xff]  }
 0x5f8   :  { %10679 = vmatpush1.bf16.msra.mxu0 %v15889_v6  ;;  %v16915_v6 = vld [vmem:[#allocation23_spill] sm:$0xff] }
 0x5f9   :  { %10654 = vmatpush1.bf16.msra.mxu1 %v15886_v44  ;;  %10680 = vmatprep.subr.bf16.mxu0 %v15897_v13  ;;  %v15956_v44 = vld [vmem:[#allocation9 + $0x2c] ss:$16 sps:$4 sm:$0xff]  }
 0x5fa   :  { %10655 = vmatprep.subr.bf16.mxu1 %v15894_v54  ;;  %v15959_v54 = vld [vmem:[#allocation9 + $0x44] ss:$16 sps:$4 sm:$0xff]   ;;  %v15962_v13 = vld [vmem:[#allocation9 + $0x4c] ss:$16 sps:$4 sm:$0xff]  }
 0x5fc   :  { %10681 = vmatpush1.bf16.msra.mxu0 %v15895_v27  ;;  %v15960_v27 = vld [vmem:[#allocation9 + $0x48] ss:$16 sps:$4 sm:$0xff]  }
 0x5fd   :  { %10656 = vmatpush1.bf16.msra.mxu1 %v15892_v47  ;;  %10682 = vmatprep.subr.bf16.mxu0 %v15900_v18  ;;  %v15957_v47 = vld [vmem:[#allocation9 + $0x40] ss:$16 sps:$4 sm:$0xff]   ;;  %v15965_v18 = vld [vmem:[#allocation9 + $0x64] ss:$16 sps:$4 sm:$0xff]  }
 0x5fe   :  { %10707 = vmatprep.subr.bf16.mxu1 %v15903_v59  ;;  %v15968_v59 = vld [vmem:[#allocation9 + $0x6c] ss:$16 sps:$4 sm:$0xff]  }
 0x600   :  { %10658 = vmatmul.mubr.bf16.vlgmr.msra.gmra.mrb[84].mxu1 %v16913_v32  ;;  %10683 = vmatpush1.bf16.msra.mxu0 %v15898_v23  ;;  %v15966_v23 = vld [vmem:[#allocation9 + $0x68] ss:$16 sps:$4 sm:$0xff]  }
 0x601   :  { %10708 = vmatpush1.bf16.msra.mxu1 %v15901_v4  ;;  %10684 = vmatprep.subr.bf16.mxu0 %v15906_v63  ;;  %v15971_v4 = vld [vmem:[#allocation9 + $0x84] ss:$16 sps:$4 sm:$0xff]   ;;  %v15974_v63 = vld [vmem:[#allocation9 + $0x8c] ss:$16 sps:$4 sm:$0xff]   ;;  %v15972_v32 = vld [vmem:[#allocation9 + $0x88] ss:$16 sps:$4 sm:$0xff]  }
 0x602   :  { %10709 = vmatprep.subr.bf16.mxu1 %v15909_v38  ;;  %10739 = vmatprep.mubr.bf16.mxu1 %v16914_v30  ;;  %v15969_v38 = vld [vmem:[#allocation9 + $0x80] ss:$16 sps:$4 sm:$0xff]   ;;  %v15983_v30 = vld [vmem:[#allocation9 + $0xc4] ss:$16 sps:$4 sm:$0xff]  }
 0x604   :  { %10685 = vmatpush1.bf16.msra.mxu0 %v15904_v48  ;;  %v15977_v48 = vld [vmem:[#allocation9 + $0xa4] ss:$16 sps:$4 sm:$0xff]  }
 0x605   :  { %10710 = vmatpush1.bf16.msra.mxu1 %v15907_v46  ;;  %10686 = vmatprep.subr.bf16.mxu0 %v15912_v25  ;;  %v15980_v46 = vld [vmem:[#allocation9 + $0xac] ss:$16 sps:$4 sm:$0xff]   ;;  %v15975_v25 = vld [vmem:[#allocation9 + $0xa0] ss:$16 sps:$4 sm:$0xff]  }
 0x606   :  { %10711 = vmatprep.subr.bf16.mxu1 %v15915_v49  ;;  %v15978_v49 = vld [vmem:[#allocation9 + $0xa8] ss:$16 sps:$4 sm:$0xff]  }
 0x608   :  { %10687 = vmatpush1.bf16.msra.mxu0 %v15910_v34 }
 0x609   :  { %10712 = vmatpush1.bf16.msra.mxu1 %v15913_v53  ;;  %10688 = vmatprep.subr.bf16.mxu0 %v15918_v62  ;;  %v15986_v53 = vld [vmem:[#allocation9 + $0xcc] ss:$16 sps:$4 sm:$0xff]  }
 0x60a   :  { %10713 = vmatprep.subr.bf16.mxu1 %v15921_v24 }
 0x60c   :  { %10689 = vmatpush1.bf16.msra.mxu0 %v15916_v26 }
 0x60d   :  { %10714 = vmatpush1.bf16.msra.mxu1 %v15919_v43  ;;  %10690 = vmatprep.subr.bf16.mxu0 %v15924_v51  ;;  %v15981_v51 = vld [vmem:[#allocation9 + $0xc0] ss:$16 sps:$4 sm:$0xff]  }
 0x60e   :  { %10715 = vmatprep.subr.bf16.mxu1 %v15927_v3 }
 0x610   :  { %10691 = vmatpush1.bf16.msra.mxu0 %v15922_v61  ;;  %v15989_v61 = vld [vmem:[#allocation9 + $0xe4] ss:$16 sps:$4 sm:$0xff]  }
 0x611   :  { %10716 = vmatpush1.bf16.msra.mxu1 %v15925_v36  ;;  %10692 = vmatprep.subr.bf16.mxu0 %v15930_v2  ;;  %v15992_v36 = vld [vmem:[#allocation9 + $0xec] ss:$16 sps:$4 sm:$0xff]   ;;  %v15987_v2 = vld [vmem:[#allocation9 + $0xe0] ss:$16 sps:$4 sm:$0xff]  }
 0x612   :  { %10717 = vmatprep.subr.bf16.mxu1 %v15933_v35  ;;  %v15990_v35 = vld [vmem:[#allocation9 + $0xe8] ss:$16 sps:$4 sm:$0xff]  }
 0x613   :  { %v10413_v5 = vpop.f32.mrb[72].mxu1 }
 0x614   :  { %v16830_v8 = vadd.f32 %v10413_v5, %v16817_v37  ;;  %v10415_v9 = vpop.f32.mrb[73].mxu1  ;;  %10693 = vmatpush1.bf16.msra.mxu0 %v15928_v56  ;;  %v15945_v37 = vld [vmem:[#allocation9] ss:$16 sps:$4 sm:$0xff]   ;;  %v15995_v56 = vld [vmem:[#allocation9 + $0x104] ss:$16 sps:$4 sm:$0xff]  }
 0x615   :  { %v16833_v0 = vadd.f32 %v10415_v9, %v16820_v14  ;;  %v10417_v57 = vpop.f32.mrb[74].mxu1  ;;  %10718 = vmatpush1.bf16.msra.mxu1 %v15931_v11  ;;  %10694 = vmatprep.subr.bf16.mxu0 %v15936_v52  ;;  %v10790_v14 = vpack.c.bf16 %v10786_v28, %v10786_v28  ;;  %v15998_v11 = vld [vmem:[#allocation9 + $0x10c] ss:$16 sps:$4 sm:$0xff]   ;;  %v15993_v52 = vld [vmem:[#allocation9 + $0x100] ss:$16 sps:$4 sm:$0xff]  }
 0x616   :  { %v10418_v40 = vpop.f32.mrb[75].mxu1  ;;  %10719 = vmatprep.subr.bf16.mxu1 %v15939_v50  ;;  %v15996_v50 = vld [vmem:[#allocation9 + $0x108] ss:$16 sps:$4 sm:$0xff]   ;;  %v16001_v5 = vld [vmem:[#allocation9 + $0x124] ss:$16 sps:$4 sm:$0xff]  }
 0x617   :  { %v16002_v9 = vld [vmem:[#allocation9 + $0x128] ss:$16 sps:$4 sm:$0xff]   ;;  %v16010_v57 = vld [vmem:[#allocation9 + $0x14c] ss:$16 sps:$4 sm:$0xff]   ;;  %v16013_v40 = vld [vmem:[#allocation9 + $0x164] ss:$16 sps:$4 sm:$0xff]  }
 0x618   :  { %10695 = vmatpush1.bf16.msra.mxu0 %v15934_v15  ;;  %v16005_v15 = vld [vmem:[#allocation9 + $0x140] ss:$16 sps:$4 sm:$0xff]   ;;  %v16028_v28 = vld [vmem:[#allocation9 + $0x1ac] ss:$16 sps:$4 sm:$0xff]  }
 0x619   :  { %10720 = vmatpush1.bf16.msra.mxu1 %v15937_v10  ;;  %10696 = vmatprep.subr.bf16.mxu0 %v15942_v41  ;;  %v16008_v10 = vld [vmem:[#allocation9 + $0x148] ss:$16 sps:$4 sm:$0xff]   ;;  %v16016_v41 = vld [vmem:[#allocation9 + $0x16c] ss:$16 sps:$4 sm:$0xff]  }
 0x61a   :  { %13555 = vmatprep.subr.msk.bf16.mxu1 %vm8849_vm0, %v13552_v20  ;;  %v16011_v20 = vld [vmem:[#allocation9 + $0x160] ss:$16 sps:$4 sm:$0xff]  }
 0x61c   :  { %10697 = vmatpush1.bf16.msra.mxu0 %v15940_v17  ;;  %v16022_v17 = vld [vmem:[#allocation9 + $0x18c] ss:$16 sps:$4 sm:$0xff]  }
 0x61d   :  { %10722 = vmatpush1.bf16.msra.mxu1 %v8857_v31  ;;  %11583 = vmatprep.subr.bf16.mxu0 %v15947_v55  ;;  %v16017_v31 = vld [vmem:[#allocation9 + $0x180] ss:$16 sps:$4 sm:$0xff]   ;;  %v16020_v55 = vld [vmem:[#allocation9 + $0x188] ss:$16 sps:$4 sm:$0xff]  }
 0x61e   :  { %11665 = vmatprep.subr.bf16.mxu1 %v15950_v16  ;;  %v16025_v16 = vld [vmem:[#allocation9 + $0x1a4] ss:$16 sps:$4 sm:$0xff]  }
 0x61f   :  { %10699 = vmatmul.mubr.bf16.vlgmr.msra.gmra.mrb[88].mxu0 %v16915_v6  ;;  %v16034_v6 = vld [vmem:[#allocation9 + $0x1cc] ss:$16 sps:$4 sm:$0xff]  }
 0x620   :  { %13556 = vmatmul.mubr.msk.bf16.vlgmr.msra.gmra.mrb[88].mxu1 %vm8845_vm1, %v16674_v45  ;;  %11584 = vmatpush1.bf16.msra.mxu0 %v15945_v37  ;;  %v15963_v45 = vld [vmem:[#allocation9 + $0x60] ss:$16 sps:$4 sm:$0xff]  }
 0x621   :  { %11615 = vmatprep.mubr.bf16.mxu0 %v10790_v14  ;;  %11666 = vmatpush1.bf16.msra.mxu1 %v15948_v42  ;;  %v16023_v37 = vld [vmem:[#allocation9 + $0x1a0] ss:$16 sps:$4 sm:$0xff]   ;;  %v10767_v42 = vsub.s32 0, %v16824_v33 }
 0x622   :  { %11697 = vmatprep.mubr.bf16.mxu1 %v10790_v14  ;;  %11585 = vmatprep.subr.bf16.mxu0 %v15953_v39  ;;  %v16026_v14 = vld [vmem:[#allocation9 + $0x1a8] ss:$16 sps:$4 sm:$0xff]   ;;  %v16031_v39 = vld [vmem:[#allocation9 + $0x1c4] ss:$16 sps:$4 sm:$0xff]  }
 0x623   :  { %11667 = vmatprep.subr.bf16.mxu1 %v15956_v44 }
 0x624   :  { %11586 = vmatpush1.bf16.msra.mxu0 %v15951_v58 }
 0x625   :  { %11668 = vmatpush1.bf16.msra.mxu1 %v15954_v19  ;;  %11587 = vmatprep.subr.bf16.mxu0 %v15959_v54 }
 0x626   :  { %11669 = vmatprep.subr.bf16.mxu1 %v15962_v13 }
 0x628   :  { %11588 = vmatpush1.bf16.msra.mxu0 %v15957_v47  ;;  %v16029_v47 = vld [vmem:[#allocation9 + $0x1c0] ss:$16 sps:$4 sm:$0xff]  }
 0x629   :  { %11670 = vmatpush1.bf16.msra.mxu1 %v15960_v27  ;;  %11589 = vmatprep.subr.bf16.mxu0 %v15965_v18  ;;  %v10768_v27 = vrot.slane %v16827_v12, %v10767_v42 }
 0x62a   :  { %11671 = vmatprep.subr.bf16.mxu1 %v15968_v59  ;;  %v16032_v59 = vld [vmem:[#allocation9 + $0x1c8] ss:$16 sps:$4 sm:$0xff]  }
 0x62c   :  { %11590 = vmatpush1.bf16.msra.mxu0 %v15963_v45  ;;  %v16037_v45 = vld [vmem:[#allocation9 + $0x1e4] ss:$16 sps:$4 sm:$0xff]  }
 0x62d   :  { %11672 = vmatpush1.bf16.msra.mxu1 %v15966_v23  ;;  %11591 = vmatprep.subr.bf16.mxu0 %v15971_v4  ;;  %v16040_v23 = vld [vmem:[#allocation9 + $0x1ec] ss:$16 sps:$4 sm:$0xff]   ;;  %v16035_v4 = vld [vmem:[#allocation9 + $0x1e0] ss:$16 sps:$4 sm:$0xff]  }
 0x62e   :  { %11673 = vmatprep.subr.bf16.mxu1 %v15974_v63  ;;  %v10785_v63 = vadd.f32 %v10768_v27, %v16708_v29  ;;  %v16050_v29 = vld [vmem:[#allocation9 + $0x228] ss:$16 sps:$4 sm:$0xff]   ;;  %v16112_v27 = vld [vmem:[#allocation9 + $0x36c] ss:$16 sps:$4 sm:$0xff]  }
 0x630   :  { %11592 = vmatpush1.bf16.msra.mxu0 %v15969_v38  ;;  %v16038_v38 = vld [vmem:[#allocation9 + $0x1e8] ss:$16 sps:$4 sm:$0xff]  }
 0x631   :  { %11674 = vmatpush1.bf16.msra.mxu1 %v15972_v32  ;;  %11593 = vmatprep.subr.bf16.mxu0 %v15977_v48  ;;  %v16043_v32 = vld [vmem:[#allocation9 + $0x204] ss:$16 sps:$4 sm:$0xff]   ;;  %v16046_v48 = vld [vmem:[#allocation9 + $0x20c] ss:$16 sps:$4 sm:$0xff]  }
 0x632   :  { %v10454_v34 = vpop.f32.mrb[76].mxu0  ;;  %11675 = vmatprep.subr.bf16.mxu1 %v15980_v46  ;;  %v16041_v46 = vld [vmem:[#allocation9 + $0x200] ss:$16 sps:$4 sm:$0xff]  }
 0x633   :  { %v16845_v62 = vadd.f32 %v10454_v34, %v16830_v8  ;;  %v10456_v24 = vpop.f32.mrb[77].mxu0  ;;  %v15999_v8 = vld [vmem:[#allocation9 + $0x120] ss:$16 sps:$4 sm:$0xff]   ;;  %v16052_v34 = vld [vmem:[#allocation9 + $0x22c] ss:$16 sps:$4 sm:$0xff]  }
 0x634   :  { %v16848_v26 = vadd.f32 %v10456_v24, %v16833_v0  ;;  %v10458_v43 = vpop.f32.mrb[78].mxu0  ;;  %11594 = vmatpush1.bf16.msra.mxu0 %v15975_v25  ;;  %v16007_v0 = vld [vmem:[#allocation9 + $0x144] ss:$16 sps:$4 sm:$0xff]   ;;  %v10789_v25 = vpack.c.bf16 %v10785_v63, %v10785_v63  ;;  %v16058_v24 = vld [vmem:[#allocation9 + $0x24c] ss:$16 sps:$4 sm:$0xff]  }
 0x635   :  { %11676 = vmatpush1.bf16.msra.mxu1 %v15978_v49  ;;  %v10459_v3 = vpop.f32.mrb[79].mxu0  ;;  %11595 = vmatprep.subr.bf16.mxu0 %v15983_v30  ;;  %v16044_v49 = vld [vmem:[#allocation9 + $0x208] ss:$16 sps:$4 sm:$0xff]   ;;  %v16049_v30 = vld [vmem:[#allocation9 + $0x224] ss:$16 sps:$4 sm:$0xff]  }
 0x636   :  { %11677 = vmatprep.subr.bf16.mxu1 %v15986_v53  ;;  %v16047_v53 = vld [vmem:[#allocation9 + $0x220] ss:$16 sps:$4 sm:$0xff]   ;;  %v16056_v43 = vld [vmem:[#allocation9 + $0x248] ss:$16 sps:$4 sm:$0xff]   ;;  %v16064_v3 = vld [vmem:[#allocation9 + $0x26c] ss:$16 sps:$4 sm:$0xff]  }
 0x637   :  { %v16116_v63 = vld [vmem:[#allocation9 + $0x388] ss:$16 sps:$4 sm:$0xff]  }
 0x638   :  { %11596 = vmatpush1.bf16.msra.mxu0 %v15981_v51  ;;  %v16061_v51 = vld [vmem:[#allocation9 + $0x264] ss:$16 sps:$4 sm:$0xff]  }
 0x639   :  { %11678 = vmatpush1.bf16.msra.mxu1 %v15984_v22  ;;  %11597 = vmatprep.subr.bf16.mxu0 %v15989_v61  ;;  %v16059_v22 = vld [vmem:[#allocation9 + $0x260] ss:$16 sps:$4 sm:$0xff]   ;;  %v16062_v61 = vld [vmem:[#allocation9 + $0x268] ss:$16 sps:$4 sm:$0xff]  }
 0x63a   :  { %11679 = vmatprep.subr.bf16.mxu1 %v15992_v36  ;;  %v16067_v36 = vld [vmem:[#allocation9 + $0x284] ss:$16 sps:$4 sm:$0xff]  }
 0x63c   :  { %11598 = vmatpush1.bf16.msra.mxu0 %v15987_v2  ;;  %v16070_v2 = vld [vmem:[#allocation9 + $0x28c] ss:$16 sps:$4 sm:$0xff]  }
 0x63d   :  { %11680 = vmatpush1.bf16.msra.mxu1 %v15990_v35  ;;  %11599 = vmatprep.subr.bf16.mxu0 %v15995_v56  ;;  %v16065_v35 = vld [vmem:[#allocation9 + $0x280] ss:$16 sps:$4 sm:$0xff]   ;;  %v16068_v56 = vld [vmem:[#allocation9 + $0x288] ss:$16 sps:$4 sm:$0xff]  }
 0x63e   :  { %11681 = vmatprep.subr.bf16.mxu1 %v15998_v11  ;;  %v16073_v11 = vld [vmem:[#allocation9 + $0x2a4] ss:$16 sps:$4 sm:$0xff]  }
 0x640   :  { %11600 = vmatpush1.bf16.msra.mxu0 %v15993_v52  ;;  %v16076_v52 = vld [vmem:[#allocation9 + $0x2ac] ss:$16 sps:$4 sm:$0xff]  }
 0x641   :  { %11682 = vmatpush1.bf16.msra.mxu1 %v15996_v50  ;;  %11601 = vmatprep.subr.bf16.mxu0 %v16001_v5  ;;  %v16071_v50 = vld [vmem:[#allocation9 + $0x2a0] ss:$16 sps:$4 sm:$0xff]   ;;  %v16074_v5 = vld [vmem:[#allocation9 + $0x2a8] ss:$16 sps:$4 sm:$0xff]  }
 0x642   :  { %11683 = vmatprep.subr.bf16.mxu1 %v16004_v1  ;;  %v16079_v1 = vld [vmem:[#allocation9 + $0x2c4] ss:$16 sps:$4 sm:$0xff]  }
 0x644   :  { %11602 = vmatpush1.bf16.msra.mxu0 %v15999_v8 }
 0x645   :  { %11684 = vmatpush1.bf16.msra.mxu1 %v16002_v9  ;;  %11603 = vmatprep.subr.bf16.mxu0 %v16007_v0  ;;  %v16082_v9 = vld [vmem:[#allocation9 + $0x2cc] ss:$16 sps:$4 sm:$0xff]  }
 0x646   :  { %11685 = vmatprep.subr.bf16.mxu1 %v16010_v57 }
 0x648   :  { %11604 = vmatpush1.bf16.msra.mxu0 %v16005_v15 }
 0x649   :  { %11686 = vmatpush1.bf16.msra.mxu1 %v16008_v10  ;;  %11605 = vmatprep.subr.bf16.mxu0 %v16013_v40  ;;  %v16077_v40 = vld [vmem:[#allocation9 + $0x2c0] ss:$16 sps:$4 sm:$0xff]  }
 0x64a   :  { %11687 = vmatprep.subr.bf16.mxu1 %v16016_v41 }
 0x64c   :  { %11606 = vmatpush1.bf16.msra.mxu0 %v16011_v20  ;;  %v16080_v20 = vld [vmem:[#allocation9 + $0x2c8] ss:$16 sps:$4 sm:$0xff]  }
 0x64d   :  { %11688 = vmatpush1.bf16.msra.mxu1 %v16014_v7  ;;  %11607 = vmatprep.subr.bf16.mxu0 %v16019_v21  ;;  %v16085_v7 = vld [vmem:[#allocation9 + $0x2e4] ss:$16 sps:$4 sm:$0xff]   ;;  %v16088_v21 = vld [vmem:[#allocation9 + $0x2ec] ss:$16 sps:$4 sm:$0xff]  }
 0x64e   :  { %11689 = vmatprep.subr.bf16.mxu1 %v16022_v17  ;;  %v16083_v17 = vld [vmem:[#allocation9 + $0x2e0] ss:$16 sps:$4 sm:$0xff]  }
 0x650   :  { %11608 = vmatpush1.bf16.msra.mxu0 %v16017_v31  ;;  %v16086_v31 = vld [vmem:[#allocation9 + $0x2e8] ss:$16 sps:$4 sm:$0xff]  }
 0x651   :  { %11690 = vmatpush1.bf16.msra.mxu1 %v16020_v55  ;;  %11609 = vmatprep.subr.bf16.mxu0 %v16025_v16  ;;  %v16091_v55 = vld [vmem:[#allocation9 + $0x304] ss:$16 sps:$4 sm:$0xff]   ;;  %v16094_v16 = vld [vmem:[#allocation9 + $0x30c] ss:$16 sps:$4 sm:$0xff]  }
 0x652   :  { %11691 = vmatprep.subr.bf16.mxu1 %v16028_v28  ;;  %v16089_v28 = vld [vmem:[#allocation9 + $0x300] ss:$16 sps:$4 sm:$0xff]  }
 0x653   :  { %v10495_v44 = vpop.f32.mrb[76].mxu1 }
 0x654   :  { %v16852_v58 = vadd.f32 %v10495_v44, %v16845_v62  ;;  %v10497_v19 = vpop.f32.mrb[77].mxu1  ;;  %11610 = vmatpush1.bf16.msra.mxu0 %v16023_v37  ;;  %v16055_v62 = vld [vmem:[#allocation9 + $0x244] ss:$16 sps:$4 sm:$0xff]   ;;  %v16092_v37 = vld [vmem:[#allocation9 + $0x308] ss:$16 sps:$4 sm:$0xff]  }
 0x655   :  { %v16855_v54 = vadd.f32 %v10497_v19, %v16848_v26  ;;  %v10499_v13 = vpop.f32.mrb[78].mxu1  ;;  %11692 = vmatpush1.bf16.msra.mxu1 %v16026_v14  ;;  %11611 = vmatprep.subr.bf16.mxu0 %v16031_v39  ;;  %v16053_v26 = vld [vmem:[#allocation9 + $0x240] ss:$16 sps:$4 sm:$0xff]   ;;  %v16097_v14 = vld [vmem:[#allocation9 + $0x324] ss:$16 sps:$4 sm:$0xff]  }
 0x656   :  { %v10500_v18 = vpop.f32.mrb[79].mxu1  ;;  %11693 = vmatprep.subr.bf16.mxu1 %v16034_v6  ;;  %v16100_v39 = vld [vmem:[#allocation9 + $0x32c] ss:$16 sps:$4 sm:$0xff]   ;;  %v16095_v44 = vld [vmem:[#allocation9 + $0x320] ss:$16 sps:$4 sm:$0xff]  }
 0x657   :  { %v16098_v6 = vld [vmem:[#allocation9 + $0x328] ss:$16 sps:$4 sm:$0xff]   ;;  %v16106_v19 = vld [vmem:[#allocation9 + $0x34c] ss:$16 sps:$4 sm:$0xff]   ;;  %v16107_v18 = vld [vmem:[#allocation9 + $0x360] ss:$16 sps:$4 sm:$0xff]  }
 0x658   :  { %11612 = vmatpush1.bf16.msra.mxu0 %v16029_v47  ;;  %v16104_v13 = vld [vmem:[#allocation9 + $0x348] ss:$16 sps:$4 sm:$0xff]   ;;  %v16109_v47 = vld [vmem:[#allocation9 + $0x364] ss:$16 sps:$4 sm:$0xff]  }
 0x659   :  { %11694 = vmatpush1.bf16.msra.mxu1 %v16032_v59  ;;  %11613 = vmatprep.subr.bf16.mxu0 %v16037_v45  ;;  %v16110_v59 = vld [vmem:[#allocation9 + $0x368] ss:$16 sps:$4 sm:$0xff]   ;;  %v16115_v45 = vld [vmem:[#allocation9 + $0x384] ss:$16 sps:$4 sm:$0xff]  }
 0x65a   :  { %11695 = vmatprep.subr.bf16.mxu1 %v16040_v23  ;;  %v16118_v23 = vld [vmem:[#allocation9 + $0x38c] ss:$16 sps:$4 sm:$0xff]  }
 0x65c   :  { %11614 = vmatpush1.bf16.msra.mxu0 %v16035_v4  ;;  %v16113_v4 = vld [vmem:[#allocation9 + $0x380] ss:$16 sps:$4 sm:$0xff]  }
 0x65d   :  { %11696 = vmatpush1.bf16.msra.mxu1 %v16038_v38  ;;  %11624 = vmatprep.subr.bf16.mxu0 %v16043_v32  ;;  %v16121_v38 = vld [vmem:[#allocation9 + $0x3a4] ss:$16 sps:$4 sm:$0xff]   ;;  %v16124_v32 = vld [vmem:[#allocation9 + $0x3ac] ss:$16 sps:$4 sm:$0xff]  }
 0x65e   :  { %11706 = vmatprep.subr.bf16.mxu1 %v16046_v48  ;;  %v16119_v48 = vld [vmem:[#allocation9 + $0x3a0] ss:$16 sps:$4 sm:$0xff]  }
 0x65f   :  { %11616 = vmatmul.mubr.bf16.vlgmr.msra.gmra.mrb[92].mxu0 %v10789_v25 }
 0x660   :  { %11698 = vmatmul.mubr.bf16.vlgmr.msra.gmra.mrb[92].mxu1 %v10789_v25  ;;  %11625 = vmatpush1.bf16.msra.mxu0 %v16041_v46  ;;  %v16122_v46 = vld [vmem:[#allocation9 + $0x3a8] ss:$16 sps:$4 sm:$0xff]   ;;  %v16127_v25 = vld [vmem:[#allocation9 + $0x3c4] ss:$16 sps:$4 sm:$0xff]  }
 0x661   :  { %11707 = vmatpush1.bf16.msra.mxu1 %v16044_v49  ;;  %11626 = vmatprep.subr.bf16.mxu0 %v16049_v30  ;;  %v16130_v30 = vld [vmem:[#allocation9 + $0x3cc] ss:$16 sps:$4 sm:$0xff]  }
 0x662   :  { %11708 = vmatprep.subr.bf16.mxu1 %v16052_v34 }
 0x664   :  { %11627 = vmatpush1.bf16.msra.mxu0 %v16047_v53 }
 0x665   :  { %11709 = vmatpush1.bf16.msra.mxu1 %v16050_v29  ;;  %11628 = vmatprep.subr.bf16.mxu0 %v16055_v62 }
 0x666   :  { %11710 = vmatprep.subr.bf16.mxu1 %v16058_v24  ;;  %v16125_v24 = vld [vmem:[#allocation9 + $0x3c0] ss:$16 sps:$4 sm:$0xff]  }
 0x668   :  { %11629 = vmatpush1.bf16.msra.mxu0 %v16053_v26 }
 0x669   :  { %11711 = vmatpush1.bf16.msra.mxu1 %v16056_v43  ;;  %11630 = vmatprep.subr.bf16.mxu0 %v16061_v51  ;;  %v16128_v43 = vld [vmem:[#allocation9 + $0x3c8] ss:$16 sps:$4 sm:$0xff]   ;;  %v16133_v51 = vld [vmem:[#allocation9 + $0x3e4] ss:$16 sps:$4 sm:$0xff]  }
 0x66a   :  { %11712 = vmatprep.subr.bf16.mxu1 %v16064_v3  ;;  %v16136_v3 = vld [vmem:[#allocation9 + $0x3ec] ss:$16 sps:$4 sm:$0xff]  }
 0x66c   :  { %11631 = vmatpush1.bf16.msra.mxu0 %v16059_v22  ;;  %v16131_v22 = vld [vmem:[#allocation9 + $0x3e0] ss:$16 sps:$4 sm:$0xff]  }
 0x66d   :  { %11713 = vmatpush1.bf16.msra.mxu1 %v16062_v61  ;;  %11632 = vmatprep.subr.bf16.mxu0 %v16067_v36  ;;  %v16134_v61 = vld [vmem:[#allocation9 + $0x3e8] ss:$16 sps:$4 sm:$0xff]  }
 0x66e   :  { %11714 = vmatprep.subr.bf16.mxu1 %v16070_v2  ;;  %v16137_v36 = vld [vmem:[#allocation12 + $0x40] sm:$0xff]  }
 0x66f   :  { %v16138_v2 = vld [vmem:[#allocation12 + $0xc0] sm:$0xff]  }
 0x670   :  { %11633 = vmatpush1.bf16.msra.mxu0 %v16065_v35 }
 0x671   :  { %11715 = vmatpush1.bf16.msra.mxu1 %v16068_v56  ;;  %11634 = vmatprep.subr.bf16.mxu0 %v16073_v11 }
 0x672   :  { %v10536_v8 = vpop.f32.mrb[80].mxu0  ;;  %11716 = vmatprep.subr.bf16.mxu1 %v16076_v52 }
 0x673   :  { %v16862_v0 = vadd.f32 %v10536_v8, %v16852_v58  ;;  %v10538_v57 = vpop.f32.mrb[81].mxu0  ;;  %v16103_v58 = vld [vmem:[#allocation9 + $0x344] ss:$16 sps:$4 sm:$0xff]  }
 0x674   :  { %v16865_v15 = vadd.f32 %v10538_v57, %v16855_v54  ;;  %v10540_v10 = vpop.f32.mrb[82].mxu0  ;;  %11635 = vmatpush1.bf16.msra.mxu0 %v16071_v50  ;;  %v16101_v54 = vld [vmem:[#allocation9 + $0x340] ss:$16 sps:$4 sm:$0xff]  }
 0x675   :  { %v10541_v41 = vpop.f32.mrb[83].mxu0  ;;  %11717 = vmatpush1.bf16.msra.mxu1 %v16074_v5  ;;  %11636 = vmatprep.subr.bf16.mxu0 %v16079_v1  ;;  %v10775_v10 = vsub.s32 2, %v16824_v33 }
 0x676   :  { %11718 = vmatprep.subr.bf16.mxu1 %v16082_v9 }
 0x678   :  { %11637 = vmatpush1.bf16.msra.mxu0 %v16077_v40  ;;  %v10779_v40 = vsub.s32 3, %v16824_v33 }
 0x679   :  { %11719 = vmatpush1.bf16.msra.mxu1 %v16080_v20  ;;  %11638 = vmatprep.subr.bf16.mxu0 %v16085_v7 }
 0x67a   :  { %11720 = vmatprep.subr.bf16.mxu1 %v16088_v21  ;;  %v10776_v21 = vrot.slane %v16827_v12, %v10775_v10 }
 0x67c   :  { %11639 = vmatpush1.bf16.msra.mxu0 %v16083_v17 }
 0x67d   :  { %11721 = vmatpush1.bf16.msra.mxu1 %v16086_v31  ;;  %11640 = vmatprep.subr.bf16.mxu0 %v16091_v55 }
 0x67e   :  { %11722 = vmatprep.subr.bf16.mxu1 %v16094_v16  ;;  %v10780_v16 = vrot.slane %v16827_v12, %v10779_v40  ;;  %v16143_v12 = vld [vmem:[#allocation12 + $0x8] sm:$0xff]  }
 0x680   :  { %11641 = vmatpush1.bf16.msra.mxu0 %v16089_v28 }
 0x681   :  { %11723 = vmatpush1.bf16.msra.mxu1 %v16092_v37  ;;  %11642 = vmatprep.subr.bf16.mxu0 %v16097_v14 }
 0x682   :  { %11724 = vmatprep.subr.bf16.mxu1 %v16100_v39 }
 0x684   :  { %11643 = vmatpush1.bf16.msra.mxu0 %v16095_v44 }
 0x685   :  { %11725 = vmatpush1.bf16.msra.mxu1 %v16098_v6  ;;  %11644 = vmatprep.subr.bf16.mxu0 %v16103_v58 }
 0x686   :  { %11726 = vmatprep.subr.bf16.mxu1 %v16106_v19 }
 0x688   :  { %11645 = vmatpush1.bf16.msra.mxu0 %v16101_v54 }
 0x689   :  { %11727 = vmatpush1.bf16.msra.mxu1 %v16104_v13  ;;  %11646 = vmatprep.subr.bf16.mxu0 %v16109_v47  ;;  %v16139_v13 = vld [vmem:[#allocation12] sm:$0xff]  }
 0x68a   :  { %11728 = vmatprep.subr.bf16.mxu1 %v16112_v27  ;;  %v16140_v47 = vld [vmem:[#allocation12 + $0x80] sm:$0xff]  }
 0x68c   :  { %11647 = vmatpush1.bf16.msra.mxu0 %v16107_v18  ;;  %v16141_v18 = vld [vmem:[#allocation12 + $0x48] sm:$0xff]  }
 0x68d   :  { %11729 = vmatpush1.bf16.msra.mxu1 %v16110_v59  ;;  %11648 = vmatprep.subr.bf16.mxu0 %v16115_v45  ;;  %v16142_v59 = vld [vmem:[#allocation12 + $0xc8] sm:$0xff]  }
 0x68e   :  { %11730 = vmatprep.subr.bf16.mxu1 %v16118_v23  ;;  %v16144_v45 = vld [vmem:[#allocation12 + $0x88] sm:$0xff]   ;;  %v16145_v23 = vld [vmem:[#allocation12 + $0x50] sm:$0xff]  }
 0x690   :  { %11649 = vmatpush1.bf16.msra.mxu0 %v16113_v4  ;;  %v16146_v4 = vld [vmem:[#allocation12 + $0xd0] sm:$0xff]  }
 0x691   :  { %11731 = vmatpush1.bf16.msra.mxu1 %v16116_v63  ;;  %11650 = vmatprep.subr.bf16.mxu0 %v16121_v38  ;;  %v16147_v63 = vld [vmem:[#allocation12 + $0x10] sm:$0xff]  }
 0x692   :  { %11732 = vmatprep.subr.bf16.mxu1 %v16124_v32  ;;  %v16148_v38 = vld [vmem:[#allocation12 + $0x90] sm:$0xff]   ;;  %v16149_v32 = vld [vmem:[#allocation12 + $0x58] sm:$0xff]  }
 0x693   :  { %v10577_v49 = vpop.f32.mrb[80].mxu1 }
 0x694   :  { %v10578_v34 = vadd.f32 %v10577_v49, %v16862_v0  ;;  %v10579_v53 = vpop.f32.mrb[81].mxu1  ;;  %11651 = vmatpush1.bf16.msra.mxu0 %v16119_v48  ;;  %v16150_v48 = vld [vmem:[#allocation12 + $0xd8] sm:$0xff]   ;;  %v16153_v49 = vld [vmem:[#allocation12 + $0x60] sm:$0xff]  }
 0x695   :  { %v10580_v29 = vadd.f32 %v10579_v53, %v16865_v15  ;;  %v10581_v62 = vpop.f32.mrb[82].mxu1  ;;  %11733 = vmatpush1.bf16.msra.mxu1 %v16122_v46  ;;  %11652 = vmatprep.subr.bf16.mxu0 %v16127_v25  ;;  %v16151_v46 = vld [vmem:[#allocation12 + $0x18] sm:$0xff]   ;;  %v16156_v53 = vld [vmem:[#allocation12 + $0xa0] sm:$0xff]  }
 0x696   :  { %v10582_v26 = vpop.f32.mrb[83].mxu1  ;;  %11734 = vmatprep.subr.bf16.mxu1 %v16130_v30  ;;  %v16152_v25 = vld [vmem:[#allocation12 + $0x98] sm:$0xff]   ;;  %v16154_v30 = vld [vmem:[#allocation12 + $0xe0] sm:$0xff]   ;;  %v16158_v62 = vld [vmem:[#allocation12 + $0xe8] sm:$0xff]  }
 0x697   :  { %v16160_v26 = vld [vmem:[#allocation12 + $0xa8] sm:$0xff]  }
 0x698   :  { %11653 = vmatpush1.bf16.msra.mxu0 %v16125_v24  ;;  %v16159_v24 = vld [vmem:[#allocation12 + $0x28] sm:$0xff]  }
 0x699   :  { %11735 = vmatpush1.bf16.msra.mxu1 %v16128_v43  ;;  %11654 = vmatprep.subr.bf16.mxu0 %v16133_v51  ;;  %v16161_v43 = vld [vmem:[#allocation12 + $0x70] sm:$0xff]  }
 0x69a   :  { %11736 = vmatprep.subr.bf16.mxu1 %v16136_v3  ;;  %v16162_v51 = vld [vmem:[#allocation12 + $0xf0] sm:$0xff]  }
 0x69b   :  { %v16163_v3 = vld [vmem:[#allocation12 + $0x30] sm:$0xff]  }
 0x69c   :  { %11655 = vmatpush1.bf16.msra.mxu0 %v16131_v22  ;;  %v16164_v22 = vld [vmem:[#allocation12 + $0xb0] sm:$0xff]  }
 0x69d   :  { %11737 = vmatpush1.bf16.msra.mxu1 %v16134_v61  ;;  %13718 = vmatprep.subr.bf16.mxu0 %v16137_v36  ;;  %v16165_v61 = vld [vmem:[#allocation12 + $0x78] sm:$0xff]  }
 0x69e   :  { %13740 = vmatprep.subr.bf16.mxu1 %v16138_v2  ;;  %v16166_v36 = vld [vmem:[#allocation12 + $0xf8] sm:$0xff]  }
 0x69f   :  { %v16167_v2 = vld [vmem:[#allocation12 + $0x38] sm:$0xff]  }
 0x6b2   :  { %v10618_v35 = vpop.f32.mrb[84].mxu0 }
 0x6b3   :  { %v10619_v56 = vadd.f32 %v10618_v35, %v10578_v34  ;;  %v10620_v11 = vpop.f32.mrb[85].mxu0  ;;  %v16155_v34 = vld [vmem:[#allocation12 + $0x20] sm:$0xff]   ;;  %v16168_v35 = vld [vmem:[#allocation12 + $0xb8] sm:$0xff]  }
 0x6b4   :  { %v10621_v52 = vadd.f32 %v10620_v11, %v10580_v29  ;;  %v10622_v50 = vpop.f32.mrb[86].mxu0  ;;  %v16157_v29 = vld [vmem:[#allocation12 + $0x68] sm:$0xff]  }
 0x6b5   :  { %v10623_v5 = vpop.f32.mrb[87].mxu0 }
 0x6d3   :  { %v10659_v1 = vpop.f32.mrb[84].mxu1 }
 0x6d4   :  { %v10660_v8 = vadd.f32 %v10659_v1, %v10619_v56  ;;  %v10661_v9 = vpop.f32.mrb[85].mxu1  ;;  %v10921_v56 = vld [vmem:[#allocation11] sm:$0xf] }
 0x6d5   :  { %v10662_v0 = vadd.f32 %v10661_v9, %v10621_v52  ;;  %v10663_v57 = vpop.f32.mrb[86].mxu1  ;;  %v10926_v11 = vrot.slane %v10921_v56, %v10767_v42  ;;  %v10934_v52 = vrot.slane %v10921_v56, %v10775_v10  ;;  %v10930_v50 = vrot.slane %v10921_v56, %v10771_v60 }
 0x6d6   :  { %v10664_v15 = vpop.f32.mrb[87].mxu1  ;;  %v10938_v5 = vrot.slane %v10921_v56, %v10779_v40  ;;  %v13685_v40 = vld [vmem:[#allocation14] ss:$0 sm:$0xff] }
 0x6f2   :  { %v10700_v41 = vpop.f32.mrb[88].mxu0 }
 0x6f3   :  { %v10741_v20 = vpop.f32.mrb[88].mxu1  ;;  %v10701_v7 = vadd.f32 %v10700_v41, %v10660_v8  ;;  %v10702_v17 = vpop.f32.mrb[89].mxu0 }
 0x6f4   :  { %v10743_v31 = vpop.f32.mrb[89].mxu1  ;;  %v10703_v55 = vadd.f32 %v10702_v17, %v10662_v0  ;;  %v10704_v28 = vpop.f32.mrb[90].mxu0 }
 0x6f5   :  { %v10745_v37 = vpop.f32.mrb[90].mxu1  ;;  %v10742_v14 = vadd.f32 %v10741_v20, %v10701_v7  ;;  %v10705_v39 = vpop.f32.mrb[91].mxu0 }
 0x6f6   :  { %v10746_v44 = vpop.f32.mrb[91].mxu1  ;;  %v10744_v6 = vadd.f32 %v10743_v31, %v10703_v55 }
 0x6f7   :  { %v10787_v58 = vadd.f32 %v10776_v21, %v10742_v14 }
 0x6f8   :  { %v10788_v19 = vadd.f32 %v10780_v16, %v10744_v6 }
 0x6f9   :  { %v10791_v27 = vpack.c.bf16 %v10787_v58, %v10787_v58 }
 0x6fa   :  { %v10792_v54 = vpack.c.bf16 %v10788_v19, %v10788_v19 }
 0x6fc   :  { %11656 = vmatprep.mubr.bf16.mxu0 %v10792_v54  ;;  %11738 = vmatprep.mubr.bf16.mxu1 %v10792_v54 }
 0x6fd   :  { %11657 = vmatmul.mubr.bf16.vlgmr.msra.gmra.mrb[92].mxu0 %v10791_v27  ;;  %11739 = vmatmul.mubr.bf16.vlgmr.msra.gmra.mrb[92].mxu1 %v10791_v27 }
 0x6fe   :  { %13719 = vmatpush3.bf16.msra.mxu0 %v16139_v13  ;;  %13741 = vmatpush3.bf16.msra.mxu1 %v16140_v47 }
 0x6ff   :  { %13720 = vmatprep.subr.bf16.mxu0 %v16141_v18  ;;  %13742 = vmatprep.subr.bf16.mxu1 %v16142_v59 }
 0x702   :  { %13721 = vmatpush3.bf16.msra.mxu0 %v16143_v12  ;;  %13743 = vmatpush3.bf16.msra.mxu1 %v16144_v45 }
 0x703   :  { %13722 = vmatprep.subr.bf16.mxu0 %v16145_v23  ;;  %13744 = vmatprep.subr.bf16.mxu1 %v16146_v4 }
 0x706   :  { %13723 = vmatpush3.bf16.msra.mxu0 %v16147_v63  ;;  %13745 = vmatpush3.bf16.msra.mxu1 %v16148_v38 }
 0x707   :  { %13724 = vmatprep.subr.bf16.mxu0 %v16149_v32  ;;  %13746 = vmatprep.subr.bf16.mxu1 %v16150_v48 }
 0x70a   :  { %13725 = vmatpush3.bf16.msra.mxu0 %v16151_v46  ;;  %13747 = vmatpush3.bf16.msra.mxu1 %v16152_v25 }
 0x70b   :  { %13726 = vmatprep.subr.bf16.mxu0 %v16153_v49  ;;  %13748 = vmatprep.subr.bf16.mxu1 %v16154_v30 }
 0x70e   :  { %13727 = vmatpush3.bf16.msra.mxu0 %v16155_v34  ;;  %13749 = vmatpush3.bf16.msra.mxu1 %v16156_v53 }
 0x70f   :  { %13728 = vmatprep.subr.bf16.mxu0 %v16157_v29  ;;  %13750 = vmatprep.subr.bf16.mxu1 %v16158_v62 }
 0x712   :  { %13729 = vmatpush3.bf16.msra.mxu0 %v16159_v24  ;;  %13751 = vmatpush3.bf16.msra.mxu1 %v16160_v26 }
 0x713   :  { %13730 = vmatprep.subr.bf16.mxu0 %v16161_v43  ;;  %13752 = vmatprep.subr.bf16.mxu1 %v16162_v51 }
 0x716   :  { %13731 = vmatpush3.bf16.msra.mxu0 %v16163_v3  ;;  %13753 = vmatpush3.bf16.msra.mxu1 %v16164_v22 }
 0x717   :  { %13732 = vmatprep.subr.bf16.mxu0 %v16165_v61  ;;  %13754 = vmatprep.subr.bf16.mxu1 %v16166_v36 }
 0x71a   :  { %13733 = vmatpush3.bf16.msra.mxu0 %v16167_v2  ;;  %13755 = vmatpush3.bf16.msra.mxu1 %v16168_v35 }
 0x7d0   :  { %v11658_v1 = vpop.f32.mrb[92].mxu0  ;;  %v11740_v8 = vpop.f32.mrb[92].mxu1 }
 0x7d1   :  { %v13762_v9 = vadd.f32 %v11658_v1, %v10926_v11  ;;  %v13764_v0 = vadd.f32 %v11740_v8, %v10934_v52  ;;  %v11660_v57 = vpop.f32.mrb[93].mxu0  ;;  %v11742_v15 = vpop.f32.mrb[93].mxu1 }
 0x7d2   :  { %v13763_v41 = vadd.f32 %v11660_v57, %v10930_v50  ;;  %v13765_v20 = vadd.f32 %v11742_v15, %v10938_v5  ;;  %v11662_v7 = vpop.f32.mrb[94].mxu0  ;;  %v11744_v21 = vpop.f32.mrb[94].mxu1 }
 0x7d3   :  { %v11663_v42 = vpop.f32.mrb[95].mxu0  ;;  %v11745_v17 = vpop.f32.mrb[95].mxu1  ;;  %v11747_v55 = vpack.c.bf16 %v13762_v9, %v13762_v9  ;;  %v11749_v16 = vpack.c.bf16 %v13764_v0, %v13764_v0 }
 0x7d4   :  { %v11748_v31 = vpack.c.bf16 %v13763_v41, %v13763_v41  ;;  %v11750_v10 = vpack.c.bf16 %v13765_v20, %v13765_v20 }
 0x7d6   :  { %12046 = vmatprep.mubr.bf16.mxu0 %v11748_v31  ;;  %12086 = vmatprep.mubr.bf16.mxu1 %v11750_v10 }
 0x7d7   :  { %12047 = vmatmul.mubr.bf16.vlgmr.msra.gmra.mrb[96].mxu0 %v11747_v55  ;;  %12087 = vmatmul.mubr.bf16.vlgmr.msra.gmra.mrb[96].mxu1 %v11749_v16 }
 0x8aa   :  { %v13734_v33 = vpop.f32.mrb[96].mxu0  ;;  %v13756_v60 = vpop.f32.mrb[96].mxu1 }
 0x8ab   :  { %v13735_v28 = vpop.f32.mrb[97].mxu0  ;;  %v13757_v37 = vpop.f32.mrb[97].mxu1 }
 0x8ac   :  { %v13736_v14 = vadd.f32 %v13735_v28, %v13734_v33  ;;  %v13758_v39 = vadd.f32 %v13757_v37, %v13756_v60  ;;  %v13737_v44 = vpop.f32.mrb[98].mxu0  ;;  %v13759_v6 = vpop.f32.mrb[98].mxu1 }
 0x8ad   :  { %v13738_v58 = vpop.f32.mrb[99].mxu0  ;;  %v13760_v19 = vpop.f32.mrb[99].mxu1 }
 0x8ae   :  { %v12049_v54 = vadd.f32 %v13736_v14, %v13685_v40 }
 0x8b0   :  { %v12089_v13 = vadd.f32 %v13758_v39, %v12049_v54 }
 0x8b2   :  { %12094 = vst [vmem:[#allocation15] sm:$0xff] %v12089_v13 }
 0x8b3   :  { %16334 = shalt.err (!%p16331_p4)
}
 0x8b4   :  { %s16335_s11 = scalar_lea.hbm %s16904_s7, 128 }
 0x8b5   :  { %p16336_p5 = scmp.ne.s32.totalorder %s16904_s7, %s16335_s11  ;;  %p16339_p6 = scmp.lt.u32.totalorder %s16335_s11, %s16904_s7 }
 0x8b7   :  { %p16341_p7 = pnand %p16339_p6, %p16336_p5 }
 0x8b9   :  { %16344 = shalt.err (!%p16341_p7)
}
 0x8ba   :  { %12104 = dma.vmem_to_hbm [thread:$0]  %s12102_s13, 128, %s16904_s7, [#allocation5]  }
 0x8bb   :  { %16353 = dma.done.wait [#allocation5], 128  }
 0x8bc   :  { %16354 = vsyncadd [#allocation5], 4294967168 }
 0x8bd   :  { %12108 = vsyncpa [#allocation4], 1 }
 0x8be   :  { %12109 = vsyncpa [#allocation7], 1 }
 0x8bf   :  { %12110 = vsyncpa [#allocation10], 1 }
 0x8c0   :  { %12111 = vsyncpa [#allocation13], 1 }
 0x8c1   :  { %12112 = vsyncpa [#allocation5], 1 }

</bundles_post_ra>
